<compile_context>
chip_gen: v7x
topology: tpu7x:2x2x1
jax: 0.10.0
libtpu: 0.0.40
codegen_flags: <defaults>
</compile_context>

<pallas_src>
import functools

import jax
import jax.numpy as jnp
from jax.experimental import pallas as pl
from jax.experimental.pallas import tpu as pltpu


def _trapz(v, dx):
    """torch.trapz(v, dx=dx) along the last axis, keepdims=True."""
    L = v.shape[-1]
    s = jnp.sum(v, axis=-1, keepdims=True)
    edges = 0.5 * (v[:, 0:1] + v[:, L - 1:L])
    return dx * (s - edges)


def emission_kernel(x_ref, w0_ref, b0_ref, w1_ref, b1_ref,
                    wm_ref, bm_ref, wnp_ref, bnp_ref,
                    inv_lam_ref, inv_lam5_ref, out_ref, *, dx, n_mix, L):
    x = x_ref[...]                                           # (bm, D_in)
    bm_rows = out_ref.shape[0]

    # ---- MLP (create_mlp: Linear + Tanh per hidden layer) ----
    h = jnp.tanh(jnp.dot(x, w0_ref[...],
                         preferred_element_type=jnp.float32) + b0_ref[...])
    z = jnp.tanh(jnp.dot(h, w1_ref[...],
                         preferred_element_type=jnp.float32) + b1_ref[...])

    # ---- PlankianMixture ----
    T = jax.nn.softplus(jnp.dot(z, wm_ref[...],
                                preferred_element_type=jnp.float32) + bm_ref[...])  # (bm, n_mix)
    inv_T = pl.reciprocal(T)                                 # narrow (bm, n_mix) reciprocal

    # Hoist loop-invariant lane broadcasts out of the mixture loop.
    inv_lam = jnp.broadcast_to(inv_lam_ref[...], (bm_rows, L))
    inv_lam5 = jnp.broadcast_to(inv_lam5_ref[...], (bm_rows, L))

    y = jnp.zeros((bm_rows, L), jnp.float32)
    for m in range(n_mix):                                   # small static mixture count -> unrolled
        u = inv_lam * inv_T[:, m:m + 1]                      # 1 / (lam * T_m)
        ym = inv_lam5 / (jnp.exp(u) - 1.0)                   # Planck curve per component
        ym = ym * pl.reciprocal(jnp.max(ym, axis=-1, keepdims=True))  # normalize by amax over lam
        y = y + ym

    y0 = y * pl.reciprocal(_trapz(y, dx))

    # ---- Transfer (lin_neg and lin_pos fused into one (h1, 2L) matmul) ----
    zz = jnp.dot(z, wnp_ref[...], preferred_element_type=jnp.float32) + bnp_ref[...]
    z_neg = -jax.nn.sigmoid(zz[:, :L]) * y0
    z_pos = jax.nn.softplus(zz[:, L:])
    scale = -_trapz(z_neg, dx) * pl.reciprocal(_trapz(z_pos, dx))    # (bm, 1) per-row scalar

    out_ref[...] = y0 + z_neg + z_pos * scale


def emission_distribution(x, params, lam, dx, *, block_b=256):
    B, d_in = x.shape
    h0 = params["w0"].shape[1]
    h1 = params["w1"].shape[1]
    n_mix = params["wm"].shape[1]
    L = lam.shape[-1]

    # Big batch tile (amortize per-step overhead, fill MXU rows) but keep at
    # least 2 grid steps so multi-TensorCore chips shard the parallel axis.
    block_b = min(block_b, max(8, pl.cdiv(B, 2)))
    block_b = max(8, (block_b // 8) * 8)
    Bp = pl.cdiv(B, block_b) * block_b
    if Bp != B:
        x = jnp.pad(x, ((0, Bp - B), (0, 0)))                # pad batch; sliced off below

    # Precomputed lam factors (explicit multiplies, no in-kernel pow/divide).
    inv_lam = 1.0 / lam
    inv_lam5 = inv_lam * inv_lam * inv_lam * inv_lam * inv_lam

    # Fuse the two Transfer linears into one (h1, 2L) weight.
    wnp = jnp.concatenate([params["wn"], params["wp"]], axis=1)
    bnp = jnp.concatenate([params["bn"], params["bp"]], axis=1)

    rep = lambda shape: pl.BlockSpec(shape, lambda i: (0, 0))   # replicated (weights)
    kernel = functools.partial(emission_kernel, dx=float(dx), n_mix=n_mix, L=L)

    out = pl.pallas_call(
        kernel,
        out_shape=jax.ShapeDtypeStruct((Bp, L), jnp.float32),
        grid=(Bp // block_b,),
        in_specs=[
            pl.BlockSpec((block_b, d_in), lambda i: (i, 0)),    # x: tiled over batch
            rep((d_in, h0)), rep((1, h0)),                      # MLP layer 0
            rep((h0, h1)), rep((1, h1)),                        # MLP layer 1
            rep((h1, n_mix)), rep((1, n_mix)),                  # PlankianMixture linear
            rep((h1, 2 * L)), rep((1, 2 * L)),                  # fused Transfer linear
            rep((1, L)),                                        # 1/lam
            rep((1, L)),                                        # 1/lam^5
        ],
        out_specs=pl.BlockSpec((block_b, L), lambda i: (i, 0)),
        compiler_params=pltpu.CompilerParams(
            dimension_semantics=("parallel",)),
    )(x, params["w0"], params["b0"], params["w1"], params["b1"],
      params["wm"], params["bm"], wnp, bnp, inv_lam, inv_lam5)

    return out[:B]


def reference(x, p, lam, dx):
    """Pure-JAX replica of the PyTorch forward for validation."""
    h = jnp.tanh(x @ p["w0"] + p["b0"])
    z = jnp.tanh(h @ p["w1"] + p["b1"])
    T = jax.nn.softplus(z @ p["wm"] + p["bm"])                 # (B, n_mix)
    lam1 = lam[0]                                              # (L,)
    y = 1.0 / (jnp.exp(1.0 / (lam1[None, None, :] * T[:, :, None])) - 1.0) / lam1 ** 5
    y = y / jnp.max(y, axis=-1, keepdims=True)
    y = jnp.sum(y, axis=1)

    def trapz(v):
        return dx * (jnp.sum(v, -1) - 0.5 * (v[:, 0] + v[:, -1]))

    y0 = y / trapz(y)[:, None]
    z_neg = -jax.nn.sigmoid(z @ p["wn"] + p["bn"]) * y0
    z_pos = jax.nn.softplus(z @ p["wp"] + p["bp"])
    z_pos = z_pos / trapz(z_pos)[:, None] * (-trapz(z_neg)[:, None])
    return y0 + z_neg + z_pos


def init_params(key, d_in, h0, h1, n_mix, L):
    """Deterministic synthetic weights; Linear weights stored as (in, out)."""
    ks = jax.random.split(key, 10)

    def lin(kw, kb, fan_in, fan_out):
        bound = 1.0 / jnp.sqrt(float(fan_in))
        w = jax.random.uniform(kw, (fan_in, fan_out), jnp.float32, -bound, bound)
        b = jax.random.uniform(kb, (1, fan_out), jnp.float32, -bound, bound)
        return w, b

    p = {}
    p["w0"], p["b0"] = lin(ks[0], ks[1], d_in, h0)
    p["w1"], p["b1"] = lin(ks[2], ks[3], h0, h1)
    p["wm"], p["bm"] = lin(ks[4], ks[5], h1, n_mix)
    p["wn"], p["bn"] = lin(ks[6], ks[7], h1, L)
    p["wp"], p["bp"] = lin(ks[8], ks[9], h1, L)
    return p


if __name__ == "__main__":
    # Shapes consistent with the module: x is (batch, input_size), output is
    # (batch, output_size) where output_size == len(lam).  Batch large enough
    # to exercise the 256-row tile with 2 grid steps.
    B, D_IN, H0, H1, N_MIX, L = 512, 5, 32, 32, 4, 128

    key = jax.random.PRNGKey(0)
    k_x, k_p = jax.random.split(key)

    x = jax.random.uniform(k_x, (B, D_IN), jnp.float32, 0.0, 1.0)
    params = init_params(k_p, D_IN, H0, H1, N_MIX, L)

    lam = jnp.linspace(0.1, 2.0, L, dtype=jnp.float32)[None, :]    # (1, L) wavelength grid
    dx = float(lam[0, 1] - lam[0, 0])

    out = emission_distribution(x, params, lam, dx, block_b=256)
    out = jax.block_until_ready(out)

    ref = jax.block_until_ready(reference(x, params, lam, dx))
    assert out.shape == (B, L)
    assert jnp.all(jnp.isfinite(out))
    assert jnp.allclose(out, ref, rtol=1e-3, atol=1e-3), "mismatch vs reference"

    print("KERNEL_OK")
</pallas_src>

<mosaic_0001>
module attributes {stable_mosaic.version = 11 : i64} {
  func.func @emission_kernel(%arg0: i32, %arg1: memref<256x5xf32, #tpu.memory_space<vmem>>, %arg2: memref<5x32xf32, #tpu.memory_space<vmem>>, %arg3: memref<1x32xf32, #tpu.memory_space<vmem>>, %arg4: memref<32x32xf32, #tpu.memory_space<vmem>>, %arg5: memref<1x32xf32, #tpu.memory_space<vmem>>, %arg6: memref<32x4xf32, #tpu.memory_space<vmem>>, %arg7: memref<1x4xf32, #tpu.memory_space<vmem>>, %arg8: memref<32x256xf32, #tpu.memory_space<vmem>>, %arg9: memref<1x256xf32, #tpu.memory_space<vmem>>, %arg10: memref<1x128xf32, #tpu.memory_space<vmem>>, %arg11: memref<1x128xf32, #tpu.memory_space<vmem>>, %arg12: memref<256x128xf32, #tpu.memory_space<vmem>>) attributes {dimension_semantics = [#tpu.dimension_semantics<parallel>], iteration_bounds = array<i64: 2>, scalar_prefetch = 0 : i64, scratch_operands = 0 : i64, tpu.core_type = #tpu.core_type<tc>, window_params = [{transform_indices = @transform_0, window_bounds = array<i64: 256, 5>}, {pipeline_mode = #tpu.pipeline_mode<synchronous>, transform_indices = @transform_1, window_bounds = array<i64: 5, 32>}, {pipeline_mode = #tpu.pipeline_mode<synchronous>, transform_indices = @transform_2, window_bounds = array<i64: 1, 32>}, {pipeline_mode = #tpu.pipeline_mode<synchronous>, transform_indices = @transform_3, window_bounds = array<i64: 32, 32>}, {pipeline_mode = #tpu.pipeline_mode<synchronous>, transform_indices = @transform_4, window_bounds = array<i64: 1, 32>}, {pipeline_mode = #tpu.pipeline_mode<synchronous>, transform_indices = @transform_5, window_bounds = array<i64: 32, 4>}, {pipeline_mode = #tpu.pipeline_mode<synchronous>, transform_indices = @transform_6, window_bounds = array<i64: 1, 4>}, {pipeline_mode = #tpu.pipeline_mode<synchronous>, transform_indices = @transform_7, window_bounds = array<i64: 32, 256>}, {pipeline_mode = #tpu.pipeline_mode<synchronous>, transform_indices = @transform_8, window_bounds = array<i64: 1, 256>}, {pipeline_mode = #tpu.pipeline_mode<synchronous>, transform_indices = @transform_9, window_bounds = array<i64: 1, 128>}, {pipeline_mode = #tpu.pipeline_mode<synchronous>, transform_indices = @transform_10, window_bounds = array<i64: 1, 128>}, {transform_indices = @transform_11, window_bounds = array<i64: 256, 128>}]} {
    %c0 = arith.constant 0 : index
    %c0_0 = arith.constant 0 : index
    %0 = vector.load %arg1[%c0, %c0_0] : memref<256x5xf32, #tpu.memory_space<vmem>>, vector<256x5xf32>
    %c0_1 = arith.constant 0 : index
    %c0_2 = arith.constant 0 : index
    %1 = vector.load %arg2[%c0_1, %c0_2] : memref<5x32xf32, #tpu.memory_space<vmem>>, vector<5x32xf32>
    %cst = arith.constant dense<0.000000e+00> : vector<256x32xf32>
    %2 = tpu.matmul %0, %1, %cst {dimension_numbers = #tpu.dot_dimension_numbers<[1], [0], [0], [1], [0, 0, 1, 1], [], []>} : vector<256x5xf32>, vector<5x32xf32>, vector<256x32xf32> -> vector<256x32xf32>
    %c0_3 = arith.constant 0 : index
    %c0_4 = arith.constant 0 : index
    %3 = vector.load %arg3[%c0_3, %c0_4] : memref<1x32xf32, #tpu.memory_space<vmem>>, vector<1x32xf32>
    %4 = vector.broadcast %3 : vector<1x32xf32> to vector<256x32xf32>
    %5 = arith.addf %2, %4 : vector<256x32xf32>
    %6 = math.tanh %5 : vector<256x32xf32>
    %c0_5 = arith.constant 0 : index
    %c0_6 = arith.constant 0 : index
    %7 = vector.load %arg4[%c0_5, %c0_6] : memref<32x32xf32, #tpu.memory_space<vmem>>, vector<32x32xf32>
    %cst_7 = arith.constant dense<0.000000e+00> : vector<256x32xf32>
    %8 = tpu.matmul %6, %7, %cst_7 {dimension_numbers = #tpu.dot_dimension_numbers<[1], [0], [0], [1], [0, 0, 1, 1], [], []>} : vector<256x32xf32>, vector<32x32xf32>, vector<256x32xf32> -> vector<256x32xf32>
    %c0_8 = arith.constant 0 : index
    %c0_9 = arith.constant 0 : index
    %9 = vector.load %arg5[%c0_8, %c0_9] : memref<1x32xf32, #tpu.memory_space<vmem>>, vector<1x32xf32>
    %10 = vector.broadcast %9 : vector<1x32xf32> to vector<256x32xf32>
    %11 = arith.addf %8, %10 : vector<256x32xf32>
    %12 = math.tanh %11 : vector<256x32xf32>
    %c0_10 = arith.constant 0 : index
    %c0_11 = arith.constant 0 : index
    %13 = vector.load %arg6[%c0_10, %c0_11] : memref<32x4xf32, #tpu.memory_space<vmem>>, vector<32x4xf32>
    %cst_12 = arith.constant dense<0.000000e+00> : vector<256x4xf32>
    %14 = tpu.matmul %12, %13, %cst_12 {dimension_numbers = #tpu.dot_dimension_numbers<[1], [0], [0], [1], [0, 0, 1, 1], [], []>} : vector<256x32xf32>, vector<32x4xf32>, vector<256x4xf32> -> vector<256x4xf32>
    %c0_13 = arith.constant 0 : index
    %c0_14 = arith.constant 0 : index
    %15 = vector.load %arg7[%c0_13, %c0_14] : memref<1x4xf32, #tpu.memory_space<vmem>>, vector<1x4xf32>
    %16 = vector.broadcast %15 : vector<1x4xf32> to vector<256x4xf32>
    %17 = arith.addf %14, %16 : vector<256x4xf32>
    %cst_15 = arith.constant 0.000000e+00 : f32
    %18 = vector.broadcast %cst_15 : f32 to vector<256x4xf32>
    %19 = arith.maximumf %17, %18 : vector<256x4xf32>
    %20 = vector.broadcast %cst_15 : f32 to vector<256x4xf32>
    %21 = arith.subf %17, %20 : vector<256x4xf32>
    %22 = arith.cmpf one, %21, %21 : vector<256x4xf32>
    %23 = vector.broadcast %cst_15 : f32 to vector<256x4xf32>
    %24 = arith.addf %17, %23 : vector<256x4xf32>
    %25 = math.absf %21 : vector<256x4xf32>
    %cst_16 = arith.constant 0.000000e+00 : f32
    %26 = vector.broadcast %cst_16 : f32 to vector<256x4xf32>
    %27 = arith.subf %26, %25 : vector<256x4xf32>
    %28 = math.exp %27 : vector<256x4xf32>
    %29 = math.log1p %28 : vector<256x4xf32>
    %30 = arith.addf %19, %29 : vector<256x4xf32>
    %31 = arith.select %22, %24, %30 : vector<256x4xi1>, vector<256x4xf32>
    %32 = tpu.reciprocal %31 : vector<256x4xf32> -> vector<256x4xf32>
    %c0_17 = arith.constant 0 : index
    %c0_18 = arith.constant 0 : index
    %33 = vector.load %arg10[%c0_17, %c0_18] : memref<1x128xf32, #tpu.memory_space<vmem>>, vector<1x128xf32>
    %34 = vector.shape_cast %33 : vector<1x128xf32> to vector<1x128xf32>
    %35 = vector.broadcast %34 : vector<1x128xf32> to vector<256x128xf32>
    %c0_19 = arith.constant 0 : index
    %c0_20 = arith.constant 0 : index
    %36 = vector.load %arg11[%c0_19, %c0_20] : memref<1x128xf32, #tpu.memory_space<vmem>>, vector<1x128xf32>
    %37 = vector.shape_cast %36 : vector<1x128xf32> to vector<1x128xf32>
    %38 = vector.broadcast %37 : vector<1x128xf32> to vector<256x128xf32>
    %cst_21 = arith.constant 0.000000e+00 : f32
    %39 = vector.broadcast %cst_21 : f32 to vector<256x128xf32>
    %40 = vector.extract_strided_slice %32 {offsets = [0, 0], sizes = [256, 1], strides = [1, 1]} : vector<256x4xf32> to vector<256x1xf32>
    %41 = vector.broadcast %40 : vector<256x1xf32> to vector<256x128xf32>
    %42 = arith.mulf %35, %41 : vector<256x128xf32>
    %43 = math.exp %42 : vector<256x128xf32>
    %cst_22 = arith.constant 1.000000e+00 : f32
    %44 = vector.broadcast %cst_22 : f32 to vector<256x128xf32>
    %45 = arith.subf %43, %44 : vector<256x128xf32>
    %46 = arith.divf %38, %45 : vector<256x128xf32>
    %cst_23 = arith.constant dense<0xFF800000> : vector<256xf32>
    %47 = vector.multi_reduction <maximumf>, %46, %cst_23 [1] : vector<256x128xf32> to vector<256xf32>
    %48 = vector.shape_cast %47 : vector<256xf32> to vector<256x1xf32>
    %49 = tpu.reciprocal %48 : vector<256x1xf32> -> vector<256x1xf32>
    %50 = vector.broadcast %49 : vector<256x1xf32> to vector<256x128xf32>
    %51 = arith.mulf %46, %50 : vector<256x128xf32>
    %52 = arith.addf %39, %51 : vector<256x128xf32>
    %53 = vector.extract_strided_slice %32 {offsets = [0, 1], sizes = [256, 1], strides = [1, 1]} : vector<256x4xf32> to vector<256x1xf32>
    %54 = vector.broadcast %53 : vector<256x1xf32> to vector<256x128xf32>
    %55 = arith.mulf %35, %54 : vector<256x128xf32>
    %56 = math.exp %55 : vector<256x128xf32>
    %cst_24 = arith.constant 1.000000e+00 : f32
    %57 = vector.broadcast %cst_24 : f32 to vector<256x128xf32>
    %58 = arith.subf %56, %57 : vector<256x128xf32>
    %59 = arith.divf %38, %58 : vector<256x128xf32>
    %cst_25 = arith.constant dense<0xFF800000> : vector<256xf32>
    %60 = vector.multi_reduction <maximumf>, %59, %cst_25 [1] : vector<256x128xf32> to vector<256xf32>
    %61 = vector.shape_cast %60 : vector<256xf32> to vector<256x1xf32>
    %62 = tpu.reciprocal %61 : vector<256x1xf32> -> vector<256x1xf32>
    %63 = vector.broadcast %62 : vector<256x1xf32> to vector<256x128xf32>
    %64 = arith.mulf %59, %63 : vector<256x128xf32>
    %65 = arith.addf %52, %64 : vector<256x128xf32>
    %66 = vector.extract_strided_slice %32 {offsets = [0, 2], sizes = [256, 1], strides = [1, 1]} : vector<256x4xf32> to vector<256x1xf32>
    %67 = vector.broadcast %66 : vector<256x1xf32> to vector<256x128xf32>
    %68 = arith.mulf %35, %67 : vector<256x128xf32>
    %69 = math.exp %68 : vector<256x128xf32>
    %cst_26 = arith.constant 1.000000e+00 : f32
    %70 = vector.broadcast %cst_26 : f32 to vector<256x128xf32>
    %71 = arith.subf %69, %70 : vector<256x128xf32>
    %72 = arith.divf %38, %71 : vector<256x128xf32>
    %cst_27 = arith.constant dense<0xFF800000> : vector<256xf32>
    %73 = vector.multi_reduction <maximumf>, %72, %cst_27 [1] : vector<256x128xf32> to vector<256xf32>
    %74 = vector.shape_cast %73 : vector<256xf32> to vector<256x1xf32>
    %75 = tpu.reciprocal %74 : vector<256x1xf32> -> vector<256x1xf32>
    %76 = vector.broadcast %75 : vector<256x1xf32> to vector<256x128xf32>
    %77 = arith.mulf %72, %76 : vector<256x128xf32>
    %78 = arith.addf %65, %77 : vector<256x128xf32>
    %79 = vector.extract_strided_slice %32 {offsets = [0, 3], sizes = [256, 1], strides = [1, 1]} : vector<256x4xf32> to vector<256x1xf32>
    %80 = vector.broadcast %79 : vector<256x1xf32> to vector<256x128xf32>
    %81 = arith.mulf %35, %80 : vector<256x128xf32>
    %82 = math.exp %81 : vector<256x128xf32>
    %cst_28 = arith.constant 1.000000e+00 : f32
    %83 = vector.broadcast %cst_28 : f32 to vector<256x128xf32>
    %84 = arith.subf %82, %83 : vector<256x128xf32>
    %85 = arith.divf %38, %84 : vector<256x128xf32>
    %cst_29 = arith.constant dense<0xFF800000> : vector<256xf32>
    %86 = vector.multi_reduction <maximumf>, %85, %cst_29 [1] : vector<256x128xf32> to vector<256xf32>
    %87 = vector.shape_cast %86 : vector<256xf32> to vector<256x1xf32>
    %88 = tpu.reciprocal %87 : vector<256x1xf32> -> vector<256x1xf32>
    %89 = vector.broadcast %88 : vector<256x1xf32> to vector<256x128xf32>
    %90 = arith.mulf %85, %89 : vector<256x128xf32>
    %91 = arith.addf %78, %90 : vector<256x128xf32>
    %cst_30 = arith.constant dense<0.000000e+00> : vector<256xf32>
    %92 = vector.multi_reduction <add>, %91, %cst_30 [1] : vector<256x128xf32> to vector<256xf32>
    %93 = vector.shape_cast %92 : vector<256xf32> to vector<256x1xf32>
    %94 = vector.extract_strided_slice %91 {offsets = [0, 0], sizes = [256, 1], strides = [1, 1]} : vector<256x128xf32> to vector<256x1xf32>
    %95 = vector.extract_strided_slice %91 {offsets = [0, 127], sizes = [256, 1], strides = [1, 1]} : vector<256x128xf32> to vector<256x1xf32>
    %96 = arith.addf %94, %95 : vector<256x1xf32>
    %cst_31 = arith.constant 5.000000e-01 : f32
    %97 = vector.broadcast %cst_31 : f32 to vector<256x1xf32>
    %98 = arith.mulf %97, %96 : vector<256x1xf32>
    %99 = arith.subf %93, %98 : vector<256x1xf32>
    %cst_32 = arith.constant 0.0149606317 : f32
    %100 = vector.broadcast %cst_32 : f32 to vector<256x1xf32>
    %101 = arith.mulf %100, %99 : vector<256x1xf32>
    %102 = tpu.reciprocal %101 : vector<256x1xf32> -> vector<256x1xf32>
    %103 = vector.broadcast %102 : vector<256x1xf32> to vector<256x128xf32>
    %104 = arith.mulf %91, %103 : vector<256x128xf32>
    %c0_33 = arith.constant 0 : index
    %c0_34 = arith.constant 0 : index
    %105 = vector.load %arg8[%c0_33, %c0_34] : memref<32x256xf32, #tpu.memory_space<vmem>>, vector<32x256xf32>
    %cst_35 = arith.constant dense<0.000000e+00> : vector<256x256xf32>
    %106 = tpu.matmul %12, %105, %cst_35 {dimension_numbers = #tpu.dot_dimension_numbers<[1], [0], [0], [1], [0, 0, 1, 1], [], []>} : vector<256x32xf32>, vector<32x256xf32>, vector<256x256xf32> -> vector<256x256xf32>
    %c0_36 = arith.constant 0 : index
    %c0_37 = arith.constant 0 : index
    %107 = vector.load %arg9[%c0_36, %c0_37] : memref<1x256xf32, #tpu.memory_space<vmem>>, vector<1x256xf32>
    %108 = vector.broadcast %107 : vector<1x256xf32> to vector<256x256xf32>
    %109 = arith.addf %106, %108 : vector<256x256xf32>
    %110 = vector.extract_strided_slice %109 {offsets = [0, 0], sizes = [256, 128], strides = [1, 1]} : vector<256x256xf32> to vector<256x128xf32>
    %111 = arith.negf %110 : vector<256x128xf32>
    %112 = math.exp %111 : vector<256x128xf32>
    %cst_38 = arith.constant 1.000000e+00 : f32
    %113 = vector.broadcast %cst_38 : f32 to vector<256x128xf32>
    %114 = arith.addf %113, %112 : vector<256x128xf32>
    %115 = arith.divf %113, %114 : vector<256x128xf32>
    %cst_39 = arith.constant 0.000000e+00 : f32
    %116 = vector.broadcast %cst_39 : f32 to vector<256x128xf32>
    %117 = arith.subf %116, %115 : vector<256x128xf32>
    %118 = arith.mulf %117, %104 : vector<256x128xf32>
    %119 = vector.extract_strided_slice %109 {offsets = [0, 128], sizes = [256, 128], strides = [1, 1]} : vector<256x256xf32> to vector<256x128xf32>
    %cst_40 = arith.constant 0.000000e+00 : f32
    %120 = vector.broadcast %cst_40 : f32 to vector<256x128xf32>
    %121 = arith.maximumf %119, %120 : vector<256x128xf32>
    %122 = vector.broadcast %cst_40 : f32 to vector<256x128xf32>
    %123 = arith.subf %119, %122 : vector<256x128xf32>
    %124 = arith.cmpf one, %123, %123 : vector<256x128xf32>
    %125 = vector.broadcast %cst_40 : f32 to vector<256x128xf32>
    %126 = arith.addf %119, %125 : vector<256x128xf32>
    %127 = math.absf %123 : vector<256x128xf32>
    %cst_41 = arith.constant 0.000000e+00 : f32
    %128 = vector.broadcast %cst_41 : f32 to vector<256x128xf32>
    %129 = arith.subf %128, %127 : vector<256x128xf32>
    %130 = math.exp %129 : vector<256x128xf32>
    %131 = math.log1p %130 : vector<256x128xf32>
    %132 = arith.addf %121, %131 : vector<256x128xf32>
    %133 = arith.select %124, %126, %132 : vector<256x128xi1>, vector<256x128xf32>
    %cst_42 = arith.constant dense<0.000000e+00> : vector<256xf32>
    %134 = vector.multi_reduction <add>, %118, %cst_42 [1] : vector<256x128xf32> to vector<256xf32>
    %135 = vector.shape_cast %134 : vector<256xf32> to vector<256x1xf32>
    %136 = vector.extract_strided_slice %118 {offsets = [0, 0], sizes = [256, 1], strides = [1, 1]} : vector<256x128xf32> to vector<256x1xf32>
    %137 = vector.extract_strided_slice %118 {offsets = [0, 127], sizes = [256, 1], strides = [1, 1]} : vector<256x128xf32> to vector<256x1xf32>
    %138 = arith.addf %136, %137 : vector<256x1xf32>
    %cst_43 = arith.constant 5.000000e-01 : f32
    %139 = vector.broadcast %cst_43 : f32 to vector<256x1xf32>
    %140 = arith.mulf %139, %138 : vector<256x1xf32>
    %141 = arith.subf %135, %140 : vector<256x1xf32>
    %cst_44 = arith.constant 0.0149606317 : f32
    %142 = vector.broadcast %cst_44 : f32 to vector<256x1xf32>
    %143 = arith.mulf %142, %141 : vector<256x1xf32>
    %cst_45 = arith.constant 0.000000e+00 : f32
    %144 = vector.broadcast %cst_45 : f32 to vector<256x1xf32>
    %145 = arith.subf %144, %143 : vector<256x1xf32>
    %cst_46 = arith.constant dense<0.000000e+00> : vector<256xf32>
    %146 = vector.multi_reduction <add>, %133, %cst_46 [1] : vector<256x128xf32> to vector<256xf32>
    %147 = vector.shape_cast %146 : vector<256xf32> to vector<256x1xf32>
    %148 = vector.extract_strided_slice %133 {offsets = [0, 0], sizes = [256, 1], strides = [1, 1]} : vector<256x128xf32> to vector<256x1xf32>
    %149 = vector.extract_strided_slice %133 {offsets = [0, 127], sizes = [256, 1], strides = [1, 1]} : vector<256x128xf32> to vector<256x1xf32>
    %150 = arith.addf %148, %149 : vector<256x1xf32>
    %cst_47 = arith.constant 5.000000e-01 : f32
    %151 = vector.broadcast %cst_47 : f32 to vector<256x1xf32>
    %152 = arith.mulf %151, %150 : vector<256x1xf32>
    %153 = arith.subf %147, %152 : vector<256x1xf32>
    %cst_48 = arith.constant 0.0149606317 : f32
    %154 = vector.broadcast %cst_48 : f32 to vector<256x1xf32>
    %155 = arith.mulf %154, %153 : vector<256x1xf32>
    %156 = tpu.reciprocal %155 : vector<256x1xf32> -> vector<256x1xf32>
    %157 = arith.mulf %145, %156 : vector<256x1xf32>
    %158 = arith.addf %104, %118 : vector<256x128xf32>
    %159 = vector.broadcast %157 : vector<256x1xf32> to vector<256x128xf32>
    %160 = arith.mulf %133, %159 : vector<256x128xf32>
    %161 = arith.addf %158, %160 : vector<256x128xf32>
    %c0_49 = arith.constant 0 : index
    %c0_50 = arith.constant 0 : index
    %162 = vector.load %arg12[%c0_49, %c0_50] : memref<256x128xf32, #tpu.memory_space<vmem>>, vector<256x128xf32>
    tpu.vector_store %arg12[%c0_49, %c0_50], %161 {strides = array<i32>} : memref<256x128xf32, #tpu.memory_space<vmem>>, vector<256x128xf32>,
    return
  }
  func.func @transform_0(%arg0: i32) -> (i32, i32) {
    %c0_i32 = arith.constant 0 : i32
    %c0_i32_0 = arith.constant 0 : i32
    return %arg0, %c0_i32 : i32, i32
  }
  func.func @transform_1(%arg0: i32) -> (i32, i32) {
    %c0_i32 = arith.constant 0 : i32
    %c0_i32_0 = arith.constant 0 : i32
    %c0_i32_1 = arith.constant 0 : i32
    return %c0_i32, %c0_i32_0 : i32, i32
  }
  func.func @transform_2(%arg0: i32) -> (i32, i32) {
    %c0_i32 = arith.constant 0 : i32
    %c0_i32_0 = arith.constant 0 : i32
    %c0_i32_1 = arith.constant 0 : i32
    return %c0_i32, %c0_i32_0 : i32, i32
  }
  func.func @transform_3(%arg0: i32) -> (i32, i32) {
    %c0_i32 = arith.constant 0 : i32
    %c0_i32_0 = arith.constant 0 : i32
    %c0_i32_1 = arith.constant 0 : i32
    return %c0_i32, %c0_i32_0 : i32, i32
  }
  func.func @transform_4(%arg0: i32) -> (i32, i32) {
    %c0_i32 = arith.constant 0 : i32
    %c0_i32_0 = arith.constant 0 : i32
    %c0_i32_1 = arith.constant 0 : i32
    return %c0_i32, %c0_i32_0 : i32, i32
  }
  func.func @transform_5(%arg0: i32) -> (i32, i32) {
    %c0_i32 = arith.constant 0 : i32
    %c0_i32_0 = arith.constant 0 : i32
    %c0_i32_1 = arith.constant 0 : i32
    return %c0_i32, %c0_i32_0 : i32, i32
  }
  func.func @transform_6(%arg0: i32) -> (i32, i32) {
    %c0_i32 = arith.constant 0 : i32
    %c0_i32_0 = arith.constant 0 : i32
    %c0_i32_1 = arith.constant 0 : i32
    return %c0_i32, %c0_i32_0 : i32, i32
  }
  func.func @transform_7(%arg0: i32) -> (i32, i32) {
    %c0_i32 = arith.constant 0 : i32
    %c0_i32_0 = arith.constant 0 : i32
    %c0_i32_1 = arith.constant 0 : i32
    return %c0_i32, %c0_i32_0 : i32, i32
  }
  func.func @transform_8(%arg0: i32) -> (i32, i32) {
    %c0_i32 = arith.constant 0 : i32
    %c0_i32_0 = arith.constant 0 : i32
    %c0_i32_1 = arith.constant 0 : i32
    return %c0_i32, %c0_i32_0 : i32, i32
  }
  func.func @transform_9(%arg0: i32) -> (i32, i32) {
    %c0_i32 = arith.constant 0 : i32
    %c0_i32_0 = arith.constant 0 : i32
    %c0_i32_1 = arith.constant 0 : i32
    return %c0_i32, %c0_i32_0 : i32, i32
  }
  func.func @transform_10(%arg0: i32) -> (i32, i32) {
    %c0_i32 = arith.constant 0 : i32
    %c0_i32_0 = arith.constant 0 : i32
    %c0_i32_1 = arith.constant 0 : i32
    return %c0_i32, %c0_i32_0 : i32, i32
  }
  func.func @transform_11(%arg0: i32) -> (i32, i32) {
    %c0_i32 = arith.constant 0 : i32
    %c0_i32_0 = arith.constant 0 : i32
    return %arg0, %c0_i32 : i32, i32
  }
}

</mosaic_0001>

<bundles_post_ra>
// kernel: tpu_custom_call.1
= control target key start
LH: loop header
LB: loop body
LE: loop exit
PB: predicated region body
PF: predicated region fallthrough
CT: control target
= control target key end

     0   :  { %16 = vsyncpa [#allocation3], 0  ;;  %s13569_s0 = inlined_call_operand.vmem [shape: f32[512,5], index: 0, kind: input, shape index: {}]   ;;  %s13570_s1 = inlined_call_operand.vmem [shape: f32[5,32], index: 1, kind: input, shape index: {}]   ;;  %s13571_s2 = inlined_call_operand.vmem [shape: f32[1,32], index: 2, kind: input, shape index: {}]   ;;  %s13572_s3 = inlined_call_operand.vmem [shape: f32[32,32], index: 3, kind: input, shape index: {}]   ;;  %s13573_s4 = inlined_call_operand.vmem [shape: f32[1,32], index: 4, kind: input, shape index: {}]   ;;  %s13574_s5 = inlined_call_operand.vmem [shape: f32[32,4], index: 5, kind: input, shape index: {}]   ;;  %s13575_s6 = inlined_call_operand.vmem [shape: f32[1,4], index: 6, kind: input, shape index: {}]   ;;  %s13576_s7 = inlined_call_operand.vmem [shape: f32[32,256], index: 7, kind: input, shape index: {}]   ;;  %s13577_s8 = inlined_call_operand.vmem [shape: f32[1,256], index: 8, kind: input, shape index: {}]   ;;  %s13578_s9 = inlined_call_operand.vmem [shape: f32[1,128], index: 9, kind: input, shape index: {}]   ;;  %s13579_s10 = inlined_call_operand.vmem [shape: f32[1,128], index: 10, kind: input, shape index: {}]   ;;  %s13580_s11 = inlined_call_operand.hbm [shape: f32[512,128], index: 11, kind: output, shape index: {}]  }
   0x1   :  { %18 = vsyncpa [#allocation3 + $0x1], 0  ;;  %s9199_s17 = smov 0   ;;  %s9201_s18 = smov 0  }
   0x2   :  { %s9203_s19 = smov 0   ;;  %s9205_s20 = smov 0  }
   0x3 LB: > { %s9220_s21 = sadd.s32 4294967295, %s9128_s20   ;;  %s6810_s22 = sadd.s32 4294967294, %s9128_s20   ;;  %s9128_s20 = sphi %s9205_s20, %s14617_s20   ;;  %s9124_s19 = sphi %s9203_s19, %s14616_s19   ;;  %s9120_s18 = sphi %s9201_s18, %s14615_s18   ;;  %s9116_s17 = sphi %s9199_s17, %s14614_s17  }
   0x4   : > { %s9224_s23 = sadd.s32 1, %s9128_s20   ;;  %s267_s24 = sadd.s32 1, %s9124_s19 }
   0x5   : > { %s264_s25 = ssub.s32 %s9128_s20, %s9224_s23  ;;  %p277_p0 = scmp.ne.s32.totalorder %s9124_s19, %s9120_s18 }
   0x6   : > { %p265_p1 = scmp.eq.s32.totalorder %s264_s25, 0  ;;  %p278_p2 = scmp.eq.s32.totalorder %s9220_s21, 1 }
   0x7   : > { %p283_p3 = scmp.ne.s32.totalorder %s9120_s18, %s9116_s17  ;;  %p284_p4 = scmp.eq.s32.totalorder %s6810_s22, 1 }
   0x8   : > { %s9235_s26 = scalar_select %p265_p1, %s9124_s19, %s267_s24  }
   0x9   : > { %p9237_p5 = por %p278_p2, %p277_p0  ;;  %p9241_p6 = por %p284_p4, %p283_p3 }
   0xa   : > { %p6813_p7 = scmp.ge.s32.totalorder %s9128_s20, 1  ;;  %p341_p8 = scmp.lt.s32.totalorder %s9128_s20, 3 }
   0xc   : > { %p342_p9 = pnand %p6813_p7, %p341_p8 }
   0xe   : > { %345 = sbr.rel (%p342_p9) target bundleno = 4193 (0x1061), region = 64 }
  0x15   : > { %v420_v0 = vld [vmem:[%s13570_s1] sm:$0x1f]  ;;  %vm525_vm0 = vcmask 1044480   ;;  %s6815_s12 = sshll.u32 %s9220_s21, 5  ;;  %v787_v2 = vld [vmem:[%s13572_s3 + $0x8] sm:$0xff]  ;;  %v788_v3 = vld [vmem:[%s13572_s3 + $0x10] sm:$0xff] }
  0x16   : > { %v786_v1 = vld [vmem:[%s13572_s3] sm:$0xff]  ;;  %7222 = vmatprep.subr.msk.mxu0 %vm525_vm0, %v420_v0  ;;  %p382_p10 = scmp.lt.s32.totalorder %s6815_s12, 63  ;;  %v789_v4 = vld [vmem:[%s13572_s3 + $0x18] sm:$0xff]  ;;  %vm428_vm1 = vcmask 39936   ;;  %v4602_v39 = vld [vmem:[%s13576_s7 + $0x8] sm:$0xff]  ;;  %vm797_vm2 = vcmask 261120  }
  0x17   : > { %7223 = vmatpush3.msk.msra.mxu0 %vm525_vm0, %v420_v0  ;;  %v7384_v5 = vpack.c.bf16 %v787_v2, %v786_v1  ;;  %v7388_v6 = vpack.c.bf16 %v789_v4, %v788_v3  ;;  %v4604_v40 = vld [vmem:[%s13576_s7 + $0x18] sm:$0xff]  ;;  %v9341_v42 = vld [vmem:[%s13571_s2] ss:$0 sm:$0xff]  ;;  %s9133_s22 = smov 1   ;;  %s7116_s29 = sshll.u32 %s9220_s21, 12 }
  0x18   : > { %s14619_s12 = smov (!%p382_p10, %s6815_s12), 63  ;;  %v7400_v41 = vpack.c.bf16 %v4604_v40, %v4602_v39  ;;  %v4601_v39 = vld [vmem:[%s13576_s7] sm:$0xff]  ;;  %v4603_v40 = vld [vmem:[%s13576_s7 + $0x10] sm:$0xff]  ;;  %s9136_s16 = smov [#allocation2]  }
  0x19   : > { %7385 = vmatprep.subr.bf16.mxu0 %v7384_v5  ;;  %7408 = vmatprep.subr.bf16.mxu1 %v7384_v5  ;;  %s6816_s30 = sshll.u32 %s14619_s12, 3 }
  0x1a   : > { %7410 = vmatpush3.bf16.msra.mxu1 %v7384_v5  ;;  %s9266_s15 = scalar_lea.vmem %s13569_s0, %s6816_s30 }
  0x1b   : > { %7409 = vmatprep.subr.bf16.mxu1 %v7388_v6  ;;  %v388_v7 = vld [vmem:[%s9266_s15] sm:$0xff]  ;;  %v389_v8 = vld [vmem:[%s9266_s15 + $0x8] sm:$0xff]  ;;  %v390_v9 = vld [vmem:[%s9266_s15 + $0x10] sm:$0xff] }
  0x1c   : > { %7224 = vmatprep.mubr.msk.f32.mxu0 %vm428_vm1, %v388_v7  ;;  %v391_v10 = vld [vmem:[%s9266_s15 + $0x18] sm:$0xff]  ;;  %v392_v11 = vld [vmem:[%s9266_s15 + $0x20] sm:$0xff]  ;;  %v393_v12 = vld [vmem:[%s9266_s15 + $0x28] sm:$0xff] }
  0x1d   : > { %7225 = vmatmul.mubr.msk.f32.vlgmr.msra.gmra.mrb[0].mxu0 %vm428_vm1, %v389_v8  ;;  %v394_v13 = vld [vmem:[%s9266_s15 + $0x30] sm:$0xff]  ;;  %v395_v14 = vld [vmem:[%s9266_s15 + $0x38] sm:$0xff]  ;;  %v396_v15 = vld [vmem:[%s9266_s15 + $0x40] sm:$0xff] }
  0x1e   : > { %7411 = vmatpush3.bf16.msra.mxu1 %v7388_v6  ;;  %7227 = vmatprep.mubr.msk.f32.mxu0 %vm428_vm1, %v390_v9  ;;  %v397_v16 = vld [vmem:[%s9266_s15 + $0x48] sm:$0xff]  ;;  %v398_v17 = vld [vmem:[%s9266_s15 + $0x50] sm:$0xff]  ;;  %v399_v18 = vld [vmem:[%s9266_s15 + $0x58] sm:$0xff] }
  0x1f   : > { %7387 = vmatpush3.bf16.msra.mxu0 %v7384_v5  ;;  %v400_v19 = vld [vmem:[%s9266_s15 + $0x60] sm:$0xff]  ;;  %v401_v20 = vld [vmem:[%s9266_s15 + $0x68] sm:$0xff]  ;;  %v402_v21 = vld [vmem:[%s9266_s15 + $0x70] sm:$0xff]  ;;  %7401 = vmatprep.subr.bf16.mxu1 %v7400_v41 }
  0x20   : > { %7389 = vmatprep.subr.bf16.mxu0 %v7388_v6  ;;  %v403_v22 = vld [vmem:[%s9266_s15 + $0x78] sm:$0xff]  ;;  %v404_v23 = vld [vmem:[%s9266_s15 + $0x80] sm:$0xff]  ;;  %v405_v24 = vld [vmem:[%s9266_s15 + $0x88] sm:$0xff] }
  0x21   : > { %7228 = vmatmul.mubr.msk.f32.gmra.mrb[2].mxu0 %vm428_vm1, %v391_v10  ;;  %v406_v25 = vld [vmem:[%s9266_s15 + $0x90] sm:$0xff]  ;;  %v407_v26 = vld [vmem:[%s9266_s15 + $0x98] sm:$0xff]  ;;  %v408_v27 = vld [vmem:[%s9266_s15 + $0xa0] sm:$0xff] }
  0x22   : > { %7230 = vmatprep.mubr.msk.f32.mxu0 %vm428_vm1, %v392_v11  ;;  %v409_v28 = vld [vmem:[%s9266_s15 + $0xa8] sm:$0xff]  ;;  %v410_v29 = vld [vmem:[%s9266_s15 + $0xb0] sm:$0xff]  ;;  %v411_v30 = vld [vmem:[%s9266_s15 + $0xb8] sm:$0xff] }
  0x23   : > { %7391 = vmatpush3.bf16.msra.mxu0 %v7388_v6  ;;  %v412_v31 = vld [vmem:[%s9266_s15 + $0xc0] sm:$0xff]  ;;  %v413_v32 = vld [vmem:[%s9266_s15 + $0xc8] sm:$0xff]  ;;  %v414_v33 = vld [vmem:[%s9266_s15 + $0xd0] sm:$0xff] }
  0x24   : > { %v415_v34 = vld [vmem:[%s9266_s15 + $0xd8] sm:$0xff]  ;;  %v416_v35 = vld [vmem:[%s9266_s15 + $0xe0] sm:$0xff]  ;;  %v417_v36 = vld [vmem:[%s9266_s15 + $0xe8] sm:$0xff] }
  0x25   : > { %7231 = vmatmul.mubr.msk.f32.gmra.mrb[4].mxu0 %vm428_vm1, %v393_v12  ;;  %v418_v37 = vld [vmem:[%s9266_s15 + $0xf0] sm:$0xff]  ;;  %v419_v38 = vld [vmem:[%s9266_s15 + $0xf8] sm:$0xff]  ;;  %v4606_v41 = vld [vmem:[%s13576_s7 + $0x28] sm:$0xff]  ;;  %s13521_s15 = scalar_lea.hbm %s13580_s11, %s7116_s29 }
  0x26   : > { %7233 = vmatprep.mubr.msk.f32.mxu0 %vm428_vm1, %v394_v13 }
  0x29   : > { %7234 = vmatmul.mubr.msk.f32.gmra.mrb[6].mxu0 %vm428_vm1, %v395_v14 }
  0x2a   : > { %7236 = vmatprep.mubr.msk.f32.mxu0 %vm428_vm1, %v396_v15 }
  0x2d   : > { %7237 = vmatmul.mubr.msk.f32.gmra.mrb[8].mxu0 %vm428_vm1, %v397_v16 }
  0x2e   : > { %7239 = vmatprep.mubr.msk.f32.mxu0 %vm428_vm1, %v398_v17 }
  0x31   : > { %7240 = vmatmul.mubr.msk.f32.gmra.mrb[10].mxu0 %vm428_vm1, %v399_v18 }
  0x32   : > { %7242 = vmatprep.mubr.msk.f32.mxu0 %vm428_vm1, %v400_v19 }
  0x35   : > { %7243 = vmatmul.mubr.msk.f32.gmra.mrb[12].mxu0 %vm428_vm1, %v401_v20 }
  0x36   : > { %7245 = vmatprep.mubr.msk.f32.mxu0 %vm428_vm1, %v402_v21 }
  0x39   : > { %7246 = vmatmul.mubr.msk.f32.gmra.mrb[14].mxu0 %vm428_vm1, %v403_v22 }
  0x3a   : > { %7248 = vmatprep.mubr.msk.f32.mxu0 %vm428_vm1, %v404_v23 }
  0x3d   : > { %7249 = vmatmul.mubr.msk.f32.gmra.mrb[16].mxu0 %vm428_vm1, %v405_v24 }
  0x3e   : > { %7251 = vmatprep.mubr.msk.f32.mxu0 %vm428_vm1, %v406_v25 }
  0x41   : > { %7252 = vmatmul.mubr.msk.f32.gmra.mrb[18].mxu0 %vm428_vm1, %v407_v26 }
  0x42   : > { %7254 = vmatprep.mubr.msk.f32.mxu0 %vm428_vm1, %v408_v27 }
  0x45   : > { %7255 = vmatmul.mubr.msk.f32.gmra.mrb[20].mxu0 %vm428_vm1, %v409_v28 }
  0x46   : > { %7257 = vmatprep.mubr.msk.f32.mxu0 %vm428_vm1, %v410_v29 }
  0x49   : > { %7258 = vmatmul.mubr.msk.f32.gmra.mrb[22].mxu0 %vm428_vm1, %v411_v30 }
  0x4a   : > { %7260 = vmatprep.mubr.msk.f32.mxu0 %vm428_vm1, %v412_v31 }
  0x4d   : > { %7261 = vmatmul.mubr.msk.f32.gmra.mrb[24].mxu0 %vm428_vm1, %v413_v32 }
  0x4e   : > { %7263 = vmatprep.mubr.msk.f32.mxu0 %vm428_vm1, %v414_v33 }
  0x51   : > { %7264 = vmatmul.mubr.msk.f32.gmra.mrb[26].mxu0 %vm428_vm1, %v415_v34 }
  0x52   : > { %7266 = vmatprep.mubr.msk.f32.mxu0 %vm428_vm1, %v416_v35 }
  0x55   : > { %7267 = vmatmul.mubr.msk.f32.gmra.mrb[28].mxu0 %vm428_vm1, %v417_v36 }
  0x56   : > { %7269 = vmatprep.mubr.msk.f32.mxu0 %vm428_vm1, %v418_v37 }
  0x59   : > { %7270 = vmatmul.mubr.msk.f32.gmra.mrb[30].mxu0 %vm428_vm1, %v419_v38 }
  0xf0   : > { %v7226_v43 = vpop.f32.mrb[0].mxu0 }
  0xf1   : > { %v601_v44 = vadd.f32 %v7226_v43, %v9341_v42  ;;  %v595_v45 = vpop.f32.mrb[1].mxu0  ;;  %v4608_v43 = vld [vmem:[%s13576_s7 + $0x38] sm:$0xff] }
  0xf2   : > { %v596_v46 = vadd.f32 %v9341_v42, %v595_v45 }
  0xf4   : > { %7587 = vtanh.f32 %v596_v46  ;;  %v7229_v47 = vpop.f32.mrb[2].mxu0 }
  0xf5   : > { %7589 = vtanh.f32 %v601_v44  ;;  %v611_v48 = vadd.f32 %v7229_v47, %v9341_v42  ;;  %v605_v49 = vpop.f32.mrb[3].mxu0 }
  0xf6   : > { %v606_v50 = vadd.f32 %v9341_v42, %v605_v49 }
  0xf7   : > { %7591 = vtanh.f32 %v611_v48  ;;  %v7402_v48 = vpack.c.bf16 %v4603_v40, %v4601_v39 }
  0xf8   : > { %7593 = vtanh.f32 %v606_v50  ;;  %v7232_v51 = vpop.f32.mrb[4].mxu0 }
  0xf9   : > { %v621_v52 = vadd.f32 %v7232_v51, %v9341_v42  ;;  %v615_v53 = vpop.f32.mrb[5].mxu0  ;;  %v7404_v51 = vpack.c.bf16 %v4608_v43, %v4606_v41 }
  0xfa   : > { %v616_v54 = vadd.f32 %v9341_v42, %v615_v53  ;;  %v4607_v53 = vld [vmem:[%s13576_s7 + $0x30] sm:$0xff] }
  0xfb   : > { %7595 = vtanh.f32 %v621_v52  ;;  %v4605_v52 = vld [vmem:[%s13576_s7 + $0x20] sm:$0xff] }
  0xfc   : > { %7597 = vtanh.f32 %v616_v54  ;;  %v7235_v55 = vpop.f32.mrb[6].mxu0 }
  0xfd   : > { %v631_v56 = vadd.f32 %v7235_v55, %v9341_v42  ;;  %v625_v57 = vpop.f32.mrb[7].mxu0 }
  0xfe   : > { %v7588_v58 = vpop.eup %7587  ;;  %v626_v59 = vadd.f32 %v9341_v42, %v625_v57 }
  0xff   : > { %v7590_v60 = vpop.eup %7589  ;;  %7280 = vmatprep.mubr.msk.f32.mxu0 %vm797_vm2, %v7588_v58  ;;  %7599 = vtanh.f32 %v631_v56  ;;  %v7406_v58 = vpack.c.bf16 %v4607_v53, %v4605_v52 }
 0x100   : > { %7281 = vmatmul.mubr.msk.f32.vlgmr.msra.gmra.mrb[32].mxu0 %vm797_vm2, %v7590_v60  ;;  %7601 = vtanh.f32 %v626_v59  ;;  %v7238_v61 = vpop.f32.mrb[8].mxu0 }
 0x101   : > { %v7592_v62 = vpop.eup %7591  ;;  %v641_v63 = vadd.f32 %v7238_v61, %v9341_v42  ;;  %v635_v0 = vpop.f32.mrb[9].mxu0 }
 0x102   : > { %v7594_v1 = vpop.eup %7593  ;;  %v636_v2 = vadd.f32 %v9341_v42, %v635_v0 }
 0x103   : > { %7283 = vmatprep.mubr.msk.f32.mxu0 %vm797_vm2, %v7594_v1  ;;  %7603 = vtanh.f32 %v641_v63 }
 0x104   : > { %7284 = vmatmul.mubr.msk.f32.gmra.mrb[34].mxu0 %vm797_vm2, %v7592_v62  ;;  %7605 = vtanh.f32 %v636_v2  ;;  %v7241_v3 = vpop.f32.mrb[10].mxu0 }
 0x105   : > { %v7596_v4 = vpop.eup %7595  ;;  %v651_v5 = vadd.f32 %v7241_v3, %v9341_v42  ;;  %v645_v6 = vpop.f32.mrb[11].mxu0 }
 0x106   : > { %v7598_v7 = vpop.eup %7597  ;;  %v646_v8 = vadd.f32 %v9341_v42, %v645_v6 }
 0x107   : > { %7286 = vmatprep.mubr.msk.f32.mxu0 %vm797_vm2, %v7598_v7  ;;  %7607 = vtanh.f32 %v651_v5 }
 0x108   : > { %7287 = vmatmul.mubr.msk.f32.gmra.mrb[36].mxu0 %vm797_vm2, %v7596_v4  ;;  %7609 = vtanh.f32 %v646_v8  ;;  %v7244_v9 = vpop.f32.mrb[12].mxu0 }
 0x109   : > { %v7600_v10 = vpop.eup %7599  ;;  %v661_v11 = vadd.f32 %v7244_v9, %v9341_v42  ;;  %v655_v12 = vpop.f32.mrb[13].mxu0 }
 0x10a   : > { %v7602_v13 = vpop.eup %7601  ;;  %v656_v14 = vadd.f32 %v9341_v42, %v655_v12 }
 0x10b   : > { %7289 = vmatprep.mubr.msk.f32.mxu0 %vm797_vm2, %v7602_v13  ;;  %7611 = vtanh.f32 %v661_v11 }
 0x10c   : > { %7290 = vmatmul.mubr.msk.f32.gmra.mrb[38].mxu0 %vm797_vm2, %v7600_v10  ;;  %7613 = vtanh.f32 %v656_v14  ;;  %v7247_v15 = vpop.f32.mrb[14].mxu0 }
 0x10d   : > { %v7604_v16 = vpop.eup %7603  ;;  %v671_v17 = vadd.f32 %v7247_v15, %v9341_v42  ;;  %v665_v18 = vpop.f32.mrb[15].mxu0 }
 0x10e   : > { %v7606_v19 = vpop.eup %7605  ;;  %v666_v20 = vadd.f32 %v9341_v42, %v665_v18 }
 0x10f   : > { %7292 = vmatprep.mubr.msk.f32.mxu0 %vm797_vm2, %v7606_v19  ;;  %7615 = vtanh.f32 %v671_v17 }
 0x110   : > { %7293 = vmatmul.mubr.msk.f32.gmra.mrb[40].mxu0 %vm797_vm2, %v7604_v16  ;;  %7617 = vtanh.f32 %v666_v20  ;;  %v7250_v21 = vpop.f32.mrb[16].mxu0  ;;  %v1151_v20 = vld [vmem:[%s13574_s5] sm:$0xff] }
 0x111   : > { %v7608_v22 = vpop.eup %7607  ;;  %v681_v23 = vadd.f32 %v7250_v21, %v9341_v42  ;;  %v675_v24 = vpop.f32.mrb[17].mxu0  ;;  %v1152_v21 = vld [vmem:[%s13574_s5 + $0x8] sm:$0xff] }
 0x112   : > { %v7610_v25 = vpop.eup %7609  ;;  %v676_v26 = vadd.f32 %v9341_v42, %v675_v24  ;;  %v1154_v24 = vld [vmem:[%s13574_s5 + $0x18] sm:$0xff] }
 0x113   : > { %7295 = vmatprep.mubr.msk.f32.mxu0 %vm797_vm2, %v7610_v25  ;;  %7619 = vtanh.f32 %v681_v23  ;;  %v1153_v23 = vld [vmem:[%s13574_s5 + $0x10] sm:$0xff] }
 0x114   : > { %7296 = vmatmul.mubr.msk.f32.gmra.mrb[42].mxu0 %vm797_vm2, %v7608_v22  ;;  %7621 = vtanh.f32 %v676_v26  ;;  %v7253_v27 = vpop.f32.mrb[18].mxu0  ;;  %v7392_v22 = vpack.c.bf16 %v1152_v21, %v1151_v20  ;;  %v7396_v25 = vpack.c.bf16 %v1154_v24, %v1153_v23  ;;  %v9130_v26 = vmov 0.0  }
 0x115   : > { %v7612_v28 = vpop.eup %7611  ;;  %v691_v29 = vadd.f32 %v7253_v27, %v9341_v42  ;;  %v685_v30 = vpop.f32.mrb[19].mxu0  ;;  %v9441_v27 = vld [vmem:[%s13573_s4] ss:$0 sm:$0xff] }
 0x116   : > { %v7614_v31 = vpop.eup %7613  ;;  %v686_v32 = vadd.f32 %v9341_v42, %v685_v30  ;;  %7393 = vmatprep.subr.bf16.mxu0 %v7392_v22 }
 0x117   : > { %7298 = vmatprep.mubr.msk.f32.mxu0 %vm797_vm2, %v7614_v31  ;;  %7623 = vtanh.f32 %v691_v29  ;;  %7395 = vmatpush3.bf16.msra.mxu0 %v7392_v22 }
 0x118   : > { %7299 = vmatmul.mubr.msk.f32.gmra.mrb[44].mxu0 %vm797_vm2, %v7612_v28  ;;  %7625 = vtanh.f32 %v686_v32  ;;  %v7256_v33 = vpop.f32.mrb[20].mxu0  ;;  %7397 = vmatprep.subr.bf16.mxu0 %v7396_v25 }
 0x119   : > { %v7616_v34 = vpop.eup %7615  ;;  %v701_v35 = vadd.f32 %v7256_v33, %v9341_v42  ;;  %v695_v36 = vpop.f32.mrb[21].mxu0 }
 0x11a   : > { %v7618_v37 = vpop.eup %7617  ;;  %v696_v38 = vadd.f32 %v9341_v42, %v695_v36 }
 0x11b   : > { %7301 = vmatprep.mubr.msk.f32.mxu0 %vm797_vm2, %v7618_v37  ;;  %7627 = vtanh.f32 %v701_v35  ;;  %7399 = vmatpush3.bf16.msra.mxu0 %v7396_v25 }
 0x11c   : > { %7302 = vmatmul.mubr.msk.f32.gmra.mrb[46].mxu0 %vm797_vm2, %v7616_v34  ;;  %7629 = vtanh.f32 %v696_v38  ;;  %v7259_v44 = vpop.f32.mrb[22].mxu0 }
 0x11d   : > { %v7620_v45 = vpop.eup %7619  ;;  %v711_v46 = vadd.f32 %v7259_v44, %v9341_v42  ;;  %v705_v47 = vpop.f32.mrb[23].mxu0 }
 0x11e   : > { %v7622_v49 = vpop.eup %7621  ;;  %v706_v50 = vadd.f32 %v9341_v42, %v705_v47 }
 0x11f   : > { %7304 = vmatprep.mubr.msk.f32.mxu1 %vm797_vm2, %v7622_v49  ;;  %7631 = vtanh.f32 %v711_v46 }
 0x120   : > { %7305 = vmatmul.mubr.msk.f32.vlgmr.msra.gmra.mrb[0].mxu1 %vm797_vm2, %v7620_v45  ;;  %7633 = vtanh.f32 %v706_v50  ;;  %v7262_v54 = vpop.f32.mrb[24].mxu0 }
 0x121   : > { %v7624_v55 = vpop.eup %7623  ;;  %v721_v56 = vadd.f32 %v7262_v54, %v9341_v42  ;;  %v715_v57 = vpop.f32.mrb[25].mxu0  ;;  %7403 = vmatpush1.bf16.msra.mxu1 %v7402_v48 }
 0x122   : > { %v7626_v59 = vpop.eup %7625  ;;  %v716_v60 = vadd.f32 %v9341_v42, %v715_v57  ;;  %7405 = vmatprep.subr.bf16.mxu1 %v7404_v51 }
 0x123   : > { %7307 = vmatprep.mubr.msk.f32.mxu1 %vm797_vm2, %v7626_v59  ;;  %7635 = vtanh.f32 %v721_v56 }
 0x124   : > { %7308 = vmatmul.mubr.msk.f32.gmra.mrb[2].mxu1 %vm797_vm2, %v7624_v55  ;;  %7637 = vtanh.f32 %v716_v60  ;;  %v7265_v61 = vpop.f32.mrb[26].mxu0 }
 0x125   : > { %v7628_v62 = vpop.eup %7627  ;;  %v731_v63 = vadd.f32 %v7265_v61, %v9341_v42  ;;  %v725_v0 = vpop.f32.mrb[27].mxu0  ;;  %7407 = vmatpush1.bf16.msra.mxu1 %v7406_v58 }
 0x126   : > { %v7630_v1 = vpop.eup %7629  ;;  %v726_v2 = vadd.f32 %v9341_v42, %v725_v0 }
 0x127   : > { %7310 = vmatprep.mubr.msk.f32.mxu1 %vm797_vm2, %v7630_v1  ;;  %7639 = vtanh.f32 %v731_v63 }
 0x128   : > { %7311 = vmatmul.mubr.msk.f32.gmra.mrb[4].mxu1 %vm797_vm2, %v7628_v62  ;;  %7641 = vtanh.f32 %v726_v2  ;;  %v7268_v3 = vpop.f32.mrb[28].mxu0 }
 0x129   : > { %v7632_v4 = vpop.eup %7631  ;;  %v741_v5 = vadd.f32 %v7268_v3, %v9341_v42  ;;  %v735_v6 = vpop.f32.mrb[29].mxu0 }
 0x12a   : > { %v7634_v7 = vpop.eup %7633  ;;  %v736_v8 = vadd.f32 %v9341_v42, %v735_v6 }
 0x12b   : > { %7313 = vmatprep.mubr.msk.f32.mxu1 %vm797_vm2, %v7634_v7  ;;  %7643 = vtanh.f32 %v741_v5 }
 0x12c   : > { %7314 = vmatmul.mubr.msk.f32.gmra.mrb[6].mxu1 %vm797_vm2, %v7632_v4  ;;  %7645 = vtanh.f32 %v736_v8  ;;  %v7271_v9 = vpop.f32.mrb[30].mxu0 }
 0x12d   : > { %v7636_v10 = vpop.eup %7635  ;;  %v751_v11 = vadd.f32 %v7271_v9, %v9341_v42  ;;  %v745_v12 = vpop.f32.mrb[31].mxu0 }
 0x12e   : > { %v7638_v13 = vpop.eup %7637  ;;  %v746_v14 = vadd.f32 %v9341_v42, %v745_v12 }
 0x12f   : > { %7316 = vmatprep.mubr.msk.f32.mxu1 %vm797_vm2, %v7638_v13  ;;  %7647 = vtanh.f32 %v751_v11 }
 0x130   : > { %7317 = vmatmul.mubr.msk.f32.gmra.mrb[8].mxu1 %vm797_vm2, %v7636_v10  ;;  %7649 = vtanh.f32 %v746_v14 }
 0x131   : > { %v7640_v15 = vpop.eup %7639 }
 0x132   : > { %v7642_v16 = vpop.eup %7641 }
 0x133   : > { %7319 = vmatprep.mubr.msk.f32.mxu1 %vm797_vm2, %v7642_v16 }
 0x134   : > { %7320 = vmatmul.mubr.msk.f32.gmra.mrb[10].mxu1 %vm797_vm2, %v7640_v15 }
 0x135   : > { %v7644_v17 = vpop.eup %7643 }
 0x136   : > { %v7646_v18 = vpop.eup %7645 }
 0x137   : > { %7322 = vmatprep.mubr.msk.f32.mxu1 %vm797_vm2, %v7646_v18 }
 0x138   : > { %7323 = vmatmul.mubr.msk.f32.gmra.mrb[12].mxu1 %vm797_vm2, %v7644_v17 }
 0x139   : > { %v7648_v19 = vpop.eup %7647 }
 0x13a   : > { %v7650_v42 = vpop.eup %7649 }
 0x13b   : > { %7325 = vmatprep.mubr.msk.f32.mxu1 %vm797_vm2, %v7650_v42 }
 0x13c   : > { %7326 = vmatmul.mubr.msk.f32.gmra.mrb[14].mxu1 %vm797_vm2, %v7648_v19 }
 0x13d   : > { %4685 = vmatprep.mubr.f32.mxu1 %v9130_v26 }
 0x1d3   : > { %v7282_v28 = vpop.f32.mrb[32].mxu0 }
 0x1d4   : > { %v966_v29 = vadd.f32 %v7282_v28, %v9441_v27  ;;  %v960_v30 = vpop.f32.mrb[33].mxu0 }
 0x1d5   : > { %v961_v31 = vadd.f32 %v9441_v27, %v960_v30 }
 0x1d7   : > { %7651 = vtanh.f32 %v961_v31  ;;  %v7285_v32 = vpop.f32.mrb[34].mxu0 }
 0x1d8   : > { %7653 = vtanh.f32 %v966_v29  ;;  %v976_v33 = vadd.f32 %v7285_v32, %v9441_v27  ;;  %v970_v34 = vpop.f32.mrb[35].mxu0 }
 0x1d9   : > { %v971_v35 = vadd.f32 %v9441_v27, %v970_v34 }
 0x1da   : > { %7655 = vtanh.f32 %v976_v33 }
 0x1db   : > { %7657 = vtanh.f32 %v971_v35  ;;  %v7288_v36 = vpop.f32.mrb[36].mxu0 }
 0x1dc   : > { %v986_v37 = vadd.f32 %v7288_v36, %v9441_v27  ;;  %v980_v38 = vpop.f32.mrb[37].mxu0 }
 0x1dd   : > { %v981_v39 = vadd.f32 %v9441_v27, %v980_v38 }
 0x1df   : > { %7659 = vtanh.f32 %v981_v39  ;;  %v7291_v40 = vpop.f32.mrb[38].mxu0 }
 0x1e0   : > { %7661 = vtanh.f32 %v986_v37  ;;  %v996_v41 = vadd.f32 %v7291_v40, %v9441_v27  ;;  %v990_v43 = vpop.f32.mrb[39].mxu0 }
 0x1e1   : > { %v7652_v44 = vpop.eup %7651  ;;  %v991_v45 = vadd.f32 %v9441_v27, %v990_v43 }
 0x1e2   : > { %v7654_v46 = vpop.eup %7653  ;;  %7336 = vmatprep.mubr.msk.f32.mxu0 %vm797_vm2, %v7652_v44  ;;  %7047 = vmatmul.mubr.msk.f32.vlgmr.msra.gmra.mrb[16].mxu1 %vm797_vm2, %v7652_v44 }
 0x1e3   : > { %7337 = vmatmul.mubr.msk.f32.vlgmr.msra.gmra.mrb[48].mxu0 %vm797_vm2, %v7654_v46  ;;  %4691 = vmatprep.mubr.f32.mxu1 %v9130_v26  ;;  %7663 = vtanh.f32 %v991_v45  ;;  %v7294_v47 = vpop.f32.mrb[40].mxu0 }
 0x1e4   : > { %v7656_v48 = vpop.eup %7655  ;;  %7665 = vtanh.f32 %v996_v41  ;;  %v1006_v49 = vadd.f32 %v7294_v47, %v9441_v27  ;;  %v1000_v50 = vpop.f32.mrb[41].mxu0 }
 0x1e5   : > { %v7658_v51 = vpop.eup %7657  ;;  %v1001_v52 = vadd.f32 %v9441_v27, %v1000_v50 }
 0x1e6   : > { %7048 = vmatmul.mubr.msk.f32.gmra.mrb[18].mxu1 %vm797_vm2, %v7654_v46  ;;  %7339 = vmatprep.mubr.msk.f32.mxu0 %vm797_vm2, %v7658_v51 }
 0x1e7   : > { %4697 = vmatprep.mubr.f32.mxu1 %v9130_v26  ;;  %7340 = vmatmul.mubr.msk.f32.gmra.mrb[50].mxu0 %vm797_vm2, %v7656_v48  ;;  %7667 = vtanh.f32 %v1001_v52  ;;  %v7297_v53 = vpop.f32.mrb[42].mxu0 }
 0x1e8   : > { %7669 = vtanh.f32 %v1006_v49  ;;  %v1016_v54 = vadd.f32 %v7297_v53, %v9441_v27  ;;  %v1010_v55 = vpop.f32.mrb[43].mxu0 }
 0x1e9   : > { %v7660_v56 = vpop.eup %7659  ;;  %v1011_v57 = vadd.f32 %v9441_v27, %v1010_v55 }
 0x1ea   : > { %v7662_v58 = vpop.eup %7661  ;;  %7049 = vmatmul.mubr.msk.f32.gmra.mrb[20].mxu1 %vm797_vm2, %v7658_v51  ;;  %7342 = vmatprep.mubr.msk.f32.mxu0 %vm797_vm2, %v7660_v56 }
 0x1eb   : > { %4703 = vmatprep.mubr.f32.mxu1 %v9130_v26  ;;  %7671 = vtanh.f32 %v1011_v57  ;;  %v7300_v59 = vpop.f32.mrb[44].mxu0  ;;  %7343 = vmatmul.mubr.msk.f32.gmra.mrb[52].mxu0 %vm797_vm2, %v7662_v58 }
 0x1ec   : > { %7673 = vtanh.f32 %v1016_v54  ;;  %v1026_v60 = vadd.f32 %v7300_v59, %v9441_v27  ;;  %v1020_v61 = vpop.f32.mrb[45].mxu0 }
 0x1ed   : > { %v7664_v62 = vpop.eup %7663  ;;  %v1021_v63 = vadd.f32 %v9441_v27, %v1020_v61 }
 0x1ee   : > { %v7666_v0 = vpop.eup %7665  ;;  %7050 = vmatmul.mubr.msk.f32.gmra.mrb[22].mxu1 %vm797_vm2, %v7656_v48  ;;  %7345 = vmatprep.mubr.msk.f32.mxu0 %vm797_vm2, %v7664_v62 }
 0x1ef   : > { %4709 = vmatprep.mubr.f32.mxu1 %v9130_v26  ;;  %7675 = vtanh.f32 %v1021_v63  ;;  %v7303_v1 = vpop.f32.mrb[46].mxu0  ;;  %7346 = vmatmul.mubr.msk.f32.gmra.mrb[54].mxu0 %vm797_vm2, %v7666_v0  ;;  %v4611_v63 = vlaneseq }
 0x1f0   : > { %7677 = vtanh.f32 %v1026_v60  ;;  %v1036_v2 = vadd.f32 %v7303_v1, %v9441_v27  ;;  %v1030_v3 = vpop.f32.mrb[47].mxu0 }
 0x1f1   : > { %v7668_v4 = vpop.eup %7667  ;;  %v1031_v5 = vadd.f32 %v9441_v27, %v1030_v3  ;;  %v9612_v1 = vshrl.u32 %v4611_v63, 7  ;;  %v4609_v3 = vld [vmem:[%s13577_s8] sm:$0x3] }
 0x1f2   : > { %v7670_v6 = vpop.eup %7669  ;;  %7051 = vmatmul.mubr.msk.f32.gmra.mrb[24].mxu1 %vm797_vm2, %v7660_v56  ;;  %7348 = vmatprep.mubr.msk.f32.mxu0 %vm797_vm2, %v7668_v4 }
 0x1f3   : > { %4715 = vmatprep.mubr.f32.mxu1 %v9130_v26  ;;  %7679 = vtanh.f32 %v1031_v5  ;;  %v7306_v7 = vpop.f32.mrb[0].mxu1  ;;  %7349 = vmatmul.mubr.msk.f32.gmra.mrb[56].mxu0 %vm797_vm2, %v7670_v6  ;;  %13831 = vst [vmem:[#allocation5_spill] sm:$0xff] %v9612_v1 }
 0x1f4   : > { %7681 = vtanh.f32 %v1036_v2  ;;  %v1046_v8 = vadd.f32 %v7306_v7, %v9441_v27  ;;  %v1040_v9 = vpop.f32.mrb[1].mxu1  ;;  %v4617_v2 = vsub.s32 1, %v9612_v1 }
 0x1f5   : > { %v9480_v10 = vpop.eup %7671  ;;  %v1041_v11 = vadd.f32 %v9441_v27, %v1040_v9 }
 0x1f6   : > { %v9483_v12 = vpop.eup %7673  ;;  %7052 = vmatmul.mubr.msk.f32.gmra.mrb[26].mxu1 %vm797_vm2, %v7662_v58  ;;  %7351 = vmatprep.mubr.msk.f32.mxu0 %vm797_vm2, %v9480_v10 }
 0x1f7   : > { %4721 = vmatprep.mubr.f32.mxu1 %v9130_v26  ;;  %7683 = vtanh.f32 %v1041_v11  ;;  %v7309_v13 = vpop.f32.mrb[2].mxu1  ;;  %7352 = vmatmul.mubr.msk.f32.gmra.mrb[58].mxu0 %vm797_vm2, %v9483_v12 }
 0x1f8   : > { %7685 = vtanh.f32 %v1046_v8  ;;  %v1056_v14 = vadd.f32 %v7309_v13, %v9441_v27  ;;  %v1050_v15 = vpop.f32.mrb[3].mxu1 }
 0x1f9   : > { %v9492_v16 = vpop.eup %7675  ;;  %v1051_v17 = vadd.f32 %v9441_v27, %v1050_v15 }
 0x1fa   : > { %v9495_v18 = vpop.eup %7677  ;;  %7053 = vmatmul.mubr.msk.f32.gmra.mrb[28].mxu1 %vm797_vm2, %v7664_v62  ;;  %7354 = vmatprep.mubr.msk.f32.mxu0 %vm797_vm2, %v9492_v16  ;;  %v13581_v62 = vmov 3  }
 0x1fb   : > { %4727 = vmatprep.mubr.f32.mxu1 %v9130_v26  ;;  %7687 = vtanh.f32 %v1051_v17  ;;  %v7312_v19 = vpop.f32.mrb[4].mxu1  ;;  %7355 = vmatmul.mubr.msk.f32.gmra.mrb[60].mxu0 %vm797_vm2, %v9495_v18 }
 0x1fc   : > { %7689 = vtanh.f32 %v1056_v14  ;;  %v1066_v42 = vadd.f32 %v7312_v19, %v9441_v27  ;;  %v1060_v20 = vpop.f32.mrb[5].mxu1  ;;  %7462 = vset.pattern.permute.xlu1 %v13581_v62 }
 0x1fd   : > { %v9504_v21 = vpop.eup %7679  ;;  %v1061_v22 = vadd.f32 %v9441_v27, %v1060_v20 }
 0x1fe   : > { %v9507_v23 = vpop.eup %7681  ;;  %7054 = vmatmul.mubr.msk.f32.gmra.mrb[30].mxu1 %vm797_vm2, %v7666_v0  ;;  %7357 = vmatprep.mubr.msk.f32.mxu0 %vm797_vm2, %v9504_v21  ;;  %v13583_v0 = vmov 0  }
 0x1ff   : > { %4733 = vmatprep.mubr.f32.mxu1 %v9130_v26  ;;  %7691 = vtanh.f32 %v1061_v22  ;;  %v7315_v24 = vpop.f32.mrb[6].mxu1  ;;  %7358 = vmatmul.mubr.msk.f32.gmra.mrb[62].mxu0 %vm797_vm2, %v9507_v23 }
 0x200   : > { %7693 = vtanh.f32 %v1066_v42  ;;  %v1076_v25 = vadd.f32 %v7315_v24, %v9441_v27  ;;  %v1070_v28 = vpop.f32.mrb[7].mxu1  ;;  %7459 = vset.pattern.permute.xlu0 %v13583_v0 }
 0x201   : > { %v9516_v29 = vpop.eup %7683  ;;  %v1071_v30 = vadd.f32 %v9441_v27, %v1070_v28 }
 0x202   : > { %v9519_v31 = vpop.eup %7685  ;;  %7055 = vmatmul.mubr.msk.f32.gmra.mrb[32].mxu1 %vm797_vm2, %v7668_v4  ;;  %7360 = vmatprep.mubr.msk.f32.mxu0 %vm797_vm2, %v9516_v29  ;;  %v9618_v4 = vrot.slane %v4609_v3, %v4617_v2 }
 0x203   : > { %4739 = vmatprep.mubr.f32.mxu1 %v9130_v26  ;;  %7695 = vtanh.f32 %v1071_v30  ;;  %v7318_v32 = vpop.f32.mrb[8].mxu1  ;;  %7361 = vmatmul.mubr.msk.f32.gmra.mrb[64].mxu0 %vm797_vm2, %v9519_v31 }
 0x204   : > { %7697 = vtanh.f32 %v1076_v25  ;;  %v1086_v33 = vadd.f32 %v7318_v32, %v9441_v27  ;;  %v1080_v34 = vpop.f32.mrb[9].mxu1 }
 0x205   : > { %v9528_v35 = vpop.eup %7687  ;;  %v1081_v36 = vadd.f32 %v9441_v27, %v1080_v34 }
 0x206   : > { %v9531_v37 = vpop.eup %7689  ;;  %7056 = vmatmul.mubr.msk.f32.gmra.mrb[34].mxu1 %vm797_vm2, %v7670_v6  ;;  %7363 = vmatprep.mubr.msk.f32.mxu0 %vm797_vm2, %v9528_v35 }
 0x207   : > { %4745 = vmatprep.mubr.f32.mxu1 %v9130_v26  ;;  %7699 = vtanh.f32 %v1081_v36  ;;  %v7321_v38 = vpop.f32.mrb[10].mxu1  ;;  %7364 = vmatmul.mubr.msk.f32.gmra.mrb[66].mxu0 %vm797_vm2, %v9531_v37 }
 0x208   : > { %7701 = vtanh.f32 %v1086_v33  ;;  %v1096_v39 = vadd.f32 %v7321_v38, %v9441_v27  ;;  %v1090_v40 = vpop.f32.mrb[11].mxu1 }
 0x209   : > { %v7692_v41 = vpop.eup %7691  ;;  %v1091_v43 = vadd.f32 %v9441_v27, %v1090_v40 }
 0x20a   : > { %v7694_v44 = vpop.eup %7693  ;;  %7057 = vmatmul.mubr.msk.f32.gmra.mrb[36].mxu1 %vm797_vm2, %v9480_v10  ;;  %7366 = vmatprep.mubr.msk.f32.mxu0 %vm797_vm2, %v7692_v41 }
 0x20b   : > { %4751 = vmatprep.mubr.f32.mxu1 %v9130_v26  ;;  %7703 = vtanh.f32 %v1091_v43  ;;  %v7324_v45 = vpop.f32.mrb[12].mxu1  ;;  %7367 = vmatmul.mubr.msk.f32.gmra.mrb[68].mxu0 %vm797_vm2, %v7694_v44 }
 0x20c   : > { %7705 = vtanh.f32 %v1096_v39  ;;  %v1106_v46 = vadd.f32 %v7324_v45, %v9441_v27  ;;  %v1100_v47 = vpop.f32.mrb[13].mxu1 }
 0x20d   : > { %v7696_v48 = vpop.eup %7695  ;;  %v1101_v49 = vadd.f32 %v9441_v27, %v1100_v47 }
 0x20e   : > { %v7698_v50 = vpop.eup %7697  ;;  %7058 = vmatmul.mubr.msk.f32.gmra.mrb[38].mxu1 %vm797_vm2, %v9483_v12  ;;  %7369 = vmatprep.mubr.msk.f32.mxu0 %vm797_vm2, %v7696_v48 }
 0x20f   : > { %4757 = vmatprep.mubr.f32.mxu1 %v9130_v26  ;;  %7707 = vtanh.f32 %v1101_v49  ;;  %v7327_v51 = vpop.f32.mrb[14].mxu1  ;;  %7370 = vmatmul.mubr.msk.f32.gmra.mrb[70].mxu0 %vm797_vm2, %v7698_v50 }
 0x210   : > { %7709 = vtanh.f32 %v1106_v46  ;;  %v1116_v52 = vadd.f32 %v7327_v51, %v9441_v27  ;;  %v1110_v53 = vpop.f32.mrb[15].mxu1 }
 0x211   : > { %v7700_v54 = vpop.eup %7699  ;;  %v1111_v55 = vadd.f32 %v9441_v27, %v1110_v53 }
 0x212   : > { %v7702_v56 = vpop.eup %7701  ;;  %7059 = vmatmul.mubr.msk.f32.gmra.mrb[40].mxu1 %vm797_vm2, %v9492_v16  ;;  %7711 = vtanh.f32 %v1116_v52  ;;  %7372 = vmatprep.mubr.msk.f32.mxu0 %vm797_vm2, %v7700_v54 }
 0x213   : > { %4763 = vmatprep.mubr.f32.mxu1 %v9130_v26  ;;  %7713 = vtanh.f32 %v1111_v55  ;;  %7373 = vmatmul.mubr.msk.f32.gmra.mrb[72].mxu0 %vm797_vm2, %v7702_v56 }
 0x215   : > { %v7704_v57 = vpop.eup %7703 }
 0x216   : > { %v7706_v58 = vpop.eup %7705  ;;  %7060 = vmatmul.mubr.msk.f32.gmra.mrb[42].mxu1 %vm797_vm2, %v9495_v18  ;;  %7375 = vmatprep.mubr.msk.f32.mxu0 %vm797_vm2, %v7704_v57 }
 0x217   : > { %4769 = vmatprep.mubr.f32.mxu1 %v9130_v26  ;;  %7376 = vmatmul.mubr.msk.f32.gmra.mrb[74].mxu0 %vm797_vm2, %v7706_v58 }
 0x219   : > { %v7708_v27 = vpop.eup %7707 }
 0x21a   : > { %v7710_v59 = vpop.eup %7709  ;;  %7061 = vmatmul.mubr.msk.f32.gmra.mrb[44].mxu1 %vm797_vm2, %v9504_v21  ;;  %7378 = vmatprep.mubr.msk.f32.mxu0 %vm797_vm2, %v7708_v27 }
 0x21b   : > { %4775 = vmatprep.mubr.f32.mxu1 %v9130_v26  ;;  %7379 = vmatmul.mubr.msk.f32.gmra.mrb[76].mxu0 %vm797_vm2, %v7710_v59 }
 0x21c   : > { %v7712_v60 = vpop.eup %7711 }
 0x21d   : > { %v7714_v61 = vpop.eup %7713 }
 0x21e   : > { %7062 = vmatmul.mubr.msk.f32.gmra.mrb[46].mxu1 %vm797_vm2, %v9507_v23  ;;  %7381 = vmatprep.mubr.msk.f32.mxu0 %vm797_vm2, %v7714_v61 }
 0x21f   : > { %4781 = vmatprep.mubr.f32.mxu1 %v9130_v26  ;;  %7382 = vmatmul.mubr.msk.f32.gmra.mrb[78].mxu0 %vm797_vm2, %v7712_v60 }
 0x222   : > { %7063 = vmatmul.mubr.msk.f32.gmra.mrb[48].mxu1 %vm797_vm2, %v9516_v29 }
 0x223   : > { %4787 = vmatprep.mubr.f32.mxu1 %v9130_v26 }
 0x226   : > { %7064 = vmatmul.mubr.msk.f32.gmra.mrb[50].mxu1 %vm797_vm2, %v9519_v31 }
 0x227   : > { %4793 = vmatprep.mubr.f32.mxu1 %v9130_v26 }
 0x22a   : > { %7065 = vmatmul.mubr.msk.f32.gmra.mrb[52].mxu1 %vm797_vm2, %v9528_v35 }
 0x22b   : > { %4799 = vmatprep.mubr.f32.mxu1 %v9130_v26 }
 0x22e   : > { %7066 = vmatmul.mubr.msk.f32.gmra.mrb[54].mxu1 %vm797_vm2, %v9531_v37 }
 0x22f   : > { %4805 = vmatprep.mubr.f32.mxu1 %v9130_v26 }
 0x232   : > { %7067 = vmatmul.mubr.msk.f32.gmra.mrb[56].mxu1 %vm797_vm2, %v7692_v41 }
 0x233   : > { %4811 = vmatprep.mubr.f32.mxu1 %v9130_v26 }
 0x236   : > { %7068 = vmatmul.mubr.msk.f32.gmra.mrb[58].mxu1 %vm797_vm2, %v7694_v44  ;;  %v9677_v44 = vld [vmem:[%s13575_s6] ss:$0 sm:$0xff] }
 0x237   : > { %4817 = vmatprep.mubr.f32.mxu1 %v9130_v26 }
 0x23a   : > { %7069 = vmatmul.mubr.msk.f32.gmra.mrb[60].mxu1 %vm797_vm2, %v7696_v48 }
 0x23b   : > { %4823 = vmatprep.mubr.f32.mxu1 %v9130_v26 }
 0x23e   : > { %7070 = vmatmul.mubr.msk.f32.gmra.mrb[62].mxu1 %vm797_vm2, %v7698_v50 }
 0x23f   : > { %4829 = vmatprep.mubr.f32.mxu1 %v9130_v26 }
 0x242   : > { %7071 = vmatmul.mubr.msk.f32.gmra.mrb[64].mxu1 %vm797_vm2, %v7700_v54 }
 0x243   : > { %4835 = vmatprep.mubr.f32.mxu1 %v9130_v26 }
 0x246   : > { %7072 = vmatmul.mubr.msk.f32.gmra.mrb[66].mxu1 %vm797_vm2, %v7702_v56 }
 0x247   : > { %4841 = vmatprep.mubr.f32.mxu1 %v9130_v26 }
 0x24a   : > { %7073 = vmatmul.mubr.msk.f32.gmra.mrb[68].mxu1 %vm797_vm2, %v7704_v57 }
 0x24b   : > { %4847 = vmatprep.mubr.f32.mxu1 %v9130_v26 }
 0x24e   : > { %7074 = vmatmul.mubr.msk.f32.gmra.mrb[70].mxu1 %vm797_vm2, %v7706_v58 }
 0x24f   : > { %4853 = vmatprep.mubr.f32.mxu1 %v9130_v26 }
 0x252   : > { %7075 = vmatmul.mubr.msk.f32.gmra.mrb[72].mxu1 %vm797_vm2, %v7708_v27 }
 0x253   : > { %4859 = vmatprep.mubr.f32.mxu1 %v9130_v26 }
 0x256   : > { %7076 = vmatmul.mubr.msk.f32.gmra.mrb[74].mxu1 %vm797_vm2, %v7710_v59 }
 0x257   : > { %4865 = vmatprep.mubr.f32.mxu1 %v9130_v26 }
 0x25a   : > { %7077 = vmatmul.mubr.msk.f32.gmra.mrb[76].mxu1 %vm797_vm2, %v7714_v61 }
 0x25b   : > { %4871 = vmatprep.mubr.f32.mxu1 %v9130_v26 }
 0x25e   : > { %7078 = vmatmul.mubr.msk.f32.gmra.mrb[78].mxu1 %vm797_vm2, %v7712_v60 }
 0x2b5   : > { %v9620_v26 = vpop.f32.mrb[16].mxu1 }
 0x2b6   : > { %13832 = vst [vmem:[#allocation6_spill] sm:$0xff] %v9620_v26  ;;  %v7338_v5 = vpop.f32.mrb[48].mxu0  ;;  %v4689_v6 = vpop.f32.mrb[17].mxu1 }
 0x2b7   : > { %v9623_v7 = vadd.f32 %v4689_v6, %v9618_v4  ;;  %v1324_v8 = vpop.f32.mrb[49].mxu0  ;;  %v9686_v48 = vadd.f32 %v7338_v5, %v9677_v44 }
 0x2b8   : > { %v9698_v57 = vadd.f32 %v9677_v44, %v1324_v8 }
 0x2b9   : > { %v9625_v9 = vpop.f32.mrb[18].mxu1  ;;  %v5230_v10 = vand.u32 2147483647, %v9623_v7  ;;  %v1580_v52 = vand.u32 2147483647, %v9686_v48  ;;  %v5134_v6 = vmax.f32 %v9623_v7, 0.0  ;;  %vm5166_vm4 = vcmp.ne.f32.partialorder %v9623_v7, %v9623_v7 }
 0x2ba   : > { %13833 = vst [vmem:[#allocation7_spill] sm:$0xff] %v9625_v9  ;;  %v4695_v11 = vpop.f32.mrb[19].mxu1  ;;  %v9628_v12 = vpop.f32.mrb[50].mxu0  ;;  %vm1516_vm8 = vcmp.ne.f32.partialorder %v9686_v48, %v9686_v48  ;;  %vm1515_vm11 = vcmp.ne.f32.partialorder %v9698_v57, %v9698_v57 }
 0x2bb   : > { %v9630_v13 = vpop.f32.mrb[51].mxu0  ;;  %v5262_v14 = vsub.f32 0.0, %v5230_v10  ;;  %v9633_v16 = vadd.f32 %v4695_v11, %v9618_v4  ;;  %v1612_v61 = vsub.f32 0.0, %v1580_v52  ;;  %v1579_v10 = vand.u32 2147483647, %v9698_v57 }
 0x2bd   : > { %v5294_v15 = vmul.f32 1.442695, %v5262_v14  ;;  %v9635_v17 = vpop.f32.mrb[20].mxu1  ;;  %v5231_v21 = vand.u32 2147483647, %v9633_v16  ;;  %vm5167_vm6 = vcmp.ne.f32.partialorder %v9633_v16, %v9633_v16 }
 0x2be   : > { %13834 = vst [vmem:[#allocation8_spill] sm:$0xff] %v9635_v17  ;;  %v4701_v18 = vpop.f32.mrb[21].mxu1  ;;  %v9637_v19 = vpop.f32.mrb[52].mxu0 }
 0x2bf   : > { %7715 = vpow2.f32 %v5294_v15  ;;  %v9639_v42 = vpop.f32.mrb[53].mxu0  ;;  %v5263_v28 = vsub.f32 0.0, %v5231_v21  ;;  %v9709_v11 = vadd.f32 %v4701_v18, %v9618_v4 }
 0x2c1   : > { %v9641_v20 = vpop.f32.mrb[22].mxu1  ;;  %v5296_v34 = vmul.f32 1.442695, %v5263_v28  ;;  %v1645_v28 = vmul.f32 1.442695, %v1612_v61  ;;  %vm5168_vm12 = vcmp.ne.f32.partialorder %v9709_v11, %v9709_v11 }
 0x2c2   : > { %13835 = vst [vmem:[#allocation9_spill] sm:$0xff] %v9641_v20  ;;  %v9644_v22 = vpop.f32.mrb[23].mxu1  ;;  %v9646_v23 = vpop.f32.mrb[54].mxu0 }
 0x2c3   : > { %v9648_v24 = vpop.f32.mrb[55].mxu0  ;;  %7717 = vpow2.f32 %v5296_v34 }
 0x2c5   : > { %v9650_v25 = vpop.f32.mrb[24].mxu1 }
 0x2c6   : > { %13836 = vst [vmem:[#allocation10_spill] sm:$0xff] %v9650_v25  ;;  %v9652_v29 = vpop.f32.mrb[25].mxu1  ;;  %v9654_v30 = vpop.f32.mrb[56].mxu0 }
 0x2c7   : > { %v9656_v31 = vpop.f32.mrb[57].mxu0 }
 0x2c9   : > { %v9658_v32 = vpop.f32.mrb[26].mxu1  ;;  %v7716_v33 = vpop.eup %7715 }
 0x2ca   : > { %13837 = vst [vmem:[#allocation11_spill] sm:$0xff] %v9658_v32  ;;  %v9660_v35 = vpop.f32.mrb[27].mxu1  ;;  %v9662_v36 = vpop.f32.mrb[58].mxu0  ;;  %v5358_v38 = vadd.f32 1.0, %v7716_v33  ;;  %v5361_v50 = vmul.f32 -0.5, %v7716_v33 }
 0x2cb   : > { %v9664_v37 = vpop.f32.mrb[59].mxu0  ;;  %v5364_v58 = vand.u32 2147483647, %v7716_v33 }
 0x2cc   : > { %7719 = vlog2.f32 %v5358_v38  ;;  %v5362_v55 = vadd.f32 1.0, %v5361_v50  ;;  %v5232_v38 = vand.u32 2147483647, %v9709_v11 }
 0x2cd   : > { %v9666_v39 = vpop.f32.mrb[28].mxu1  ;;  %v7718_v54 = vpop.eup %7717  ;;  %vm5365_vm3 = vcmp.lt.f32.partialorder %v5364_v58, 0.0004427343 }
 0x2ce   : > { %13838 = vst [vmem:[#allocation12_spill] sm:$0xff] %v9666_v39  ;;  %v9668_v40 = vpop.f32.mrb[29].mxu1  ;;  %v9670_v41 = vpop.f32.mrb[60].mxu0  ;;  %v5367_v63 = vadd.f32 1.0, %v7718_v54  ;;  %v5363_v5 = vmul.f32 %v7716_v33, %v5362_v55  ;;  %v1611_v33 = vsub.f32 0.0, %v1579_v10 }
 0x2cf   : > { %v9672_v43 = vpop.f32.mrb[61].mxu0 }
 0x2d0   : > { %7721 = vlog2.f32 %v5367_v63  ;;  %v1643_v58 = vmul.f32 1.442695, %v1611_v33 }
 0x2d1   : > { %v9679_v45 = vpop.f32.mrb[30].mxu1  ;;  %7723 = vpow2.f32 %v1645_v28 }
 0x2d2   : > { %13839 = vst [vmem:[#allocation13_spill] sm:$0xff] %v9679_v45  ;;  %v9681_v46 = vpop.f32.mrb[31].mxu1  ;;  %v9683_v47 = vpop.f32.mrb[62].mxu0  ;;  %7725 = vpow2.f32 %v1643_v58 }
 0x2d3   : > { %v9688_v49 = vpop.f32.mrb[63].mxu0 }
 0x2d5   : > { %v9690_v51 = vpop.f32.mrb[32].mxu1 }
 0x2d6   : > { %13840 = vst [vmem:[#allocation14_spill] sm:$0xff] %v9690_v51  ;;  %v9693_v53 = vpop.f32.mrb[33].mxu1  ;;  %v9695_v56 = vpop.f32.mrb[64].mxu0  ;;  %v9761_v51 = vadd.f32 %v9644_v22, %v9618_v4 }
 0x2d7   : > { %v7720_v60 = vpop.eup %7719  ;;  %v9704_v2 = vpop.f32.mrb[65].mxu0 }
 0x2d8   : > { %v5360_v3 = vmul.f32 0.6931472, %v7720_v60  ;;  %v5264_v60 = vsub.f32 0.0, %v5232_v38  ;;  %vm5169_vm0 = vcmp.ne.f32.partialorder %v9761_v51, %v9761_v51 }
 0x2d9   : > { %v9700_v27 = vpop.f32.mrb[34].mxu1 }
 0x2da   : > { %13841 = vst [vmem:[#allocation15_spill] sm:$0xff] %v9700_v27  ;;  %v9702_v59 = vpop.f32.mrb[35].mxu1  ;;  %v5366_v14 = vsel %vm5365_vm3, %v5363_v5, %v5360_v3  ;;  %v9715_v21 = vpop.f32.mrb[66].mxu0  ;;  %v5370_v3 = vmul.f32 -0.5, %v7718_v54 }
 0x2db   : > { %v5646_v34 = vadd.f32 %v5366_v14, %v5134_v6  ;;  %v9730_v55 = vpop.f32.mrb[67].mxu0  ;;  %v7722_v10 = vpop.eup %7721  ;;  %v5298_v14 = vmul.f32 1.442695, %v5264_v60 }
 0x2dc   : > { %v5371_v38 = vadd.f32 1.0, %v5370_v3 }
 0x2dd   : > { %v9711_v8 = vpop.f32.mrb[36].mxu1  ;;  %v9721_v18 = vsel %vm5166_vm4, %v9623_v7, %v5646_v34  ;;  %v9738_v7 = vadd.f32 %v9628_v12, %v9677_v44  ;;  %v5373_v12 = vand.u32 2147483647, %v7718_v54  ;;  %7727 = vpow2.f32 %v5298_v14 }
 0x2de   : > { %13842 = vst [vmem:[#allocation16_spill] sm:$0xff] %v9711_v8  ;;  %v9713_v15 = vpop.f32.mrb[37].mxu1  ;;  %13843 = vst [vmem:[#allocation17_spill] sm:$0xff] %v9721_v18  ;;  %6158 = vrot.lane.b32.xlu1 %v9721_v18, %s9133_s22  ;;  %6062 = vadd.xlane.f32.xlu0 %v9721_v18  ;;  %v9734_v63 = vpop.f32.mrb[68].mxu0  ;;  %v5369_v18 = vmul.f32 0.6931472, %v7722_v10  ;;  %v5372_v60 = vmul.f32 %v7718_v54, %v5371_v38 }
 0x2df   : > { %v9742_v6 = vpop.f32.mrb[69].mxu0  ;;  %v1582_v33 = vand.u32 2147483647, %v9738_v7  ;;  %vm5374_vm5 = vcmp.lt.f32.partialorder %v5373_v12, 0.0004427343  ;;  %v5135_v10 = vmax.f32 %v9633_v16, 0.0  ;;  %vm1518_vm14 = vcmp.ne.f32.partialorder %v9738_v7, %v9738_v7 }
 0x2e0   : > { %v5375_v27 = vsel %vm5374_vm5, %v5372_v60, %v5369_v18 }
 0x2e1   : > { %v9723_v50 = vpop.f32.mrb[38].mxu1  ;;  %v1614_v58 = vsub.f32 0.0, %v1582_v33  ;;  %v5233_v33 = vand.u32 2147483647, %v9761_v51  ;;  %v5647_v54 = vadd.f32 %v5375_v27, %v5135_v10 }
 0x2e2   : > { %13844 = vst [vmem:[#allocation18_spill] sm:$0xff] %v9723_v50  ;;  %v9728_v52 = vpop.f32.mrb[39].mxu1  ;;  %v9746_v28 = vpop.f32.mrb[70].mxu0 }
 0x2e3   : > { %v9751_v0 = vpop.f32.mrb[71].mxu0  ;;  %v5265_v12 = vsub.f32 0.0, %v5233_v33  ;;  %v9776_v60 = vsel %vm5167_vm6, %v9633_v16, %v5647_v54 }
 0x2e4   : > { %13853 = vst [vmem:[#allocation27_spill] sm:$0xff] %v9776_v60 }
 0x2e5   : > { %v9732_v61 = vpop.f32.mrb[40].mxu1  ;;  %v5300_v33 = vmul.f32 1.442695, %v5265_v12 }
 0x2e6   : > { %13845 = vst [vmem:[#allocation19_spill] sm:$0xff] %v9732_v61  ;;  %v9740_v5 = vpop.f32.mrb[41].mxu1  ;;  %v7724_v61 = vpop.eup %7723 }
 0x2e7   : > { %v9755_v50 = vpop.f32.mrb[72].mxu0  ;;  %v1716_v3 = vadd.f32 1.0, %v7724_v61  ;;  %v7726_v45 = vpop.eup %7725  ;;  %v1722_v20 = vand.u32 2147483647, %v7724_v61 }
 0x2e8   : > { %v9763_v39 = vpop.f32.mrb[73].mxu0  ;;  %v1707_v22 = vadd.f32 1.0, %v7726_v45  ;;  %v7728_v18 = vpop.eup %7727  ;;  %v1710_v9 = vmul.f32 -0.5, %v7726_v45 }
 0x2e9   : > { %v9744_v34 = vpop.f32.mrb[42].mxu1  ;;  %13849 = vst [vmem:[#allocation23_spill] sm:$0xff] %v9763_v39  ;;  %7729 = vlog2.f32 %v1716_v3  ;;  %v9786_v3 = vadd.f32 %v9677_v44, %v9630_v13  ;;  %vm1723_vm7 = vcmp.lt.f32.partialorder %v1722_v20, 0.0004427343  ;;  %v5382_v39 = vand.u32 2147483647, %v7728_v18 }
 0x2ea   : > { %13846 = vst [vmem:[#allocation20_spill] sm:$0xff] %v9744_v34  ;;  %v9749_v62 = vpop.f32.mrb[43].mxu1 }
 0x2eb   : > { %v1581_v32 = vand.u32 2147483647, %v9786_v3  ;;  %vm5383_vm10 = vcmp.lt.f32.partialorder %v5382_v39, 0.0004427343  ;;  %vm1517_vm2 = vcmp.ne.f32.partialorder %v9786_v3, %v9786_v3 }
 0x2ed   : > { %v9753_v8 = vpop.f32.mrb[44].mxu1  ;;  %v1613_v1 = vsub.f32 0.0, %v1581_v32 }
 0x2ee   : > { %13847 = vst [vmem:[#allocation21_spill] sm:$0xff] %v9753_v8  ;;  %v9757_v34 = vpop.f32.mrb[45].mxu1  ;;  %v1649_v8 = vmul.f32 1.442695, %v1614_v58 }
 0x2ef   : > { %13848 = vst [vmem:[#allocation22_spill] sm:$0xff] %v9757_v34 }
 0x2f0   : > { %7731 = vpow2.f32 %v1649_v8  ;;  %v5376_v8 = vadd.f32 1.0, %v7728_v18 }
 0x2f1   : > { %v9766_v14 = vpop.f32.mrb[46].mxu1  ;;  %7733 = vlog2.f32 %v1707_v22 }
 0x2f2   : > { %13850 = vst [vmem:[#allocation24_spill] sm:$0xff] %v9766_v14  ;;  %v9769_v38 = vpop.f32.mrb[47].mxu1  ;;  %v9790_v14 = vpop.f32.mrb[74].mxu0  ;;  %7735 = vlog2.f32 %v5376_v8  ;;  %v5379_v8 = vmul.f32 -0.5, %v7728_v18 }
 0x2f3   : > { %13851 = vst [vmem:[#allocation25_spill] sm:$0xff] %v9769_v38  ;;  %13857 = vst [vmem:[#allocation31_spill] sm:$0xff] %v9790_v14  ;;  %v7730_v54 = vpop.eup %7729  ;;  %v9797_v22 = vpop.f32.mrb[75].mxu0  ;;  %7737 = vpow2.f32 %v5300_v33  ;;  %v1484_v33 = vmax.f32 %v9686_v48, 0.0  ;;  %v1713_v38 = vand.u32 2147483647, %v7726_v45 }
 0x2f4   : > { %6160 = vrot.lane.b32.xlu0 %v9776_v60, %s9133_s22  ;;  %13860 = vst [vmem:[#allocation34_spill] sm:$0xff] %v9797_v22  ;;  %v1718_v26 = vmul.f32 0.6931472, %v7730_v54  ;;  %v1711_v22 = vadd.f32 1.0, %v1710_v9  ;;  %v1647_v54 = vmul.f32 1.442695, %v1613_v1 }
 0x2f5   : > { %v9771_v25 = vpop.f32.mrb[48].mxu1  ;;  %vm1714_vm9 = vcmp.lt.f32.partialorder %v1713_v38, 0.0004427343  ;;  %v1483_v1 = vmax.f32 %v9698_v57, 0.0  ;;  %v5136_v38 = vmax.f32 %v9709_v11, 0.0 }
 0x2f6   : > { %13852 = vst [vmem:[#allocation26_spill] sm:$0xff] %v9771_v25  ;;  %v9778_v58 = vpop.f32.mrb[49].mxu1  ;;  %v1719_v25 = vmul.f32 -0.5, %v7724_v61  ;;  %v1712_v20 = vmul.f32 %v7726_v45, %v1711_v22 }
 0x2f7   : > { %13854 = vst [vmem:[#allocation28_spill] sm:$0xff] %v9778_v58 }
 0x2f9   : > { %v9782_v27 = vpop.f32.mrb[50].mxu1 }
 0x2fa   : > { %13855 = vst [vmem:[#allocation29_spill] sm:$0xff] %v9782_v27  ;;  %v9788_v10 = vpop.f32.mrb[51].mxu1  ;;  %v1720_v27 = vadd.f32 1.0, %v1719_v25  ;;  %v9799_v13 = vpop.eup %7731 }
 0x2fb   : > { %13856 = vst [vmem:[#allocation30_spill] sm:$0xff] %v9788_v10  ;;  %v1734_v58 = vadd.f32 1.0, %v9799_v13  ;;  %v7734_v14 = vpop.eup %7733  ;;  %v1740_v39 = vand.u32 2147483647, %v9799_v13 }
 0x2fc   : > { %v1709_v32 = vmul.f32 0.6931472, %v7734_v14 }
 0x2fd   : > { %v9792_v16 = vpop.f32.mrb[52].mxu1  ;;  %7739 = vlog2.f32 %v1734_v58  ;;  %vm9841_vm13 = vcmp.lt.f32.partialorder %v1740_v39, 0.0004427343 }
 0x2fe   : > { %13858 = vst [vmem:[#allocation32_spill] sm:$0xff] %v9792_v16  ;;  %v9795_v17 = vpop.f32.mrb[53].mxu1  ;;  %v1721_v16 = vmul.f32 %v7724_v61, %v1720_v27  ;;  %v5380_v61 = vadd.f32 1.0, %v5379_v8  ;;  %v7736_v27 = vpop.eup %7735  ;;  %7741 = vpow2.f32 %v1647_v54  ;;  %v1715_v9 = vsel %vm1714_vm9, %v1712_v20, %v1709_v32 }
 0x2ff   : > { %13859 = vst [vmem:[#allocation33_spill] sm:$0xff] %v9795_v17  ;;  %v7738_v34 = vpop.eup %7737  ;;  %v1995_v8 = vadd.f32 %v1715_v9, %v1483_v1 }
 0x300   : > { %v1724_v17 = vsel %vm1723_vm7, %v1721_v16, %v1718_v26  ;;  %v5378_v16 = vmul.f32 0.6931472, %v7736_v27  ;;  %v5385_v45 = vadd.f32 1.0, %v7738_v34 }
 0x301   : > { %v9801_v12 = vpop.f32.mrb[54].mxu1 }
 0x302   : > { %13861 = vst [vmem:[#allocation35_spill] sm:$0xff] %v9801_v12  ;;  %v9803_v10 = vpop.f32.mrb[55].mxu1  ;;  %6064 = vadd.xlane.f32.xlu1 %v9776_v60  ;;  %v5381_v60 = vmul.f32 %v7728_v18, %v5380_v61  ;;  %v9826_v18 = vpop.f32.mrb[76].mxu0 }
 0x303   : > { %13862 = vst [vmem:[#allocation36_spill] sm:$0xff] %v9803_v10  ;;  %v1996_v10 = vadd.f32 %v1724_v17, %v1484_v33  ;;  %v1737_v17 = vmul.f32 -0.5, %v9799_v13 }
 0x304   : > { %v5384_v54 = vsel %vm5383_vm10, %v5381_v60, %v5378_v16  ;;  %v9838_v60 = vpop.f32.mrb[77].mxu0 }
 0x305   : > { %v9806_v25 = vpop.f32.mrb[56].mxu1  ;;  %v2028_v58 = vsel %vm1516_vm8, %v9686_v48, %v1996_v10  ;;  %v1738_v32 = vadd.f32 1.0, %v1737_v17  ;;  %v2027_v48 = vsel %vm1515_vm11, %v9698_v57, %v1995_v8  ;;  %v5648_v10 = vadd.f32 %v5384_v54, %v5136_v38 }
 0x306   : > { %13863 = vst [vmem:[#allocation37_spill] sm:$0xff] %v9806_v25  ;;  %v9810_v12 = vpop.f32.mrb[57].mxu1  ;;  %7743 = vrcp.f32 %v2028_v58  ;;  %v5388_v57 = vmul.f32 -0.5, %v7738_v34  ;;  %v1486_v38 = vmax.f32 %v9738_v7, 0.0  ;;  %v13594_v25 = vmov 2  }
 0x307   : > { %7745 = vlog2.f32 %v5385_v45  ;;  %v7740_v61 = vpop.eup %7739  ;;  %v1739_v16 = vmul.f32 %v9799_v13, %v1738_v32  ;;  %v9848_v45 = vsel %vm5168_vm12, %v9709_v11, %v5648_v10 }
 0x308   : > { %v7742_v1 = vpop.eup %7741  ;;  %v1736_v9 = vmul.f32 0.6931472, %v7740_v61  ;;  %7747 = vrcp.f32 %v2027_v48  ;;  %13873 = vst [vmem:[#allocation45_spill] sm:$0xff] %v9848_v45  ;;  %v5389_v61 = vadd.f32 1.0, %v5388_v57  ;;  %v5391_v48 = vand.u32 2147483647, %v7738_v34 }
 0x309   : > { %v9814_v26 = vpop.f32.mrb[58].mxu1  ;;  %v1725_v54 = vadd.f32 1.0, %v7742_v1 }
 0x30a   : > { %13864 = vst [vmem:[#allocation38_spill] sm:$0xff] %v9814_v26  ;;  %v9817_v14 = vpop.f32.mrb[59].mxu1  ;;  %v1742_v13 = vsel %vm9841_vm13, %v1739_v16, %v1736_v9  ;;  %v9869_v9 = vpop.f32.mrb[78].mxu0  ;;  %vm9871_vm15 = vcmp.lt.f32.partialorder %v5391_v48, 0.0004427343 }
 0x30b   : > { %13865 = vst [vmem:[#allocation39_spill] sm:$0xff] %v9817_v14  ;;  %7749 = vlog2.f32 %v1725_v54  ;;  %v1731_v26 = vand.u32 2147483647, %v7742_v1 }
 0x30d   : > { %v9821_v22 = vpop.f32.mrb[60].mxu1  ;;  %vm1732_vm1 = vcmp.lt.f32.partialorder %v1731_v26, 0.0004427343 }
 0x30e   : > { %13866 = vst [vmem:[#allocation40_spill] sm:$0xff] %v9821_v22  ;;  %v9824_v33 = vpop.f32.mrb[61].mxu1  ;;  %v5390_v22 = vmul.f32 %v7738_v34, %v5389_v61  ;;  %v5137_v34 = vmax.f32 %v9761_v51, 0.0 }
 0x30f   : > { %13867 = vst [vmem:[#allocation41_spill] sm:$0xff] %v9824_v33 }
 0x310   : > { %v9858_v32 = vpop.eup %7743 }
 0x311   : > { %v9832_v27 = vpop.f32.mrb[62].mxu1  ;;  %v7746_v11 = vpop.eup %7745 }
 0x312   : > { %13868 = vst [vmem:[#allocation42_spill] sm:$0xff] %v9832_v27  ;;  %v9836_v20 = vpop.f32.mrb[63].mxu1 }
 0x313   : > { %13869 = vst [vmem:[#allocation43_spill] sm:$0xff] %v9836_v20  ;;  %6162 = vrot.lane.b32.xlu1 %v9848_v45, %s9133_s22  ;;  %6066 = vadd.xlane.f32.xlu0 %v9848_v45  ;;  %v5387_v45 = vmul.f32 0.6931472, %v7746_v11  ;;  %v1728_v11 = vmul.f32 -0.5, %v7742_v1 }
 0x315   : > { %v9845_v17 = vpop.f32.mrb[64].mxu1  ;;  %v5393_v61 = vsel %vm9871_vm15, %v5390_v22, %v5387_v45  ;;  %v1729_v27 = vadd.f32 1.0, %v1728_v11 }
 0x316   : > { %13872 = vst [vmem:[#allocation44_spill] sm:$0xff] %v9845_v17  ;;  %v9850_v8 = vpop.f32.mrb[65].mxu1  ;;  %v1998_v17 = vadd.f32 %v1742_v13, %v1486_v38  ;;  %v7748_v38 = vpop.eup %7747  ;;  %v13592_v13 = vmov 1  }
 0x317   : > { %13874 = vst [vmem:[#allocation46_spill] sm:$0xff] %v9850_v8  ;;  %3582 = vperm.xlu1 %7462, %v9858_v32   ;;  %v1730_v45 = vmul.f32 %v7742_v1, %v1729_v27  ;;  %v13891_v1 = vmov 1  }
 0x318   : > { %v2030_v54 = vsel %vm1518_vm14, %v9738_v7, %v1998_v17  ;;  %v5649_v7 = vadd.f32 %v5393_v61, %v5137_v34  ;;  %v7750_v17 = vpop.eup %7749  ;;  %v13887_v34 = vmov 0  }
 0x319   : > { %v9860_v39 = vpop.f32.mrb[66].mxu1  ;;  %7751 = vrcp.f32 %v2030_v54  ;;  %v1727_v22 = vmul.f32 0.6931472, %v7750_v17 }
 0x31a   : > { %13875 = vst [vmem:[#allocation47_spill] sm:$0xff] %v9860_v39  ;;  %v9862_v10 = vpop.f32.mrb[67].mxu1  ;;  %v9877_v39 = vpop.f32.mrb[79].mxu0  ;;  %v9896_v54 = vsel %vm5169_vm0, %v9761_v51, %v5649_v7 }
 0x31b   : > { %13876 = vst [vmem:[#allocation48_spill] sm:$0xff] %v9862_v10  ;;  %7464 = vset.pattern.permute.xlu1 %v13592_v13  ;;  %13885 = vst [vmem:[#allocation55_spill] sm:$0xff] %v9896_v54 }
 0x31c   : > { %2618 = vperm.xlu1 %7464, %v7748_v38  }
 0x31d   : > { %v9867_v58 = vpop.f32.mrb[68].mxu1 }
 0x31e   : > { %13877 = vst [vmem:[#allocation49_spill] sm:$0xff] %v9867_v58  ;;  %v9875_v57 = vpop.f32.mrb[69].mxu1 }
 0x31f   : > { %13880 = vst [vmem:[#allocation50_spill] sm:$0xff] %v9875_v57 }
 0x320   : > { %7465 = vset.pattern.permute.xlu1 %v13594_v25  ;;  %v1485_v25 = vmax.f32 %v9786_v3, 0.0 }
 0x321   : > { %v9884_v48 = vpop.f32.mrb[70].mxu1  ;;  %3098 = vperm.xlu1 %7465, %v7748_v38  }
 0x322   : > { %13881 = vst [vmem:[#allocation51_spill] sm:$0xff] %v9884_v48  ;;  %v9886_v58 = vpop.f32.mrb[71].mxu1  ;;  %v1733_v48 = vsel %vm1732_vm1, %v1730_v45, %v1727_v22  ;;  %v13894_v45 = vmov 2  }
 0x323   : > { %13882 = vst [vmem:[#allocation52_spill] sm:$0xff] %v9886_v58  ;;  %v1997_v26 = vadd.f32 %v1733_v48, %v1485_v25  ;;  %v13895_v25 = vmov 3  }
 0x325   : > { %v9891_v13 = vpop.f32.mrb[72].mxu1  ;;  %6164 = vrot.lane.b32.xlu1 %v9896_v54, %s9133_s22  ;;  %v2029_v22 = vsel %vm1517_vm2, %v9786_v3, %v1997_v26  ;;  %v1345_v3 = vadd.f32 %v9677_v44, %v9639_v42  ;;  %v9938_v26 = vadd.f32 %v9637_v19, %v9677_v44 }
 0x326   : > { %13883 = vst [vmem:[#allocation53_spill] sm:$0xff] %v9891_v13  ;;  %v9893_v16 = vpop.f32.mrb[73].mxu1  ;;  %7467 = vset.pattern.permute.xlu1 %v13887_v34  ;;  %v7752_v13 = vpop.eup %7751  ;;  %7753 = vrcp.f32 %v2029_v22 }
 0x327   : > { %13884 = vst [vmem:[#allocation54_spill] sm:$0xff] %v9893_v16  ;;  %v1584_v22 = vand.u32 2147483647, %v9938_v26  ;;  %vm1519_vm4 = vcmp.ne.f32.partialorder %v1345_v3, %v1345_v3  ;;  %vm1520_vm8 = vcmp.ne.f32.partialorder %v9938_v26, %v9938_v26 }
 0x329   : > { %v9900_v11 = vpop.f32.mrb[74].mxu1  ;;  %2112 = vperm.xlu0 %7459, %v9858_v32   ;;  %2122 = vperm.xlu1 %7467, %v7752_v13  }
 0x32a   : > { %13886 = vst [vmem:[#allocation56_spill] sm:$0xff] %v9900_v11  ;;  %v9903_v61 = vpop.f32.mrb[75].mxu1 }
 0x32b   : > { %13888 = vst [vmem:[#allocation57_spill] sm:$0xff] %v9903_v61  ;;  %v9948_v61 = vadd.f32 %v9660_v35, %v9618_v4 }
 0x32d   : > { %v9907_v27 = vpop.f32.mrb[76].mxu1  ;;  %7460 = vset.pattern.permute.xlu0 %v13891_v1  ;;  %7468 = vset.pattern.permute.xlu1 %v13891_v1  ;;  %vm5171_vm11 = vcmp.ne.f32.partialorder %v9948_v61, %v9948_v61 }
 0x32e   : > { %13889 = vst [vmem:[#allocation58_spill] sm:$0xff] %v9907_v27  ;;  %v9909_v51 = vpop.f32.mrb[77].mxu1  ;;  %2622 = vperm.xlu0 %7460, %v9858_v32   ;;  %2630 = vperm.xlu1 %7468, %v7752_v13   ;;  %v1616_v27 = vsub.f32 0.0, %v1584_v22 }
 0x32f   : > { %13890 = vst [vmem:[#allocation59_spill] sm:$0xff] %v9909_v51 }
 0x330   : > { %v7754_v48 = vpop.eup %7753 }
 0x331   : > { %v9915_v7 = vpop.f32.mrb[78].mxu1 }
 0x332   : > { %13892 = vst [vmem:[#allocation60_spill] sm:$0xff] %v9915_v7  ;;  %v9918_v17 = vpop.f32.mrb[79].mxu1  ;;  %7461 = vset.pattern.permute.xlu0 %v13894_v45  ;;  %7469 = vset.pattern.permute.xlu1 %v13894_v45  ;;  %v1653_v7 = vmul.f32 1.442695, %v1616_v27 }
 0x333   : > { %13893 = vst [vmem:[#allocation61_spill] sm:$0xff] %v9918_v17  ;;  %3102 = vperm.xlu0 %7461, %v9858_v32   ;;  %3110 = vperm.xlu1 %7469, %v7752_v13   ;;  %v1583_v32 = vand.u32 2147483647, %v1345_v3 }
 0x337   : > { %7463 = vset.pattern.permute.xlu0 %v13887_v34  ;;  %7470 = vset.pattern.permute.xlu1 %v13895_v25 }
 0x338   : > { %3590 = vperm.xlu1 %7470, %v7752_v13   ;;  %2107 = vperm.xlu0 %7463, %v7748_v38  }
 0x33c   : > { %7471 = vset.pattern.permute.xlu1 %v13887_v34  ;;  %7466 = vset.pattern.permute.xlu0 %v13895_v25 }
 0x33d   : > { %2117 = vperm.xlu1 %7471, %v7754_v48   ;;  %3578 = vperm.xlu0 %7466, %v7748_v38   ;;  %v1615_v38 = vsub.f32 0.0, %v1583_v32 }
 0x33f   : > { %v1651_v13 = vmul.f32 1.442695, %v1615_v38 }
 0x341   : > { %7472 = vset.pattern.permute.xlu1 %v13891_v1  ;;  %7479 = vset.pattern.permute.xlu0 %v13887_v34  ;;  %7755 = vpow2.f32 %v1651_v13 }
 0x342   : > { %2626 = vperm.xlu1 %7472, %v7754_v48   ;;  %7757 = vpow2.f32 %v1653_v7 }
 0x346   : > { %7473 = vset.pattern.permute.xlu1 %v13894_v45 }
 0x347   : > { %3106 = vperm.xlu1 %7473, %v7754_v48  }
 0x34b   : > { %7474 = vset.pattern.permute.xlu1 %v13895_v25  ;;  %v7756_v11 = vpop.eup %7755 }
 0x34c   : > { %3586 = vperm.xlu1 %7474, %v7754_v48   ;;  %v9943_v48 = vadd.f32 %v9652_v29, %v9618_v4  ;;  %v1743_v32 = vadd.f32 1.0, %v7756_v11  ;;  %v1746_v19 = vmul.f32 -0.5, %v7756_v11  ;;  %v7758_v51 = vpop.eup %7757  ;;  %v1749_v22 = vand.u32 2147483647, %v7756_v11 }
 0x34d   : > { %v1752_v13 = vadd.f32 1.0, %v7758_v51  ;;  %v1755_v57 = vmul.f32 -0.5, %v7758_v51 }
 0x34e   : > { %7759 = vlog2.f32 %v1743_v32  ;;  %v1747_v17 = vadd.f32 1.0, %v1746_v19  ;;  %vm1750_vm3 = vcmp.lt.f32.partialorder %v1749_v22, 0.0004427343  ;;  %v9953_v19 = vadd.f32 %v9646_v23, %v9677_v44 }
 0x34f   : > { %v5138_v23 = vmax.f32 %v9943_v48, 0.0  ;;  %vm5170_vm7 = vcmp.ne.f32.partialorder %v9943_v48, %v9943_v48 }
 0x350   : > { %7475 = vset.pattern.permute.xlu1 %v13887_v34  ;;  %v1748_v58 = vmul.f32 %v7756_v11, %v1747_v17  ;;  %v1756_v17 = vadd.f32 1.0, %v1755_v57  ;;  %v9964_v57 = vadd.f32 %v9654_v30, %v9677_v44  ;;  %vm1522_vm13 = vcmp.ne.f32.partialorder %v9953_v19, %v9953_v19 }
 0x352   : > { %vm1524_vm0 = vcmp.ne.f32.partialorder %v9964_v57, %v9964_v57 }
 0x358   : > { %v7760_v29 = vpop.eup %7759 }
 0x359   : > { %v1745_v27 = vmul.f32 0.6931472, %v7760_v29  ;;  %v1586_v29 = vand.u32 2147483647, %v9953_v19 }
 0x35b   : > { %v1751_v32 = vsel %vm1750_vm3, %v1748_v58, %v1745_v27  ;;  %v1758_v27 = vand.u32 2147483647, %v7758_v51  ;;  %v1618_v20 = vsub.f32 0.0, %v1586_v29 }
 0x35c   : > { %6068 = vadd.xlane.f32.xlu0 %v9896_v54  ;;  %v5234_v54 = vand.u32 2147483647, %v9943_v48 }
 0x35d   : > { %vm1759_vm5 = vcmp.lt.f32.partialorder %v1758_v27, 0.0004427343  ;;  %v1657_v14 = vmul.f32 1.442695, %v1618_v20  ;;  %v9980_v20 = vadd.f32 %v9668_v40, %v9618_v4 }
 0x35e   : > { %v5266_v42 = vsub.f32 0.0, %v5234_v54  ;;  %v5235_v54 = vand.u32 2147483647, %v9948_v61 }
 0x35f   : > { %v5236_v27 = vand.u32 2147483647, %v9980_v20  ;;  %vm5172_vm3 = vcmp.ne.f32.partialorder %v9980_v20, %v9980_v20 }
 0x360   : > { %v5302_v38 = vmul.f32 1.442695, %v5266_v42  ;;  %v1487_v42 = vmax.f32 %v1345_v3, 0.0 }
 0x362   : > { %7761 = vpow2.f32 %v5302_v38  ;;  %v5267_v38 = vsub.f32 0.0, %v5235_v54  ;;  %v1999_v10 = vadd.f32 %v1751_v32, %v1487_v42  ;;  %v1757_v32 = vmul.f32 %v7758_v51, %v1756_v17 }
 0x363   : > { %7763 = vlog2.f32 %v1752_v13  ;;  %v9957_v13 = vadd.f32 %v9677_v44, %v9648_v24 }
 0x364   : > { %v5304_v11 = vmul.f32 1.442695, %v5267_v38 }
 0x365   : > { %v1585_v8 = vand.u32 2147483647, %v9957_v13  ;;  %vm1521_vm14 = vcmp.ne.f32.partialorder %v9957_v13, %v9957_v13 }
 0x367   : > { %v1617_v38 = vsub.f32 0.0, %v1585_v8 }
 0x369   : > { %v1655_v17 = vmul.f32 1.442695, %v1617_v38 }
 0x36c   : > { %v7762_v16 = vpop.eup %7761 }
 0x36d   : > { %v5394_v7 = vadd.f32 1.0, %v7762_v16  ;;  %v5397_v35 = vmul.f32 -0.5, %v7762_v16  ;;  %v7764_v58 = vpop.eup %7763  ;;  %v5400_v54 = vand.u32 2147483647, %v7762_v16 }
 0x36e   : > { %v1754_v42 = vmul.f32 0.6931472, %v7764_v58  ;;  %v9987_v58 = vadd.f32 %v9677_v44, %v9656_v31 }
 0x36f   : > { %7765 = vlog2.f32 %v5394_v7  ;;  %v5398_v22 = vadd.f32 1.0, %v5397_v35  ;;  %v2031_v7 = vsel %vm1519_vm4, %v1345_v3, %v1999_v10  ;;  %vm5401_vm6 = vcmp.lt.f32.partialorder %v5400_v54, 0.0004427343 }
 0x370   : > { %7767 = vpow2.f32 %v5304_v11  ;;  %v1488_v10 = vmax.f32 %v9938_v26, 0.0  ;;  %v1760_v3 = vsel %vm1759_vm5, %v1757_v32, %v1754_v42  ;;  %vm1523_vm4 = vcmp.ne.f32.partialorder %v9987_v58, %v9987_v58 }
 0x371   : > { %v5399_v24 = vmul.f32 %v7762_v16, %v5398_v22  ;;  %7769 = vrcp.f32 %v2031_v7  ;;  %v1588_v16 = vand.u32 2147483647, %v9964_v57  ;;  %v1587_v7 = vand.u32 2147483647, %v9987_v58 }
 0x372   : > { %v2000_v29 = vadd.f32 %v1760_v3, %v1488_v10  ;;  %7771 = vpow2.f32 %v1657_v14 }
 0x373   : > { %7773 = vpow2.f32 %v1655_v17  ;;  %v1619_v32 = vsub.f32 0.0, %v1587_v7 }
 0x375   : > { %v1659_v10 = vmul.f32 1.442695, %v1619_v32 }
 0x379   : > { %v7766_v33 = vpop.eup %7765 }
 0x37a   : > { %v5396_v35 = vmul.f32 0.6931472, %v7766_v33  ;;  %v7768_v30 = vpop.eup %7767  ;;  %v1620_v33 = vsub.f32 0.0, %v1588_v16 }
 0x37b   : > { %v9982_v8 = vpop.eup %7769  ;;  %v5403_v54 = vadd.f32 1.0, %v7768_v30  ;;  %v5406_v31 = vmul.f32 -0.5, %v7768_v30 }
 0x37c   : > { %v5402_v51 = vsel %vm5401_vm6, %v5399_v24, %v5396_v35  ;;  %v1661_v14 = vmul.f32 1.442695, %v1620_v33  ;;  %v7772_v40 = vpop.eup %7771 }
 0x37d   : > { %v5650_v11 = vadd.f32 %v5402_v51, %v5138_v23  ;;  %v5268_v23 = vsub.f32 0.0, %v5236_v27  ;;  %v7774_v42 = vpop.eup %7773  ;;  %v5407_v51 = vadd.f32 1.0, %v5406_v31  ;;  %v1773_v17 = vmul.f32 -0.5, %v7772_v40 }
 0x37e   : > { %v1761_v38 = vadd.f32 1.0, %v7774_v42  ;;  %v1776_v32 = vand.u32 2147483647, %v7772_v40  ;;  %v1767_v31 = vand.u32 2147483647, %v7774_v42  ;;  %v1490_v27 = vmax.f32 %v9953_v19, 0.0 }
 0x37f   : > { %v9971_v22 = vsel %vm5170_vm7, %v9943_v48, %v5650_v11  ;;  %v2032_v48 = vsel %vm1520_vm8, %v9938_v26, %v2000_v29  ;;  %v1770_v26 = vadd.f32 1.0, %v7772_v40  ;;  %v5306_v24 = vmul.f32 1.442695, %v5268_v23 }
 0x380   : > { %13896 = vst [vmem:[#allocation62_spill] sm:$0xff] %v9971_v22  ;;  %6070 = vadd.xlane.f32.xlu1 %v9971_v22  ;;  %6166 = vrot.lane.b32.xlu0 %v9971_v22, %s9133_s22  ;;  %7775 = vrcp.f32 %v2032_v48  ;;  %v5409_v11 = vand.u32 2147483647, %v7768_v30  ;;  %v5408_v48 = vmul.f32 %v7768_v30, %v5407_v51  ;;  %v1774_v7 = vadd.f32 1.0, %v1773_v17 }
 0x381   : > { %7777 = vpow2.f32 %v1661_v14  ;;  %v1764_v14 = vmul.f32 -0.5, %v7774_v42  ;;  %vm10005_vm10 = vcmp.lt.f32.partialorder %v1776_v32, 0.0004427343  ;;  %vm10014_vm12 = vcmp.lt.f32.partialorder %v1767_v31, 0.0004427343 }
 0x382   : > { %7779 = vlog2.f32 %v5403_v54  ;;  %vm9993_vm9 = vcmp.lt.f32.partialorder %v5409_v11, 0.0004427343  ;;  %v5139_v54 = vmax.f32 %v9948_v61, 0.0 }
 0x383   : > { %7781 = vlog2.f32 %v1770_v26  ;;  %v1765_v30 = vadd.f32 1.0, %v1764_v14 }
 0x384   : > { %2127 = vperm.xlu0 %7479, %v9982_v8   ;;  %7783 = vpow2.f32 %v5306_v24 }
 0x385   : > { %7785 = vlog2.f32 %v1761_v38 }
 0x386   : > { %7787 = vpow2.f32 %v1659_v10 }
 0x38a   : > { %v7776_v35 = vpop.eup %7775 }
 0x38b   : > { %v7778_v3 = vpop.eup %7777 }
 0x38c   : > { %v7780_v16 = vpop.eup %7779  ;;  %v1788_v29 = vadd.f32 1.0, %v7778_v3 }
 0x38d   : > { %v5405_v33 = vmul.f32 0.6931472, %v7780_v16  ;;  %v7782_v23 = vpop.eup %7781  ;;  %v1775_v16 = vmul.f32 %v7772_v40, %v1774_v7 }
 0x38e   : > { %7789 = vlog2.f32 %v1788_v29  ;;  %v10001_v24 = vpop.eup %7783  ;;  %v1772_v51 = vmul.f32 0.6931472, %v7782_v23 }
 0x38f   : > { %v5411_v26 = vsel %vm9993_vm9, %v5408_v48, %v5405_v33  ;;  %v7786_v38 = vpop.eup %7785  ;;  %v1766_v33 = vmul.f32 %v7774_v42, %v1765_v30  ;;  %v1791_v48 = vmul.f32 -0.5, %v7778_v3  ;;  %v5412_v14 = vadd.f32 1.0, %v10001_v24 }
 0x390   : > { %v10003_v10 = vpop.eup %7787  ;;  %v5651_v11 = vadd.f32 %v5411_v26, %v5139_v54  ;;  %v1763_v29 = vmul.f32 0.6931472, %v7786_v38  ;;  %v1778_v7 = vsel %vm10005_vm10, %v1775_v16, %v1772_v51  ;;  %v1489_v42 = vmax.f32 %v9957_v13, 0.0 }
 0x391   : > { %2132 = vperm.xlu1 %7475, %v7776_v35   ;;  %v1779_v54 = vadd.f32 1.0, %v10003_v10  ;;  %v1792_v32 = vadd.f32 1.0, %v1791_v48  ;;  %7791 = vlog2.f32 %v5412_v14  ;;  %v2002_v30 = vadd.f32 %v1778_v7, %v1490_v27 }
 0x392   : > { %v10022_v23 = vsel %vm5171_vm11, %v9948_v61, %v5651_v11  ;;  %v1794_v38 = vand.u32 2147483647, %v7778_v3  ;;  %v5415_v17 = vmul.f32 -0.5, %v10001_v24  ;;  %v1492_v48 = vmax.f32 %v9964_v57, 0.0 }
 0x393   : > { %13903 = vst [vmem:[#allocation63_spill] sm:$0xff] %v10022_v23  ;;  %7793 = vlog2.f32 %v1779_v54  ;;  %v1793_v51 = vmul.f32 %v7778_v3, %v1792_v32  ;;  %v2034_v16 = vsel %vm1522_vm13, %v9953_v19, %v2002_v30  ;;  %v5418_v40 = vand.u32 2147483647, %v10001_v24 }
 0x394   : > { %vm10035_vm15 = vcmp.lt.f32.partialorder %v1794_v38, 0.0004427343  ;;  %7795 = vrcp.f32 %v2034_v16  ;;  %v5416_v3 = vadd.f32 1.0, %v5415_v17  ;;  %v10051_v7 = vadd.f32 %v9681_v46, %v9618_v4 }
 0x395   : > { %7476 = vset.pattern.permute.xlu1 %v13891_v1  ;;  %vm5419_vm1 = vcmp.lt.f32.partialorder %v5418_v40, 0.0004427343 }
 0x396   : > { %2638 = vperm.xlu1 %7476, %v7776_v35   ;;  %v5417_v32 = vmul.f32 %v10001_v24, %v5416_v3  ;;  %v5237_v38 = vand.u32 2147483647, %v10051_v7  ;;  %vm5173_vm6 = vcmp.ne.f32.partialorder %v10051_v7, %v10051_v7 }
 0x398   : > { %v7790_v26 = vpop.eup %7789 }
 0x399   : > { %v1790_v31 = vmul.f32 0.6931472, %v7790_v26 }
 0x39a   : > { %7477 = vset.pattern.permute.xlu1 %v13894_v45 }
 0x39b   : > { %3118 = vperm.xlu1 %7477, %v7776_v35   ;;  %v1796_v19 = vsel %vm10035_vm15, %v1793_v51, %v1790_v31  ;;  %v7792_v14 = vpop.eup %7791 }
 0x39d   : > { %v7794_v54 = vpop.eup %7793 }
 0x39e   : > { %v1781_v26 = vmul.f32 0.6931472, %v7794_v54  ;;  %v7796_v24 = vpop.eup %7795 }
 0x39f   : > { %7478 = vset.pattern.permute.xlu1 %v13895_v25 }
 0x3a0   : > { %3598 = vperm.xlu1 %7478, %v7776_v35   ;;  %v1769_v35 = vsel %vm10014_vm12, %v1766_v33, %v1763_v29  ;;  %v1782_v29 = vmul.f32 -0.5, %v10003_v10 }
 0x3a1   : > { %v2001_v61 = vadd.f32 %v1769_v35, %v1489_v42  ;;  %v1785_v42 = vand.u32 2147483647, %v10003_v10  ;;  %v5414_v35 = vmul.f32 0.6931472, %v7792_v14 }
 0x3a2   : > { %v1783_v27 = vadd.f32 1.0, %v1782_v29 }
 0x3a3   : > { %6072 = vadd.xlane.f32.xlu0 %v10022_v23  ;;  %v2033_v33 = vsel %vm1521_vm14, %v9957_v13, %v2001_v61  ;;  %v2004_v13 = vadd.f32 %v1796_v19, %v1492_v48  ;;  %vm1786_vm2 = vcmp.lt.f32.partialorder %v1785_v42, 0.0004427343  ;;  %v1491_v61 = vmax.f32 %v9987_v58, 0.0 }
 0x3a4   : > { %7480 = vset.pattern.permute.xlu1 %v13891_v1  ;;  %7797 = vrcp.f32 %v2033_v33  ;;  %v1784_v30 = vmul.f32 %v10003_v10, %v1783_v27  ;;  %v5420_v31 = vsel %vm5419_vm1, %v5417_v32, %v5414_v35  ;;  %v5269_v10 = vsub.f32 0.0, %v5237_v38 }
 0x3a5   : > { %2634 = vperm.xlu1 %7480, %v9982_v8   ;;  %v2036_v46 = vsel %vm1524_vm0, %v9964_v57, %v2004_v13  ;;  %v10068_v57 = vadd.f32 %v9662_v36, %v9677_v44  ;;  %v10105_v13 = vld [vmem:[%s13575_s6] ss:$0 sm:$0xff] }
 0x3a6   : > { %7799 = vrcp.f32 %v2036_v46  ;;  %v1787_v51 = vsel %vm1786_vm2, %v1784_v30, %v1781_v26  ;;  %v5308_v29 = vmul.f32 1.442695, %v5269_v10  ;;  %v10109_v42 = vadd.f32 %v10105_v13, %v9670_v41 }
 0x3a7   : > { %v2003_v17 = vadd.f32 %v1787_v51, %v1491_v61  ;;  %v1590_v19 = vand.u32 2147483647, %v10068_v57  ;;  %v10115_v46 = vadd.f32 %v9693_v53, %v9618_v4  ;;  %v10120_v41 = vadd.f32 %v10105_v13, %v9672_v43 }
 0x3a8   : > { %7801 = vpow2.f32 %v5308_v29  ;;  %v1592_v32 = vand.u32 2147483647, %v10109_v42  ;;  %vm1526_vm8 = vcmp.ne.f32.partialorder %v10068_v57, %v10068_v57  ;;  %vm1528_vm12 = vcmp.ne.f32.partialorder %v10109_v42, %v10109_v42 }
 0x3a9   : > { %7481 = vset.pattern.permute.xlu1 %v13894_v45  ;;  %v2035_v48 = vsel %vm1523_vm4, %v9987_v58, %v2003_v17  ;;  %v1622_v3 = vsub.f32 0.0, %v1590_v19  ;;  %v5238_v10 = vand.u32 2147483647, %v10115_v46  ;;  %vm5174_vm15 = vcmp.ne.f32.partialorder %v10115_v46, %v10115_v46 }
 0x3aa   : > { %3114 = vperm.xlu1 %7481, %v9982_v8   ;;  %7803 = vrcp.f32 %v2035_v48  ;;  %v1624_v38 = vsub.f32 0.0, %v1592_v32  ;;  %v5141_v48 = vmax.f32 %v10051_v7, 0.0  ;;  %vm1527_vm0 = vcmp.ne.f32.partialorder %v10120_v41, %v10120_v41 }
 0x3ab   : > { %v1665_v58 = vmul.f32 1.442695, %v1622_v3  ;;  %v5270_v19 = vsub.f32 0.0, %v5238_v10 }
 0x3ad   : > { %7805 = vpow2.f32 %v1665_v58 }
 0x3ae   : > { %7482 = vset.pattern.permute.xlu1 %v13895_v25  ;;  %v7798_v16 = vpop.eup %7797 }
 0x3af   : > { %3594 = vperm.xlu1 %7482, %v9982_v8   ;;  %v5140_v8 = vmax.f32 %v9980_v20, 0.0 }
 0x3b0   : > { %v10083_v36 = vpop.eup %7799 }
 0x3b1   : > { %v5652_v11 = vadd.f32 %v5420_v31, %v5140_v8 }
 0x3b2   : > { %v7802_v27 = vpop.eup %7801 }
 0x3b3   : > { %6168 = vrot.lane.b32.xlu1 %v10022_v23, %s9133_s22  ;;  %v10076_v33 = vsel %vm5172_vm3, %v9980_v20, %v5652_v11  ;;  %v10089_v20 = vadd.f32 %v9677_v44, %v9664_v37  ;;  %v5421_v44 = vadd.f32 1.0, %v7802_v27  ;;  %v5424_v30 = vmul.f32 -0.5, %v7802_v27 }
 0x3b4   : > { %7483 = vset.pattern.permute.xlu1 %v13887_v34  ;;  %13906 = vst [vmem:[#allocation64_spill] sm:$0xff] %v10076_v33  ;;  %v10095_v40 = vpop.eup %7803  ;;  %v5427_v31 = vand.u32 2147483647, %v7802_v27 }
 0x3b5   : > { %v1589_v14 = vand.u32 2147483647, %v10089_v20  ;;  %7807 = vlog2.f32 %v5421_v44  ;;  %v5425_v8 = vadd.f32 1.0, %v5424_v30  ;;  %v5310_v44 = vmul.f32 1.442695, %v5270_v19 }
 0x3b6   : > { %vm5428_vm5 = vcmp.lt.f32.partialorder %v5427_v31, 0.0004427343  ;;  %v1493_v19 = vmax.f32 %v10089_v20, 0.0  ;;  %vm1525_vm10 = vcmp.ne.f32.partialorder %v10089_v20, %v10089_v20 }
 0x3b7   : > { %2142 = vperm.xlu1 %7483, %v7796_v24   ;;  %v1621_v37 = vsub.f32 0.0, %v1589_v14  ;;  %v7806_v35 = vpop.eup %7805  ;;  %v5426_v17 = vmul.f32 %v7802_v27, %v5425_v8 }
 0x3b8   : > { %v1806_v26 = vadd.f32 1.0, %v7806_v35  ;;  %v1809_v53 = vmul.f32 -0.5, %v7806_v35 }
 0x3b9   : > { %2137 = vperm.xlu0 %7479, %v7798_v16   ;;  %v1663_v54 = vmul.f32 1.442695, %v1621_v37  ;;  %v1812_v37 = vand.u32 2147483647, %v7806_v35 }
 0x3ba   : > { %v1810_v58 = vadd.f32 1.0, %v1809_v53 }
 0x3bb   : > { %7484 = vset.pattern.permute.xlu1 %v13891_v1  ;;  %7809 = vpow2.f32 %v1663_v54  ;;  %vm1813_vm7 = vcmp.lt.f32.partialorder %v1812_v37, 0.0004427343 }
 0x3bc   : > { %2646 = vperm.xlu1 %7484, %v7796_v24   ;;  %7811 = vlog2.f32 %v1806_v26  ;;  %v1811_v26 = vmul.f32 %v7806_v35, %v1810_v58 }
 0x3bd   : > { %6170 = vrot.lane.b32.xlu0 %v10076_v33, %s9133_s22 }
 0x3be   : > { %7492 = vset.pattern.permute.xlu0 %v13894_v45 }
 0x3bf   : > { %v7808_v61 = vpop.eup %7807 }
 0x3c0   : > { %7485 = vset.pattern.permute.xlu1 %v13894_v45  ;;  %v5423_v11 = vmul.f32 0.6931472, %v7808_v61  ;;  %v1494_v61 = vmax.f32 %v10068_v57, 0.0 }
 0x3c1   : > { %3126 = vperm.xlu1 %7485, %v7796_v24   ;;  %3134 = vperm.xlu0 %7492, %v10083_v36  }
 0x3c2   : > { %v5429_v3 = vsel %vm5428_vm5, %v5426_v17, %v5423_v11 }
 0x3c3   : > { %v5653_v54 = vadd.f32 %v5429_v3, %v5141_v48 }
 0x3c5   : > { %7486 = vset.pattern.permute.xlu1 %v13895_v25  ;;  %7493 = vset.pattern.permute.xlu0 %v13895_v25  ;;  %v7810_v51 = vpop.eup %7809 }
 0x3c6   : > { %3606 = vperm.xlu1 %7486, %v7796_v24   ;;  %3614 = vperm.xlu0 %7493, %v10083_v36   ;;  %v1669_v24 = vmul.f32 1.442695, %v1624_v38  ;;  %v1797_v29 = vadd.f32 1.0, %v7810_v51  ;;  %v7812_v14 = vpop.eup %7811  ;;  %v1800_v30 = vmul.f32 -0.5, %v7810_v51  ;;  %v10128_v38 = vsel %vm5173_vm6, %v10051_v7, %v5653_v54 }
 0x3c7   : > { %v1808_v27 = vmul.f32 0.6931472, %v7812_v14  ;;  %13907 = vst [vmem:[#allocation65_spill] sm:$0xff] %v10128_v38  ;;  %v1803_v17 = vand.u32 2147483647, %v7810_v51 }
 0x3c8   : > { %7813 = vpow2.f32 %v1669_v24  ;;  %v1801_v24 = vadd.f32 1.0, %v1800_v30 }
 0x3c9   : > { %7815 = vlog2.f32 %v1797_v29  ;;  %v1814_v31 = vsel %vm1813_vm7, %v1811_v26, %v1808_v27  ;;  %vm1804_vm9 = vcmp.lt.f32.partialorder %v1803_v17, 0.0004427343 }
 0x3ca   : > { %7487 = vset.pattern.permute.xlu1 %v13891_v1  ;;  %7494 = vset.pattern.permute.xlu0 %v13887_v34  ;;  %7817 = vpow2.f32 %v5310_v44  ;;  %v2006_v11 = vadd.f32 %v1814_v31, %v1494_v61  ;;  %v1802_v53 = vmul.f32 %v7810_v51, %v1801_v24  ;;  %v1496_v31 = vmax.f32 %v10109_v42, 0.0 }
 0x3cb   : > { %2642 = vperm.xlu1 %7487, %v7798_v16   ;;  %2147 = vperm.xlu0 %7494, %v10095_v40  }
 0x3cc   : > { %v2038_v7 = vsel %vm1526_vm8, %v10068_v57, %v2006_v11 }
 0x3cf   : > { %7488 = vset.pattern.permute.xlu1 %v13894_v45  ;;  %7499 = vset.pattern.permute.xlu0 %v13894_v45 }
 0x3d0   : > { %3122 = vperm.xlu1 %7488, %v7798_v16  }
 0x3d2   : > { %v7814_v8 = vpop.eup %7813 }
 0x3d3   : > { %v1824_v10 = vadd.f32 1.0, %v7814_v8  ;;  %v1827_v3 = vmul.f32 -0.5, %v7814_v8  ;;  %v1830_v57 = vand.u32 2147483647, %v7814_v8 }
 0x3d4   : > { %7489 = vset.pattern.permute.xlu1 %v13895_v25 }
 0x3d5   : > { %3602 = vperm.xlu1 %7489, %v7798_v16   ;;  %v1591_v16 = vand.u32 2147483647, %v10120_v41  ;;  %v1828_v51 = vadd.f32 1.0, %v1827_v3  ;;  %vm1831_vm11 = vcmp.lt.f32.partialorder %v1830_v57, 0.0004427343 }
 0x3d7   : > { %v1623_v43 = vsub.f32 0.0, %v1591_v16  ;;  %v7816_v16 = vpop.eup %7815  ;;  %v1829_v27 = vmul.f32 %v7814_v8, %v1828_v51 }
 0x3d8   : > { %v1799_v35 = vmul.f32 0.6931472, %v7816_v16  ;;  %v7818_v29 = vpop.eup %7817 }
 0x3d9   : > { %7490 = vset.pattern.permute.xlu1 %v13887_v34  ;;  %v1667_v32 = vmul.f32 1.442695, %v1623_v43  ;;  %v5430_v58 = vadd.f32 1.0, %v7818_v29  ;;  %v5433_v30 = vmul.f32 -0.5, %v7818_v29  ;;  %v5436_v17 = vand.u32 2147483647, %v7818_v29 }
 0x3da   : > { %v1805_v43 = vsel %vm1804_vm9, %v1802_v53, %v1799_v35 }
 0x3db   : > { %7819 = vpow2.f32 %v1667_v32  ;;  %v2005_v37 = vadd.f32 %v1805_v43, %v1493_v19  ;;  %vm5437_vm13 = vcmp.lt.f32.partialorder %v5436_v17, 0.0004427343 }
 0x3dc   : > { %7821 = vlog2.f32 %v1824_v10  ;;  %v5434_v10 = vadd.f32 1.0, %v5433_v30 }
 0x3dd   : > { %7823 = vrcp.f32 %v2038_v7  ;;  %v2037_v54 = vsel %vm1525_vm10, %v10089_v20, %v2005_v37  ;;  %v10157_v37 = vadd.f32 %v9702_v59, %v9618_v4 }
 0x3de   : > { %7825 = vlog2.f32 %v5430_v58  ;;  %v5435_v7 = vmul.f32 %v7818_v29, %v5434_v10  ;;  %v1495_v29 = vmax.f32 %v10120_v41, 0.0 }
 0x3df   : > { %vm5175_vm2 = vcmp.ne.f32.partialorder %v10157_v37, %v10157_v37 }
 0x3e5   : > { %v7820_v48 = vpop.eup %7819 }
 0x3e6   : > { %v1815_v14 = vadd.f32 1.0, %v7820_v48  ;;  %v7822_v44 = vpop.eup %7821  ;;  %v1818_v61 = vmul.f32 -0.5, %v7820_v48  ;;  %v1821_v8 = vand.u32 2147483647, %v7820_v48 }
 0x3e7   : > { %v1826_v32 = vmul.f32 0.6931472, %v7822_v44  ;;  %v10140_v26 = vpop.eup %7823  ;;  %v5239_v44 = vand.u32 2147483647, %v10157_v37 }
 0x3e8   : > { %7827 = vlog2.f32 %v1815_v14  ;;  %v7826_v16 = vpop.eup %7825  ;;  %v1819_v11 = vadd.f32 1.0, %v1818_v61  ;;  %vm1822_vm14 = vcmp.lt.f32.partialorder %v1821_v8, 0.0004427343  ;;  %v5142_v14 = vmax.f32 %v10115_v46, 0.0 }
 0x3e9   : > { %7829 = vrcp.f32 %v2037_v54  ;;  %v1832_v24 = vsel %vm1831_vm11, %v1829_v27, %v1826_v32  ;;  %v5432_v53 = vmul.f32 0.6931472, %v7826_v16  ;;  %v5271_v54 = vsub.f32 0.0, %v5239_v44 }
 0x3ea   : > { %6076 = vadd.xlane.f32.xlu0 %v10128_v38  ;;  %v2008_v35 = vadd.f32 %v1832_v24, %v1496_v31  ;;  %v1820_v43 = vmul.f32 %v7820_v48, %v1819_v11  ;;  %v10211_v11 = vadd.f32 %v10105_v13, %v9695_v56  ;;  %v10224_v56 = vadd.f32 %v10105_v13, %v9704_v2 }
 0x3eb   : > { %v5438_v48 = vsel %vm5437_vm13, %v5435_v7, %v5432_v53  ;;  %v5312_v30 = vmul.f32 1.442695, %v5271_v54  ;;  %v5143_v2 = vmax.f32 %v10157_v37, 0.0 }
 0x3ec   : > { %v2040_v58 = vsel %vm1528_vm12, %v10109_v42, %v2008_v35  ;;  %v5654_v42 = vadd.f32 %v5438_v48, %v5142_v14  ;;  %v1595_v48 = vand.u32 2147483647, %v10224_v56  ;;  %vm1532_vm8 = vcmp.ne.f32.partialorder %v10211_v11, %v10211_v11 }
 0x3ed   : > { %7831 = vrcp.f32 %v2040_v58  ;;  %vm1531_vm12 = vcmp.ne.f32.partialorder %v10224_v56, %v10224_v56 }
 0x3ee   : > { %v10170_v59 = vsel %vm5174_vm15, %v10115_v46, %v5654_v42 }
 0x3ef   : > { %13908 = vst [vmem:[#allocation66_spill] sm:$0xff] %v10170_v59 }
 0x3f2   : > { %v7828_v20 = vpop.eup %7827 }
 0x3f3   : > { %v1817_v19 = vmul.f32 0.6931472, %v7828_v20  ;;  %v10148_v3 = vpop.eup %7829  ;;  %v1596_v20 = vand.u32 2147483647, %v10211_v11 }
 0x3f5   : > { %v1823_v51 = vsel %vm1822_vm14, %v1820_v43, %v1817_v19  ;;  %v1628_v53 = vsub.f32 0.0, %v1596_v20 }
 0x3f6   : > { %v2007_v57 = vadd.f32 %v1823_v51, %v1495_v29 }
 0x3f7   : > { %v10181_v27 = vpop.eup %7831  ;;  %v1677_v58 = vmul.f32 1.442695, %v1628_v53 }
 0x3f8   : > { %v2039_v32 = vsel %vm1527_vm0, %v10120_v41, %v2007_v57  ;;  %v1627_v57 = vsub.f32 0.0, %v1595_v48 }
 0x3f9   : > { %6074 = vadd.xlane.f32.xlu1 %v10076_v33  ;;  %7833 = vrcp.f32 %v2039_v32 }
 0x3fa   : > { %7835 = vpow2.f32 %v5312_v30 }
 0x400   : > { %3142 = vperm.xlu0 %7499, %v10140_v26  }
 0x403   : > { %v10195_v61 = vpop.eup %7833 }
 0x404   : > { %7500 = vset.pattern.permute.xlu0 %v13895_v25 }
 0x405   : > { %3622 = vperm.xlu0 %7500, %v10140_v26  }
 0x409   : > { %7501 = vset.pattern.permute.xlu0 %v13887_v34 }
 0x40a   : > { %2152 = vperm.xlu1 %7490, %v10083_v36   ;;  %2157 = vperm.xlu0 %7501, %v10148_v3  }
 0x40e   : > { %7491 = vset.pattern.permute.xlu1 %v13891_v1  ;;  %7502 = vset.pattern.permute.xlu0 %v13891_v1 }
 0x40f   : > { %2654 = vperm.xlu1 %7491, %v10083_v36   ;;  %2658 = vperm.xlu0 %7502, %v10148_v3   ;;  %v10178_v36 = vadd.f32 %v10105_v13, %v9683_v47  ;;  %v10193_v47 = vadd.f32 %v10105_v13, %v9688_v49 }
 0x411   : > { %v1594_v46 = vand.u32 2147483647, %v10178_v36  ;;  %v1593_v24 = vand.u32 2147483647, %v10193_v47  ;;  %vm1530_vm4 = vcmp.ne.f32.partialorder %v10178_v36, %v10178_v36  ;;  %vm1529_vm6 = vcmp.ne.f32.partialorder %v10193_v47, %v10193_v47 }
 0x413   : > { %2650 = vperm.xlu1 %7491, %v10095_v40   ;;  %6174 = vrot.lane.b32.xlu0 %v10170_v59, %s9133_s22  ;;  %v1626_v41 = vsub.f32 0.0, %v1594_v46  ;;  %v1625_v49 = vsub.f32 0.0, %v1593_v24  ;;  %v1675_v24 = vmul.f32 1.442695, %v1627_v57 }
 0x414   : > { %7507 = vset.pattern.permute.xlu0 %v13894_v45 }
 0x415   : > { %v1673_v31 = vmul.f32 1.442695, %v1626_v41  ;;  %v1671_v16 = vmul.f32 1.442695, %v1625_v49 }
 0x417   : > { %7495 = vset.pattern.permute.xlu1 %v13894_v45  ;;  %3150 = vperm.xlu0 %7507, %v10181_v27   ;;  %7837 = vpow2.f32 %v1673_v31 }
 0x418   : > { %3130 = vperm.xlu1 %7495, %v10095_v40  }
 0x41b   : > { %7508 = vset.pattern.permute.xlu0 %v13895_v25 }
 0x41c   : > { %7496 = vset.pattern.permute.xlu1 %v13895_v25  ;;  %3630 = vperm.xlu0 %7508, %v10181_v27  }
 0x41d   : > { %3610 = vperm.xlu1 %7496, %v10095_v40   ;;  %v7836_v40 = vpop.eup %7835 }
 0x41e   : > { %v5439_v10 = vadd.f32 1.0, %v7836_v40  ;;  %v5442_v8 = vmul.f32 -0.5, %v7836_v40  ;;  %v5445_v43 = vand.u32 2147483647, %v7836_v40 }
 0x420   : > { %7509 = vset.pattern.permute.xlu0 %v13887_v34  ;;  %7839 = vlog2.f32 %v5439_v10  ;;  %v5443_v7 = vadd.f32 1.0, %v5442_v8  ;;  %vm5446_vm1 = vcmp.lt.f32.partialorder %v5445_v43, 0.0004427343 }
 0x421   : > { %6172 = vrot.lane.b32.xlu1 %v10128_v38, %s9133_s22  ;;  %2167 = vperm.xlu0 %7509, %v10195_v61   ;;  %v7838_v17 = vpop.eup %7837  ;;  %7841 = vpow2.f32 %v1671_v16  ;;  %v13932_v38 = vld [vmem:[#allocation28_spill] sm:$0xff] }
 0x422   : > { %7497 = vset.pattern.permute.xlu1 %v13887_v34  ;;  %v1842_v35 = vadd.f32 1.0, %v7838_v17  ;;  %v5444_v51 = vmul.f32 %v7836_v40, %v5443_v7  ;;  %v1845_v42 = vmul.f32 -0.5, %v7838_v17  ;;  %v1848_v46 = vand.u32 2147483647, %v7838_v17 }
 0x424   : > { %7843 = vlog2.f32 %v1842_v35  ;;  %v1846_v32 = vadd.f32 1.0, %v1845_v42  ;;  %vm1849_vm3 = vcmp.lt.f32.partialorder %v1848_v46, 0.0004427343  ;;  %v1498_v35 = vmax.f32 %v10178_v36, 0.0 }
 0x425   : > { %2162 = vperm.xlu1 %7497, %v10140_v26   ;;  %7510 = vset.pattern.permute.xlu0 %v13891_v1  ;;  %7845 = vpow2.f32 %v1677_v58 }
 0x426   : > { %2666 = vperm.xlu0 %7510, %v10195_v61   ;;  %v1847_v49 = vmul.f32 %v7838_v17, %v1846_v32 }
 0x429   : > { %7498 = vset.pattern.permute.xlu1 %v13891_v1 }
 0x42a   : > { %2662 = vperm.xlu1 %7498, %v10140_v26   ;;  %7515 = vset.pattern.permute.xlu0 %v13894_v45  ;;  %v10219_v26 = vadd.f32 %v9713_v15, %v9618_v4  ;;  %v7840_v19 = vpop.eup %7839 }
 0x42b   : > { %v7842_v14 = vpop.eup %7841  ;;  %v5441_v15 = vmul.f32 0.6931472, %v7840_v19 }
 0x42c   : > { %v5240_v29 = vand.u32 2147483647, %v10219_v26  ;;  %v1836_v10 = vmul.f32 -0.5, %v7842_v14  ;;  %v1839_v58 = vand.u32 2147483647, %v7842_v14  ;;  %vm5176_vm11 = vcmp.ne.f32.partialorder %v10219_v26, %v10219_v26 }
 0x42d   : > { %v5447_v54 = vsel %vm5446_vm1, %v5444_v51, %v5441_v15  ;;  %v1497_v51 = vmax.f32 %v10193_v47, 0.0 }
 0x42e   : > { %7503 = vset.pattern.permute.xlu1 %v13894_v45  ;;  %v5272_v44 = vsub.f32 0.0, %v5240_v29  ;;  %v7844_v30 = vpop.eup %7843  ;;  %v5655_v31 = vadd.f32 %v5447_v54, %v5143_v2  ;;  %v1837_v53 = vadd.f32 1.0, %v1836_v10  ;;  %vm1840_vm5 = vcmp.lt.f32.partialorder %v1839_v58, 0.0004427343 }
 0x42f   : > { %3138 = vperm.xlu1 %7503, %v10148_v3   ;;  %v1844_v40 = vmul.f32 0.6931472, %v7844_v30  ;;  %v7846_v20 = vpop.eup %7845 }
 0x430   : > { %v5314_v41 = vmul.f32 1.442695, %v5272_v44  ;;  %v10233_v16 = vsel %vm5175_vm2, %v10157_v37, %v5655_v31  ;;  %v1860_v7 = vadd.f32 1.0, %v7846_v20  ;;  %v1838_v29 = vmul.f32 %v7842_v14, %v1837_v53 }
 0x431   : > { %13909 = vst [vmem:[#allocation67_spill] sm:$0xff] %v10233_v16  ;;  %v1850_v8 = vsel %vm1849_vm3, %v1847_v49, %v1844_v40  ;;  %v1866_v32 = vand.u32 2147483647, %v7846_v20  ;;  %v1500_v40 = vmax.f32 %v10211_v11, 0.0 }
 0x432   : > { %v2010_v43 = vadd.f32 %v1850_v8, %v1498_v35 }
 0x433   : > { %7504 = vset.pattern.permute.xlu1 %v13895_v25  ;;  %vm1867_vm7 = vcmp.lt.f32.partialorder %v1866_v32, 0.0004427343 }
 0x434   : > { %3618 = vperm.xlu1 %7504, %v10148_v3   ;;  %v1833_v3 = vadd.f32 1.0, %v7842_v14  ;;  %v2042_v37 = vsel %vm1530_vm4, %v10178_v36, %v2010_v43 }
 0x436   : > { %7847 = vlog2.f32 %v1833_v3  ;;  %v1863_v3 = vmul.f32 -0.5, %v7846_v20 }
 0x437   : > { %7849 = vpow2.f32 %v5314_v41 }
 0x438   : > { %7505 = vset.pattern.permute.xlu1 %v13887_v34  ;;  %7851 = vpow2.f32 %v1675_v24  ;;  %v1864_v54 = vadd.f32 1.0, %v1863_v3 }
 0x439   : > { %7853 = vlog2.f32 %v1860_v7 }
 0x43a   : > { %7855 = vrcp.f32 %v2042_v37  ;;  %v1865_v46 = vmul.f32 %v7846_v20, %v1864_v54 }
 0x440   : > { %v7848_v19 = vpop.eup %7847 }
 0x441   : > { %v1835_v17 = vmul.f32 0.6931472, %v7848_v19  ;;  %v7850_v48 = vpop.eup %7849 }
 0x442   : > { %v7852_v15 = vpop.eup %7851  ;;  %v5448_v2 = vadd.f32 1.0, %v7850_v48  ;;  %v5451_v31 = vmul.f32 -0.5, %v7850_v48 }
 0x443   : > { %v1841_v42 = vsel %vm1840_vm5, %v1838_v29, %v1835_v17  ;;  %v1851_v44 = vadd.f32 1.0, %v7852_v15  ;;  %v7854_v14 = vpop.eup %7853  ;;  %v1854_v24 = vmul.f32 -0.5, %v7852_v15  ;;  %v1857_v20 = vand.u32 2147483647, %v7852_v15 }
 0x444   : > { %v2009_v57 = vadd.f32 %v1841_v42, %v1497_v51  ;;  %7857 = vlog2.f32 %v5448_v2  ;;  %v1862_v30 = vmul.f32 0.6931472, %v7854_v14  ;;  %v10245_v41 = vpop.eup %7855  ;;  %v5452_v10 = vadd.f32 1.0, %v5451_v31 }
 0x445   : > { %6080 = vadd.xlane.f32.xlu0 %v10233_v16  ;;  %7859 = vlog2.f32 %v1851_v44  ;;  %v1855_v8 = vadd.f32 1.0, %v1854_v24  ;;  %vm1858_vm10 = vcmp.lt.f32.partialorder %v1857_v20, 0.0004427343  ;;  %v5144_v51 = vmax.f32 %v10219_v26, 0.0  ;;  %v10311_v24 = vpop.permute.xlu1 %6158 }
 0x446   : > { %v2041_v36 = vsel %vm1529_vm6, %v10193_v47, %v2009_v57  ;;  %v1868_v49 = vsel %vm1867_vm7, %v1865_v46, %v1862_v30  ;;  %v5454_v47 = vand.u32 2147483647, %v7850_v48  ;;  %v5453_v43 = vmul.f32 %v7850_v48, %v5452_v10  ;;  %13911 = vst [vmem:[#allocation69_spill] sm:$0xff] %v10311_v24 }
 0x447   : > { %7861 = vrcp.f32 %v2041_v36  ;;  %v2012_v7 = vadd.f32 %v1868_v49, %v1500_v40  ;;  %v1856_v17 = vmul.f32 %v7852_v15, %v1855_v8  ;;  %v10261_v42 = vadd.f32 %v9728_v52, %v9618_v4 }
 0x448   : > { %vm5455_vm9 = vcmp.lt.f32.partialorder %v5454_v47, 0.0004427343  ;;  %v1499_v48 = vmax.f32 %v10224_v56, 0.0  ;;  %v10282_v14 = vadd.f32 %v10105_v13, %v9715_v21  ;;  %v10297_v21 = vadd.f32 %v10105_v13, %v9730_v55 }
 0x449   : > { %v2044_v37 = vsel %vm1532_vm8, %v10211_v11, %v2012_v7  ;;  %v5241_v2 = vand.u32 2147483647, %v10261_v42  ;;  %v10317_v49 = vadd.f32 %v10105_v13, %v9734_v63  ;;  %v10327_v63 = vadd.f32 %v9740_v5, %v9618_v4 }
 0x44a   : > { %7863 = vrcp.f32 %v2044_v37  ;;  %v1597_v46 = vand.u32 2147483647, %v10297_v21  ;;  %v10334_v20 = vadd.f32 %v10105_v13, %v9742_v6  ;;  %v5145_v6 = vmax.f32 %v10261_v42, 0.0 }
 0x44b   : > { %v5273_v57 = vsub.f32 0.0, %v5241_v2  ;;  %v1600_v8 = vand.u32 2147483647, %v10317_v49  ;;  %vm5177_vm14 = vcmp.ne.f32.partialorder %v10261_v42, %v10261_v42  ;;  %vm1534_vm0 = vcmp.ne.f32.partialorder %v10282_v14, %v10282_v14 }
 0x44c   : > { %v1629_v55 = vsub.f32 0.0, %v1597_v46  ;;  %v1599_v5 = vand.u32 2147483647, %v10334_v20  ;;  %vm1533_vm2 = vcmp.ne.f32.partialorder %v10297_v21, %v10297_v21  ;;  %vm1536_vm4 = vcmp.ne.f32.partialorder %v10317_v49, %v10317_v49 }
 0x44d   : > { %v5316_v36 = vmul.f32 1.442695, %v5273_v57  ;;  %vm5178_vm7 = vcmp.ne.f32.partialorder %v10327_v63, %v10327_v63  ;;  %vm1535_vm8 = vcmp.ne.f32.partialorder %v10334_v20, %v10334_v20 }
 0x44e   : > { %v7858_v35 = vpop.eup %7857  ;;  %v1679_v40 = vmul.f32 1.442695, %v1629_v55  ;;  %v1631_v2 = vsub.f32 0.0, %v1599_v5 }
 0x44f   : > { %v7860_v53 = vpop.eup %7859  ;;  %v5450_v19 = vmul.f32 0.6931472, %v7858_v35  ;;  %v10319_v35 = vpop.xlane.xlu1 %6064 }
 0x450   : > { %v1853_v58 = vmul.f32 0.6931472, %v7860_v53  ;;  %13912 = vst [vmem:[#allocation70_spill] sm:$0xff] %v10319_v35 }
 0x451   : > { %v10253_v29 = vpop.eup %7861  ;;  %v5456_v3 = vsel %vm5455_vm9, %v5453_v43, %v5450_v19 }
 0x452   : > { %v1859_v15 = vsel %vm1858_vm10, %v1856_v17, %v1853_v58  ;;  %v5656_v11 = vadd.f32 %v5456_v3, %v5144_v51  ;;  %v5242_v51 = vand.u32 2147483647, %v10327_v63 }
 0x453   : > { %v2011_v44 = vadd.f32 %v1859_v15, %v1499_v48  ;;  %v10329_v7 = vpop.permute.xlu1 %6162 }
 0x454   : > { %v10274_v52 = vsel %vm5176_vm11, %v10219_v26, %v5656_v11  ;;  %v10285_v32 = vpop.eup %7863  ;;  %v1598_v26 = vand.u32 2147483647, %v10282_v14  ;;  %13913 = vst [vmem:[#allocation71_spill] sm:$0xff] %v10329_v7  ;;  %v5274_v11 = vsub.f32 0.0, %v5242_v51 }
 0x455   : > { %13910 = vst [vmem:[#allocation68_spill] sm:$0xff] %v10274_v52  ;;  %v2043_v54 = vsel %vm1531_vm12, %v10224_v56, %v2011_v44 }
 0x456   : > { %7865 = vrcp.f32 %v2043_v54 }
 0x457   : > { %7867 = vpow2.f32 %v5316_v36 }
 0x458   : > { %6078 = vadd.xlane.f32.xlu1 %v10170_v59 }
 0x45b   : > { %3158 = vperm.xlu0 %7515, %v10245_v41  }
 0x45f   : > { %7516 = vset.pattern.permute.xlu0 %v13895_v25 }
 0x460   : > { %3638 = vperm.xlu0 %7516, %v10245_v41   ;;  %v10299_v56 = vpop.eup %7865 }
 0x464   : > { %7517 = vset.pattern.permute.xlu0 %v13887_v34 }
 0x465   : > { %2177 = vperm.xlu0 %7517, %v10253_v29  }
 0x469   : > { %2172 = vperm.xlu1 %7505, %v10181_v27   ;;  %7518 = vset.pattern.permute.xlu0 %v13891_v1 }
 0x46a   : > { %2674 = vperm.xlu0 %7518, %v10253_v29  }
 0x46d   : > { %7506 = vset.pattern.permute.xlu1 %v13891_v1 }
 0x46e   : > { %2670 = vperm.xlu1 %7506, %v10181_v27   ;;  %6178 = vrot.lane.b32.xlu0 %v10274_v52, %s9133_s22  ;;  %v1630_v27 = vsub.f32 0.0, %v1598_v26  ;;  %v5318_v26 = vmul.f32 1.442695, %v5274_v11 }
 0x46f   : > { %7523 = vset.pattern.permute.xlu0 %v13894_v45 }
 0x470   : > { %v1681_v30 = vmul.f32 1.442695, %v1630_v27 }
 0x472   : > { %7511 = vset.pattern.permute.xlu1 %v13894_v45  ;;  %3166 = vperm.xlu0 %7523, %v10285_v32   ;;  %7869 = vpow2.f32 %v1681_v30  ;;  %v1683_v30 = vmul.f32 1.442695, %v1631_v2 }
 0x473   : > { %3146 = vperm.xlu1 %7511, %v10195_v61  }
 0x476   : > { %7524 = vset.pattern.permute.xlu0 %v13895_v25 }
 0x477   : > { %7512 = vset.pattern.permute.xlu1 %v13895_v25  ;;  %3646 = vperm.xlu0 %7524, %v10285_v32  }
 0x478   : > { %3626 = vperm.xlu1 %7512, %v10195_v61   ;;  %v7868_v61 = vpop.eup %7867 }
 0x479   : > { %v5457_v31 = vadd.f32 1.0, %v7868_v61  ;;  %v5460_v53 = vmul.f32 -0.5, %v7868_v61  ;;  %v5463_v58 = vand.u32 2147483647, %v7868_v61 }
 0x47b   : > { %7525 = vset.pattern.permute.xlu0 %v13887_v34  ;;  %7871 = vlog2.f32 %v5457_v31  ;;  %v5461_v19 = vadd.f32 1.0, %v5460_v53  ;;  %vm5464_vm13 = vcmp.lt.f32.partialorder %v5463_v58, 0.0004427343 }
 0x47c   : > { %6176 = vrot.lane.b32.xlu1 %v10233_v16, %s9133_s22  ;;  %2187 = vperm.xlu0 %7525, %v10299_v56   ;;  %v7870_v10 = vpop.eup %7869  ;;  %7873 = vpow2.f32 %v1679_v40 }
 0x47d   : > { %7513 = vset.pattern.permute.xlu1 %v13887_v34  ;;  %v1878_v47 = vadd.f32 1.0, %v7870_v10  ;;  %v5462_v3 = vmul.f32 %v7868_v61, %v5461_v19  ;;  %v1881_v15 = vmul.f32 -0.5, %v7870_v10  ;;  %v1884_v36 = vand.u32 2147483647, %v7870_v10 }
 0x47f   : > { %7875 = vlog2.f32 %v1878_v47  ;;  %v1882_v57 = vadd.f32 1.0, %v1881_v15  ;;  %vm1885_vm15 = vcmp.lt.f32.partialorder %v1884_v36, 0.0004427343 }
 0x480   : > { %2182 = vperm.xlu1 %7513, %v10245_v41   ;;  %7526 = vset.pattern.permute.xlu0 %v13891_v1 }
 0x481   : > { %2682 = vperm.xlu0 %7526, %v10299_v56   ;;  %v1883_v61 = vmul.f32 %v7870_v10, %v1882_v57  ;;  %v10354_v57 = vpop.permute.xlu1 %3582 }
 0x484   : > { %7514 = vset.pattern.permute.xlu1 %v13891_v1 }
 0x485   : > { %2678 = vperm.xlu1 %7514, %v10245_v41   ;;  %7531 = vset.pattern.permute.xlu0 %v13894_v45  ;;  %v1632_v41 = vsub.f32 0.0, %v1600_v8  ;;  %v7872_v43 = vpop.eup %7871  ;;  %v1502_v8 = vmax.f32 %v10282_v14, 0.0 }
 0x486   : > { %v7874_v37 = vpop.eup %7873  ;;  %v5459_v48 = vmul.f32 0.6931472, %v7872_v43 }
 0x487   : > { %v1685_v17 = vmul.f32 1.442695, %v1632_v41  ;;  %v1872_v55 = vmul.f32 -0.5, %v7874_v37  ;;  %v1875_v58 = vand.u32 2147483647, %v7874_v37 }
 0x488   : > { %v5465_v44 = vsel %vm5464_vm13, %v5462_v3, %v5459_v48  ;;  %v1501_v48 = vmax.f32 %v10297_v21, 0.0 }
 0x489   : > { %7519 = vset.pattern.permute.xlu1 %v13894_v45  ;;  %7877 = vpow2.f32 %v1685_v17  ;;  %v7876_v54 = vpop.eup %7875  ;;  %v5657_v27 = vadd.f32 %v5465_v44, %v5145_v6  ;;  %v1873_v53 = vadd.f32 1.0, %v1872_v55  ;;  %vm1876_vm1 = vcmp.lt.f32.partialorder %v1875_v58, 0.0004427343 }
 0x48a   : > { %3154 = vperm.xlu1 %7519, %v10253_v29   ;;  %v1880_v46 = vmul.f32 0.6931472, %v7876_v54 }
 0x48b   : > { %v10343_v31 = vsel %vm5177_vm14, %v10261_v42, %v5657_v27  ;;  %v1874_v17 = vmul.f32 %v7874_v37, %v1873_v53 }
 0x48c   : > { %13914 = vst [vmem:[#allocation72_spill] sm:$0xff] %v10343_v31  ;;  %v1886_v47 = vsel %vm1885_vm15, %v1883_v61, %v1880_v46  ;;  %v1504_v46 = vmax.f32 %v10317_v49, 0.0 }
 0x48d   : > { %v2014_v43 = vadd.f32 %v1886_v47, %v1502_v8  ;;  %v10361_v47 = vpop.permute.xlu1 %2618 }
 0x48e   : > { %7520 = vset.pattern.permute.xlu1 %v13895_v25 }
 0x48f   : > { %3634 = vperm.xlu1 %7520, %v10253_v29   ;;  %v1869_v29 = vadd.f32 1.0, %v7874_v37  ;;  %v2046_v42 = vsel %vm1534_vm0, %v10282_v14, %v2014_v43 }
 0x491   : > { %7879 = vlog2.f32 %v1869_v29 }
 0x492   : > { %7881 = vpow2.f32 %v5318_v26 }
 0x493   : > { %7521 = vset.pattern.permute.xlu1 %v13887_v34  ;;  %v7878_v40 = vpop.eup %7877  ;;  %7883 = vpow2.f32 %v1683_v30 }
 0x494   : > { %v1896_v41 = vadd.f32 1.0, %v7878_v40  ;;  %v1899_v15 = vmul.f32 -0.5, %v7878_v40  ;;  %v1902_v44 = vand.u32 2147483647, %v7878_v40 }
 0x496   : > { %7885 = vlog2.f32 %v1896_v41  ;;  %v1900_v2 = vadd.f32 1.0, %v1899_v15  ;;  %vm1903_vm3 = vcmp.lt.f32.partialorder %v1902_v44, 0.0004427343  ;;  %v10372_v15 = vpop.permute.xlu1 %3098 }
 0x497   : > { %7887 = vrcp.f32 %v2046_v42 }
 0x498   : > { %v1901_v36 = vmul.f32 %v7878_v40, %v1900_v2 }
 0x49b   : > { %v7880_v19 = vpop.eup %7879 }
 0x49c   : > { %v1871_v10 = vmul.f32 0.6931472, %v7880_v19  ;;  %v7882_v51 = vpop.eup %7881 }
 0x49d   : > { %v7884_v5 = vpop.eup %7883  ;;  %v5466_v29 = vadd.f32 1.0, %v7882_v51  ;;  %v5469_v27 = vmul.f32 -0.5, %v7882_v51  ;;  %v5472_v53 = vand.u32 2147483647, %v7882_v51 }
 0x49e   : > { %v1877_v3 = vsel %vm1876_vm1, %v1874_v17, %v1871_v10  ;;  %v1887_v6 = vadd.f32 1.0, %v7884_v5  ;;  %v1890_v30 = vmul.f32 -0.5, %v7884_v5  ;;  %v1893_v19 = vand.u32 2147483647, %v7884_v5 }
 0x49f   : > { %v2013_v11 = vadd.f32 %v1877_v3, %v1501_v48  ;;  %7889 = vlog2.f32 %v5466_v29  ;;  %v5470_v55 = vadd.f32 1.0, %v5469_v27  ;;  %vm5473_vm5 = vcmp.lt.f32.partialorder %v5472_v53, 0.0004427343 }
 0x4a0   : > { %6084 = vadd.xlane.f32.xlu0 %v10343_v31  ;;  %v7886_v37 = vpop.eup %7885  ;;  %7891 = vlog2.f32 %v1887_v6  ;;  %vm1894_vm6 = vcmp.lt.f32.partialorder %v1893_v19, 0.0004427343  ;;  %v5146_v3 = vmax.f32 %v10327_v63, 0.0  ;;  %v10377_v29 = vadd.f32 %v9749_v62, %v9618_v4  ;;  %v10388_v62 = vpop.permute.xlu1 %6164 }
 0x4a1   : > { %v2045_v14 = vsel %vm1533_vm2, %v10297_v21, %v2013_v11  ;;  %v1898_v54 = vmul.f32 0.6931472, %v7886_v37  ;;  %v10357_v26 = vpop.eup %7887  ;;  %v1891_v21 = vadd.f32 1.0, %v1890_v30  ;;  %v5471_v58 = vmul.f32 %v7882_v51, %v5470_v55  ;;  %13915 = vst [vmem:[#allocation73_spill] sm:$0xff] %v10388_v62 }
 0x4a2   : > { %7893 = vrcp.f32 %v2045_v14  ;;  %v1503_v51 = vmax.f32 %v10334_v20, 0.0  ;;  %v5243_v11 = vand.u32 2147483647, %v10377_v29  ;;  %v10419_v30 = vadd.f32 %v10105_v13, %v9751_v0 }
 0x4a3   : > { %v1904_v61 = vsel %vm1903_vm3, %v1901_v36, %v1898_v54  ;;  %v1892_v17 = vmul.f32 %v7884_v5, %v1891_v21  ;;  %v10400_v54 = vadd.f32 %v10105_v13, %v9746_v28  ;;  %vm5179_vm10 = vcmp.ne.f32.partialorder %v10377_v29, %v10377_v29 }
 0x4a4   : > { %v2016_v41 = vadd.f32 %v1904_v61, %v1504_v46  ;;  %v5275_v44 = vsub.f32 0.0, %v5243_v11  ;;  %v10405_v27 = vpop.permute.xlu1 %2122  ;;  %v1601_v55 = vand.u32 2147483647, %v10419_v30  ;;  %vm1537_vm14 = vcmp.ne.f32.partialorder %v10419_v30, %v10419_v30 }
 0x4a5   : > { %vm1538_vm12 = vcmp.ne.f32.partialorder %v10400_v54, %v10400_v54 }
 0x4a6   : > { %v2048_v48 = vsel %vm1536_vm4, %v10317_v49, %v2016_v41  ;;  %v1633_v0 = vsub.f32 0.0, %v1601_v55  ;;  %v10441_v41 = vadd.f32 %v10105_v13, %v9755_v50  ;;  %v5147_v55 = vmax.f32 %v10377_v29, 0.0 }
 0x4a7   : > { %7895 = vrcp.f32 %v2048_v48  ;;  %v13917_v48 = vld [vmem:[#allocation22_spill] sm:$0xff] }
 0x4a8   : > { %v10451_v50 = vadd.f32 %v13917_v48, %v9618_v4  ;;  %vm1540_vm0 = vcmp.ne.f32.partialorder %v10441_v41, %v10441_v41 }
 0x4a9   : > { %v7890_v8 = vpop.eup %7889 }
 0x4aa   : > { %v7892_v40 = vpop.eup %7891  ;;  %v5468_v43 = vmul.f32 0.6931472, %v7890_v8  ;;  %vm5180_vm3 = vcmp.ne.f32.partialorder %v10451_v50, %v10451_v50 }
 0x4ab   : > { %v1889_v10 = vmul.f32 0.6931472, %v7892_v40  ;;  %v1687_v40 = vmul.f32 1.442695, %v1633_v0 }
 0x4ac   : > { %v10367_v42 = vpop.eup %7893  ;;  %v5474_v5 = vsel %vm5473_vm5, %v5471_v58, %v5468_v43  ;;  %v1604_v58 = vand.u32 2147483647, %v10441_v41 }
 0x4ad   : > { %v1895_v6 = vsel %vm1894_vm6, %v1892_v17, %v1889_v10  ;;  %v5658_v49 = vadd.f32 %v5474_v5, %v5146_v3  ;;  %v10459_v3 = vld [vmem:[%s13575_s6] ss:$0 sm:$0xff] }
 0x4ae   : > { %v2015_v2 = vadd.f32 %v1895_v6, %v1503_v51  ;;  %v13918_v51 = vld [vmem:[#allocation23_spill] sm:$0xff] }
 0x4af   : > { %v10392_v37 = vsel %vm5178_vm7, %v10327_v63, %v5658_v49  ;;  %v5320_v63 = vmul.f32 1.442695, %v5275_v44  ;;  %v10463_v5 = vadd.f32 %v10459_v3, %v13918_v51 }
 0x4b0   : > { %13916 = vst [vmem:[#allocation74_spill] sm:$0xff] %v10392_v37  ;;  %v2047_v14 = vsel %vm1535_vm8, %v10334_v20, %v2015_v2  ;;  %v10412_v20 = vpop.permute.xlu1 %2630 }
 0x4b1   : > { %v10403_v36 = vpop.eup %7895  ;;  %7897 = vrcp.f32 %v2047_v14  ;;  %v5244_v14 = vand.u32 2147483647, %v10451_v50  ;;  %vm1539_vm4 = vcmp.ne.f32.partialorder %v10463_v5, %v10463_v5 }
 0x4b2   : > { %7899 = vpow2.f32 %v5320_v63 }
 0x4b3   : > { %6082 = vadd.xlane.f32.xlu1 %v10274_v52  ;;  %v5276_v0 = vsub.f32 0.0, %v5244_v14  ;;  %v1506_v14 = vmax.f32 %v10400_v54, 0.0 }
 0x4b4   : > { %v10428_v8 = vpop.permute.xlu1 %3110 }
 0x4b6   : > { %3174 = vperm.xlu0 %7531, %v10357_v26  }
 0x4b8   : > { %v10434_v21 = vpop.permute.xlu1 %3590 }
 0x4ba   : > { %7532 = vset.pattern.permute.xlu0 %v13895_v25 }
 0x4bb   : > { %3654 = vperm.xlu0 %7532, %v10357_v26   ;;  %v10421_v46 = vpop.eup %7897 }
 0x4bc   : > { %v10443_v43 = vpop.permute.xlu1 %2117 }
 0x4bf   : > { %7533 = vset.pattern.permute.xlu0 %v13887_v34 }
 0x4c0   : > { %2197 = vperm.xlu0 %7533, %v10367_v42   ;;  %v10453_v13 = vpop.permute.xlu1 %2626 }
 0x4c4   : > { %2192 = vperm.xlu1 %7521, %v10285_v32   ;;  %7534 = vset.pattern.permute.xlu0 %v13891_v1 }
 0x4c5   : > { %2690 = vperm.xlu0 %7534, %v10367_v42  }
 0x4c8   : > { %7522 = vset.pattern.permute.xlu1 %v13891_v1 }
 0x4c9   : > { %2686 = vperm.xlu1 %7522, %v10285_v32   ;;  %6182 = vrot.lane.b32.xlu0 %v10392_v37, %s9133_s22  ;;  %v1602_v32 = vand.u32 2147483647, %v10400_v54 }
 0x4ca   : > { %7539 = vset.pattern.permute.xlu0 %v13894_v45 }
 0x4cb   : > { %v1634_v28 = vsub.f32 0.0, %v1602_v32 }
 0x4cd   : > { %7527 = vset.pattern.permute.xlu1 %v13894_v45  ;;  %3182 = vperm.xlu0 %7539, %v10403_v36   ;;  %v1689_v61 = vmul.f32 1.442695, %v1634_v28 }
 0x4ce   : > { %3162 = vperm.xlu1 %7527, %v10299_v56  }
 0x4cf   : > { %7901 = vpow2.f32 %v1689_v61 }
 0x4d1   : > { %7540 = vset.pattern.permute.xlu0 %v13895_v25 }
 0x4d2   : > { %7528 = vset.pattern.permute.xlu1 %v13895_v25  ;;  %3662 = vperm.xlu0 %7540, %v10403_v36  }
 0x4d3   : > { %3642 = vperm.xlu1 %7528, %v10299_v56   ;;  %v7900_v56 = vpop.eup %7899 }
 0x4d4   : > { %v5475_v53 = vadd.f32 1.0, %v7900_v56  ;;  %v5478_v17 = vmul.f32 -0.5, %v7900_v56  ;;  %v5481_v11 = vand.u32 2147483647, %v7900_v56 }
 0x4d6   : > { %7541 = vset.pattern.permute.xlu0 %v13887_v34  ;;  %7903 = vlog2.f32 %v5475_v53  ;;  %v5479_v6 = vadd.f32 1.0, %v5478_v17  ;;  %vm5482_vm9 = vcmp.lt.f32.partialorder %v5481_v11, 0.0004427343 }
 0x4d7   : > { %6180 = vrot.lane.b32.xlu1 %v10343_v31, %s9133_s22  ;;  %2207 = vperm.xlu0 %7541, %v10421_v46   ;;  %7905 = vpow2.f32 %v1687_v40 }
 0x4d8   : > { %7529 = vset.pattern.permute.xlu1 %v13887_v34  ;;  %v5480_v32 = vmul.f32 %v7900_v56, %v5479_v6 }
 0x4d9   : > { %v7902_v19 = vpop.eup %7901 }
 0x4da   : > { %v1914_v10 = vadd.f32 1.0, %v7902_v19  ;;  %v1917_v28 = vmul.f32 -0.5, %v7902_v19  ;;  %v1920_v17 = vand.u32 2147483647, %v7902_v19 }
 0x4db   : > { %2202 = vperm.xlu1 %7529, %v10357_v26   ;;  %7542 = vset.pattern.permute.xlu0 %v13891_v1 }
 0x4dc   : > { %2698 = vperm.xlu0 %7542, %v10421_v46   ;;  %7907 = vlog2.f32 %v1914_v10  ;;  %vm1921_vm11 = vcmp.lt.f32.partialorder %v1920_v17, 0.0004427343 }
 0x4df   : > { %7530 = vset.pattern.permute.xlu1 %v13891_v1 }
 0x4e0   : > { %2694 = vperm.xlu1 %7530, %v10357_v26   ;;  %7547 = vset.pattern.permute.xlu0 %v13894_v45  ;;  %v1636_v26 = vsub.f32 0.0, %v1604_v58  ;;  %v7904_v49 = vpop.eup %7903  ;;  %v1918_v58 = vadd.f32 1.0, %v1917_v28 }
 0x4e1   : > { %v7906_v44 = vpop.eup %7905  ;;  %v5477_v63 = vmul.f32 0.6931472, %v7904_v49 }
 0x4e2   : > { %v1693_v2 = vmul.f32 1.442695, %v1636_v26  ;;  %v1905_v61 = vadd.f32 1.0, %v7906_v44  ;;  %v5322_v26 = vmul.f32 1.442695, %v5276_v0  ;;  %v1919_v6 = vmul.f32 %v7902_v19, %v1918_v58 }
 0x4e3   : > { %v5483_v40 = vsel %vm5482_vm9, %v5480_v32, %v5477_v63  ;;  %v1908_v49 = vmul.f32 -0.5, %v7906_v44  ;;  %v1505_v58 = vmax.f32 %v10419_v30, 0.0 }
 0x4e4   : > { %7535 = vset.pattern.permute.xlu1 %v13894_v45  ;;  %7909 = vpow2.f32 %v1693_v2  ;;  %v5659_v48 = vadd.f32 %v5483_v40, %v5147_v55  ;;  %v1911_v55 = vand.u32 2147483647, %v7906_v44 }
 0x4e5   : > { %3170 = vperm.xlu1 %7535, %v10367_v42   ;;  %7911 = vlog2.f32 %v1905_v61  ;;  %v1909_v63 = vadd.f32 1.0, %v1908_v49  ;;  %v10483_v49 = vpop.permute.xlu1 %3106 }
 0x4e6   : > { %v7908_v10 = vpop.eup %7907  ;;  %7913 = vpow2.f32 %v5322_v26  ;;  %v10472_v11 = vsel %vm5179_vm10, %v10377_v29, %v5659_v48  ;;  %vm1912_vm13 = vcmp.lt.f32.partialorder %v1911_v55, 0.0004427343  ;;  %v1508_v55 = vmax.f32 %v10441_v41, 0.0 }
 0x4e7   : > { %v1916_v56 = vmul.f32 0.6931472, %v7908_v10  ;;  %13919 = vst [vmem:[#allocation22_spill] sm:$0xff] %v10472_v11  ;;  %v1910_v0 = vmul.f32 %v7906_v44, %v1909_v63 }
 0x4e9   : > { %7536 = vset.pattern.permute.xlu1 %v13895_v25 }
 0x4ea   : > { %3650 = vperm.xlu1 %7536, %v10367_v42   ;;  %v1603_v42 = vand.u32 2147483647, %v10463_v5 }
 0x4ec   : > { %v1635_v53 = vsub.f32 0.0, %v1603_v42  ;;  %v1922_v42 = vsel %vm1921_vm11, %v1919_v6, %v1916_v56 }
 0x4ed   : > { %v2018_v61 = vadd.f32 %v1922_v42, %v1506_v14 }
 0x4ee   : > { %7537 = vset.pattern.permute.xlu1 %v13887_v34  ;;  %v1691_v51 = vmul.f32 1.442695, %v1635_v53  ;;  %v7910_v2 = vpop.eup %7909 }
 0x4ef   : > { %v1932_v32 = vadd.f32 1.0, %v7910_v2  ;;  %v7912_v28 = vpop.eup %7911  ;;  %v2050_v29 = vsel %vm1538_vm12, %v10400_v54, %v2018_v61  ;;  %v1935_v17 = vmul.f32 -0.5, %v7910_v2  ;;  %v1938_v6 = vand.u32 2147483647, %v7910_v2  ;;  %v10488_v61 = vpop.xlane.xlu0 %6062 }
 0x4f0   : > { %7915 = vpow2.f32 %v1691_v51  ;;  %v1907_v19 = vmul.f32 0.6931472, %v7912_v28  ;;  %v7914_v53 = vpop.eup %7913  ;;  %13920 = vst [vmem:[#allocation23_spill] sm:$0xff] %v10488_v61 }
 0x4f1   : > { %7917 = vlog2.f32 %v1932_v32  ;;  %v5484_v26 = vadd.f32 1.0, %v7914_v53  ;;  %v1936_v56 = vadd.f32 1.0, %v1935_v17  ;;  %vm1939_vm15 = vcmp.lt.f32.partialorder %v1938_v6, 0.0004427343 }
 0x4f2   : > { %7919 = vrcp.f32 %v2050_v29  ;;  %v1913_v10 = vsel %vm1912_vm13, %v1910_v0, %v1907_v19  ;;  %v5487_v32 = vmul.f32 -0.5, %v7914_v53 }
 0x4f3   : > { %v2017_v51 = vadd.f32 %v1913_v10, %v1505_v58  ;;  %7921 = vlog2.f32 %v5484_v26  ;;  %v1937_v42 = vmul.f32 %v7910_v2, %v1936_v56  ;;  %v5490_v58 = vand.u32 2147483647, %v7914_v53  ;;  %v10496_v26 = vpop.permute.xlu0 %6160 }
 0x4f4   : > { %13921 = vst [vmem:[#allocation75_spill] sm:$0xff] %v10496_v26 }
 0x4f5   : > { %v2049_v54 = vsel %vm1537_vm14, %v10419_v30, %v2017_v51  ;;  %v5488_v30 = vadd.f32 1.0, %v5487_v32  ;;  %vm10500_vm1 = vcmp.lt.f32.partialorder %v5490_v58, 0.0004427343 }
 0x4f7   : > { %v5489_v56 = vmul.f32 %v7914_v53, %v5488_v30 }
 0x4fa   : > { %v7916_v40 = vpop.eup %7915 }
 0x4fb   : > { %6088 = vadd.xlane.f32.xlu0 %v10472_v11  ;;  %v1923_v48 = vadd.f32 1.0, %v7916_v40  ;;  %v7918_v44 = vpop.eup %7917  ;;  %v1926_v28 = vmul.f32 -0.5, %v7916_v40  ;;  %v1929_v17 = vand.u32 2147483647, %v7916_v40 }
 0x4fc   : > { %v1934_v14 = vmul.f32 0.6931472, %v7918_v44  ;;  %v10486_v63 = vpop.eup %7919 }
 0x4fd   : > { %7923 = vlog2.f32 %v1923_v48  ;;  %v7922_v0 = vpop.eup %7921  ;;  %v1927_v29 = vadd.f32 1.0, %v1926_v28  ;;  %v10498_v48 = vpop.permute.xlu1 %3586  ;;  %vm10507_vm2 = vcmp.lt.f32.partialorder %v1929_v17, 0.0004427343  ;;  %v5148_v28 = vmax.f32 %v10451_v50, 0.0 }
 0x4fe   : > { %7925 = vrcp.f32 %v2049_v54  ;;  %v1940_v19 = vsel %vm1939_vm15, %v1937_v42, %v1934_v14  ;;  %v5486_v51 = vmul.f32 0.6931472, %v7922_v0 }
 0x4ff   : > { %v2020_v10 = vadd.f32 %v1940_v19, %v1508_v55  ;;  %v1928_v6 = vmul.f32 %v7916_v40, %v1927_v29  ;;  %v10513_v55 = vpop.xlane.xlu0 %6066  ;;  %v13928_v40 = vld [vmem:[#allocation25_spill] sm:$0xff] }
 0x500   : > { %13926 = vst [vmem:[#allocation76_spill] sm:$0xff] %v10513_v55  ;;  %v10520_v19 = vadd.f32 %v13928_v40, %v9618_v4  ;;  %v5492_v30 = vsel %vm10500_vm1, %v5489_v56, %v5486_v51 }
 0x501   : > { %v2052_v42 = vsel %vm1540_vm0, %v10441_v41, %v2020_v10  ;;  %v10515_v53 = vpop.xlane.xlu1 %6070  ;;  %v1507_v41 = vmax.f32 %v10463_v5, 0.0  ;;  %v5660_v58 = vadd.f32 %v5492_v30, %v5148_v28  ;;  %v13931_v30 = vld [vmem:[#allocation34_spill] sm:$0xff] }
 0x502   : > { %13927 = vst [vmem:[#allocation77_spill] sm:$0xff] %v10515_v53  ;;  %7927 = vrcp.f32 %v2052_v42  ;;  %vm5181_vm6 = vcmp.ne.f32.partialorder %v10520_v19, %v10520_v19 }
 0x503   : > { %v10527_v29 = vpop.permute.xlu0 %2112  ;;  %v10541_v51 = vsel %vm5180_vm3, %v10451_v50, %v5660_v58 }
 0x504   : > { %13929 = vst [vmem:[#allocation25_spill] sm:$0xff] %v10541_v51 }
 0x505   : > { %v10537_v17 = vpop.permute.xlu1 %2132 }
 0x507   : > { %v7924_v2 = vpop.eup %7923  ;;  %v10551_v42 = vpop.permute.xlu0 %2622 }
 0x508   : > { %v1925_v44 = vmul.f32 0.6931472, %v7924_v2  ;;  %v10504_v14 = vpop.eup %7925  ;;  %v5245_v2 = vand.u32 2147483647, %v10520_v19 }
 0x509   : > { %v10556_v50 = vpop.permute.xlu1 %2638 }
 0x50a   : > { %v1931_v0 = vsel %vm10507_vm2, %v1928_v6, %v1925_v44  ;;  %v5277_v56 = vsub.f32 0.0, %v5245_v2  ;;  %v13930_v6 = vld [vmem:[#allocation31_spill] sm:$0xff] }
 0x50b   : > { %v2019_v10 = vadd.f32 %v1931_v0, %v1507_v41  ;;  %v10549_v54 = vadd.f32 %v10459_v3, %v13930_v6  ;;  %v10572_v0 = vadd.f32 %v10459_v3, %v13931_v30 }
 0x50c   : > { %v10554_v32 = vpop.eup %7927  ;;  %v5324_v28 = vmul.f32 1.442695, %v5277_v56 }
 0x50d   : > { %v2051_v44 = vsel %vm1539_vm4, %v10463_v5, %v2019_v10  ;;  %v10562_v5 = vpop.permute.xlu0 %3102  ;;  %v10565_v41 = vpop.permute.xlu1 %3118  ;;  %v1605_v56 = vand.u32 2147483647, %v10572_v0  ;;  %vm1542_vm8 = vcmp.ne.f32.partialorder %v10549_v54, %v10549_v54  ;;  %vm1541_vm10 = vcmp.ne.f32.partialorder %v10572_v0, %v10572_v0 }
 0x50e   : > { %6086 = vadd.xlane.f32.xlu1 %v10392_v37  ;;  %7929 = vrcp.f32 %v2051_v44 }
 0x50f   : > { %7931 = vpow2.f32 %v5324_v28  ;;  %v1637_v6 = vsub.f32 0.0, %v1605_v56 }
 0x511   : > { %3190 = vperm.xlu0 %7547, %v10486_v63   ;;  %v10576_v10 = vpop.permute.xlu0 %2107  ;;  %v10583_v44 = vpop.permute.xlu1 %3598  ;;  %v1695_v30 = vmul.f32 1.442695, %v1637_v6 }
 0x515   : > { %7548 = vset.pattern.permute.xlu0 %v13895_v25  ;;  %v10588_v28 = vpop.permute.xlu0 %3578 }
 0x516   : > { %3670 = vperm.xlu0 %7548, %v10486_v63  }
 0x518   : > { %v10574_v58 = vpop.eup %7929 }
 0x51a   : > { %7549 = vset.pattern.permute.xlu0 %v13887_v34 }
 0x51b   : > { %2217 = vperm.xlu0 %7549, %v10504_v14  }
 0x51f   : > { %2212 = vperm.xlu1 %7537, %v10403_v36   ;;  %7550 = vset.pattern.permute.xlu0 %v13891_v1 }
 0x520   : > { %2706 = vperm.xlu0 %7550, %v10504_v14  }
 0x523   : > { %7538 = vset.pattern.permute.xlu1 %v13891_v1 }
 0x524   : > { %2702 = vperm.xlu1 %7538, %v10403_v36   ;;  %6186 = vrot.lane.b32.xlu0 %v10541_v51, %s9133_s22  ;;  %v1606_v36 = vand.u32 2147483647, %v10549_v54 }
 0x525   : > { %7555 = vset.pattern.permute.xlu0 %v13894_v45 }
 0x526   : > { %v1638_v40 = vsub.f32 0.0, %v1606_v36  ;;  %v10591_v36 = vpop.permute.xlu1 %2634 }
 0x528   : > { %7543 = vset.pattern.permute.xlu1 %v13894_v45  ;;  %3198 = vperm.xlu0 %7555, %v10554_v32   ;;  %v1697_v2 = vmul.f32 1.442695, %v1638_v40 }
 0x529   : > { %3178 = vperm.xlu1 %7543, %v10421_v46  }
 0x52a   : > { %7933 = vpow2.f32 %v1697_v2  ;;  %v10598_v2 = vadd.f32 %v10459_v3, %v9826_v18  ;;  %v10608_v18 = vadd.f32 %v13932_v38, %v9618_v4 }
 0x52c   : > { %7556 = vset.pattern.permute.xlu0 %v13895_v25  ;;  %v1608_v31 = vand.u32 2147483647, %v10598_v2  ;;  %v5246_v37 = vand.u32 2147483647, %v10608_v18  ;;  %vm1544_vm12 = vcmp.ne.f32.partialorder %v10598_v2, %v10598_v2  ;;  %vm5182_vm15 = vcmp.ne.f32.partialorder %v10608_v18, %v10608_v18 }
 0x52d   : > { %7544 = vset.pattern.permute.xlu1 %v13895_v25  ;;  %3678 = vperm.xlu0 %7556, %v10554_v32  }
 0x52e   : > { %3658 = vperm.xlu1 %7544, %v10421_v46   ;;  %v7932_v46 = vpop.eup %7931 }
 0x52f   : > { %v5493_v40 = vadd.f32 1.0, %v7932_v46  ;;  %v5496_v16 = vmul.f32 -0.5, %v7932_v46  ;;  %v5499_v62 = vand.u32 2147483647, %v7932_v46 }
 0x531   : > { %7557 = vset.pattern.permute.xlu0 %v13887_v34  ;;  %7935 = vlog2.f32 %v5493_v40  ;;  %v5497_v23 = vadd.f32 1.0, %v5496_v16  ;;  %vm5500_vm5 = vcmp.lt.f32.partialorder %v5499_v62, 0.0004427343 }
 0x532   : > { %6184 = vrot.lane.b32.xlu1 %v10472_v11, %s9133_s22  ;;  %2227 = vperm.xlu0 %7557, %v10574_v58   ;;  %7937 = vpow2.f32 %v1695_v30  ;;  %v10600_v11 = vpop.permute.xlu1 %3114  ;;  %v10615_v30 = vadd.f32 %v10459_v3, %v9838_v60  ;;  %v5149_v60 = vmax.f32 %v10520_v19, 0.0 }
 0x533   : > { %7545 = vset.pattern.permute.xlu1 %v13887_v34  ;;  %v5498_v59 = vmul.f32 %v7932_v46, %v5497_v23 }
 0x534   : > { %v7934_v56 = vpop.eup %7933  ;;  %v1607_v38 = vand.u32 2147483647, %v10615_v30  ;;  %vm1543_vm0 = vcmp.ne.f32.partialorder %v10615_v30, %v10615_v30 }
 0x535   : > { %v1950_v6 = vadd.f32 1.0, %v7934_v56  ;;  %v1953_v53 = vmul.f32 -0.5, %v7934_v56  ;;  %v1956_v22 = vand.u32 2147483647, %v7934_v56 }
 0x536   : > { %2222 = vperm.xlu1 %7545, %v10486_v63   ;;  %7558 = vset.pattern.permute.xlu0 %v13891_v1  ;;  %v10610_v40 = vpop.permute.xlu1 %3594  ;;  %v1639_v16 = vsub.f32 0.0, %v1607_v38 }
 0x537   : > { %2714 = vperm.xlu0 %7558, %v10574_v58   ;;  %7939 = vlog2.f32 %v1950_v6  ;;  %v5278_v6 = vsub.f32 0.0, %v5246_v37  ;;  %v1954_v55 = vadd.f32 1.0, %v1953_v53  ;;  %vm1957_vm7 = vcmp.lt.f32.partialorder %v1956_v22, 0.0004427343 }
 0x538   : > { %v1699_v24 = vmul.f32 1.442695, %v1639_v16 }
 0x539   : > { %v5326_v61 = vmul.f32 1.442695, %v5278_v6 }
 0x53a   : > { %7546 = vset.pattern.permute.xlu1 %v13891_v1 }
 0x53b   : > { %2710 = vperm.xlu1 %7546, %v10486_v63   ;;  %7563 = vset.pattern.permute.xlu0 %v13894_v45  ;;  %v1640_v63 = vsub.f32 0.0, %v1608_v31  ;;  %v7936_v35 = vpop.eup %7935 }
 0x53c   : > { %v7938_v31 = vpop.eup %7937  ;;  %v5495_v52 = vmul.f32 0.6931472, %v7936_v35  ;;  %v1955_v35 = vmul.f32 %v7934_v56, %v1954_v55  ;;  %v1509_v56 = vmax.f32 %v10572_v0, 0.0 }
 0x53d   : > { %v1701_v26 = vmul.f32 1.442695, %v1640_v63  ;;  %v1944_v62 = vmul.f32 -0.5, %v7938_v31  ;;  %v1947_v55 = vand.u32 2147483647, %v7938_v31 }
 0x53e   : > { %v5501_v33 = vsel %vm5500_vm5, %v5498_v59, %v5495_v52  ;;  %v1510_v59 = vmax.f32 %v10549_v54, 0.0  ;;  %v10627_v52 = vpop.xlane.xlu0 %6068 }
 0x53f   : > { %7551 = vset.pattern.permute.xlu1 %v13894_v45  ;;  %7941 = vpow2.f32 %v1701_v26  ;;  %v5661_v7 = vadd.f32 %v5501_v33, %v5149_v60  ;;  %13934 = vst [vmem:[#allocation34_spill] sm:$0xff] %v10627_v52  ;;  %v1945_v53 = vadd.f32 1.0, %v1944_v62  ;;  %vm1948_vm9 = vcmp.lt.f32.partialorder %v1947_v55, 0.0004427343 }
 0x540   : > { %3186 = vperm.xlu1 %7551, %v10504_v14  }
 0x541   : > { %v7940_v63 = vpop.eup %7939  ;;  %v10624_v26 = vsel %vm5181_vm6, %v10520_v19, %v5661_v7  ;;  %v1946_v7 = vmul.f32 %v7938_v31, %v1945_v53 }
 0x542   : > { %v1952_v23 = vmul.f32 0.6931472, %v7940_v63  ;;  %13933 = vst [vmem:[#allocation31_spill] sm:$0xff] %v10624_v26 }
 0x544   : > { %7552 = vset.pattern.permute.xlu1 %v13895_v25  ;;  %v1958_v33 = vsel %vm1957_vm7, %v1955_v35, %v1952_v23 }
 0x545   : > { %3666 = vperm.xlu1 %7552, %v10504_v14   ;;  %v1941_v14 = vadd.f32 1.0, %v7938_v31 }
 0x547   : > { %7943 = vlog2.f32 %v1941_v14  ;;  %v2022_v14 = vadd.f32 %v1958_v33, %v1510_v59  ;;  %v10637_v59 = vpop.permute.xlu0 %6166  ;;  %v10639_v33 = vpop.permute.xlu1 %6168 }
 0x548   : > { %7945 = vpow2.f32 %v5326_v61  ;;  %13935 = vst [vmem:[#allocation28_spill] sm:$0xff] %v10637_v59  ;;  %13936 = vst [vmem:[#allocation78_spill] sm:$0xff] %v10639_v33 }
 0x549   : > { %7553 = vset.pattern.permute.xlu1 %v13887_v34  ;;  %v7942_v37 = vpop.eup %7941  ;;  %7947 = vpow2.f32 %v1699_v24  ;;  %v2054_v61 = vsel %vm1542_vm8, %v10549_v54, %v2022_v14 }
 0x54a   : > { %v1968_v46 = vadd.f32 1.0, %v7942_v37  ;;  %v1971_v6 = vmul.f32 -0.5, %v7942_v37  ;;  %v1974_v62 = vand.u32 2147483647, %v7942_v37 }
 0x54c   : > { %7949 = vlog2.f32 %v1968_v46  ;;  %v1972_v35 = vadd.f32 1.0, %v1971_v6  ;;  %vm1975_vm11 = vcmp.lt.f32.partialorder %v1974_v62, 0.0004427343 }
 0x54d   : > { %7951 = vrcp.f32 %v2054_v61 }
 0x54e   : > { %v1973_v46 = vmul.f32 %v7942_v37, %v1972_v35  ;;  %v10654_v35 = vpop.permute.xlu1 %2142 }
 0x551   : > { %v7944_v38 = vpop.eup %7943 }
 0x552   : > { %v1943_v22 = vmul.f32 0.6931472, %v7944_v38  ;;  %v7946_v24 = vpop.eup %7945 }
 0x553   : > { %v7948_v19 = vpop.eup %7947  ;;  %v5502_v16 = vadd.f32 1.0, %v7946_v24  ;;  %v5505_v14 = vmul.f32 -0.5, %v7946_v24  ;;  %v5508_v6 = vand.u32 2147483647, %v7946_v24 }
 0x554   : > { %v1949_v60 = vsel %vm1948_vm9, %v1946_v7, %v1943_v22  ;;  %v1959_v63 = vadd.f32 1.0, %v7948_v19  ;;  %v1962_v55 = vmul.f32 -0.5, %v7948_v19  ;;  %v1512_v22 = vmax.f32 %v10598_v2, 0.0  ;;  %v10646_v7 = vpop.permute.xlu0 %2127 }
 0x555   : > { %v2021_v23 = vadd.f32 %v1949_v60, %v1509_v56  ;;  %7953 = vlog2.f32 %v5502_v16  ;;  %v5506_v61 = vadd.f32 1.0, %v5505_v14  ;;  %vm10656_vm13 = vcmp.lt.f32.partialorder %v5508_v6, 0.0004427343 }
 0x556   : > { %6092 = vadd.xlane.f32.xlu0 %v10624_v26  ;;  %v7950_v31 = vpop.eup %7949  ;;  %7955 = vlog2.f32 %v1959_v63  ;;  %v1963_v60 = vadd.f32 1.0, %v1962_v55  ;;  %v1965_v63 = vand.u32 2147483647, %v7948_v19 }
 0x557   : > { %v2053_v54 = vsel %vm1541_vm10, %v10572_v0, %v2021_v23  ;;  %v1970_v53 = vmul.f32 0.6931472, %v7950_v31  ;;  %v10642_v38 = vpop.eup %7951  ;;  %v5507_v62 = vmul.f32 %v7946_v24, %v5506_v61  ;;  %v13940_v24 = vld [vmem:[#allocation30_spill] sm:$0xff]  ;;  %v1511_v61 = vmax.f32 %v10615_v30, 0.0 }
 0x558   : > { %7957 = vrcp.f32 %v2053_v54  ;;  %v10649_v23 = vpop.xlane.xlu0 %6072  ;;  %vm1966_vm14 = vcmp.lt.f32.partialorder %v1965_v63, 0.0004427343 }
 0x559   : > { %v1976_v0 = vsel %vm1975_vm11, %v1973_v46, %v1970_v53  ;;  %13937 = vst [vmem:[#allocation79_spill] sm:$0xff] %v10649_v23  ;;  %v1964_v53 = vmul.f32 %v7948_v19, %v1963_v60  ;;  %v10670_v19 = vadd.f32 %v13940_v24, %v9618_v4  ;;  %v10675_v60 = vpop.permute.xlu1 %2646  ;;  %v10699_v46 = vadd.f32 %v10459_v3, %v9869_v9 }
 0x55a   : > { %v2024_v16 = vadd.f32 %v1976_v0, %v1512_v22  ;;  %v5150_v0 = vmax.f32 %v10608_v18, 0.0 }
 0x55b   : > { %vm5183_vm2 = vcmp.ne.f32.partialorder %v10670_v19, %v10670_v19  ;;  %vm1546_vm4 = vcmp.ne.f32.partialorder %v10699_v46, %v10699_v46 }
 0x55c   : > { %v2056_v55 = vsel %vm1544_vm12, %v10598_v2, %v2024_v16  ;;  %v10663_v22 = vpop.permute.xlu0 %2137 }
 0x55d   : > { %7959 = vrcp.f32 %v2056_v55 }
 0x55f   : > { %v7954_v56 = vpop.eup %7953 }
 0x560   : > { %v7956_v37 = vpop.eup %7955  ;;  %v5504_v31 = vmul.f32 0.6931472, %v7954_v56  ;;  %v10680_v63 = vpop.permute.xlu0 %6170 }
 0x561   : > { %v1961_v54 = vmul.f32 0.6931472, %v7956_v37  ;;  %v5247_v37 = vand.u32 2147483647, %v10670_v19  ;;  %13941 = vst [vmem:[#allocation30_spill] sm:$0xff] %v10680_v63 }
 0x562   : > { %v10660_v14 = vpop.eup %7957  ;;  %v5510_v56 = vsel %vm10656_vm13, %v5507_v62, %v5504_v31  ;;  %v10687_v31 = vpop.permute.xlu1 %3126 }
 0x563   : > { %v1967_v2 = vsel %vm1966_vm14, %v1964_v53, %v1961_v54  ;;  %v5662_v6 = vadd.f32 %v5510_v56, %v5150_v0  ;;  %13942 = vst [vmem:[#allocation80_spill] sm:$0xff] %v10687_v31  ;;  %v5279_v54 = vsub.f32 0.0, %v5247_v37 }
 0x564   : > { %v2023_v16 = vadd.f32 %v1967_v2, %v1511_v61  ;;  %v10702_v55 = vpop.permute.xlu0 %3134  ;;  %v10720_v61 = vadd.f32 %v10459_v3, %v9877_v39 }
 0x565   : > { %v10691_v62 = vsel %vm5182_vm15, %v10608_v18, %v5662_v6  ;;  %13944 = vst [vmem:[#allocation82_spill] sm:$0xff] %v10702_v55  ;;  %v5328_v18 = vmul.f32 1.442695, %v5279_v54 }
 0x566   : > { %13943 = vst [vmem:[#allocation81_spill] sm:$0xff] %v10691_v62  ;;  %v2055_v53 = vsel %vm1543_vm0, %v10615_v30, %v2023_v16  ;;  %v10709_v30 = vpop.permute.xlu1 %3606  ;;  %vm1545_vm6 = vcmp.ne.f32.partialorder %v10720_v61, %v10720_v61 }
 0x567   : > { %v10704_v0 = vpop.eup %7959  ;;  %7961 = vrcp.f32 %v2055_v53  ;;  %13945 = vst [vmem:[#allocation83_spill] sm:$0xff] %v10709_v30 }
 0x568   : > { %7963 = vpow2.f32 %v5328_v18  ;;  %v10712_v9 = vpop.permute.xlu0 %3614 }
 0x569   : > { %6090 = vadd.xlane.f32.xlu1 %v10541_v51  ;;  %13946 = vst [vmem:[#allocation84_spill] sm:$0xff] %v10712_v9 }
 0x56a   : > { %v10722_v56 = vpop.permute.xlu1 %2642 }
 0x56b   : > { %13947 = vst [vmem:[#allocation85_spill] sm:$0xff] %v10722_v56 }
 0x56c   : > { %3206 = vperm.xlu0 %7563, %v10642_v38   ;;  %v10727_v37 = vpop.permute.xlu0 %2147 }
 0x56d   : > { %13948 = vst [vmem:[#allocation86_spill] sm:$0xff] %v10727_v37 }
 0x56e   : > { %v10734_v39 = vpop.permute.xlu1 %3122 }
 0x570   : > { %7564 = vset.pattern.permute.xlu0 %v13895_v25  ;;  %v10738_v54 = vpop.xlane.xlu0 %6076 }
 0x571   : > { %3686 = vperm.xlu0 %7564, %v10642_v38   ;;  %v10724_v2 = vpop.eup %7961  ;;  %13949 = vst [vmem:[#allocation87_spill] sm:$0xff] %v10738_v54 }
 0x572   : > { %v7964_v3 = vpop.eup %7963 }
 0x573   : > { %v5511_v53 = vadd.f32 1.0, %v7964_v3  ;;  %v5517_v23 = vand.u32 2147483647, %v7964_v3 }
 0x575   : > { %7565 = vset.pattern.permute.xlu0 %v13887_v34  ;;  %vm5518_vm1 = vcmp.lt.f32.partialorder %v5517_v23, 0.0004427343 }
 0x576   : > { %2237 = vperm.xlu0 %7565, %v10660_v14  }
 0x57a   : > { %2232 = vperm.xlu1 %7553, %v10554_v32   ;;  %7566 = vset.pattern.permute.xlu0 %v13891_v1 }
 0x57b   : > { %2722 = vperm.xlu0 %7566, %v10660_v14  }
 0x57e   : > { %7554 = vset.pattern.permute.xlu1 %v13891_v1 }
 0x57f   : > { %2718 = vperm.xlu1 %7554, %v10554_v32   ;;  %6190 = vrot.lane.b32.xlu0 %v10691_v62, %s9133_s22  ;;  %v1610_v32 = vand.u32 2147483647, %v10699_v46 }
 0x580   : > { %7571 = vset.pattern.permute.xlu0 %v13894_v45 }
 0x581   : > { %v1642_v24 = vsub.f32 0.0, %v1610_v32  ;;  %v10742_v32 = vpop.permute.xlu1 %3602 }
 0x583   : > { %7559 = vset.pattern.permute.xlu1 %v13894_v45  ;;  %3214 = vperm.xlu0 %7571, %v10704_v0   ;;  %v1705_v6 = vmul.f32 1.442695, %v1642_v24 }
 0x584   : > { %3194 = vperm.xlu1 %7559, %v10574_v58  }
 0x585   : > { %7965 = vpow2.f32 %v1705_v6  ;;  %v10746_v6 = vpop.xlane.xlu1 %6074 }
 0x586   : > { %7967 = vlog2.f32 %v5511_v53  ;;  %13950 = vst [vmem:[#allocation88_spill] sm:$0xff] %v10746_v6 }
 0x587   : > { %7572 = vset.pattern.permute.xlu0 %v13895_v25 }
 0x588   : > { %7560 = vset.pattern.permute.xlu1 %v13895_v25  ;;  %3694 = vperm.xlu0 %7572, %v10704_v0  }
 0x589   : > { %3674 = vperm.xlu1 %7560, %v10574_v58   ;;  %v1609_v58 = vand.u32 2147483647, %v10720_v61 }
 0x58b   : > { %v1641_v16 = vsub.f32 0.0, %v1609_v58 }
 0x58c   : > { %7573 = vset.pattern.permute.xlu0 %v13887_v34 }
 0x58d   : > { %6188 = vrot.lane.b32.xlu1 %v10624_v26, %s9133_s22  ;;  %2247 = vperm.xlu0 %7573, %v10724_v2   ;;  %v1703_v18 = vmul.f32 1.442695, %v1641_v16  ;;  %v5514_v26 = vmul.f32 -0.5, %v7964_v3  ;;  %v13951_v16 = vld [vmem:[#allocation33_spill] sm:$0xff] }
 0x58e   : > { %7561 = vset.pattern.permute.xlu1 %v13887_v34  ;;  %v10753_v54 = vadd.f32 %v13951_v16, %v9618_v4  ;;  %v5151_v16 = vmax.f32 %v10670_v19, 0.0 }
 0x58f   : > { %v7966_v24 = vpop.eup %7965  ;;  %7969 = vpow2.f32 %v1703_v18  ;;  %v5515_v53 = vadd.f32 1.0, %v5514_v26 }
 0x590   : > { %v1986_v58 = vadd.f32 1.0, %v7966_v24  ;;  %v7968_v18 = vpop.eup %7967  ;;  %v5248_v52 = vand.u32 2147483647, %v10753_v54  ;;  %v1989_v63 = vmul.f32 -0.5, %v7966_v24  ;;  %vm5184_vm8 = vcmp.ne.f32.partialorder %v10753_v54, %v10753_v54 }
 0x591   : > { %2242 = vperm.xlu1 %7561, %v10642_v38   ;;  %7574 = vset.pattern.permute.xlu0 %v13891_v1  ;;  %v5513_v51 = vmul.f32 0.6931472, %v7968_v18  ;;  %v5516_v6 = vmul.f32 %v7964_v3, %v5515_v53 }
 0x592   : > { %2730 = vperm.xlu0 %7574, %v10724_v2   ;;  %7971 = vlog2.f32 %v1986_v58  ;;  %v5280_v37 = vsub.f32 0.0, %v5248_v52  ;;  %v1990_v9 = vadd.f32 1.0, %v1989_v63  ;;  %v1992_v58 = vand.u32 2147483647, %v7966_v24 }
 0x593   : > { %v5519_v56 = vsel %vm5518_vm1, %v5516_v6, %v5513_v51  ;;  %v1514_v52 = vmax.f32 %v10699_v46, 0.0  ;;  %v10767_v51 = vpop.permute.xlu0 %3142 }
 0x594   : > { %v5330_v26 = vmul.f32 1.442695, %v5280_v37  ;;  %v5663_v30 = vadd.f32 %v5519_v56, %v5151_v16  ;;  %v1991_v31 = vmul.f32 %v7966_v24, %v1990_v9  ;;  %vm1993_vm3 = vcmp.lt.f32.partialorder %v1992_v58, 0.0004427343  ;;  %13953 = vst [vmem:[#allocation89_spill] sm:$0xff] %v10767_v51 }
 0x595   : > { %7562 = vset.pattern.permute.xlu1 %v13891_v1 }
 0x596   : > { %2726 = vperm.xlu1 %7562, %v10642_v38   ;;  %7579 = vset.pattern.permute.xlu0 %v13894_v45  ;;  %v10755_v38 = vpop.permute.xlu1 %2152  ;;  %v10764_v23 = vsel %vm5183_vm2, %v10670_v19, %v5663_v30  ;;  %v1513_v30 = vmax.f32 %v10720_v61, 0.0 }
 0x597   : > { %13952 = vst [vmem:[#allocation33_spill] sm:$0xff] %v10764_v23  ;;  %v10780_v58 = vpop.permute.xlu0 %3622 }
 0x599   : > { %v7970_v33 = vpop.eup %7969 }
 0x59a   : > { %7567 = vset.pattern.permute.xlu1 %v13894_v45  ;;  %v1977_v59 = vadd.f32 1.0, %v7970_v33  ;;  %v1980_v3 = vmul.f32 -0.5, %v7970_v33  ;;  %v1983_v6 = vand.u32 2147483647, %v7970_v33 }
 0x59b   : > { %3202 = vperm.xlu1 %7567, %v10660_v14  }
 0x59c   : > { %7973 = vlog2.f32 %v1977_v59  ;;  %v1981_v63 = vadd.f32 1.0, %v1980_v3  ;;  %vm1984_vm5 = vcmp.lt.f32.partialorder %v1983_v6, 0.0004427343 }
 0x59d   : > { %7975 = vpow2.f32 %v5330_v26  ;;  %v10784_v26 = vpop.permute.xlu1 %2654 }
 0x59e   : > { %v1982_v24 = vmul.f32 %v7970_v33, %v1981_v63  ;;  %v10790_v63 = vpop.permute.xlu0 %2157 }
 0x59f   : > { %7568 = vset.pattern.permute.xlu1 %v13895_v25  ;;  %13956 = vst [vmem:[#allocation90_spill] sm:$0xff] %v10790_v63 }
 0x5a0   : > { %3682 = vperm.xlu1 %7568, %v10660_v14   ;;  %v7972_v14 = vpop.eup %7971 }
 0x5a1   : > { %v1988_v55 = vmul.f32 0.6931472, %v7972_v14 }
 0x5a3   : > { %v1994_v59 = vsel %vm1993_vm3, %v1991_v31, %v1988_v55  ;;  %v13954_v31 = vld [vmem:[#allocation36_spill] sm:$0xff] }
 0x5a4   : > { %7569 = vset.pattern.permute.xlu1 %v13887_v34  ;;  %v2026_v37 = vadd.f32 %v1994_v59, %v1514_v52  ;;  %v10776_v55 = vadd.f32 %v13954_v31, %v9618_v4  ;;  %13955 = vst [vmem:[#allocation36_spill] sm:$0xff] %v10780_v58 }
 0x5a6   : > { %v7974_v56 = vpop.eup %7973  ;;  %v2058_v53 = vsel %vm1546_vm4, %v10699_v46, %v2026_v37  ;;  %v5249_v33 = vand.u32 2147483647, %v10776_v55  ;;  %vm5185_vm10 = vcmp.ne.f32.partialorder %v10776_v55, %v10776_v55 }
 0x5a7   : > { %v1979_v9 = vmul.f32 0.6931472, %v7974_v56  ;;  %v7976_v19 = vpop.eup %7975  ;;  %7977 = vrcp.f32 %v2058_v53 }
 0x5a8   : > { %v5520_v16 = vadd.f32 1.0, %v7976_v19  ;;  %v5523_v52 = vmul.f32 -0.5, %v7976_v19  ;;  %v5281_v59 = vsub.f32 0.0, %v5249_v33 }
 0x5a9   : > { %v1985_v18 = vsel %vm1984_vm5, %v1982_v24, %v1979_v9  ;;  %v5526_v9 = vand.u32 2147483647, %v7976_v19  ;;  %v10796_v24 = vpop.permute.xlu0 %2658 }
 0x5aa   : > { %v2025_v14 = vadd.f32 %v1985_v18, %v1513_v30  ;;  %7979 = vlog2.f32 %v5520_v16  ;;  %v5524_v56 = vadd.f32 1.0, %v5523_v52  ;;  %v5332_v6 = vmul.f32 1.442695, %v5281_v59  ;;  %13958 = vst [vmem:[#allocation92_spill] sm:$0xff] %v10796_v24 }
 0x5ab   : > { %vm5527_vm7 = vcmp.lt.f32.partialorder %v5526_v9, 0.0004427343  ;;  %v5152_v16 = vmax.f32 %v10753_v54, 0.0 }
 0x5ac   : > { %v2057_v46 = vsel %vm1545_vm6, %v10720_v61, %v2025_v14  ;;  %v10793_v61 = vpop.permute.xlu1 %2650  ;;  %v5525_v30 = vmul.f32 %v7976_v19, %v5524_v56 }
 0x5ad   : > { %7981 = vrcp.f32 %v2057_v46  ;;  %13957 = vst [vmem:[#allocation91_spill] sm:$0xff] %v10793_v61  ;;  %v10805_v33 = vpop.permute.xlu0 %6174  ;;  %v10809_v46 = vadd.f32 %v9810_v12, %v9618_v4 }
 0x5ae   : > { %7983 = vpow2.f32 %v5332_v6  ;;  %13959 = vst [vmem:[#allocation93_spill] sm:$0xff] %v10805_v33 }
 0x5af   : > { %v5250_v56 = vand.u32 2147483647, %v10809_v46  ;;  %vm5186_vm12 = vcmp.ne.f32.partialorder %v10809_v46, %v10809_v46 }
 0x5b0   : > { %v10803_v31 = vpop.permute.xlu1 %3130 }
 0x5b1   : > { %6096 = vadd.xlane.f32.xlu0 %v10764_v23  ;;  %v10787_v3 = vpop.eup %7977  ;;  %v5282_v9 = vsub.f32 0.0, %v5250_v56 }
 0x5b4   : > { %v7980_v37 = vpop.eup %7979  ;;  %v10816_v52 = vpop.permute.xlu1 %3610 }
 0x5b5   : > { %v5522_v53 = vmul.f32 0.6931472, %v7980_v37  ;;  %v10823_v37 = vpop.permute.xlu0 %3150 }
 0x5b6   : > { %13961 = vst [vmem:[#allocation95_spill] sm:$0xff] %v10823_v37 }
 0x5b7   : > { %v10798_v18 = vpop.eup %7981  ;;  %v5528_v14 = vsel %vm5527_vm7, %v5525_v30, %v5522_v53 }
 0x5b8   : > { %v5664_v19 = vadd.f32 %v5528_v14, %v5152_v16  ;;  %v7984_v59 = vpop.eup %7983  ;;  %v10829_v53 = vpop.permute.xlu1 %6172 }
 0x5b9   : > { %v5529_v6 = vadd.f32 1.0, %v7984_v59  ;;  %13962 = vst [vmem:[#allocation96_spill] sm:$0xff] %v10829_v53  ;;  %v5535_v56 = vand.u32 2147483647, %v7984_v59 }
 0x5ba   : > { %v10821_v12 = vsel %vm5184_vm8, %v10753_v54, %v5664_v19  ;;  %v5334_v54 = vmul.f32 1.442695, %v5282_v9 }
 0x5bb   : > { %13960 = vst [vmem:[#allocation94_spill] sm:$0xff] %v10821_v12  ;;  %7985 = vlog2.f32 %v5529_v6  ;;  %vm5536_vm9 = vcmp.lt.f32.partialorder %v5535_v56, 0.0004427343 }
 0x5bc   : > { %v10834_v30 = vpop.permute.xlu1 %2162  ;;  %7987 = vpow2.f32 %v5334_v54 }
 0x5c0   : > { %v10840_v19 = vpop.permute.xlu1 %2662 }
 0x5c4   : > { %6094 = vadd.xlane.f32.xlu1 %v10691_v62  ;;  %v10844_v54 = vpop.permute.xlu1 %3138  ;;  %v13963_v62 = vld [vmem:[#allocation39_spill] sm:$0xff] }
 0x5c5   : > { %v7986_v14 = vpop.eup %7985  ;;  %v4816_v33 = vadd.f32 %v13963_v62, %v9618_v4 }
 0x5c6   : > { %v5531_v6 = vmul.f32 0.6931472, %v7986_v14  ;;  %v7988_v53 = vpop.eup %7987 }
 0x5c7   : > { %3222 = vperm.xlu0 %7579, %v10787_v3   ;;  %vm5187_vm14 = vcmp.ne.f32.partialorder %v4816_v33, %v4816_v33 }
 0x5cb   : > { %7580 = vset.pattern.permute.xlu0 %v13895_v25 }
 0x5cc   : > { %3702 = vperm.xlu0 %7580, %v10787_v3  }
 0x5d0   : > { %7581 = vset.pattern.permute.xlu0 %v13887_v34 }
 0x5d1   : > { %2257 = vperm.xlu0 %7581, %v10798_v18  }
 0x5d5   : > { %2252 = vperm.xlu1 %7569, %v10704_v0   ;;  %7582 = vset.pattern.permute.xlu0 %v13891_v1 }
 0x5d6   : > { %2738 = vperm.xlu0 %7582, %v10798_v18  }
 0x5d9   : > { %7570 = vset.pattern.permute.xlu1 %v13891_v1 }
 0x5da   : > { %2734 = vperm.xlu1 %7570, %v10704_v0   ;;  %6194 = vrot.lane.b32.xlu0 %v10821_v12, %s9133_s22  ;;  %v5532_v0 = vmul.f32 -0.5, %v7984_v59 }
 0x5db   : > { %7585 = vset.pattern.permute.xlu0 %v13887_v34 }
 0x5dc   : > { %v5533_v16 = vadd.f32 1.0, %v5532_v0  ;;  %v5538_v0 = vadd.f32 1.0, %v7988_v53 }
 0x5de   : > { %7575 = vset.pattern.permute.xlu1 %v13894_v45  ;;  %v5534_v9 = vmul.f32 %v7984_v59, %v5533_v16  ;;  %v10853_v59 = vpop.permute.xlu1 %3618  ;;  %7989 = vlog2.f32 %v5538_v0  ;;  %v5251_v16 = vand.u32 2147483647, %v4816_v33 }
 0x5df   : > { %3210 = vperm.xlu1 %7575, %v10724_v2  }
 0x5e2   : > { %v10863_v62 = vpop.xlane.xlu1 %6078 }
 0x5e3   : > { %7576 = vset.pattern.permute.xlu1 %v13895_v25  ;;  %13966 = vst [vmem:[#allocation98_spill] sm:$0xff] %v10863_v62 }
 0x5e4   : > { %3690 = vperm.xlu1 %7576, %v10724_v2   ;;  %v5153_v2 = vmax.f32 %v10776_v55, 0.0 }
 0x5e8   : > { %6192 = vrot.lane.b32.xlu1 %v10764_v23, %s9133_s22  ;;  %v5537_v23 = vsel %vm5536_vm9, %v5534_v9, %v5531_v6  ;;  %v7990_v56 = vpop.eup %7989  ;;  %v5544_v9 = vand.u32 2147483647, %v7988_v53 }
 0x5e9   : > { %7577 = vset.pattern.permute.xlu1 %v13887_v34  ;;  %v5665_v37 = vadd.f32 %v5537_v23, %v5153_v2  ;;  %v5283_v23 = vsub.f32 0.0, %v5251_v16  ;;  %v5154_v2 = vmax.f32 %v10809_v46, 0.0 }
 0x5ea   : > { %vm5545_vm11 = vcmp.lt.f32.partialorder %v5544_v9, 0.0004427343 }
 0x5eb   : > { %v5336_v6 = vmul.f32 1.442695, %v5283_v23 }
 0x5ec   : > { %2262 = vperm.xlu1 %7577, %v10787_v3  }
 0x5ed   : > { %7991 = vpow2.f32 %v5336_v6 }
 0x5f0   : > { %7578 = vset.pattern.permute.xlu1 %v13891_v1  ;;  %v10857_v1 = vsel %vm5185_vm10, %v10776_v55, %v5665_v37  ;;  %v5540_v55 = vmul.f32 0.6931472, %v7990_v56 }
 0x5f1   : > { %2742 = vperm.xlu1 %7578, %v10787_v3   ;;  %13964 = vst [vmem:[#allocation39_spill] sm:$0xff] %v10857_v1  ;;  %v10859_v3 = vpop.permute.xlu0 %3630 }
 0x5f2   : > { %13965 = vst [vmem:[#allocation97_spill] sm:$0xff] %v10859_v3 }
 0x5f5   : > { %7583 = vset.pattern.permute.xlu1 %v13894_v45  ;;  %v5541_v45 = vmul.f32 -0.5, %v7988_v53 }
 0x5f6   : > { %3218 = vperm.xlu1 %7583, %v10798_v18  }
 0x5f7   : > { %v5542_v14 = vadd.f32 1.0, %v5541_v45  ;;  %v10875_v45 = vpop.permute.xlu0 %2167 }
 0x5f8   : > { %13969 = vst [vmem:[#allocation99_spill] sm:$0xff] %v10875_v45 }
 0x5f9   : > { %6100 = vadd.xlane.f32.xlu0 %v10857_v1  ;;  %v5543_v37 = vmul.f32 %v7988_v53, %v5542_v14 }
 0x5fa   : > { %7584 = vset.pattern.permute.xlu1 %v13895_v25  ;;  %v13967_v25 = vld [vmem:[#allocation41_spill] sm:$0xff] }
 0x5fb   : > { %3698 = vperm.xlu1 %7584, %v10798_v18   ;;  %v5546_v0 = vsel %vm5545_vm11, %v5543_v37, %v5540_v55  ;;  %v4822_v62 = vadd.f32 %v13967_v25, %v9618_v4  ;;  %v7992_v18 = vpop.eup %7991  ;;  %v10879_v55 = vpop.permute.xlu1 %2172 }
 0x5fc   : > { %v5666_v3 = vadd.f32 %v5546_v0, %v5154_v2  ;;  %v5547_v53 = vadd.f32 1.0, %v7992_v18  ;;  %v5550_v56 = vmul.f32 -0.5, %v7992_v18  ;;  %v5553_v37 = vand.u32 2147483647, %v7992_v18  ;;  %v10886_v61 = vpop.permute.xlu0 %2666 }
 0x5fd   : > { %v5252_v16 = vand.u32 2147483647, %v4822_v62  ;;  %v5155_v0 = vmax.f32 %v4816_v33, 0.0  ;;  %13972 = vst [vmem:[#allocation100_spill] sm:$0xff] %v10886_v61  ;;  %vm5188_vm0 = vcmp.ne.f32.partialorder %v4822_v62, %v4822_v62 }
 0x5fe   : > { %7993 = vlog2.f32 %v5547_v53  ;;  %v5551_v6 = vadd.f32 1.0, %v5550_v56  ;;  %vm5554_vm13 = vcmp.lt.f32.partialorder %v5553_v37, 0.0004427343 }
 0x5ff   : > { %7586 = vset.pattern.permute.xlu1 %v13887_v34  ;;  %v10873_v34 = vsel %vm5186_vm12, %v10809_v46, %v5666_v3  ;;  %v5284_v23 = vsub.f32 0.0, %v5252_v16  ;;  %v13970_v16 = vld [vmem:[#allocation43_spill] sm:$0xff] }
 0x600   : > { %13968 = vst [vmem:[#allocation41_spill] sm:$0xff] %v10873_v34  ;;  %v5552_v3 = vmul.f32 %v7992_v18, %v5551_v6  ;;  %v4828_v53 = vadd.f32 %v13970_v16, %v9618_v4 }
 0x601   : > { %v5338_v14 = vmul.f32 1.442695, %v5284_v23 }
 0x602   : > { %vm5189_vm2 = vcmp.ne.f32.partialorder %v4828_v53, %v4828_v53 }
 0x603   : > { %7995 = vpow2.f32 %v5338_v14  ;;  %v5253_v14 = vand.u32 2147483647, %v4828_v53 }
 0x605   : > { %v5285_v6 = vsub.f32 0.0, %v5253_v14  ;;  %v10897_v14 = vpop.xlane.xlu0 %6080 }
 0x606   : > { %13975 = vst [vmem:[#allocation101_spill] sm:$0xff] %v10897_v14 }
 0x608   : > { %v7994_v9 = vpop.eup %7993 }
 0x609   : > { %v5549_v46 = vmul.f32 0.6931472, %v7994_v9  ;;  %v10889_v9 = vpop.permute.xlu1 %2670 }
 0x60b   : > { %v5555_v25 = vsel %vm5554_vm13, %v5552_v3, %v5549_v46  ;;  %v5340_v3 = vmul.f32 1.442695, %v5285_v6 }
 0x60c   : > { %v5667_v23 = vadd.f32 %v5555_v25, %v5155_v0 }
 0x60d   : > { %v7996_v2 = vpop.eup %7995 }
 0x60e   : > { %v5556_v45 = vadd.f32 1.0, %v7996_v2  ;;  %v10884_v56 = vsel %vm5187_vm14, %v4816_v33, %v5667_v23  ;;  %v5559_v18 = vmul.f32 -0.5, %v7996_v2  ;;  %v5562_v0 = vand.u32 2147483647, %v7996_v2  ;;  %v13973_v23 = vld [vmem:[#allocation46_spill] sm:$0xff] }
 0x60f   : > { %6198 = vrot.lane.b32.xlu0 %v10873_v34, %s9133_s22  ;;  %13971 = vst [vmem:[#allocation43_spill] sm:$0xff] %v10884_v56  ;;  %v5156_v33 = vmax.f32 %v4822_v62, 0.0 }
 0x610   : > { %7997 = vlog2.f32 %v5556_v45  ;;  %v5560_v37 = vadd.f32 1.0, %v5559_v18  ;;  %vm5563_vm15 = vcmp.lt.f32.partialorder %v5562_v0, 0.0004427343  ;;  %v10901_v0 = vpop.permute.xlu1 %3146 }
 0x611   : > { %7999 = vpow2.f32 %v5340_v3 }
 0x612   : > { %v5561_v45 = vmul.f32 %v7996_v2, %v5560_v37 }
 0x61a   : > { %v7998_v46 = vpop.eup %7997 }
 0x61b   : > { %v5558_v25 = vmul.f32 0.6931472, %v7998_v46  ;;  %v8000_v24 = vpop.eup %7999 }
 0x61c   : > { %v5565_v18 = vadd.f32 1.0, %v8000_v24  ;;  %v5568_v37 = vmul.f32 -0.5, %v8000_v24 }
 0x61d   : > { %v5564_v16 = vsel %vm5563_vm15, %v5561_v45, %v5558_v25  ;;  %v5571_v25 = vand.u32 2147483647, %v8000_v24 }
 0x61e   : > { %v5668_v61 = vadd.f32 %v5564_v16, %v5156_v33  ;;  %8001 = vlog2.f32 %v5565_v18  ;;  %v5569_v46 = vadd.f32 1.0, %v5568_v37  ;;  %v5157_v33 = vmax.f32 %v4828_v53, 0.0 }
 0x61f   : > { %6098 = vadd.xlane.f32.xlu1 %v10821_v12  ;;  %v4834_v12 = vadd.f32 %v13973_v23, %v9618_v4  ;;  %vm5572_vm1 = vcmp.lt.f32.partialorder %v5571_v25, 0.0004427343 }
 0x621   : > { %v5254_v63 = vand.u32 2147483647, %v4834_v12  ;;  %vm5190_vm4 = vcmp.ne.f32.partialorder %v4834_v12, %v4834_v12 }
 0x623   : > { %v5286_v2 = vsub.f32 0.0, %v5254_v63  ;;  %v13976_v63 = vld [vmem:[#allocation48_spill] sm:$0xff] }
 0x624   : > { %v4840_v18 = vadd.f32 %v13976_v63, %v9618_v4 }
 0x625   : > { %v5342_v6 = vmul.f32 1.442695, %v5286_v2 }
 0x626   : > { %v5255_v37 = vand.u32 2147483647, %v4840_v18  ;;  %vm5191_vm6 = vcmp.ne.f32.partialorder %v4840_v18, %v4840_v18 }
 0x627   : > { %8003 = vpow2.f32 %v5342_v6  ;;  %v10906_v6 = vpop.permute.xlu0 %3158 }
 0x628   : > { %v8002_v3 = vpop.eup %8001  ;;  %13977 = vst [vmem:[#allocation48_spill] sm:$0xff] %v10906_v6 }
 0x62b   : > { %v10915_v25 = vpop.permute.xlu0 %3638 }
 0x62c   : > { %13980 = vst [vmem:[#allocation104_spill] sm:$0xff] %v10915_v25 }
 0x62e   : > { %6104 = vadd.xlane.f32.xlu0 %v10884_v56 }
 0x630   : > { %6196 = vrot.lane.b32.xlu1 %v10857_v1, %s9133_s22  ;;  %v10895_v1 = vsel %vm5188_vm0, %v4822_v62, %v5668_v61  ;;  %v5567_v61 = vmul.f32 0.6931472, %v8002_v3  ;;  %v5570_v62 = vmul.f32 %v8000_v24, %v5569_v46  ;;  %v10911_v3 = vpop.permute.xlu1 %3626  ;;  %v5287_v46 = vsub.f32 0.0, %v5255_v37 }
 0x631   : > { %13974 = vst [vmem:[#allocation46_spill] sm:$0xff] %v10895_v1  ;;  %v8004_v45 = vpop.eup %8003  ;;  %13979 = vst [vmem:[#allocation103_spill] sm:$0xff] %v10911_v3 }
 0x632   : > { %v5573_v16 = vsel %vm5572_vm1, %v5570_v62, %v5567_v61  ;;  %v5574_v23 = vadd.f32 1.0, %v8004_v45  ;;  %v5577_v24 = vmul.f32 -0.5, %v8004_v45 }
 0x633   : > { %v5669_v2 = vadd.f32 %v5573_v16, %v5157_v33  ;;  %v5344_v33 = vmul.f32 1.442695, %v5287_v46  ;;  %v5580_v16 = vand.u32 2147483647, %v8004_v45 }
 0x634   : > { %8005 = vlog2.f32 %v5574_v23  ;;  %v5578_v61 = vadd.f32 1.0, %v5577_v24  ;;  %v10917_v23 = vpop.permute.xlu0 %2177 }
 0x635   : > { %v10908_v14 = vsel %vm5189_vm2, %v4828_v53, %v5669_v2  ;;  %13981 = vst [vmem:[#allocation105_spill] sm:$0xff] %v10917_v23  ;;  %8007 = vpow2.f32 %v5344_v33  ;;  %vm5581_vm3 = vcmp.lt.f32.partialorder %v5580_v16, 0.0004427343  ;;  %v5158_v2 = vmax.f32 %v4834_v12, 0.0 }
 0x636   : > { %13978 = vst [vmem:[#allocation102_spill] sm:$0xff] %v10908_v14  ;;  %v5579_v53 = vmul.f32 %v8004_v45, %v5578_v61 }
 0x638   : > { %v10919_v6 = vpop.permute.xlu0 %2674 }
 0x639   : > { %13982 = vst [vmem:[#allocation106_spill] sm:$0xff] %v10919_v6 }
 0x63c   : > { %v10925_v46 = vpop.permute.xlu0 %6178 }
 0x63d   : > { %13985 = vst [vmem:[#allocation107_spill] sm:$0xff] %v10925_v46 }
 0x63e   : > { %v8006_v62 = vpop.eup %8005 }
 0x63f   : > { %v5576_v63 = vmul.f32 0.6931472, %v8006_v62  ;;  %v8008_v25 = vpop.eup %8007 }
 0x640   : > { %v5583_v45 = vadd.f32 1.0, %v8008_v25  ;;  %v10929_v62 = vpop.permute.xlu0 %3166  ;;  %v5586_v16 = vmul.f32 -0.5, %v8008_v25 }
 0x641   : > { %13986 = vst [vmem:[#allocation108_spill] sm:$0xff] %v10929_v62  ;;  %v5159_v62 = vmax.f32 %v4840_v18, 0.0 }
 0x642   : > { %8009 = vlog2.f32 %v5583_v45 }
 0x644   : > { %6202 = vrot.lane.b32.xlu0 %v10895_v1, %s9133_s22 }
 0x654   : > { %6102 = vadd.xlane.f32.xlu1 %v10873_v34  ;;  %v5582_v34 = vsel %vm5581_vm3, %v5579_v53, %v5576_v63  ;;  %v8010_v63 = vpop.eup %8009  ;;  %v10933_v53 = vpop.permute.xlu1 %6176 }
 0x655   : > { %v5670_v37 = vadd.f32 %v5582_v34, %v5158_v2  ;;  %v5587_v34 = vadd.f32 1.0, %v5586_v16  ;;  %13988 = vst [vmem:[#allocation110_spill] sm:$0xff] %v10933_v53 }
 0x657   : > { %v10923_v51 = vsel %vm5190_vm4, %v4834_v12, %v5670_v37  ;;  %v5589_v12 = vand.u32 2147483647, %v8008_v25  ;;  %v5585_v37 = vmul.f32 0.6931472, %v8010_v63  ;;  %v5588_v46 = vmul.f32 %v8008_v25, %v5587_v34 }
 0x659   : > { %vm5590_vm5 = vcmp.lt.f32.partialorder %v5589_v12, 0.0004427343 }
 0x65a   : > { %v5591_v45 = vsel %vm5590_vm5, %v5588_v46, %v5585_v37  ;;  %v10952_v46 = vpop.permute.xlu1 %2182 }
 0x65b   : > { %v5671_v6 = vadd.f32 %v5591_v45, %v5159_v62  ;;  %13995 = vst [vmem:[#allocation115_spill] sm:$0xff] %v10952_v46 }
 0x65d   : > { %v10947_v63 = vsel %vm5191_vm6, %v4840_v18, %v5671_v6 }
 0x65e   : > { %13993 = vst [vmem:[#allocation113_spill] sm:$0xff] %v10947_v63 }
 0x663   : > { %6108 = vadd.xlane.f32.xlu0 %v10908_v14 }
 0x665   : > { %6200 = vrot.lane.b32.xlu1 %v10884_v56, %s9133_s22  ;;  %v13983_v56 = vld [vmem:[#allocation50_spill] sm:$0xff] }
 0x666   : > { %v4846_v58 = vadd.f32 %v13983_v56, %v9618_v4  ;;  %13984 = vst [vmem:[#allocation50_spill] sm:$0xff] %v10923_v51  ;;  %v10931_v56 = vpop.permute.xlu0 %3646 }
 0x667   : > { %13987 = vst [vmem:[#allocation109_spill] sm:$0xff] %v10931_v56  ;;  %v13991_v56 = vld [vmem:[#allocation52_spill] sm:$0xff] }
 0x668   : > { %v5256_v24 = vand.u32 2147483647, %v4846_v58  ;;  %v10942_v16 = vadd.f32 %v13991_v56, %v9618_v4  ;;  %v5160_v6 = vmax.f32 %v4846_v58, 0.0  ;;  %vm5192_vm8 = vcmp.ne.f32.partialorder %v4846_v58, %v4846_v58 }
 0x66a   : > { %v5288_v61 = vsub.f32 0.0, %v5256_v24  ;;  %v10936_v2 = vpop.permute.xlu0 %2187  ;;  %vm5193_vm10 = vcmp.ne.f32.partialorder %v10942_v16, %v10942_v16 }
 0x66b   : > { %13989 = vst [vmem:[#allocation111_spill] sm:$0xff] %v10936_v2  ;;  %v13998_v2 = vld [vmem:[#allocation54_spill] sm:$0xff] }
 0x66c   : > { %v5346_v33 = vmul.f32 1.442695, %v5288_v61  ;;  %v10962_v23 = vadd.f32 %v13998_v2, %v9618_v4  ;;  %v10973_v2 = vpop.permute.xlu1 %2678 }
 0x66d   : > { %14002 = vst [vmem:[#allocation120_spill] sm:$0xff] %v10973_v2 }
 0x66e   : > { %8011 = vpow2.f32 %v5346_v33  ;;  %v10938_v61 = vpop.permute.xlu0 %2682  ;;  %vm5194_vm12 = vcmp.ne.f32.partialorder %v10962_v23, %v10962_v23 }
 0x66f   : > { %13990 = vst [vmem:[#allocation112_spill] sm:$0xff] %v10938_v61 }
 0x672   : > { %v10944_v53 = vpop.xlane.xlu0 %6084 }
 0x673   : > { %13992 = vst [vmem:[#allocation52_spill] sm:$0xff] %v10944_v53 }
 0x676   : > { %v10950_v25 = vpop.permute.xlu0 %3174 }
 0x677   : > { %13994 = vst [vmem:[#allocation114_spill] sm:$0xff] %v10950_v25 }
 0x678   : > { %v8012_v24 = vpop.eup %8011 }
 0x679   : > { %6206 = vrot.lane.b32.xlu0 %v10923_v51, %s9133_s22  ;;  %v5592_v33 = vadd.f32 1.0, %v8012_v24  ;;  %v5595_v56 = vmul.f32 -0.5, %v8012_v24 }
 0x67a   : > { %v10956_v45 = vpop.permute.xlu0 %3654 }
 0x67b   : > { %8013 = vlog2.f32 %v5592_v33  ;;  %v5596_v62 = vadd.f32 1.0, %v5595_v56  ;;  %13996 = vst [vmem:[#allocation116_spill] sm:$0xff] %v10956_v45  ;;  %v5598_v33 = vand.u32 2147483647, %v8012_v24 }
 0x67d   : > { %v5597_v18 = vmul.f32 %v8012_v24, %v5596_v62  ;;  %vm5599_vm7 = vcmp.lt.f32.partialorder %v5598_v33, 0.0004427343  ;;  %v10977_v33 = vpop.permute.xlu1 %3154 }
 0x67e   : > { %v10958_v61 = vpop.permute.xlu0 %2197  ;;  %14004 = vst [vmem:[#allocation122_spill] sm:$0xff] %v10977_v33 }
 0x67f   : > { %13997 = vst [vmem:[#allocation117_spill] sm:$0xff] %v10958_v61 }
 0x685   : > { %v8014_v12 = vpop.eup %8013 }
 0x686   : > { %v5594_v53 = vmul.f32 0.6931472, %v8014_v12 }
 0x688   : > { %v5600_v25 = vsel %vm5599_vm7, %v5597_v18, %v5594_v53 }
 0x689   : > { %6106 = vadd.xlane.f32.xlu1 %v10895_v1  ;;  %v5257_v1 = vand.u32 2147483647, %v10942_v16 }
 0x68b   : > { %v5289_v34 = vsub.f32 0.0, %v5257_v1  ;;  %v10964_v1 = vpop.permute.xlu0 %2690 }
 0x68c   : > { %13999 = vst [vmem:[#allocation54_spill] sm:$0xff] %v10964_v1 }
 0x68d   : > { %v5348_v37 = vmul.f32 1.442695, %v5289_v34  ;;  %v5258_v34 = vand.u32 2147483647, %v10962_v23 }
 0x68f   : > { %8015 = vpow2.f32 %v5348_v37  ;;  %v5290_v62 = vsub.f32 0.0, %v5258_v34  ;;  %v10971_v12 = vpop.permute.xlu0 %6182 }
 0x690   : > { %14001 = vst [vmem:[#allocation119_spill] sm:$0xff] %v10971_v12  ;;  %v10982_v12 = vpop.permute.xlu1 %3634 }
 0x691   : > { %v5350_v53 = vmul.f32 1.442695, %v5290_v62  ;;  %14006 = vst [vmem:[#allocation124_spill] sm:$0xff] %v10982_v12 }
 0x694   : > { %v10987_v61 = vpop.xlane.xlu1 %6082 }
 0x695   : > { %14008 = vst [vmem:[#allocation126_spill] sm:$0xff] %v10987_v61 }
 0x698   : > { %6112 = vadd.xlane.f32.xlu0 %v10947_v63 }
 0x699   : > { %v8016_v56 = vpop.eup %8015 }
 0x69a   : > { %6204 = vrot.lane.b32.xlu1 %v10908_v14, %s9133_s22  ;;  %v5672_v14 = vadd.f32 %v5600_v25, %v5160_v6  ;;  %v5601_v24 = vadd.f32 1.0, %v8016_v56  ;;  %v10975_v25 = vpop.permute.xlu0 %3182  ;;  %v5604_v37 = vmul.f32 -0.5, %v8016_v56  ;;  %v5607_v6 = vand.u32 2147483647, %v8016_v56 }
 0x69b   : > { %14003 = vst [vmem:[#allocation121_spill] sm:$0xff] %v10975_v25 }
 0x69c   : > { %v10967_v45 = vsel %vm5192_vm8, %v4846_v58, %v5672_v14  ;;  %8017 = vlog2.f32 %v5601_v24  ;;  %v5605_v58 = vadd.f32 1.0, %v5604_v37  ;;  %vm5608_vm9 = vcmp.lt.f32.partialorder %v5607_v6, 0.0004427343  ;;  %v14009_v37 = vld [vmem:[#allocation57_spill] sm:$0xff] }
 0x69d   : > { %14000 = vst [vmem:[#allocation118_spill] sm:$0xff] %v10967_v45  ;;  %8019 = vpow2.f32 %v5350_v53  ;;  %v5161_v53 = vmax.f32 %v10942_v16, 0.0 }
 0x69e   : > { %v10979_v18 = vpop.permute.xlu0 %3662  ;;  %v5606_v1 = vmul.f32 %v8016_v56, %v5605_v58  ;;  %v14011_v58 = vld [vmem:[#allocation61_spill] sm:$0xff] }
 0x69f   : > { %14005 = vst [vmem:[#allocation123_spill] sm:$0xff] %v10979_v18  ;;  %v10991_v18 = vadd.f32 %v14009_v37, %v9618_v4 }
 0x6a1   : > { %v5259_v56 = vand.u32 2147483647, %v10991_v18  ;;  %vm5195_vm15 = vcmp.ne.f32.partialorder %v10991_v18, %v10991_v18 }
 0x6a2   : > { %v10984_v62 = vpop.permute.xlu0 %2207 }
 0x6a3   : > { %14007 = vst [vmem:[#allocation125_spill] sm:$0xff] %v10984_v62 }
 0x6a6   : > { %v8018_v14 = vpop.eup %8017  ;;  %v10993_v2 = vpop.permute.xlu0 %2698 }
 0x6a7   : > { %v5603_v34 = vmul.f32 0.6931472, %v8018_v14  ;;  %v8020_v24 = vpop.eup %8019  ;;  %14010 = vst [vmem:[#allocation57_spill] sm:$0xff] %v10993_v2  ;;  %v11000_v14 = vadd.f32 %v14011_v58, %v9618_v4 }
 0x6a8   : > { %v5610_v33 = vadd.f32 1.0, %v8020_v24 }
 0x6a9   : > { %v5609_v25 = vsel %vm5608_vm9, %v5606_v1, %v5603_v34  ;;  %v11002_v1 = vpop.permute.xlu1 %2192  ;;  %vm5197_vm0 = vcmp.ne.f32.partialorder %v11000_v14, %v11000_v14 }
 0x6aa   : > { %8021 = vlog2.f32 %v5610_v33  ;;  %14012 = vst [vmem:[#allocation61_spill] sm:$0xff] %v11002_v1  ;;  %v11007_v34 = vpop.xlane.xlu0 %6088  ;;  %v5291_v33 = vsub.f32 0.0, %v5259_v56  ;;  %v5162_v56 = vmax.f32 %v10962_v23, 0.0 }
 0x6ab   : > { %14014 = vst [vmem:[#allocation128_spill] sm:$0xff] %v11007_v34 }
 0x6ac   : > { %v5352_v62 = vmul.f32 1.442695, %v5291_v33 }
 0x6ad   : > { %v11015_v58 = vpop.permute.xlu1 %2686 }
 0x6ae   : > { %6210 = vrot.lane.b32.xlu0 %v10967_v45, %s9133_s22  ;;  %v11013_v37 = vpop.permute.xlu0 %3190  ;;  %8023 = vpow2.f32 %v5352_v62 }
 0x6af   : > { %14015 = vst [vmem:[#allocation129_spill] sm:$0xff] %v11013_v37 }
 0x6b2   : > { %v11017_v1 = vpop.permute.xlu0 %3670 }
 0x6b3   : > { %14016 = vst [vmem:[#allocation130_spill] sm:$0xff] %v11017_v1 }
 0x6b4   : > { %v8022_v2 = vpop.eup %8021 }
 0x6b5   : > { %v5612_v34 = vmul.f32 0.6931472, %v8022_v2 }
 0x6b6   : > { %v11022_v37 = vpop.permute.xlu0 %2217 }
 0x6b7   : > { %14017 = vst [vmem:[#allocation131_spill] sm:$0xff] %v11022_v37 }
 0x6b8   : > { %v8024_v2 = vpop.eup %8023 }
 0x6b9   : > { %v5619_v62 = vadd.f32 1.0, %v8024_v2  ;;  %v5622_v37 = vmul.f32 -0.5, %v8024_v2 }
 0x6be   : > { %6110 = vadd.xlane.f32.xlu1 %v10923_v51  ;;  %v5673_v51 = vadd.f32 %v5609_v25, %v5161_v53  ;;  %v5613_v25 = vmul.f32 -0.5, %v8020_v24  ;;  %v5261_v53 = vand.u32 2147483647, %v11000_v14 }
 0x6c0   : > { %v11005_v6 = vsel %vm5193_vm10, %v10942_v16, %v5673_v51  ;;  %v5614_v61 = vadd.f32 1.0, %v5613_v25  ;;  %v5293_v51 = vsub.f32 0.0, %v5261_v53  ;;  %v5616_v16 = vand.u32 2147483647, %v8020_v24 }
 0x6c1   : > { %14013 = vst [vmem:[#allocation127_spill] sm:$0xff] %v11005_v6 }
 0x6c2   : > { %v5615_v12 = vmul.f32 %v8020_v24, %v5614_v61  ;;  %v5356_v46 = vmul.f32 1.442695, %v5293_v51  ;;  %vm5617_vm11 = vcmp.lt.f32.partialorder %v5616_v16, 0.0004427343  ;;  %v11031_v61 = vld [vmem:[%s13578_s9] ss:$0 sm:$0xff] }
 0x6c3   : > { %v3226_v24 = vmul.f32 %v11031_v61, %v10562_v5  ;;  %v3706_v53 = vmul.f32 %v11031_v61, %v10354_v57 }
 0x6c4   : > { %v5618_v3 = vsel %vm5617_vm11, %v5615_v12, %v5612_v34  ;;  %8025 = vpow2.f32 %v5356_v46  ;;  %v11038_v46 = vpop.permute.xlu0 %2706 }
 0x6c5   : > { %v5674_v33 = vadd.f32 %v5618_v3, %v5162_v56  ;;  %14020 = vst [vmem:[#allocation134_spill] sm:$0xff] %v11038_v46  ;;  %v3259_v51 = vmul.f32 1.442695, %v3226_v24  ;;  %8027 = vlog2.f32 %v5619_v62  ;;  %v3739_v56 = vmul.f32 1.442695, %v3706_v53 }
 0x6c6   : > { %v2268_v62 = vmul.f32 %v11031_v61, %v10405_v27 }
 0x6c7   : > { %v11036_v12 = vsel %vm5194_vm12, %v10962_v23, %v5674_v33  ;;  %8029 = vpow2.f32 %v3259_v51  ;;  %v2265_v23 = vmul.f32 %v11031_v61, %v10576_v10  ;;  %v5623_v51 = vadd.f32 1.0, %v5622_v37 }
 0x6c8   : > { %14019 = vst [vmem:[#allocation133_spill] sm:$0xff] %v11036_v12  ;;  %v11046_v16 = vpop.permute.xlu0 %6186  ;;  %v2303_v1 = vmul.f32 1.442695, %v2268_v62  ;;  %v5163_v62 = vmax.f32 %v10991_v18, 0.0 }
 0x6c9   : > { %14022 = vst [vmem:[#allocation136_spill] sm:$0xff] %v11046_v16  ;;  %v2297_v46 = vmul.f32 1.442695, %v2265_v23  ;;  %v5624_v27 = vmul.f32 %v8024_v2, %v5623_v51 }
 0x6cc   : > { %v11054_v57 = vpop.permute.xlu0 %3198 }
 0x6cd   : > { %6116 = vadd.xlane.f32.xlu0 %v11005_v6  ;;  %14024 = vst [vmem:[#allocation138_spill] sm:$0xff] %v11054_v57 }
 0x6ce   : > { %v8026_v34 = vpop.eup %8025 }
 0x6cf   : > { %6208 = vrot.lane.b32.xlu1 %v10947_v63, %s9133_s22  ;;  %v11019_v63 = vpop.permute.xlu1 %3162  ;;  %v5637_v5 = vadd.f32 1.0, %v8026_v34  ;;  %v5640_v10 = vmul.f32 -0.5, %v8026_v34  ;;  %v8028_v16 = vpop.eup %8027 }
 0x6d0   : > { %v11063_v23 = vpop.permute.xlu0 %3678 }
 0x6d1   : > { %8031 = vlog2.f32 %v5637_v5  ;;  %v5625_v5 = vand.u32 2147483647, %v8024_v2  ;;  %14026 = vst [vmem:[#allocation140_spill] sm:$0xff] %v11063_v23 }
 0x6d2   : > { %8033 = vpow2.f32 %v3739_v56  ;;  %v8030_v56 = vpop.eup %8029 }
 0x6d3   : > { %v11024_v25 = vpop.permute.xlu1 %3642  ;;  %8035 = vpow2.f32 %v2297_v46  ;;  %v6984_v37 = vadd.f32 -1.0, %v8030_v56  ;;  %vm11067_vm13 = vcmp.lt.f32.partialorder %v5625_v5, 0.0004427343  ;;  %v11118_v56 = vld [vmem:[%s13579_s10] ss:$0 sm:$0xff] }
 0x6d4   : > { %14018 = vst [vmem:[#allocation132_spill] sm:$0xff] %v11024_v25  ;;  %v11076_v5 = vpop.permute.xlu0 %2227 }
 0x6d7   : > { %v11042_v3 = vpop.permute.xlu1 %6180 }
 0x6d8   : > { %14021 = vst [vmem:[#allocation135_spill] sm:$0xff] %v11042_v3  ;;  %v2745_v3 = vmul.f32 %v11031_v61, %v10361_v47  ;;  %v2748_v47 = vmul.f32 %v11031_v61, %v10412_v20 }
 0x6da   : > { %v2777_v53 = vmul.f32 1.442695, %v2745_v3  ;;  %v5641_v3 = vadd.f32 1.0, %v5640_v10  ;;  %v2783_v20 = vmul.f32 1.442695, %v2748_v47 }
 0x6db   : > { %v11050_v33 = vpop.permute.xlu1 %2202  ;;  %v8032_v46 = vpop.eup %8031 }
 0x6dc   : > { %14023 = vst [vmem:[#allocation137_spill] sm:$0xff] %v11050_v33  ;;  %8037 = vpow2.f32 %v2777_v53  ;;  %v8034_v25 = vpop.eup %8033  ;;  %v2267_v53 = vmul.f32 %v11031_v61, %v10443_v43  ;;  %v5639_v2 = vmul.f32 0.6931472, %v8032_v46  ;;  %v5642_v51 = vmul.f32 %v8026_v34, %v5641_v3 }
 0x6dd   : > { %8039 = vpow2.f32 %v2303_v1  ;;  %v7016_v10 = vadd.f32 -1.0, %v8034_v25  ;;  %v8036_v23 = vpop.eup %8035  ;;  %v5165_v1 = vmax.f32 %v11000_v14, 0.0  ;;  %v2747_v33 = vmul.f32 %v11031_v61, %v10453_v13 }
 0x6de   : > { %8041 = vrcp.f32 %v6984_v37  ;;  %v2301_v47 = vmul.f32 1.442695, %v2267_v53  ;;  %v6919_v25 = vadd.f32 -1.0, %v8036_v23  ;;  %v3227_v13 = vmul.f32 %v11031_v61, %v10483_v49 }
 0x6df   : > { %v11056_v24 = vpop.permute.xlu1 %2694  ;;  %8043 = vpow2.f32 %v2783_v20  ;;  %v2781_v37 = vmul.f32 1.442695, %v2747_v33  ;;  %v3707_v49 = vmul.f32 %v11031_v61, %v10498_v48 }
 0x6e0   : > { %14025 = vst [vmem:[#allocation139_spill] sm:$0xff] %v11056_v24  ;;  %v5621_v24 = vmul.f32 0.6931472, %v8028_v16  ;;  %8045 = vrcp.f32 %v7016_v10 }
 0x6e1   : > { %8047 = vpow2.f32 %v2301_v47  ;;  %v3741_v48 = vmul.f32 1.442695, %v3707_v49  ;;  %v2270_v47 = vmul.f32 %v11031_v61, %v10537_v17 }
 0x6e2   : > { %v5627_v16 = vsel %vm11067_vm13, %v5624_v27, %v5621_v24  ;;  %v11093_v27 = vpop.permute.xlu0 %2714  ;;  %8049 = vrcp.f32 %v6919_v25 }
 0x6e3   : > { %6214 = vrot.lane.b32.xlu0 %v11036_v12, %s9133_s22  ;;  %v11065_v57 = vpop.permute.xlu1 %3170  ;;  %v5675_v43 = vadd.f32 %v5627_v16, %v5163_v62  ;;  %8051 = vpow2.f32 %v2781_v37  ;;  %v3261_v16 = vmul.f32 1.442695, %v3227_v13  ;;  %v2307_v37 = vmul.f32 1.442695, %v2270_v47 }
 0x6e4   : > { %14027 = vst [vmem:[#allocation141_spill] sm:$0xff] %v11065_v57  ;;  %v2750_v13 = vmul.f32 %v11031_v61, %v10556_v50 }
 0x6e5   : > { %v11096_v3 = vsel %vm5195_vm15, %v10991_v18, %v5675_v43 }
 0x6e6   : > { %14033 = vst [vmem:[#allocation143_spill] sm:$0xff] %v11096_v3  ;;  %v11105_v18 = vpop.xlane.xlu0 %6092  ;;  %v2787_v49 = vmul.f32 1.442695, %v2750_v13 }
 0x6e7   : > { %v11082_v57 = vpop.permute.xlu1 %3650  ;;  %14034 = vst [vmem:[#allocation144_spill] sm:$0xff] %v11105_v18 }
 0x6ea   : > { %v11123_v43 = vpop.permute.xlu0 %3206 }
 0x6eb   : > { %v11091_v24 = vpop.xlane.xlu1 %6086 }
 0x6ec   : > { %14032 = vst [vmem:[#allocation142_spill] sm:$0xff] %v11091_v24  ;;  %v2754_v24 = vmul.f32 %v11031_v61, %v10784_v26 }
 0x6ee   : > { %v2795_v26 = vmul.f32 1.442695, %v2754_v24 }
 0x6f3   : > { %6114 = vadd.xlane.f32.xlu1 %v10967_v45  ;;  %v5643_v45 = vand.u32 2147483647, %v8026_v34  ;;  %v8038_v34 = vpop.eup %8037 }
 0x6f4   : > { %v8040_v23 = vpop.eup %8039  ;;  %v6951_v62 = vadd.f32 -1.0, %v8038_v34 }
 0x6f5   : > { %vm11078_vm14 = vcmp.lt.f32.partialorder %v5643_v45, 0.0004427343  ;;  %v8042_v20 = vpop.eup %8041  ;;  %v6922_v10 = vadd.f32 -1.0, %v8040_v23  ;;  %v11136_v23 = vpop.permute.xlu0 %3686 }
 0x6f6   : > { %v5645_v45 = vsel %vm11078_vm14, %v5642_v51, %v5639_v2  ;;  %v11112_v2 = vpop.permute.xlu1 %2212  ;;  %v8044_v51 = vpop.eup %8043  ;;  %8053 = vrcp.f32 %v6951_v62 }
 0x6f7   : > { %v5677_v46 = vadd.f32 %v5645_v45, %v5165_v1  ;;  %v8046_v1 = vpop.eup %8045  ;;  %8055 = vpow2.f32 %v3261_v16  ;;  %v6954_v33 = vadd.f32 -1.0, %v8044_v51  ;;  %v3229_v51 = vmul.f32 %v11031_v61, %v10600_v11 }
 0x6f8   : > { %8057 = vrcp.f32 %v6922_v10  ;;  %v8048_v45 = vpop.eup %8047  ;;  %v11131_v34 = vmul.f32 %v8046_v1, %v11118_v56 }
 0x6f9   : > { %v11108_v53 = vsel %vm5197_vm0, %v11000_v14, %v5677_v46  ;;  %v11121_v14 = vmul.f32 %v8042_v20, %v11118_v56  ;;  %v8050_v46 = vpop.eup %8049  ;;  %8059 = vpow2.f32 %v3741_v48  ;;  %v6921_v17 = vadd.f32 -1.0, %v8048_v45 }
 0x6fa   : > { %14035 = vst [vmem:[#allocation145_spill] sm:$0xff] %v11108_v53  ;;  %v11128_v25 = vpop.permute.xlu1 %2702  ;;  %8061 = vrcp.f32 %v6954_v33  ;;  %v8052_v62 = vpop.eup %8051  ;;  %v11139_v20 = vmul.f32 %v8050_v46, %v11118_v56  ;;  %v3265_v45 = vmul.f32 1.442695, %v3229_v51  ;;  %v3709_v46 = vmul.f32 %v11031_v61, %v10610_v40 }
 0x6fb   : > { %8063 = vpow2.f32 %v2307_v37  ;;  %v6953_v50 = vadd.f32 -1.0, %v8052_v62  ;;  %v11149_v33 = vpop.permute.xlu0 %2237  ;;  %v2272_v51 = vmul.f32 %v11031_v61, %v10654_v35  ;;  %v2752_v35 = vmul.f32 %v11031_v61, %v10675_v60 }
 0x6fc   : > { %14036 = vst [vmem:[#allocation146_spill] sm:$0xff] %v11139_v20  ;;  %8065 = vrcp.f32 %v6921_v17  ;;  %14038 = vst [vmem:[#allocation148_spill] sm:$0xff] %v11149_v33 }
 0x6fd   : > { %8067 = vpow2.f32 %v2787_v49  ;;  %v3745_v49 = vmul.f32 1.442695, %v3709_v46 }
 0x6fe   : > { %v11143_v10 = vpop.permute.xlu1 %3178  ;;  %8069 = vrcp.f32 %v6953_v50 }
 0x6ff   : > { %8071 = vpow2.f32 %v3265_v45  ;;  %v11164_v50 = vpop.permute.xlu0 %2722  ;;  %v2311_v45 = vmul.f32 1.442695, %v2272_v51 }
 0x700   : > { %v8054_v16 = vpop.eup %8053  ;;  %14040 = vst [vmem:[#allocation150_spill] sm:$0xff] %v11164_v50 }
 0x701   : > { %v8056_v1 = vpop.eup %8055  ;;  %v11147_v48 = vmul.f32 %v8054_v16, %v11118_v56  ;;  %v3225_v16 = vmul.f32 %v11031_v61, %v10372_v15 }
 0x702   : > { %6120 = vadd.xlane.f32.xlu0 %v11096_v3  ;;  %v8058_v47 = vpop.eup %8057  ;;  %v6985_v11 = vadd.f32 -1.0, %v8056_v1  ;;  %v11154_v13 = vpop.permute.xlu1 %3658 }
 0x703   : > { %14037 = vst [vmem:[#allocation147_spill] sm:$0xff] %v11147_v48  ;;  %v8060_v37 = vpop.eup %8059  ;;  %v11157_v17 = vmul.f32 %v8058_v47, %v11118_v56  ;;  %v2266_v47 = vmul.f32 %v11031_v61, %v10527_v29  ;;  %v3257_v15 = vmul.f32 1.442695, %v3225_v16  ;;  %v2746_v16 = vmul.f32 %v11031_v61, %v10551_v42  ;;  %v11185_v60 = vpop.permute.xlu0 %6190 }
 0x704   : > { %6212 = vrot.lane.b32.xlu1 %v11005_v6, %s9133_s22  ;;  %v8062_v62 = vpop.eup %8061  ;;  %8073 = vrcp.f32 %v6985_v11  ;;  %v7017_v40 = vadd.f32 -1.0, %v8060_v37 }
 0x705   : > { %14039 = vst [vmem:[#allocation149_spill] sm:$0xff] %v11157_v17  ;;  %v8064_v1 = vpop.eup %8063  ;;  %v11169_v6 = vmul.f32 %v8062_v62, %v11118_v56  ;;  %8075 = vpow2.f32 %v3745_v49  ;;  %v2299_v62 = vmul.f32 1.442695, %v2266_v47  ;;  %v2779_v42 = vmul.f32 1.442695, %v2746_v16 }
 0x706   : > { %6124 = vadd.xlane.f32.xlu0 %v11108_v53  ;;  %v8066_v18 = vpop.eup %8065  ;;  %v11173_v46 = vpop.permute.xlu1 %6184  ;;  %8077 = vrcp.f32 %v7017_v40  ;;  %v6924_v11 = vadd.f32 -1.0, %v8064_v1  ;;  %v14043_v53 = vld [vmem:[#allocation59_spill] sm:$0xff]  ;;  %v3231_v40 = vmul.f32 %v11031_v61, %v10734_v39 }
 0x707   : > { %14041 = vst [vmem:[#allocation151_spill] sm:$0xff] %v11169_v6  ;;  %14042 = vst [vmem:[#allocation152_spill] sm:$0xff] %v11173_v46  ;;  %v8068_v37 = vpop.eup %8067  ;;  %v11178_v29 = vadd.f32 %v14043_v53, %v9618_v4  ;;  %v11183_v49 = vmul.f32 %v8066_v18, %v11118_v56  ;;  %8079 = vpow2.f32 %v3257_v15  ;;  %v2791_v46 = vmul.f32 1.442695, %v2752_v35 }
 0x708   : > { %v8070_v51 = vpop.eup %8069  ;;  %14044 = vst [vmem:[#allocation59_spill] sm:$0xff] %v11185_v60  ;;  %8081 = vpow2.f32 %v2311_v45  ;;  %v6956_v4 = vadd.f32 -1.0, %v8068_v37  ;;  %v3228_v45 = vmul.f32 %v11031_v61, %v10428_v8  ;;  %v3269_v39 = vmul.f32 1.442695, %v3231_v40  ;;  %v11201_v37 = vpop.permute.xlu0 %3214 }
 0x709   : > { %8083 = vrcp.f32 %v6924_v11  ;;  %v8072_v53 = vpop.eup %8071  ;;  %v5260_v1 = vand.u32 2147483647, %v11178_v29  ;;  %v11194_v47 = vmul.f32 %v8070_v51, %v11118_v56  ;;  %v3711_v35 = vmul.f32 %v11031_v61, %v10742_v32  ;;  %14045 = vst [vmem:[#allocation153_spill] sm:$0xff] %v11201_v37 }
 0x70a   : > { %3419 = vmax.xlane.f32.xlu0 %v11121_v14  ;;  %8085 = vpow2.f32 %v2299_v62  ;;  %v11191_v18 = vpop.permute.xlu1 %2222  ;;  %v6987_v11 = vadd.f32 -1.0, %v8072_v53  ;;  %v3708_v40 = vmul.f32 %v11031_v61, %v10434_v21  ;;  %vm5196_vm2 = vcmp.ne.f32.partialorder %v11178_v29, %v11178_v29 }
 0x70b   : > { %8087 = vpow2.f32 %v2791_v46  ;;  %v5292_v16 = vsub.f32 0.0, %v5260_v1  ;;  %v3263_v46 = vmul.f32 1.442695, %v3228_v45  ;;  %v3749_v32 = vmul.f32 1.442695, %v3711_v35 }
 0x70c   : > { %8089 = vrcp.f32 %v6956_v4  ;;  %v2274_v4 = vmul.f32 %v11031_v61, %v10755_v38  ;;  %v3743_v21 = vmul.f32 1.442695, %v3708_v40 }
 0x70d   : > { %8091 = vpow2.f32 %v2779_v42 }
 0x70e   : > { %3899 = vmax.xlane.f32.xlu0 %v11131_v34  ;;  %v8074_v15 = vpop.eup %8073  ;;  %8093 = vpow2.f32 %v3269_v39  ;;  %v11211_v53 = vpop.permute.xlu1 %2710  ;;  %v2315_v38 = vmul.f32 1.442695, %v2274_v4 }
 0x70f   : > { %v8076_v62 = vpop.eup %8075  ;;  %v11205_v51 = vmul.f32 %v8074_v15, %v11118_v56  ;;  %8095 = vrcp.f32 %v6987_v11  ;;  %v5354_v15 = vmul.f32 1.442695, %v5292_v16  ;;  %v11217_v39 = vpop.permute.xlu0 %3694 }
 0x710   : > { %v8078_v8 = vpop.eup %8077  ;;  %v7019_v42 = vadd.f32 -1.0, %v8076_v62  ;;  %8097 = vpow2.f32 %v3263_v46  ;;  %14046 = vst [vmem:[#allocation154_spill] sm:$0xff] %v11217_v39  ;;  %v14057_v39 = vld [vmem:[#allocation82_spill] sm:$0xff] }
 0x711   : > { %v8080_v1 = vpop.eup %8079  ;;  %v11215_v60 = vmul.f32 %v8078_v8, %v11118_v56  ;;  %8099 = vpow2.f32 %v3749_v32  ;;  %v3705_v8 = vmul.f32 %v11031_v61, %v10588_v28 }
 0x712   : > { %2457 = vmax.xlane.f32.xlu0 %v11139_v20  ;;  %8101 = vrcp.f32 %v7019_v42  ;;  %v6983_v16 = vadd.f32 -1.0, %v8080_v1  ;;  %v11224_v46 = vpop.permute.xlu1 %3186 }
 0x713   : > { %8103 = vpow2.f32 %v5354_v15  ;;  %v11232_v42 = vpop.permute.xlu0 %2247  ;;  %v3737_v15 = vmul.f32 1.442695, %v3705_v8 }
 0x714   : > { %8105 = vpow2.f32 %v3743_v21  ;;  %14047 = vst [vmem:[#allocation155_spill] sm:$0xff] %v11232_v42 }
 0x715   : > { %8107 = vpow2.f32 %v2315_v38 }
 0x716   : > { %2937 = vmax.xlane.f32.xlu0 %v11147_v48 }
 0x71a   : > { %2463 = vmax.xlane.f32.xlu0 %v11157_v17 }
 0x71e   : > { %2943 = vmax.xlane.f32.xlu0 %v11169_v6 }
 0x722   : > { %2461 = vmax.xlane.f32.xlu0 %v11183_v49 }
 0x726   : > { %2941 = vmax.xlane.f32.xlu0 %v11194_v47 }
 0x728   : > { %6118 = vadd.xlane.f32.xlu1 %v11036_v12  ;;  %v8082_v12 = vpop.eup %8081 }
 0x729   : > { %v8084_v45 = vpop.eup %8083  ;;  %v6926_v11 = vadd.f32 -1.0, %v8082_v12  ;;  %v3233_v12 = vmul.f32 %v11031_v61, %v10803_v31  ;;  %v3230_v31 = vmul.f32 %v11031_v61, %v10565_v41 }
 0x72a   : > { %3421 = vmax.xlane.f32.xlu0 %v11205_v51  ;;  %v8086_v35 = vpop.eup %8085  ;;  %v11227_v40 = vmul.f32 %v8084_v45, %v11118_v56  ;;  %v2269_v45 = vmul.f32 %v11031_v61, %v10646_v7 }
 0x72b   : > { %v8088_v62 = vpop.eup %8087  ;;  %v6920_v4 = vadd.f32 -1.0, %v8086_v35  ;;  %8109 = vrcp.f32 %v6926_v11  ;;  %v3273_v38 = vmul.f32 1.442695, %v3233_v12  ;;  %v3713_v11 = vmul.f32 %v11031_v61, %v10816_v52 }
 0x72c   : > { %v8090_v32 = vpop.eup %8089  ;;  %v6958_v1 = vadd.f32 -1.0, %v8088_v62  ;;  %8111 = vrcp.f32 %v6983_v16  ;;  %v11243_v62 = vpop.permute.xlu1 %3666  ;;  %v3267_v41 = vmul.f32 1.442695, %v3230_v31 }
 0x72d   : > { %v8092_v17 = vpop.eup %8091  ;;  %v11237_v21 = vmul.f32 %v8090_v32, %v11118_v56  ;;  %8113 = vrcp.f32 %v6920_v4  ;;  %v2305_v32 = vmul.f32 1.442695, %v2269_v45  ;;  %v3753_v12 = vmul.f32 1.442695, %v3713_v11 }
 0x72e   : > { %3901 = vmax.xlane.f32.xlu0 %v11215_v60  ;;  %v8094_v28 = vpop.eup %8093  ;;  %v6952_v24 = vadd.f32 -1.0, %v8092_v17  ;;  %8115 = vpow2.f32 %v2795_v26  ;;  %v11249_v26 = vpop.permute.xlu0 %2730 }
 0x72f   : > { %v8096_v35 = vpop.eup %8095  ;;  %8117 = vrcp.f32 %v6958_v1  ;;  %v6989_v7 = vadd.f32 -1.0, %v8094_v28  ;;  %14049 = vst [vmem:[#allocation157_spill] sm:$0xff] %v11249_v26  ;;  %v2276_v1 = vmul.f32 %v11031_v61, %v10834_v30 }
 0x730   : > { %v8098_v16 = vpop.eup %8097  ;;  %8119 = vpow2.f32 %v3737_v15  ;;  %v11247_v17 = vmul.f32 %v8096_v35, %v11118_v56  ;;  %v11257_v28 = vpop.xlane.xlu1 %6090 }
 0x731   : > { %v8100_v8 = vpop.eup %8099  ;;  %8121 = vrcp.f32 %v6952_v24  ;;  %14050 = vst [vmem:[#allocation158_spill] sm:$0xff] %v11257_v28  ;;  %v6986_v24 = vadd.f32 -1.0, %v8098_v16  ;;  %v2756_v16 = vmul.f32 %v11031_v61, %v10840_v19 }
 0x732   : > { %2467 = vmax.xlane.f32.xlu0 %v11227_v40  ;;  %14048 = vst [vmem:[#allocation156_spill] sm:$0xff] %v11247_v17  ;;  %v8102_v4 = vpop.eup %8101  ;;  %8123 = vpow2.f32 %v3273_v38  ;;  %v7021_v45 = vadd.f32 -1.0, %v8100_v8  ;;  %v3710_v38 = vmul.f32 %v11031_v61, %v10583_v44  ;;  %v11265_v11 = vpop.xlane.xlu0 %6096 }
 0x733   : > { %v11253_v52 = vpop.eup %8103  ;;  %8125 = vrcp.f32 %v6989_v7  ;;  %v11261_v31 = vmul.f32 %v8102_v4, %v11118_v56  ;;  %14052 = vst [vmem:[#allocation160_spill] sm:$0xff] %v11265_v11  ;;  %v2319_v7 = vmul.f32 1.442695, %v2276_v1 }
 0x734   : > { %v8106_v15 = vpop.eup %8105  ;;  %8127 = vpow2.f32 %v2305_v32  ;;  %v5628_v30 = vadd.f32 1.0, %v11253_v52  ;;  %v11277_v11 = vpop.permute.xlu1 %2232  ;;  %v3747_v6 = vmul.f32 1.442695, %v3710_v38  ;;  %v2271_v38 = vmul.f32 %v11031_v61, %v10663_v22 }
 0x735   : > { %v8108_v35 = vpop.eup %8107  ;;  %14051 = vst [vmem:[#allocation159_spill] sm:$0xff] %v11261_v31  ;;  %8129 = vpow2.f32 %v3267_v41  ;;  %v7018_v44 = vadd.f32 -1.0, %v8106_v15  ;;  %v2749_v41 = vmul.f32 %v11031_v61, %v10591_v36 }
 0x736   : > { %2947 = vmax.xlane.f32.xlu0 %v11237_v21  ;;  %8131 = vpow2.f32 %v3753_v12  ;;  %v6928_v32 = vadd.f32 -1.0, %v8108_v35  ;;  %v11282_v19 = vpop.permute.xlu0 %3222  ;;  %v3235_v35 = vmul.f32 %v11031_v61, %v10844_v54 }
 0x737   : > { %8133 = vrcp.f32 %v7021_v45  ;;  %14053 = vst [vmem:[#allocation161_spill] sm:$0xff] %v11282_v19  ;;  %v2799_v45 = vmul.f32 1.442695, %v2756_v16 }
 0x738   : > { %8135 = vrcp.f32 %v6986_v24  ;;  %v3277_v54 = vmul.f32 1.442695, %v3235_v35  ;;  %v14056_v35 = vld [vmem:[#allocation80_spill] sm:$0xff] }
 0x739   : > { %6216 = vrot.lane.b32.xlu1 %v11096_v3, %s9133_s22  ;;  %v8110_v3 = vpop.eup %8109  ;;  %8137 = vlog2.f32 %v5628_v30  ;;  %v3232_v26 = vmul.f32 %v11031_v61, %v14056_v35  ;;  %v3234_v35 = vmul.f32 %v11031_v61, %v14057_v39  ;;  %v2758_v39 = vmul.f32 %v11031_v61, %v10889_v9 }
 0x73a   : > { %3425 = vmax.xlane.f32.xlu0 %v11247_v17  ;;  %v11268_v28 = vpop.eup %8111  ;;  %v11280_v12 = vmul.f32 %v8110_v3, %v11118_v56  ;;  %8139 = vpow2.f32 %v2319_v7  ;;  %v2785_v3 = vmul.f32 1.442695, %v2749_v41  ;;  %v3715_v17 = vmul.f32 %v11031_v61, %v10853_v59  ;;  %v11299_v22 = vpop.permute.xlu0 %3702 }
 0x73b   : > { %v11273_v8 = vpop.eup %8113  ;;  %8141 = vrcp.f32 %v6928_v32  ;;  %v11296_v32 = vpop.permute.xlu1 %2718  ;;  %14054 = vst [vmem:[#allocation162_spill] sm:$0xff] %v11299_v22  ;;  %v5631_v41 = vmul.f32 -0.5, %v11253_v52  ;;  %v5634_v22 = vand.u32 2147483647, %v11253_v52 }
 0x73c   : > { %v8116_v4 = vpop.eup %8115  ;;  %8143 = vrcp.f32 %v7018_v44 }
 0x73d   : > { %v8118_v1 = vpop.eup %8117  ;;  %v6960_v36 = vadd.f32 -1.0, %v8116_v4  ;;  %8145 = vpow2.f32 %v3747_v6  ;;  %v2309_v6 = vmul.f32 1.442695, %v2271_v38  ;;  %vm11333_vm1 = vcmp.lt.f32.partialorder %v5634_v22, 0.0004427343 }
 0x73e   : > { %3905 = vmax.xlane.f32.xlu0 %v11261_v31  ;;  %v8120_v31 = vpop.eup %8119  ;;  %v11292_v30 = vmul.f32 %v8118_v1, %v11118_v56  ;;  %8147 = vpow2.f32 %v2799_v45  ;;  %v5164_v22 = vmax.f32 %v11178_v29, 0.0 }
 0x73f   : > { %v11287_v15 = vpop.eup %8121  ;;  %v7015_v16 = vadd.f32 -1.0, %v8120_v31  ;;  %8149 = vrcp.f32 %v6960_v36  ;;  %v3757_v36 = vmul.f32 1.442695, %v3715_v17  ;;  %v11315_v37 = vpop.permute.xlu1 %3194 }
 0x740   : > { %v8124_v24 = vpop.eup %8123  ;;  %8151 = vpow2.f32 %v2785_v3 }
 0x741   : > { %v8126_v7 = vpop.eup %8125  ;;  %v6991_v44 = vadd.f32 -1.0, %v8124_v24  ;;  %8153 = vrcp.f32 %v7015_v16  ;;  %v2278_v24 = vmul.f32 %v11031_v61, %v10879_v55 }
 0x742   : > { %2471 = vmax.xlane.f32.xlu0 %v11280_v12  ;;  %v8128_v19 = vpop.eup %8127  ;;  %v11303_v31 = vmul.f32 %v8126_v7, %v11118_v56  ;;  %8155 = vpow2.f32 %v3277_v54  ;;  %v5632_v7 = vadd.f32 1.0, %v5631_v41  ;;  %v3271_v54 = vmul.f32 1.442695, %v3232_v26  ;;  %v11322_v41 = vpop.permute.xlu0 %2257 }
 0x743   : > { %v8130_v4 = vpop.eup %8129  ;;  %v6923_v59 = vadd.f32 -1.0, %v8128_v19  ;;  %8157 = vrcp.f32 %v6991_v44  ;;  %14060 = vst [vmem:[#allocation82_spill] sm:$0xff] %v11322_v41 }
 0x744   : > { %v8132_v1 = vpop.eup %8131  ;;  %14055 = vst [vmem:[#allocation163_spill] sm:$0xff] %v11303_v31  ;;  %v6988_v19 = vadd.f32 -1.0, %v8130_v4  ;;  %8159 = vpow2.f32 %v2309_v6  ;;  %v2323_v4 = vmul.f32 1.442695, %v2278_v24  ;;  %v5633_v26 = vmul.f32 %v11253_v52, %v5632_v7  ;;  %v11339_v52 = vpop.permute.xlu1 %3674 }
 0x745   : > { %v8134_v45 = vpop.eup %8133  ;;  %v7023_v38 = vadd.f32 -1.0, %v8132_v1  ;;  %8161 = vrcp.f32 %v6923_v59 }
 0x746   : > { %2951 = vmax.xlane.f32.xlu0 %v11292_v30  ;;  %v11307_v42 = vpop.eup %8135  ;;  %v11318_v17 = vmul.f32 %v8134_v45, %v11118_v56  ;;  %8163 = vpow2.f32 %v3757_v36 }
 0x747   : > { %v8138_v3 = vpop.eup %8137  ;;  %8165 = vrcp.f32 %v7023_v38  ;;  %v2803_v38 = vmul.f32 1.442695, %v2758_v39 }
 0x748   : > { %v8140_v16 = vpop.eup %8139  ;;  %14058 = vst [vmem:[#allocation80_spill] sm:$0xff] %v11318_v17  ;;  %v5630_v20 = vmul.f32 0.6931472, %v8138_v3  ;;  %8167 = vrcp.f32 %v6988_v19  ;;  %v3237_v3 = vmul.f32 %v11031_v61, %v10901_v0  ;;  %v11345_v19 = vpop.permute.xlu0 %2738 }
 0x749   : > { %v8142_v55 = vpop.eup %8141  ;;  %v6930_v45 = vadd.f32 -1.0, %v8140_v16  ;;  %8169 = vpow2.f32 %v3271_v54  ;;  %14064 = vst [vmem:[#allocation164_spill] sm:$0xff] %v11345_v19 }
 0x74a   : > { %3429 = vmax.xlane.f32.xlu0 %v11303_v31  ;;  %v14059_v31 = vld [vmem:[#allocation83_spill] sm:$0xff]  ;;  %v11324_v1 = vpop.eup %8143  ;;  %v11331_v41 = vmul.f32 %v8142_v55, %v11118_v56  ;;  %8171 = vpow2.f32 %v2323_v4 }
 0x74b   : > { %v3712_v44 = vmul.f32 %v11031_v61, %v14059_v31  ;;  %v8146_v6 = vpop.eup %8145  ;;  %v3275_v31 = vmul.f32 1.442695, %v3234_v35  ;;  %8173 = vrcp.f32 %v6930_v45  ;;  %v5636_v35 = vsel %vm11333_vm1, %v5633_v26, %v5630_v20 }
 0x74c   : > { %v8148_v59 = vpop.eup %8147  ;;  %14061 = vst [vmem:[#allocation83_spill] sm:$0xff] %v11331_v41  ;;  %v7020_v54 = vadd.f32 -1.0, %v8146_v6  ;;  %v3281_v45 = vmul.f32 1.442695, %v3237_v3  ;;  %v5676_v26 = vadd.f32 %v5636_v35, %v5164_v22 }
 0x74d   : > { %v8150_v24 = vpop.eup %8149  ;;  %v3751_v9 = vmul.f32 1.442695, %v3712_v44  ;;  %v6962_v16 = vadd.f32 -1.0, %v8148_v59  ;;  %8175 = vpow2.f32 %v3275_v31  ;;  %v14065_v44 = vld [vmem:[#allocation84_spill] sm:$0xff]  ;;  %v14067_v59 = vld [vmem:[#allocation103_spill] sm:$0xff] }
 0x74e   : > { %3909 = vmax.xlane.f32.xlu0 %v11318_v17  ;;  %v8152_v17 = vpop.eup %8151  ;;  %v3714_v0 = vmul.f32 %v11031_v61, %v14065_v44  ;;  %v11352_v4 = vmul.f32 %v8150_v24, %v11118_v56  ;;  %v3717_v19 = vmul.f32 %v11031_v61, %v14067_v59  ;;  %v14068_v24 = vld [vmem:[#allocation85_spill] sm:$0xff]  ;;  %v14071_v59 = vld [vmem:[#allocation86_spill] sm:$0xff] }
 0x74f   : > { %v11342_v7 = vpop.eup %8153  ;;  %8177 = vpow2.f32 %v3751_v9  ;;  %v11361_v9 = vpop.permute.xlu1 %6188 }
 0x750   : > { %v8156_v55 = vpop.eup %8155  ;;  %14066 = vst [vmem:[#allocation84_spill] sm:$0xff] %v11352_v4  ;;  %8179 = vpow2.f32 %v2803_v38  ;;  %v3755_v36 = vmul.f32 1.442695, %v3714_v0  ;;  %14069 = vst [vmem:[#allocation103_spill] sm:$0xff] %v11361_v9  ;;  %v3761_v35 = vmul.f32 1.442695, %v3717_v19 }
 0x751   : > { %v8158_v39 = vpop.eup %8157  ;;  %8181 = vrcp.f32 %v6962_v16  ;;  %v6993_v6 = vadd.f32 -1.0, %v8156_v55  ;;  %v11368_v16 = vpop.permute.xlu0 %6194  ;;  %v14073_v55 = vld [vmem:[#allocation115_spill] sm:$0xff] }
 0x752   : > { %2475 = vmax.xlane.f32.xlu0 %v11331_v41  ;;  %v6955_v41 = vadd.f32 -1.0, %v8152_v17  ;;  %v8160_v48 = vpop.eup %8159  ;;  %8183 = vrcp.f32 %v7020_v54  ;;  %v2751_v17 = vmul.f32 %v11031_v61, %v14068_v24  ;;  %v11364_v38 = vmul.f32 %v8158_v39, %v11118_v56  ;;  %14072 = vst [vmem:[#allocation86_spill] sm:$0xff] %v11368_v16 }
 0x753   : > { %v11357_v20 = vpop.eup %8161  ;;  %v6925_v44 = vadd.f32 -1.0, %v8160_v48  ;;  %v2280_v54 = vmul.f32 %v11031_v61, %v14073_v55  ;;  %v11378_v24 = vsel %vm5196_vm2, %v11178_v29, %v5676_v26 }
 0x754   : > { %v8164_v31 = vpop.eup %8163  ;;  %14070 = vst [vmem:[#allocation85_spill] sm:$0xff] %v11364_v38  ;;  %8185 = vrcp.f32 %v6955_v41  ;;  %v2789_v39 = vmul.f32 1.442695, %v2751_v17  ;;  %14074 = vst [vmem:[#allocation115_spill] sm:$0xff] %v11378_v24  ;;  %v11388_v17 = vpop.permute.xlu1 %2242 }
 0x755   : > { %v8166_v3 = vpop.eup %8165  ;;  %8187 = vpow2.f32 %v3281_v45  ;;  %v7025_v48 = vadd.f32 -1.0, %v8164_v31  ;;  %v11383_v45 = vpop.xlane.xlu0 %6100  ;;  %v14077_v31 = vld [vmem:[#allocation120_spill] sm:$0xff] }
 0x756   : > { %2955 = vmax.xlane.f32.xlu0 %v11352_v4  ;;  %v2273_v4 = vmul.f32 %v11031_v61, %v14071_v59  ;;  %v11372_v22 = vpop.eup %8167  ;;  %8189 = vrcp.f32 %v6993_v6  ;;  %v11381_v59 = vmul.f32 %v8166_v3, %v11118_v56  ;;  %14076 = vst [vmem:[#allocation166_spill] sm:$0xff] %v11383_v45  ;;  %v2327_v6 = vmul.f32 1.442695, %v2280_v54 }
 0x757   : > { %v8170_v0 = vpop.eup %8169  ;;  %8191 = vpow2.f32 %v3755_v36  ;;  %v2760_v36 = vmul.f32 %v11031_v61, %v14077_v31  ;;  %v14079_v31 = vld [vmem:[#allocation89_spill] sm:$0xff] }
 0x758   : > { %v8172_v41 = vpop.eup %8171  ;;  %14075 = vst [vmem:[#allocation165_spill] sm:$0xff] %v11381_v59  ;;  %8193 = vrcp.f32 %v6925_v44  ;;  %v2313_v19 = vmul.f32 1.442695, %v2273_v4  ;;  %v11393_v4 = vmul.f32 %v11273_v8, %v11118_v56  ;;  %v6990_v44 = vadd.f32 -1.0, %v8170_v0  ;;  %v14080_v8 = vld [vmem:[#allocation122_spill] sm:$0xff] }
 0x759   : > { %v8174_v9 = vpop.eup %8173  ;;  %8195 = vpow2.f32 %v3761_v35  ;;  %v6932_v26 = vadd.f32 -1.0, %v8172_v41  ;;  %v3236_v16 = vmul.f32 %v11031_v61, %v14079_v31  ;;  %v2807_v41 = vmul.f32 1.442695, %v2760_v36 }
 0x75a   : > { %3433 = vmax.xlane.f32.xlu0 %v11364_v38  ;;  %v8176_v55 = vpop.eup %8175  ;;  %8197 = vrcp.f32 %v7025_v48  ;;  %v11396_v35 = vmul.f32 %v8174_v9, %v11118_v56 }
 0x75b   : > { %v8178_v29 = vpop.eup %8177  ;;  %8199 = vpow2.f32 %v2789_v39  ;;  %v6992_v45 = vadd.f32 -1.0, %v8176_v55  ;;  %v11408_v39 = vpop.permute.xlu0 %6198 }
 0x75c   : > { %v8180_v3 = vpop.eup %8179  ;;  %14078 = vst [vmem:[#allocation120_spill] sm:$0xff] %v11396_v35  ;;  %8201 = vpow2.f32 %v2313_v19  ;;  %14081 = vst [vmem:[#allocation89_spill] sm:$0xff] %v11408_v39  ;;  %v11412_v19 = vmul.f32 %v11287_v15, %v11118_v56  ;;  %v7022_v31 = vadd.f32 -1.0, %v8178_v29  ;;  %v14084_v39 = vld [vmem:[#allocation124_spill] sm:$0xff] }
 0x75d   : > { %6122 = vadd.xlane.f32.xlu1 %v11378_v24  ;;  %v8182_v54 = vpop.eup %8181  ;;  %8203 = vpow2.f32 %v2327_v6  ;;  %v3239_v24 = vmul.f32 %v11031_v61, %v14080_v8  ;;  %v6964_v9 = vadd.f32 -1.0, %v8180_v3  ;;  %v14082_v6 = vld [vmem:[#allocation36_spill] sm:$0xff] }
 0x75e   : > { %3913 = vmax.xlane.f32.xlu0 %v11381_v59  ;;  %v11401_v48 = vpop.eup %8183  ;;  %8205 = vrcp.f32 %v6932_v26  ;;  %v3716_v36 = vmul.f32 %v11031_v61, %v14082_v6  ;;  %v11416_v59 = vpop.permute.xlu1 %2726  ;;  %v11419_v8 = vmul.f32 %v8182_v54, %v11118_v56  ;;  %v3279_v26 = vmul.f32 1.442695, %v3236_v16 }
 0x75f   : > { %v11406_v0 = vpop.eup %8185  ;;  %8207 = vrcp.f32 %v6990_v44  ;;  %v3285_v15 = vmul.f32 1.442695, %v3239_v24  ;;  %v3719_v44 = vmul.f32 %v11031_v61, %v14084_v39  ;;  %v11427_v38 = vpop.xlane.xlu0 %6104 }
 0x760   : > { %v8188_v55 = vpop.eup %8187  ;;  %14083 = vst [vmem:[#allocation122_spill] sm:$0xff] %v11419_v8  ;;  %8209 = vrcp.f32 %v6992_v45  ;;  %14085 = vst [vmem:[#allocation36_spill] sm:$0xff] %v11427_v38  ;;  %v11431_v45 = vmul.f32 %v11268_v28, %v11118_v56  ;;  %v3759_v54 = vmul.f32 1.442695, %v3716_v36  ;;  %v14089_v38 = vld [vmem:[#allocation61_spill] sm:$0xff] }
 0x761   : > { %2459 = vmax.xlane.f32.xlu1 %v11393_v4  ;;  %8211 = vpow2.f32 %v2807_v41  ;;  %v6995_v6 = vadd.f32 -1.0, %v8188_v55  ;;  %v14087_v41 = vld [vmem:[#allocation90_spill] sm:$0xff]  ;;  %v3765_v55 = vmul.f32 1.442695, %v3719_v44  ;;  %v2282_v28 = vmul.f32 %v11031_v61, %v14089_v38 }
 0x762   : > { %2479 = vmax.xlane.f32.xlu0 %v11396_v35  ;;  %v8190_v35 = vpop.eup %8189  ;;  %8213 = vrcp.f32 %v6964_v9  ;;  %14086 = vst [vmem:[#allocation124_spill] sm:$0xff] %v11431_v45  ;;  %v2275_v24 = vmul.f32 %v11031_v61, %v14087_v41  ;;  %v11441_v33 = vpop.permute.xlu1 %3202  ;;  %v14091_v41 = vld [vmem:[#allocation92_spill] sm:$0xff] }
 0x763   : > { %v8192_v3 = vpop.eup %8191  ;;  %8215 = vrcp.f32 %v7022_v31  ;;  %v11436_v39 = vmul.f32 %v8190_v35, %v11118_v56  ;;  %v11446_v35 = vmul.f32 %v11342_v7, %v11118_v56 }
 0x764   : > { %v11425_v29 = vpop.eup %8193  ;;  %v7024_v50 = vadd.f32 -1.0, %v8192_v3  ;;  %8217 = vpow2.f32 %v3279_v26  ;;  %v2317_v3 = vmul.f32 1.442695, %v2275_v24  ;;  %v11463_v24 = vld [vmem:[%s13578_s9] ss:$0 sm:$0xff] }
 0x765   : > { %2939 = vmax.xlane.f32.xlu1 %v11412_v19  ;;  %v8196_v16 = vpop.eup %8195  ;;  %14088 = vst [vmem:[#allocation90_spill] sm:$0xff] %v11436_v39  ;;  %8219 = vpow2.f32 %v3285_v15  ;;  %14090 = vst [vmem:[#allocation61_spill] sm:$0xff] %v11446_v35  ;;  %v2755_v15 = vmul.f32 %v11031_v61, %v14091_v41 }
 0x766   : > { %2959 = vmax.xlane.f32.xlu0 %v11419_v8  ;;  %v8198_v8 = vpop.eup %8197  ;;  %8221 = vrcp.f32 %v6995_v6  ;;  %v7027_v36 = vadd.f32 -1.0, %v8196_v16  ;;  %v11455_v16 = vpop.permute.xlu0 %6202 }
 0x767   : > { %v8200_v9 = vpop.eup %8199  ;;  %8223 = vpow2.f32 %v3759_v54  ;;  %v11451_v44 = vmul.f32 %v8198_v8, %v11118_v56  ;;  %v2331_v54 = vmul.f32 1.442695, %v2282_v28  ;;  %v14096_v28 = vld [vmem:[#allocation95_spill] sm:$0xff] }
 0x768   : > { %v8202_v31 = vpop.eup %8201  ;;  %8225 = vrcp.f32 %v7024_v50  ;;  %v2762_v50 = vmul.f32 %v11463_v24, %v11015_v58  ;;  %v3238_v41 = vmul.f32 %v11463_v24, %v14096_v28 }
 0x769   : > { %3417 = vmax.xlane.f32.xlu1 %v11431_v45  ;;  %v8204_v26 = vpop.eup %8203  ;;  %14092 = vst [vmem:[#allocation92_spill] sm:$0xff] %v11451_v44  ;;  %v6957_v45 = vadd.f32 -1.0, %v8200_v9  ;;  %8227 = vpow2.f32 %v3765_v55  ;;  %v2797_v55 = vmul.f32 1.442695, %v2755_v15 }
 0x76a   : > { %3437 = vmax.xlane.f32.xlu0 %v11436_v39  ;;  %v8206_v38 = vpop.eup %8205  ;;  %v14093_v39 = vld [vmem:[#allocation91_spill] sm:$0xff]  ;;  %8229 = vrcp.f32 %v7027_v36  ;;  %v11481_v36 = vpop.xlane.xlu0 %6108  ;;  %v3283_v28 = vmul.f32 1.442695, %v3238_v41 }
 0x76b   : > { %v2753_v6 = vmul.f32 %v11031_v61, %v14093_v39  ;;  %14094 = vst [vmem:[#allocation91_spill] sm:$0xff] %v11455_v16  ;;  %v11458_v7 = vpop.eup %8207  ;;  %v6934_v61 = vadd.f32 -1.0, %v8204_v26  ;;  %v11472_v39 = vmul.f32 %v11307_v42, %v11118_v56  ;;  %8231 = vpow2.f32 %v2317_v3  ;;  %v11476_v16 = vpop.permute.xlu1 %3682  ;;  %14098 = vst [vmem:[#allocation168_spill] sm:$0xff] %v11481_v36 }
 0x76c   : > { %v11468_v8 = vpop.eup %8209  ;;  %v11479_v58 = vmul.f32 %v8206_v38, %v11118_v56  ;;  %8233 = vrcp.f32 %v6957_v45  ;;  %v2811_v26 = vmul.f32 1.442695, %v2762_v50  ;;  %v3241_v3 = vmul.f32 %v11463_v24, %v11019_v63 }
 0x76d   : > { %3897 = vmax.xlane.f32.xlu1 %v11446_v35  ;;  %14095 = vst [vmem:[#allocation167_spill] sm:$0xff] %v11472_v39  ;;  %v8212_v9 = vpop.eup %8211  ;;  %v2793_v35 = vmul.f32 1.442695, %v2753_v6  ;;  %8235 = vpow2.f32 %v2331_v54  ;;  %v11491_v45 = vmul.f32 %v11324_v1, %v11118_v56 }
 0x76e   : > { %3917 = vmax.xlane.f32.xlu0 %v11451_v44  ;;  %14097 = vst [vmem:[#allocation95_spill] sm:$0xff] %v11479_v58  ;;  %v8214_v44 = vpop.eup %8213  ;;  %8237 = vrcp.f32 %v6934_v61  ;;  %v6966_v38 = vadd.f32 -1.0, %v8212_v9  ;;  %v3289_v61 = vmul.f32 1.442695, %v3241_v3  ;;  %v14102_v9 = vld [vmem:[#allocation132_spill] sm:$0xff] }
 0x76f   : > { %v11484_v42 = vpop.eup %8215  ;;  %14099 = vst [vmem:[#allocation169_spill] sm:$0xff] %v11491_v45  ;;  %8239 = vpow2.f32 %v2797_v55  ;;  %v11493_v36 = vpop.xlane.xlu1 %6094  ;;  %v11496_v54 = vmul.f32 %v8214_v44, %v11118_v56  ;;  %v3721_v1 = vmul.f32 %v11463_v24, %v14102_v9 }
 0x770   : > { %v8218_v15 = vpop.eup %8217  ;;  %14100 = vst [vmem:[#allocation170_spill] sm:$0xff] %v11493_v36  ;;  %8241 = vpow2.f32 %v2793_v35  ;;  %v11504_v36 = vpop.permute.xlu0 %6206 }
 0x771   : > { %3423 = vmax.xlane.f32.xlu1 %v11472_v39  ;;  %v8220_v6 = vpop.eup %8219  ;;  %14101 = vst [vmem:[#allocation171_spill] sm:$0xff] %v11496_v54  ;;  %v6927_v39 = vadd.f32 -1.0, %v8202_v31  ;;  %8243 = vpow2.f32 %v2811_v26  ;;  %14103 = vst [vmem:[#allocation132_spill] sm:$0xff] %v11504_v36  ;;  %v11508_v31 = vmul.f32 %v11372_v22, %v11118_v56  ;;  %v6994_v44 = vadd.f32 -1.0, %v8218_v15  ;;  %v14105_v26 = vld [vmem:[#allocation97_spill] sm:$0xff] }
 0x772   : > { %2483 = vmax.xlane.f32.xlu0 %v11479_v58  ;;  %v8222_v50 = vpop.eup %8221  ;;  %8245 = vrcp.f32 %v6966_v38  ;;  %v6997_v41 = vadd.f32 -1.0, %v8220_v6  ;;  %v3718_v3 = vmul.f32 %v11463_v24, %v14105_v26  ;;  %v3769_v6 = vmul.f32 1.442695, %v3721_v1  ;;  %v14107_v36 = vld [vmem:[#allocation137_spill] sm:$0xff]  ;;  %v14110_v1 = vld [vmem:[#allocation99_spill] sm:$0xff] }
 0x773   : > { %v8224_v63 = vpop.eup %8223  ;;  %14104 = vst [vmem:[#allocation172_spill] sm:$0xff] %v11508_v31  ;;  %8247 = vpow2.f32 %v3283_v28  ;;  %v11513_v9 = vmul.f32 %v8222_v50, %v11118_v56  ;;  %v2284_v22 = vmul.f32 %v11463_v24, %v14107_v36  ;;  %v2277_v36 = vmul.f32 %v11463_v24, %v14110_v1 }
 0x774   : > { %v11502_v55 = vpop.eup %8225  ;;  %8249 = vrcp.f32 %v6927_v39  ;;  %v11523_v50 = vpop.xlane.xlu0 %6112  ;;  %v11527_v39 = vmul.f32 %v11401_v48, %v11118_v56 }
 0x775   : > { %3903 = vmax.xlane.f32.xlu1 %v11491_v45  ;;  %v8228_v35 = vpop.eup %8227  ;;  %14106 = vst [vmem:[#allocation97_spill] sm:$0xff] %v11513_v9  ;;  %8251 = vpow2.f32 %v3289_v61  ;;  %v11518_v45 = vpop.permute.xlu1 %2252  ;;  %14108 = vst [vmem:[#allocation137_spill] sm:$0xff] %v11523_v50  ;;  %v3763_v61 = vmul.f32 1.442695, %v3718_v3  ;;  %v14112_v50 = vld [vmem:[#allocation139_spill] sm:$0xff] }
 0x776   : > { %2963 = vmax.xlane.f32.xlu0 %v11496_v54  ;;  %v8230_v58 = vpop.eup %8229  ;;  %v7026_v54 = vadd.f32 -1.0, %v8224_v63  ;;  %8253 = vrcp.f32 %v6997_v41  ;;  %v7029_v28 = vadd.f32 -1.0, %v8228_v35  ;;  %14109 = vst [vmem:[#allocation173_spill] sm:$0xff] %v11527_v39  ;;  %v2335_v35 = vmul.f32 1.442695, %v2284_v22 }
 0x777   : > { %v8232_v38 = vpop.eup %8231  ;;  %8255 = vrcp.f32 %v6994_v44  ;;  %v11532_v26 = vmul.f32 %v8230_v58, %v11118_v56  ;;  %v2764_v48 = vmul.f32 %v11463_v24, %v14112_v50  ;;  %v11540_v58 = vmul.f32 %v11357_v20, %v11118_v56  ;;  %v14116_v20 = vld [vmem:[#allocation141_spill] sm:$0xff] }
 0x778   : > { %v11521_v15 = vpop.eup %8233  ;;  %8257 = vrcp.f32 %v7026_v54  ;;  %v2321_v54 = vmul.f32 1.442695, %v2277_v36 }
 0x779   : > { %3427 = vmax.xlane.f32.xlu1 %v11508_v31  ;;  %v8236_v63 = vpop.eup %8235  ;;  %14111 = vst [vmem:[#allocation99_spill] sm:$0xff] %v11532_v26  ;;  %v6929_v31 = vadd.f32 -1.0, %v8232_v38  ;;  %8259 = vpow2.f32 %v3769_v6  ;;  %14113 = vst [vmem:[#allocation139_spill] sm:$0xff] %v11540_v58  ;;  %v11542_v38 = vpop.permute.xlu1 %2734 }
 0x77a   : > { %3441 = vmax.xlane.f32.xlu0 %v11513_v9  ;;  %v8238_v9 = vpop.eup %8237  ;;  %8261 = vrcp.f32 %v7029_v28  ;;  %v6936_v3 = vadd.f32 -1.0, %v8236_v63  ;;  %v2815_v63 = vmul.f32 1.442695, %v2764_v48 }
 0x77b   : > { %v8240_v41 = vpop.eup %8239  ;;  %8263 = vpow2.f32 %v3763_v61  ;;  %v11545_v6 = vmul.f32 %v8238_v9, %v11118_v56 }
 0x77c   : > { %v8242_v44 = vpop.eup %8241  ;;  %8265 = vrcp.f32 %v6929_v31  ;;  %v6961_v50 = vadd.f32 -1.0, %v8240_v41  ;;  %v11558_v31 = vld [vmem:[%s13579_s10] ss:$0 sm:$0xff] }
 0x77d   : > { %3907 = vmax.xlane.f32.xlu1 %v11527_v39  ;;  %v8244_v1 = vpop.eup %8243  ;;  %14114 = vst [vmem:[#allocation174_spill] sm:$0xff] %v11545_v6  ;;  %v11547_v39 = vpop.permute.xlu0 %6210  ;;  %8267 = vpow2.f32 %v2335_v35  ;;  %v11562_v9 = vmul.f32 %v11558_v31, %v11406_v0  ;;  %v6959_v41 = vadd.f32 -1.0, %v8242_v44  ;;  %v14118_v35 = vld [vmem:[#allocation100_spill] sm:$0xff] }
 0x77e   : > { %3921 = vmax.xlane.f32.xlu0 %v11532_v26  ;;  %v8246_v22 = vpop.eup %8245  ;;  %14115 = vst [vmem:[#allocation175_spill] sm:$0xff] %v11547_v39  ;;  %v3243_v26 = vmul.f32 %v11463_v24, %v14116_v20  ;;  %8269 = vrcp.f32 %v6936_v3  ;;  %v6968_v56 = vadd.f32 -1.0, %v8244_v1  ;;  %v2757_v48 = vmul.f32 %v11463_v24, %v14118_v35  ;;  %v14120_v39 = vld [vmem:[#allocation48_spill] sm:$0xff]  ;;  %v11578_v35 = vpop.permute.xlu1 %3210 }
 0x77f   : > { %v8248_v28 = vpop.eup %8247  ;;  %14117 = vst [vmem:[#allocation141_spill] sm:$0xff] %v11562_v9  ;;  %8271 = vpow2.f32 %v2321_v54  ;;  %v11567_v20 = vmul.f32 %v11558_v31, %v8246_v22  ;;  %v3723_v54 = vmul.f32 %v11463_v24, %v11082_v57 }
 0x780   : > { %v11553_v61 = vpop.eup %8249  ;;  %8273 = vrcp.f32 %v6961_v50  ;;  %v6996_v1 = vadd.f32 -1.0, %v8248_v28  ;;  %v3293_v44 = vmul.f32 1.442695, %v3243_v26 }
 0x781   : > { %2465 = vmax.xlane.f32.xlu1 %v11540_v58  ;;  %v8252_v36 = vpop.eup %8251  ;;  %14119 = vst [vmem:[#allocation100_spill] sm:$0xff] %v11567_v20  ;;  %v11571_v58 = vpop.xlane.xlu0 %6116  ;;  %8275 = vpow2.f32 %v2815_v63  ;;  %v14123_v63 = vld [vmem:[#allocation104_spill] sm:$0xff] }
 0x782   : > { %2487 = vmax.xlane.f32.xlu0 %v11545_v6  ;;  %v8254_v3 = vpop.eup %8253  ;;  %v3240_v6 = vmul.f32 %v11463_v24, %v14120_v39  ;;  %14121 = vst [vmem:[#allocation48_spill] sm:$0xff] %v11571_v58  ;;  %8277 = vrcp.f32 %v6968_v56  ;;  %v6999_v50 = vadd.f32 -1.0, %v8252_v36  ;;  %v11585_v39 = vmul.f32 %v11558_v31, %v11458_v7 }
 0x783   : > { %v11574_v0 = vpop.eup %8255  ;;  %8279 = vrcp.f32 %v6959_v41  ;;  %v2801_v58 = vmul.f32 1.442695, %v2757_v48  ;;  %v3720_v26 = vmul.f32 %v11463_v24, %v14123_v63  ;;  %v11590_v57 = vmul.f32 %v11558_v31, %v8254_v3 }
 0x784   : > { %v11581_v22 = vpop.eup %8257  ;;  %14122 = vst [vmem:[#allocation176_spill] sm:$0xff] %v11585_v39  ;;  %8281 = vrcp.f32 %v6996_v1  ;;  %v3773_v36 = vmul.f32 1.442695, %v3723_v54  ;;  %v2286_v7 = vmul.f32 %v11463_v24, %v11112_v2  ;;  %v11602_v3 = vmul.f32 %v11558_v31, %v11484_v42 }
 0x785   : > { %2945 = vmax.xlane.f32.xlu1 %v11562_v9  ;;  %v8260_v28 = vpop.eup %8259  ;;  %14124 = vst [vmem:[#allocation104_spill] sm:$0xff] %v11590_v57  ;;  %8283 = vpow2.f32 %v3293_v44  ;;  %v11598_v63 = vpop.permute.xlu0 %6214  ;;  %v3767_v1 = vmul.f32 1.442695, %v3720_v26  ;;  %v14127_v44 = vld [vmem:[#allocation105_spill] sm:$0xff] }
 0x786   : > { %2967 = vmax.xlane.f32.xlu0 %v11567_v20  ;;  %v8262_v9 = vpop.eup %8261  ;;  %v3287_v20 = vmul.f32 1.442695, %v3240_v6  ;;  %8285 = vrcp.f32 %v6999_v50  ;;  %v7031_v48 = vadd.f32 -1.0, %v8260_v28  ;;  %14125 = vst [vmem:[#allocation177_spill] sm:$0xff] %v11598_v63  ;;  %14126 = vst [vmem:[#allocation178_spill] sm:$0xff] %v11602_v3  ;;  %v2279_v54 = vmul.f32 %v11463_v24, %v14127_v44 }
 0x787   : > { %v8264_v56 = vpop.eup %8263  ;;  %8287 = vpow2.f32 %v2801_v58  ;;  %v11609_v2 = vmul.f32 %v11558_v31, %v8262_v9  ;;  %v2339_v42 = vmul.f32 1.442695, %v2286_v7  ;;  %v2766_v58 = vmul.f32 %v11463_v24, %v11128_v25 }
 0x788   : > { %v11596_v41 = vpop.eup %8265  ;;  %v7028_v50 = vadd.f32 -1.0, %v8264_v56  ;;  %8289 = vpow2.f32 %v3287_v20  ;;  %v11619_v9 = vmul.f32 %v11558_v31, %v11425_v29  ;;  %v2325_v63 = vmul.f32 1.442695, %v2279_v54 }
 0x789   : > { %3431 = vmax.xlane.f32.xlu1 %v11585_v39  ;;  %v8268_v6 = vpop.eup %8267  ;;  %v11606_v39 = vpop.permute.xlu1 %3690  ;;  %14128 = vst [vmem:[#allocation105_spill] sm:$0xff] %v11609_v2  ;;  %8291 = vpow2.f32 %v3773_v36  ;;  %v14131_v36 = vld [vmem:[#allocation106_spill] sm:$0xff] }
 0x78a   : > { %3445 = vmax.xlane.f32.xlu0 %v11590_v57  ;;  %v8270_v57 = vpop.eup %8269  ;;  %8293 = vrcp.f32 %v7031_v48  ;;  %v6938_v44 = vadd.f32 -1.0, %v8268_v6  ;;  %14129 = vst [vmem:[#allocation179_spill] sm:$0xff] %v11619_v9  ;;  %v2759_v7 = vmul.f32 %v11463_v24, %v14131_v36  ;;  %v14133_v48 = vld [vmem:[#allocation108_spill] sm:$0xff] }
 0x78b   : > { %v8272_v28 = vpop.eup %8271  ;;  %8295 = vpow2.f32 %v3767_v1  ;;  %v11626_v25 = vmul.f32 %v11558_v31, %v8270_v57  ;;  %v3242_v6 = vmul.f32 %v11463_v24, %v14133_v48  ;;  %v3245_v1 = vmul.f32 %v11463_v24, %v11143_v10 }
 0x78c   : > { %v11615_v26 = vpop.eup %8273  ;;  %8297 = vrcp.f32 %v7028_v50 }
 0x78d   : > { %3911 = vmax.xlane.f32.xlu1 %v11602_v3  ;;  %v8276_v20 = vpop.eup %8275  ;;  %14132 = vst [vmem:[#allocation106_spill] sm:$0xff] %v11626_v25  ;;  %v6931_v3 = vadd.f32 -1.0, %v8272_v28  ;;  %8299 = vpow2.f32 %v2339_v42  ;;  %v11635_v54 = vpop.permute.xlu1 %6192  ;;  %v11642_v28 = vmul.f32 %v11558_v31, %v11521_v15  ;;  %v2805_v42 = vmul.f32 1.442695, %v2759_v7 }
 0x78e   : > { %3925 = vmax.xlane.f32.xlu0 %v11609_v2  ;;  %v8278_v2 = vpop.eup %8277  ;;  %14134 = vst [vmem:[#allocation108_spill] sm:$0xff] %v11635_v54  ;;  %8301 = vrcp.f32 %v6938_v44  ;;  %v6970_v50 = vadd.f32 -1.0, %v8276_v20  ;;  %v3297_v15 = vmul.f32 1.442695, %v3245_v1  ;;  %v3725_v20 = vmul.f32 %v11463_v24, %v11154_v13 }
 0x78f   : > { %v11621_v56 = vpop.xlane.xlu0 %6120  ;;  %v11631_v29 = vpop.eup %8279  ;;  %14135 = vst [vmem:[#allocation181_spill] sm:$0xff] %v11642_v28  ;;  %8303 = vpow2.f32 %v2325_v63  ;;  %v11649_v54 = vmul.f32 %v11558_v31, %v8278_v2  ;;  %v11657_v2 = vmul.f32 %v11558_v31, %v11468_v8  ;;  %v2288_v8 = vmul.f32 %v11463_v24, %v11191_v18 }
 0x790   : > { %14130 = vst [vmem:[#allocation180_spill] sm:$0xff] %v11621_v56  ;;  %v2819_v56 = vmul.f32 1.442695, %v2766_v58  ;;  %v11638_v57 = vpop.eup %8281  ;;  %v14137_v58 = vld [vmem:[#allocation109_spill] sm:$0xff]  ;;  %8305 = vrcp.f32 %v6931_v3 }
 0x791   : > { %2469 = vmax.xlane.f32.xlu1 %v11619_v9  ;;  %v8284_v48 = vpop.eup %8283  ;;  %v3722_v10 = vmul.f32 %v11463_v24, %v14137_v58  ;;  %14138 = vst [vmem:[#allocation109_spill] sm:$0xff] %v11649_v54  ;;  %v3291_v9 = vmul.f32 1.442695, %v3242_v6  ;;  %14139 = vst [vmem:[#allocation183_spill] sm:$0xff] %v11657_v2 }
 0x792   : > { %2491 = vmax.xlane.f32.xlu0 %v11626_v25  ;;  %v8286_v25 = vpop.eup %8285  ;;  %8307 = vpow2.f32 %v2819_v56  ;;  %v7001_v7 = vadd.f32 -1.0, %v8284_v48  ;;  %v3777_v48 = vmul.f32 1.442695, %v3725_v20 }
 0x793   : > { %v11644_v36 = vpop.xlane.xlu0 %6124  ;;  %v8288_v44 = vpop.eup %8287  ;;  %8309 = vrcp.f32 %v6970_v50  ;;  %v3771_v6 = vmul.f32 1.442695, %v3722_v10  ;;  %v11664_v56 = vmul.f32 %v11558_v31, %v8286_v25  ;;  %v11674_v25 = vmul.f32 %v11558_v31, %v11502_v55 }
 0x794   : > { %14136 = vst [vmem:[#allocation182_spill] sm:$0xff] %v11644_v36  ;;  %v8290_v63 = vpop.eup %8289  ;;  %8311 = vpow2.f32 %v2805_v42  ;;  %v11661_v36 = vpop.permute.xlu1 %2262  ;;  %v6963_v1 = vadd.f32 -1.0, %v8288_v44  ;;  %v2343_v55 = vmul.f32 1.442695, %v2288_v8  ;;  %v14145_v8 = vld [vmem:[#allocation112_spill] sm:$0xff] }
 0x795   : > { %2949 = vmax.xlane.f32.xlu1 %v11642_v28  ;;  %v8292_v3 = vpop.eup %8291  ;;  %14140 = vst [vmem:[#allocation184_spill] sm:$0xff] %v11664_v56  ;;  %8313 = vpow2.f32 %v3291_v9  ;;  %14141 = vst [vmem:[#allocation185_spill] sm:$0xff] %v11674_v25 }
 0x796   : > { %2971 = vmax.xlane.f32.xlu0 %v11649_v54  ;;  %v8294_v13 = vpop.eup %8293  ;;  %8315 = vpow2.f32 %v3297_v15  ;;  %v7033_v10 = vadd.f32 -1.0, %v8292_v3  ;;  %v6998_v54 = vadd.f32 -1.0, %v8290_v63  ;;  %v14142_v15 = vld [vmem:[#allocation111_spill] sm:$0xff]  ;;  %v2768_v3 = vmul.f32 %v11463_v24, %v11211_v53 }
 0x797   : > { %v11659_v58 = vpop.xlane.xlu0 %3419  ;;  %v8296_v50 = vpop.eup %8295  ;;  %8317 = vrcp.f32 %v7001_v7  ;;  %v2281_v20 = vmul.f32 %v11463_v24, %v14142_v15  ;;  %v11681_v18 = vmul.f32 %v11558_v31, %v8294_v13  ;;  %v11693_v13 = vmul.f32 %v11558_v31, %v11553_v61 }
 0x798   : > { %v11670_v42 = vpop.eup %8297  ;;  %8319 = vpow2.f32 %v3771_v6  ;;  %v11686_v28 = vpop.permute.xlu1 %2742  ;;  %v2761_v53 = vmul.f32 %v11463_v24, %v14145_v8  ;;  %v2823_v61 = vmul.f32 1.442695, %v2768_v3 }
 0x799   : > { %3435 = vmax.xlane.f32.xlu1 %v11657_v2  ;;  %v8300_v9 = vpop.eup %8299  ;;  %14143 = vst [vmem:[#allocation111_spill] sm:$0xff] %v11681_v18  ;;  %8321 = vrcp.f32 %v6963_v1  ;;  %v7030_v2 = vadd.f32 -1.0, %v8296_v50  ;;  %14144 = vst [vmem:[#allocation186_spill] sm:$0xff] %v11693_v13 }
 0x79a   : > { %3449 = vmax.xlane.f32.xlu0 %v11664_v56  ;;  %v8302_v56 = vpop.eup %8301  ;;  %8323 = vpow2.f32 %v3777_v48  ;;  %v6940_v6 = vadd.f32 -1.0, %v8300_v9  ;;  %v2329_v48 = vmul.f32 1.442695, %v2281_v20  ;;  %v3247_v9 = vmul.f32 %v11463_v24, %v11224_v46 }
 0x79b   : > { %v11676_v44 = vpop.xlane.xlu0 %3899  ;;  %v8304_v7 = vpop.eup %8303  ;;  %8325 = vrcp.f32 %v7033_v10  ;;  %v11700_v15 = vmul.f32 %v11558_v31, %v8302_v56  ;;  %v11708_v56 = vmul.f32 %v11558_v31, %v11631_v29  ;;  %v3727_v29 = vmul.f32 %v11463_v24, %v11243_v62 }
 0x79c   : > { %v11689_v63 = vpop.eup %8305  ;;  %8327 = vrcp.f32 %v6998_v54 }
 0x79d   : > { %3915 = vmax.xlane.f32.xlu1 %v11674_v25  ;;  %v8308_v50 = vpop.eup %8307  ;;  %14146 = vst [vmem:[#allocation112_spill] sm:$0xff] %v11700_v15  ;;  %8329 = vrcp.f32 %v7030_v2  ;;  %v6933_v25 = vadd.f32 -1.0, %v8304_v7  ;;  %14147 = vst [vmem:[#allocation187_spill] sm:$0xff] %v11708_v56  ;;  %v2809_v7 = vmul.f32 1.442695, %v2761_v53 }
 0x79e   : > { %3929 = vmax.xlane.f32.xlu0 %v11681_v18  ;;  %v8310_v18 = vpop.eup %8309  ;;  %8331 = vpow2.f32 %v2343_v55  ;;  %v6972_v20 = vadd.f32 -1.0, %v8308_v50  ;;  %v3301_v50 = vmul.f32 1.442695, %v3247_v9 }
 0x79f   : > { %v11695_v1 = vpop.xlane.xlu0 %2457  ;;  %v8312_v10 = vpop.eup %8311  ;;  %8333 = vrcp.f32 %v6940_v6  ;;  %v11715_v55 = vmul.f32 %v11558_v31, %v8310_v18  ;;  %v11725_v18 = vmul.f32 %v11558_v31, %v11574_v0 }
 0x7a0   : > { %v8314_v54 = vpop.eup %8313  ;;  %8335 = vpow2.f32 %v2329_v48  ;;  %v6965_v3 = vadd.f32 -1.0, %v8312_v10 }
 0x7a1   : > { %2473 = vmax.xlane.f32.xlu1 %v11693_v13  ;;  %v8316_v2 = vpop.eup %8315  ;;  %v11712_v13 = vpop.permute.xlu1 %3218  ;;  %14148 = vst [vmem:[#allocation188_spill] sm:$0xff] %v11715_v55  ;;  %8337 = vrcp.f32 %v6933_v25  ;;  %14149 = vst [vmem:[#allocation189_spill] sm:$0xff] %v11725_v18 }
 0x7a2   : > { %2495 = vmax.xlane.f32.xlu0 %v11700_v15  ;;  %v8318_v46 = vpop.eup %8317  ;;  %8339 = vpow2.f32 %v2823_v61  ;;  %v7003_v53 = vadd.f32 -1.0, %v8316_v2  ;;  %v7000_v15 = vadd.f32 -1.0, %v8314_v54  ;;  %v14150_v61 = vld [vmem:[#allocation114_spill] sm:$0xff]  ;;  %v3781_v2 = vmul.f32 1.442695, %v3727_v29 }
 0x7a3   : > { %v11710_v8 = vpop.xlane.xlu0 %2937  ;;  %v8320_v6 = vpop.eup %8319  ;;  %8341 = vrcp.f32 %v6972_v20  ;;  %v3244_v9 = vmul.f32 %v11463_v24, %v14150_v61  ;;  %v11732_v62 = vmul.f32 %v11558_v31, %v8318_v46  ;;  %v2290_v20 = vmul.f32 %v11463_v24, %v11277_v11 }
 0x7a4   : > { %v11721_v48 = vpop.eup %8321  ;;  %8343 = vpow2.f32 %v2809_v7 }
 0x7a5   : > { %2953 = vmax.xlane.f32.xlu1 %v11708_v56  ;;  %v8324_v10 = vpop.eup %8323  ;;  %14151 = vst [vmem:[#allocation114_spill] sm:$0xff] %v11732_v62  ;;  %8345 = vrcp.f32 %v6965_v3  ;;  %v7032_v56 = vadd.f32 -1.0, %v8320_v6  ;;  %v11739_v54 = vpop.permute.xlu1 %3698  ;;  %v11746_v3 = vmul.f32 %v11558_v31, %v11581_v22  ;;  %v3295_v61 = vmul.f32 1.442695, %v3244_v9 }
 0x7a6   : > { %2975 = vmax.xlane.f32.xlu0 %v11715_v55  ;;  %v8326_v55 = vpop.eup %8325  ;;  %8347 = vpow2.f32 %v3301_v50  ;;  %v7035_v46 = vadd.f32 -1.0, %v8324_v10 }
 0x7a7   : > { %v11727_v25 = vpop.xlane.xlu0 %2463  ;;  %v11737_v0 = vpop.eup %8327  ;;  %8349 = vrcp.f32 %v7003_v53  ;;  %14152 = vst [vmem:[#allocation190_spill] sm:$0xff] %v11746_v3  ;;  %v11751_v50 = vmul.f32 %v11558_v31, %v8326_v55  ;;  %v2770_v53 = vmul.f32 %v11463_v24, %v11296_v32  ;;  %v11763_v55 = vmul.f32 %v11558_v31, %v11596_v41 }
 0x7a8   : > { %v11742_v7 = vpop.eup %8329  ;;  %8351 = vrcp.f32 %v7000_v15 }
 0x7a9   : > { %3439 = vmax.xlane.f32.xlu1 %v11725_v18  ;;  %v8332_v11 = vpop.eup %8331  ;;  %14153 = vst [vmem:[#allocation191_spill] sm:$0xff] %v11751_v50  ;;  %8353 = vrcp.f32 %v7032_v56  ;;  %v2347_v18 = vmul.f32 1.442695, %v2290_v20  ;;  %v11756_v22 = vpop.xlane.xlu1 %6098  ;;  %14155 = vst [vmem:[#allocation193_spill] sm:$0xff] %v11763_v55 }
 0x7aa   : > { %3453 = vmax.xlane.f32.xlu0 %v11732_v62  ;;  %v8334_v29 = vpop.eup %8333  ;;  %8355 = vpow2.f32 %v3781_v2  ;;  %14154 = vst [vmem:[#allocation192_spill] sm:$0xff] %v11756_v22  ;;  %v6942_v15 = vadd.f32 -1.0, %v8332_v11 }
 0x7ab   : > { %v11748_v6 = vpop.xlane.xlu0 %2943  ;;  %v8336_v62 = vpop.eup %8335  ;;  %8357 = vrcp.f32 %v7035_v46  ;;  %v11766_v20 = vmul.f32 %v11558_v31, %v8334_v29  ;;  %v3249_v46 = vmul.f32 %v11463_v24, %v11315_v37 }
 0x7ac   : > { %v11759_v10 = vpop.eup %8337  ;;  %8359 = vpow2.f32 %v3295_v61  ;;  %v6935_v32 = vadd.f32 -1.0, %v8336_v62  ;;  %v11776_v61 = vmul.f32 %v11558_v31, %v11615_v26 }
 0x7ad   : > { %3919 = vmax.xlane.f32.xlu1 %v11746_v3  ;;  %v8340_v9 = vpop.eup %8339  ;;  %14156 = vst [vmem:[#allocation194_spill] sm:$0xff] %v11766_v20  ;;  %8361 = vpow2.f32 %v2347_v18  ;;  %v11778_v29 = vpop.permute.xlu1 %6196  ;;  %v3305_v26 = vmul.f32 1.442695, %v3249_v46 }
 0x7ae   : > { %3933 = vmax.xlane.f32.xlu0 %v11751_v50  ;;  %v8342_v2 = vpop.eup %8341  ;;  %v2827_v50 = vmul.f32 1.442695, %v2770_v53  ;;  %v6974_v11 = vadd.f32 -1.0, %v8340_v9  ;;  %14157 = vst [vmem:[#allocation195_spill] sm:$0xff] %v11776_v61  ;;  %14158 = vst [vmem:[#allocation196_spill] sm:$0xff] %v11778_v29  ;;  %v3729_v9 = vmul.f32 %v11463_v24, %v11339_v52  ;;  %v14162_v29 = vld [vmem:[#allocation117_spill] sm:$0xff] }
 0x7af   : > { %v2462_v56 = vpop.xlane.xlu0 %2461  ;;  %v8344_v22 = vpop.eup %8343  ;;  %v11781_v53 = vmul.f32 %v11558_v31, %v8342_v2 }
 0x7b0   : > { %8363 = vrcp.f32 %v2462_v56  ;;  %v11772_v41 = vpop.eup %8345  ;;  %v6967_v56 = vadd.f32 -1.0, %v8344_v22  ;;  %v11795_v22 = vmul.f32 %v11558_v31, %v11638_v57 }
 0x7b1   : > { %2477 = vmax.xlane.f32.xlu1 %v11763_v55  ;;  %8365 = vrcp.f32 %v6942_v15  ;;  %v8348_v18 = vpop.eup %8347  ;;  %14159 = vst [vmem:[#allocation197_spill] sm:$0xff] %v11781_v53 }
 0x7b2   : > { %2499 = vmax.xlane.f32.xlu0 %v11766_v20  ;;  %v8350_v37 = vpop.eup %8349  ;;  %v14160_v20 = vld [vmem:[#allocation116_spill] sm:$0xff]  ;;  %v7005_v2 = vadd.f32 -1.0, %v8348_v18  ;;  %v3785_v18 = vmul.f32 1.442695, %v3729_v9 }
 0x7b3   : > { %v2942_v62 = vpop.xlane.xlu0 %2941  ;;  %v3724_v55 = vmul.f32 %v11463_v24, %v14160_v20  ;;  %v11786_v15 = vpop.eup %8351  ;;  %14161 = vst [vmem:[#allocation116_spill] sm:$0xff] %v11795_v22  ;;  %v11802_v52 = vmul.f32 %v11558_v31, %v8350_v37  ;;  %v11810_v37 = vmul.f32 %v11558_v31, %v11670_v42  ;;  %v11823_v42 = vmul.f32 %v11558_v31, %v11689_v63 }
 0x7b4   : > { %8367 = vrcp.f32 %v2942_v62  ;;  %v11791_v62 = vpop.eup %8353 }
 0x7b5   : > { %8369 = vrcp.f32 %v6935_v32  ;;  %2957 = vmax.xlane.f32.xlu1 %v11776_v61  ;;  %v8356_v32 = vpop.eup %8355  ;;  %v2283_v61 = vmul.f32 %v11463_v24, %v14162_v29  ;;  %14164 = vst [vmem:[#allocation198_spill] sm:$0xff] %v11802_v52  ;;  %14165 = vst [vmem:[#allocation199_spill] sm:$0xff] %v11810_v37 }
 0x7b6   : > { %8371 = vpow2.f32 %v2827_v50  ;;  %2979 = vmax.xlane.f32.xlu0 %v11781_v53  ;;  %v11799_v50 = vpop.xlane.xlu1 %6102  ;;  %v8358_v46 = vpop.eup %8357  ;;  %v3775_v53 = vmul.f32 1.442695, %v3724_v55 }
 0x7b7   : > { %8373 = vrcp.f32 %v6974_v11  ;;  %v3422_v20 = vpop.xlane.xlu0 %3421  ;;  %14163 = vst [vmem:[#allocation117_spill] sm:$0xff] %v11799_v50  ;;  %v2292_v11 = vmul.f32 %v11463_v24, %v11388_v17  ;;  %v8360_v57 = vpop.eup %8359  ;;  %v7037_v50 = vadd.f32 -1.0, %v8356_v32  ;;  %v2333_v55 = vmul.f32 1.442695, %v2283_v61 }
 0x7b8   : > { %8375 = vrcp.f32 %v3422_v20  ;;  %v8362_v29 = vpop.eup %8361  ;;  %v11813_v17 = vmul.f32 %v11558_v31, %v8358_v46  ;;  %v7002_v63 = vadd.f32 -1.0, %v8360_v57 }
 0x7b9   : > { %8377 = vrcp.f32 %v6967_v56  ;;  %3443 = vmax.xlane.f32.xlu1 %v11795_v22 }
 0x7ba   : > { %8379 = vpow2.f32 %v3305_v26  ;;  %3457 = vmax.xlane.f32.xlu0 %v11802_v52  ;;  %v8364_v56 = vpop.eup %8363  ;;  %14166 = vst [vmem:[#allocation200_spill] sm:$0xff] %v11813_v17  ;;  %v2351_v26 = vmul.f32 1.442695, %v2292_v11  ;;  %v11818_v32 = vpop.permute.xlu1 %6200 }
 0x7bb   : > { %8381 = vrcp.f32 %v7005_v2  ;;  %v3902_v20 = vpop.xlane.xlu0 %3901  ;;  %v8366_v22 = vpop.eup %8365  ;;  %v2772_v2 = vmul.f32 %v11463_v24, %v11416_v59  ;;  %14167 = vst [vmem:[#allocation201_spill] sm:$0xff] %v11818_v32  ;;  %v2555_v46 = vmul.f32 %v8364_v56, %v11183_v49  ;;  %v14168_v59 = vld [vmem:[#allocation54_spill] sm:$0xff] }
 0x7bc   : > { %8383 = vrcp.f32 %v3902_v20  ;;  %v2763_v32 = vmul.f32 %v11463_v24, %v14168_v59 }
 0x7bd   : > { %8385 = vpow2.f32 %v3775_v53  ;;  %3923 = vmax.xlane.f32.xlu1 %v11810_v37  ;;  %v6944_v53 = vadd.f32 -1.0, %v8362_v29  ;;  %v14169_v37 = vld [vmem:[#allocation121_spill] sm:$0xff]  ;;  %v3251_v29 = vmul.f32 %v11463_v24, %v11441_v33  ;;  %v3731_v33 = vmul.f32 %v11463_v24, %v11476_v16 }
 0x7be   : > { %v8368_v9 = vpop.eup %8367  ;;  %8387 = vpow2.f32 %v3785_v18  ;;  %3937 = vmax.xlane.f32.xlu0 %v11813_v17  ;;  %v11832_v17 = vmul.f32 %v11558_v31, %v8366_v22  ;;  %v3246_v3 = vmul.f32 %v11463_v24, %v14169_v37  ;;  %v11839_v56 = vpop.xlane.xlu1 %6106  ;;  %v11846_v37 = vmul.f32 %v11558_v31, %v11721_v48 }
 0x7bf   : > { %v11825_v61 = vpop.eup %8369  ;;  %8389 = vrcp.f32 %v7037_v50  ;;  %v3035_v11 = vmul.f32 %v8368_v9, %v11194_v47  ;;  %v2468_v18 = vpop.xlane.xlu0 %2467  ;;  %v2831_v47 = vmul.f32 1.442695, %v2772_v2  ;;  %14170 = vst [vmem:[#allocation54_spill] sm:$0xff] %v11839_v56  ;;  %v2813_v2 = vmul.f32 1.442695, %v2763_v32  ;;  %v14179_v56 = vld [vmem:[#allocation129_spill] sm:$0xff] }
 0x7c0   : > { %v8372_v20 = vpop.eup %8371  ;;  %8391 = vpow2.f32 %v2333_v55 }
 0x7c1   : > { %v8374_v52 = vpop.eup %8373  ;;  %8393 = vpow2.f32 %v2351_v26  ;;  %2481 = vmax.xlane.f32.xlu1 %v11823_v42  ;;  %v3067_v49 = vadd.f32 %v3035_v11, %v2555_v46  ;;  %v6976_v57 = vadd.f32 -1.0, %v8372_v20 }
 0x7c2   : > { %v8376_v50 = vpop.eup %8375  ;;  %8395 = vrcp.f32 %v2468_v18  ;;  %2503 = vmax.xlane.f32.xlu0 %v11832_v17  ;;  %v11852_v46 = vmul.f32 %v11558_v31, %v8374_v52  ;;  %v14171_v18 = vld [vmem:[#allocation123_spill] sm:$0xff] }
 0x7c3   : > { %v11842_v22 = vpop.eup %8377  ;;  %8397 = vrcp.f32 %v6944_v53  ;;  %v2948_v55 = vpop.xlane.xlu0 %2947  ;;  %v3515_v26 = vmul.f32 %v8376_v50, %v11205_v51  ;;  %v3299_v53 = vmul.f32 1.442695, %v3246_v3  ;;  %v3726_v20 = vmul.f32 %v11463_v24, %v14171_v18  ;;  %v14172_v51 = vld [vmem:[#allocation125_spill] sm:$0xff] }
 0x7c4   : > { %v8380_v9 = vpop.eup %8379  ;;  %8399 = vrcp.f32 %v2948_v55  ;;  %v2285_v32 = vmul.f32 %v11463_v24, %v14172_v51  ;;  %v3309_v50 = vmul.f32 1.442695, %v3251_v29  ;;  %v11862_v3 = vmul.f32 %v11558_v31, %v11737_v0  ;;  %v11869_v29 = vpop.permute.xlu1 %6204 }
 0x7c5   : > { %v8382_v11 = vpop.eup %8381  ;;  %8401 = vrcp.f32 %v7002_v63  ;;  %2961 = vmax.xlane.f32.xlu1 %v11846_v37  ;;  %v3547_v48 = vadd.f32 %v3515_v26, %v3067_v49  ;;  %v7007_v52 = vadd.f32 -1.0, %v8380_v9  ;;  %v14173_v26 = vld [vmem:[#allocation57_spill] sm:$0xff]  ;;  %14174 = vst [vmem:[#allocation121_spill] sm:$0xff] %v11869_v29  ;;  %v3779_v9 = vmul.f32 1.442695, %v3726_v20 }
 0x7c6   : > { %v8384_v59 = vpop.eup %8383  ;;  %8403 = vpow2.f32 %v2831_v47  ;;  %2983 = vmax.xlane.f32.xlu0 %v11852_v46  ;;  %v2765_v18 = vmul.f32 %v11463_v24, %v14173_v26  ;;  %v3789_v47 = vmul.f32 1.442695, %v3731_v33  ;;  %v11872_v51 = vmul.f32 %v11558_v31, %v8382_v11 }
 0x7c7   : > { %v8386_v16 = vpop.eup %8385  ;;  %8405 = vrcp.f32 %v6976_v57  ;;  %v11864_v63 = vpop.xlane.xlu0 %3425  ;;  %v3995_v55 = vmul.f32 %v8384_v59, %v11215_v60  ;;  %v2294_v0 = vmul.f32 %v11463_v24, %v11518_v45  ;;  %v2337_v59 = vmul.f32 1.442695, %v2285_v32 }
 0x7c8   : > { %v8388_v49 = vpop.eup %8387  ;;  %8407 = vpow2.f32 %v2813_v2  ;;  %v11882_v11 = vmul.f32 %v11558_v31, %v11742_v7  ;;  %v2817_v45 = vmul.f32 1.442695, %v2765_v18  ;;  %v11886_v29 = vpop.xlane.xlu1 %6110  ;;  %v2774_v7 = vmul.f32 %v11463_v24, %v11542_v38 }
 0x7c9   : > { %v8390_v57 = vpop.eup %8389  ;;  %8409 = vpow2.f32 %v3299_v53  ;;  %3447 = vmax.xlane.f32.xlu1 %v11862_v3  ;;  %v11877_v60 = vadd.f32 %v3995_v55, %v3547_v48  ;;  %v7039_v26 = vadd.f32 -1.0, %v8388_v49  ;;  %14176 = vst [vmem:[#allocation125_spill] sm:$0xff] %v11886_v29  ;;  %v11897_v55 = vmul.f32 %v11558_v31, %v11759_v10 }
 0x7ca   : > { %v8392_v2 = vpop.eup %8391  ;;  %8411 = vpow2.f32 %v3309_v50  ;;  %3461 = vmax.xlane.f32.xlu0 %v11872_v51  ;;  %v11889_v48 = vmul.f32 %v11558_v31, %v8390_v57  ;;  %v2355_v50 = vmul.f32 1.442695, %v2294_v0  ;;  %v7034_v29 = vadd.f32 -1.0, %v8386_v16 }
 0x7cb   : > { %14175 = vst [vmem:[#allocation123_spill] sm:$0xff] %v11877_v60  ;;  %v8394_v33 = vpop.eup %8393  ;;  %8413 = vrcp.f32 %v7007_v52  ;;  %v11884_v53 = vpop.xlane.xlu0 %3905  ;;  %v3248_v10 = vmul.f32 %v11463_v24, %v14179_v56  ;;  %v11918_v56 = vmul.f32 %v11558_v31, %v11772_v41  ;;  %v3733_v41 = vmul.f32 %v11463_v24, %v11606_v39 }
 0x7cc   : > { %v8396_v20 = vpop.eup %8395  ;;  %8415 = vpow2.f32 %v3789_v47  ;;  %14177 = vst [vmem:[#allocation57_spill] sm:$0xff] %v11889_v48  ;;  %v6946_v18 = vadd.f32 -1.0, %v8394_v33 }
 0x7cd   : > { %v8398_v32 = vpop.eup %8397  ;;  %8417 = vpow2.f32 %v3779_v9  ;;  %3927 = vmax.xlane.f32.xlu1 %v11882_v11  ;;  %v2558_v47 = vmul.f32 %v8396_v20, %v11227_v40  ;;  %v2835_v40 = vmul.f32 1.442695, %v2774_v7  ;;  %v11913_v20 = vpop.permute.xlu1 %6208 }
 0x7ce   : > { %v8400_v52 = vpop.eup %8399  ;;  %8419 = vpow2.f32 %v2337_v59  ;;  %3941 = vmax.xlane.f32.xlu0 %v11889_v48  ;;  %v11904_v59 = vmul.f32 %v11558_v31, %v8398_v32  ;;  %14180 = vst [vmem:[#allocation129_spill] sm:$0xff] %v11913_v20  ;;  %v14223_v48 = vld [vmem:[#allocation161_spill] sm:$0xff] }
 0x7cf   : > { %v11899_v49 = vpop.eup %8401  ;;  %8421 = vrcp.f32 %v7039_v26  ;;  %v3038_v57 = vmul.f32 %v8400_v52, %v11237_v21  ;;  %v2472_v9 = vpop.xlane.xlu0 %2471  ;;  %v3253_v21 = vmul.f32 %v11463_v24, %v11578_v35  ;;  %v6937_v52 = vadd.f32 -1.0, %v8392_v2 }
 0x7d0   : > { %v8404_v0 = vpop.eup %8403  ;;  %8423 = vpow2.f32 %v2817_v45  ;;  %14178 = vst [vmem:[#allocation202_spill] sm:$0xff] %v11904_v59 }
 0x7d1   : > { %v8406_v38 = vpop.eup %8405  ;;  %8425 = vpow2.f32 %v2355_v50  ;;  %2485 = vmax.xlane.f32.xlu1 %v11897_v55  ;;  %v11909_v26 = vadd.f32 %v3038_v57, %v2558_v47  ;;  %v6978_v16 = vadd.f32 -1.0, %v8404_v0  ;;  %v14181_v47 = vld [vmem:[#allocation130_spill] sm:$0xff]  ;;  %v3313_v0 = vmul.f32 1.442695, %v3253_v21  ;;  %v11928_v20 = vpop.xlane.xlu1 %6114 }
 0x7d2   : > { %v8408_v33 = vpop.eup %8407  ;;  %8427 = vrcp.f32 %v2472_v9  ;;  %2507 = vmax.xlane.f32.xlu0 %v11904_v59  ;;  %v3728_v7 = vmul.f32 %v11463_v24, %v14181_v47  ;;  %v11923_v35 = vmul.f32 %v11558_v31, %v8406_v38  ;;  %v3303_v9 = vmul.f32 1.442695, %v3248_v10  ;;  %14183 = vst [vmem:[#allocation203_spill] sm:$0xff] %v11928_v20  ;;  %v14222_v59 = vld [vmem:[#allocation156_spill] sm:$0xff] }
 0x7d3   : > { %v8410_v45 = vpop.eup %8409  ;;  %8429 = vrcp.f32 %v6946_v18  ;;  %v2952_v32 = vpop.xlane.xlu0 %2951  ;;  %v11940_v10 = vmul.f32 %v11558_v31, %v11786_v15  ;;  %v3793_v47 = vmul.f32 1.442695, %v3733_v41 }
 0x7d4   : > { %v8412_v50 = vpop.eup %8411  ;;  %8431 = vrcp.f32 %v2952_v32  ;;  %14182 = vst [vmem:[#allocation130_spill] sm:$0xff] %v11923_v35  ;;  %v3783_v39 = vmul.f32 1.442695, %v3728_v7 }
 0x7d5   : > { %v8414_v57 = vpop.eup %8413  ;;  %8433 = vrcp.f32 %v7034_v29  ;;  %2965 = vmax.xlane.f32.xlu1 %v11918_v56  ;;  %v7009_v32 = vadd.f32 -1.0, %v8412_v50  ;;  %v11934_v29 = vld [vmem:[%s13578_s9] ss:$0 sm:$0xff]  ;;  %v11951_v20 = vpop.permute.xlu1 %6212 }
 0x7d6   : > { %v8416_v18 = vpop.eup %8415  ;;  %8435 = vpow2.f32 %v2835_v40  ;;  %2987 = vmax.xlane.f32.xlu0 %v11923_v35  ;;  %v2296_v38 = vmul.f32 %v11934_v29, %v11661_v36  ;;  %v11943_v40 = vmul.f32 %v11558_v31, %v8414_v57  ;;  %v6969_v57 = vadd.f32 -1.0, %v8408_v33  ;;  %14185 = vst [vmem:[#allocation205_spill] sm:$0xff] %v11951_v20 }
 0x7d7   : > { %v8418_v2 = vpop.eup %8417  ;;  %8437 = vrcp.f32 %v6978_v16  ;;  %v7041_v16 = vadd.f32 -1.0, %v8416_v18  ;;  %v11962_v33 = vmul.f32 %v11558_v31, %v11825_v61 }
 0x7d8   : > { %v8420_v24 = vpop.eup %8419  ;;  %8439 = vrcp.f32 %v6937_v52  ;;  %14184 = vst [vmem:[#allocation204_spill] sm:$0xff] %v11943_v40  ;;  %v2359_v15 = vmul.f32 1.442695, %v2296_v38  ;;  %v11949_v52 = vmul.f32 %v11558_v31, %v11791_v62  ;;  %v2776_v62 = vmul.f32 %v11934_v29, %v11686_v28 }
 0x7d9   : > { %v8422_v21 = vpop.eup %8421  ;;  %8441 = vpow2.f32 %v3303_v9  ;;  %3451 = vmax.xlane.f32.xlu1 %v11940_v10  ;;  %v11968_v28 = vpop.xlane.xlu1 %6118 }
 0x7da   : > { %v8424_v50 = vpop.eup %8423  ;;  %8443 = vpow2.f32 %v3313_v0  ;;  %3465 = vmax.xlane.f32.xlu0 %v11943_v40  ;;  %v11954_v9 = vmul.f32 %v11558_v31, %v8422_v21  ;;  %v7004_v0 = vadd.f32 -1.0, %v8410_v45 }
 0x7db   : > { %v8426_v36 = vpop.eup %8425  ;;  %8445 = vrcp.f32 %v7009_v32  ;;  %v7036_v32 = vadd.f32 -1.0, %v8418_v2  ;;  %v6939_v2 = vadd.f32 -1.0, %v8420_v24  ;;  %v6971_v40 = vadd.f32 -1.0, %v8424_v50 }
 0x7dc   : > { %v8428_v7 = vpop.eup %8427  ;;  %8447 = vpow2.f32 %v3783_v39  ;;  %14186 = vst [vmem:[#allocation206_spill] sm:$0xff] %v11954_v9  ;;  %v6948_v39 = vadd.f32 -1.0, %v8426_v36  ;;  %v3255_v36 = vmul.f32 %v11934_v29, %v11712_v13  ;;  %v2839_v24 = vmul.f32 1.442695, %v2776_v62  ;;  %v14190_v13 = vld [vmem:[#allocation134_spill] sm:$0xff] }
 0x7dd   : > { %v8430_v18 = vpop.eup %8429  ;;  %8449 = vrcp.f32 %v7041_v16  ;;  %3931 = vmax.xlane.f32.xlu1 %v11949_v52  ;;  %v2560_v45 = vmul.f32 %v8428_v7, %v11280_v12 }
 0x7de   : > { %v8432_v41 = vpop.eup %8431  ;;  %8451 = vpow2.f32 %v3793_v47  ;;  %3945 = vmax.xlane.f32.xlu0 %v11954_v9  ;;  %v14187_v47 = vld [vmem:[#allocation131_spill] sm:$0xff]  ;;  %v11971_v9 = vmul.f32 %v11558_v31, %v8430_v18  ;;  %v3317_v62 = vmul.f32 1.442695, %v3255_v36 }
 0x7df   : > { %v8434_v38 = vpop.eup %8433  ;;  %8453 = vpow2.f32 %v2359_v15  ;;  %v3040_v21 = vmul.f32 %v8432_v41, %v11292_v30  ;;  %v2287_v20 = vmul.f32 %v11934_v29, %v14187_v47  ;;  %14188 = vst [vmem:[#allocation131_spill] sm:$0xff] %v11968_v28 }
 0x7e0   : > { %v8436_v16 = vpop.eup %8435  ;;  %8455 = vrcp.f32 %v6969_v57  ;;  %14189 = vst [vmem:[#allocation207_spill] sm:$0xff] %v11971_v9  ;;  %v11981_v57 = vmul.f32 %v11558_v31, %v11842_v22 }
 0x7e1   : > { %v8438_v61 = vpop.eup %8437  ;;  %8457 = vrcp.f32 %v7004_v0  ;;  %2489 = vmax.xlane.f32.xlu1 %v11962_v33  ;;  %v11976_v12 = vadd.f32 %v3040_v21, %v2560_v45  ;;  %v6980_v7 = vadd.f32 -1.0, %v8436_v16  ;;  %v2341_v18 = vmul.f32 1.442695, %v2287_v20  ;;  %v11991_v21 = vpop.permute.xlu1 %6216 }
 0x7e2   : > { %v8440_v30 = vpop.eup %8439  ;;  %8459 = vrcp.f32 %v7036_v32  ;;  %2511 = vmax.xlane.f32.xlu0 %v11971_v9  ;;  %v2767_v0 = vmul.f32 %v11934_v29, %v14190_v13  ;;  %v11986_v41 = vmul.f32 %v11558_v31, %v8438_v61  ;;  %14192 = vst [vmem:[#allocation208_spill] sm:$0xff] %v11991_v21 }
 0x7e3   : > { %v8442_v15 = vpop.eup %8441  ;;  %8461 = vrcp.f32 %v6948_v39  ;;  %v3735_v39 = vmul.f32 %v11934_v29, %v11739_v54 }
 0x7e4   : > { %v8444_v50 = vpop.eup %8443  ;;  %8463 = vrcp.f32 %v6939_v2  ;;  %14191 = vst [vmem:[#allocation134_spill] sm:$0xff] %v11986_v41  ;;  %v7006_v22 = vadd.f32 -1.0, %v8442_v15  ;;  %v11996_v2 = vmul.f32 %v11558_v31, %v11899_v49  ;;  %v2821_v47 = vmul.f32 1.442695, %v2767_v0  ;;  %v14195_v0 = vld [vmem:[#allocation138_spill] sm:$0xff] }
 0x7e5   : > { %v8446_v32 = vpop.eup %8445  ;;  %8465 = vrcp.f32 %v6971_v40  ;;  %2969 = vmax.xlane.f32.xlu1 %v11981_v57  ;;  %v7011_v16 = vadd.f32 -1.0, %v8444_v50  ;;  %v3797_v36 = vmul.f32 1.442695, %v3735_v39  ;;  %v12015_v39 = vld [vmem:[%s13579_s10] ss:$0 sm:$0xff] }
 0x7e6   : > { %v8448_v45 = vpop.eup %8447  ;;  %8467 = vpow2.f32 %v2839_v24  ;;  %2991 = vmax.xlane.f32.xlu0 %v11986_v41  ;;  %v11999_v54 = vmul.f32 %v11558_v31, %v8446_v32  ;;  %v3250_v32 = vmul.f32 %v11934_v29, %v14195_v0 }
 0x7e7   : > { %v8450_v20 = vpop.eup %8449  ;;  %8469 = vrcp.f32 %v6980_v7  ;;  %v7038_v15 = vadd.f32 -1.0, %v8448_v45 }
 0x7e8   : > { %v8452_v40 = vpop.eup %8451  ;;  %8471 = vpow2.f32 %v2341_v18  ;;  %14193 = vst [vmem:[#allocation209_spill] sm:$0xff] %v11999_v54  ;;  %v12006_v18 = vmul.f32 %v11558_v31, %v8434_v38  ;;  %v12018_v45 = vmul.f32 %v12015_v39, %v8450_v20  ;;  %v14197_v38 = vld [vmem:[#allocation140_spill] sm:$0xff]  ;;  %v3307_v0 = vmul.f32 1.442695, %v3250_v32 }
 0x7e9   : > { %v8454_v61 = vpop.eup %8453  ;;  %8473 = vpow2.f32 %v3317_v62  ;;  %3455 = vmax.xlane.f32.xlu1 %v11996_v2  ;;  %v7043_v50 = vadd.f32 -1.0, %v8452_v40 }
 0x7ea   : > { %v8456_v24 = vpop.eup %8455  ;;  %8475 = vrcp.f32 %v7006_v22  ;;  %v12002_v7 = vpop.xlane.xlu1 %6122  ;;  %3469 = vmax.xlane.f32.xlu0 %v11999_v54  ;;  %v6950_v62 = vadd.f32 -1.0, %v8454_v61  ;;  %14196 = vst [vmem:[#allocation138_spill] sm:$0xff] %v12018_v45  ;;  %v12029_v61 = vmul.f32 %v12015_v39, %v8440_v30 }
 0x7eb   : > { %14194 = vst [vmem:[#allocation210_spill] sm:$0xff] %v12002_v7  ;;  %v8458_v49 = vpop.eup %8457  ;;  %8477 = vrcp.f32 %v7011_v16  ;;  %v3730_v16 = vmul.f32 %v11934_v29, %v14197_v38  ;;  %v2769_v38 = vmul.f32 %v11934_v29, %v11093_v27 }
 0x7ec   : > { %v12008_v13 = vpop.eup %8459  ;;  %8479 = vpow2.f32 %v2821_v47 }
 0x7ed   : > { %v8462_v22 = vpop.eup %8461  ;;  %8481 = vpow2.f32 %v3797_v36  ;;  %3935 = vmax.xlane.f32.xlu1 %v12006_v18  ;;  %v2289_v36 = vmul.f32 %v11934_v29, %v11076_v5  ;;  %v3787_v28 = vmul.f32 1.442695, %v3730_v16  ;;  %v2825_v16 = vmul.f32 1.442695, %v2769_v38 }
 0x7ee   : > { %v12021_v31 = vpop.eup %8463  ;;  %8483 = vrcp.f32 %v7038_v15  ;;  %v2460_v40 = vpop.xlane.xlu1 %2459  ;;  %3949 = vmax.xlane.f32.xlu0 %v12018_v45  ;;  %v12034_v15 = vmul.f32 %v12015_v39, %v8462_v22 }
 0x7ef   : > { %v12026_v47 = vpop.eup %8465  ;;  %8485 = vrcp.f32 %v7043_v50  ;;  %v2345_v27 = vmul.f32 1.442695, %v2289_v36 }
 0x7f0   : > { %v8468_v20 = vpop.eup %8467  ;;  %8487 = vrcp.f32 %v6950_v62  ;;  %14198 = vst [vmem:[#allocation140_spill] sm:$0xff] %v12034_v15  ;;  %v12042_v62 = vmul.f32 %v12015_v39, %v8456_v24 }
 0x7f1   : > { %v8470_v7 = vpop.eup %8469  ;;  %8489 = vrcp.f32 %v2460_v40  ;;  %2493 = vmax.xlane.f32.xlu1 %v12029_v61  ;;  %v6982_v5 = vadd.f32 -1.0, %v8468_v20 }
 0x7f2   : > { %v8472_v50 = vpop.eup %8471  ;;  %8491 = vrcp.f32 %v11659_v58  ;;  %v2940_v30 = vpop.xlane.xlu1 %2939  ;;  %2515 = vmax.xlane.f32.xlu0 %v12034_v15  ;;  %v12047_v40 = vmul.f32 %v12015_v39, %v8470_v7 }
 0x7f3   : > { %v8474_v32 = vpop.eup %8473  ;;  %8493 = vrcp.f32 %v2940_v30 }
 0x7f4   : > { %v12044_v22 = vpop.eup %8475  ;;  %8495 = vpow2.f32 %v3307_v0  ;;  %14199 = vst [vmem:[#allocation211_spill] sm:$0xff] %v12047_v40  ;;  %v7013_v20 = vadd.f32 -1.0, %v8474_v32  ;;  %v12053_v0 = vmul.f32 %v12015_v39, %v8458_v49  ;;  %v12065_v49 = vmul.f32 %v12015_v39, %v12008_v13 }
 0x7f5   : > { %v8478_v21 = vpop.eup %8477  ;;  %8497 = vrcp.f32 %v11676_v44  ;;  %2973 = vmax.xlane.f32.xlu1 %v12042_v62 }
 0x7f6   : > { %v8480_v58 = vpop.eup %8479  ;;  %8499 = vpow2.f32 %v3787_v28  ;;  %v3418_v30 = vpop.xlane.xlu1 %3417  ;;  %2995 = vmax.xlane.f32.xlu0 %v12047_v40  ;;  %v12058_v7 = vmul.f32 %v12015_v39, %v8478_v21 }
 0x7f7   : > { %v8482_v24 = vpop.eup %8481  ;;  %8501 = vrcp.f32 %v6982_v5 }
 0x7f8   : > { %v12055_v36 = vpop.eup %8483  ;;  %8503 = vpow2.f32 %v2345_v27  ;;  %14200 = vst [vmem:[#allocation212_spill] sm:$0xff] %v12058_v7  ;;  %v7045_v38 = vadd.f32 -1.0, %v8482_v24  ;;  %v6941_v24 = vadd.f32 -1.0, %v8472_v50 }
 0x7f9   : > { %v8486_v44 = vpop.eup %8485  ;;  %8505 = vpow2.f32 %v2825_v16  ;;  %3459 = vmax.xlane.f32.xlu1 %v12053_v0 }
 0x7fa   : > { %v8488_v28 = vpop.eup %8487  ;;  %8507 = vrcp.f32 %v7013_v20  ;;  %v3898_v32 = vpop.xlane.xlu1 %3897  ;;  %3473 = vmax.xlane.f32.xlu0 %v12058_v7  ;;  %v12069_v21 = vmul.f32 %v12015_v39, %v8486_v44 }
 0x7fb   : > { %v8490_v5 = vpop.eup %8489  ;;  %8509 = vrcp.f32 %v11710_v8  ;;  %v12082_v44 = vmul.f32 %v12015_v39, %v8488_v28 }
 0x7fc   : > { %v8492_v27 = vpop.eup %8491  ;;  %8511 = vrcp.f32 %v11695_v1  ;;  %14201 = vst [vmem:[#allocation213_spill] sm:$0xff] %v12069_v21  ;;  %v2554_v7 = vmul.f32 %v8490_v5, %v11393_v4  ;;  %v12079_v1 = vmul.f32 %v12015_v39, %v12021_v31 }
 0x7fd   : > { %v8494_v16 = vpop.eup %8493  ;;  %8513 = vrcp.f32 %v3418_v30  ;;  %3939 = vmax.xlane.f32.xlu1 %v12065_v49  ;;  %14202 = vst [vmem:[#allocation214_spill] sm:$0xff] %v12082_v44 }
 0x7fe   : > { %v8496_v20 = vpop.eup %8495  ;;  %8515 = vrcp.f32 %v7045_v38  ;;  %v3034_v8 = vmul.f32 %v8494_v16, %v11412_v19  ;;  %v12074_v15 = vpop.xlane.xlu1 %3423  ;;  %3953 = vmax.xlane.f32.xlu0 %v12069_v21  ;;  %v3514_v38 = vmul.f32 %v8492_v27, %v11121_v14  ;;  %v3252_v19 = vmul.f32 %v11934_v29, %v11123_v43 }
 0x7ff   : > { %v8498_v13 = vpop.eup %8497  ;;  %8517 = vrcp.f32 %v3898_v32  ;;  %v6973_v32 = vadd.f32 -1.0, %v8480_v58  ;;  %v12094_v14 = vmul.f32 %v12015_v39, %v12026_v47  ;;  %v7008_v27 = vadd.f32 -1.0, %v8496_v20 }
 0x800   : > { %v8500_v30 = vpop.eup %8499  ;;  %v3066_v50 = vadd.f32 %v3034_v8, %v2554_v7  ;;  %8519 = vrcp.f32 %v6941_v24  ;;  %v3994_v28 = vmul.f32 %v8498_v13, %v11131_v34  ;;  %v3311_v24 = vmul.f32 1.442695, %v3252_v19 }
 0x801   : > { %v8502_v4 = vpop.eup %8501  ;;  %2497 = vmax.xlane.f32.xlu1 %v12079_v1  ;;  %8521 = vrcp.f32 %v6973_v32  ;;  %v7040_v13 = vadd.f32 -1.0, %v8500_v30  ;;  %v12111_v19 = vmul.f32 %v12015_v39, %v12044_v22  ;;  %v14207_v32 = vld [vmem:[#allocation147_spill] sm:$0xff] }
 0x802   : > { %v8504_v5 = vpop.eup %8503  ;;  %v12088_v16 = vpop.xlane.xlu1 %3903  ;;  %2519 = vmax.xlane.f32.xlu0 %v12082_v44  ;;  %v3546_v31 = vadd.f32 %v3514_v38, %v3066_v50  ;;  %v12097_v43 = vmul.f32 %v12015_v39, %v8502_v4  ;;  %v3732_v44 = vmul.f32 %v11934_v29, %v11136_v23  ;;  %v14205_v50 = vld [vmem:[#allocation148_spill] sm:$0xff]  ;;  %8523 = vrcp.f32 %v7008_v27  ;;  %v14206_v23 = vld [vmem:[#allocation150_spill] sm:$0xff] }
 0x803   : > { %v8506_v21 = vpop.eup %8505  ;;  %v2291_v47 = vmul.f32 %v11934_v29, %v14205_v50  ;;  %v6943_v4 = vadd.f32 -1.0, %v8504_v5  ;;  %8525 = vpow2.f32 %v3311_v24  ;;  %v14210_v27 = vld [vmem:[#allocation124_spill] sm:$0xff] }
 0x804   : > { %v8508_v7 = vpop.eup %8507  ;;  %14203 = vst [vmem:[#allocation215_spill] sm:$0xff] %v12097_v43  ;;  %v12099_v8 = vadd.f32 %v3994_v28, %v3546_v31  ;;  %v2771_v28 = vmul.f32 %v11934_v29, %v14206_v23  ;;  %v3791_v45 = vmul.f32 1.442695, %v3732_v44  ;;  %8527 = vrcp.f32 %v7040_v13 }
 0x805   : > { %v8510_v58 = vpop.eup %8509  ;;  %2977 = vmax.xlane.f32.xlu1 %v12094_v14  ;;  %v12117_v40 = vmul.f32 %v12015_v39, %v8508_v7  ;;  %v2349_v5 = vmul.f32 1.442695, %v2291_v47  ;;  %8529 = vrcp.f32 %v6943_v4  ;;  %v12127_v7 = vmul.f32 %v12015_v39, %v12055_v36 }
 0x806   : > { %14204 = vst [vmem:[#allocation216_spill] sm:$0xff] %v12099_v8  ;;  %v8512_v34 = vpop.eup %8511  ;;  %v12106_v38 = vpop.xlane.xlu1 %3427  ;;  %2999 = vmax.xlane.f32.xlu0 %v12097_v43  ;;  %v3033_v30 = vmul.f32 %v8510_v58, %v14207_v32  ;;  %v14209_v43 = vld [vmem:[#allocation146_spill] sm:$0xff]  ;;  %v6975_v58 = vadd.f32 -1.0, %v8506_v21  ;;  %v2829_v44 = vmul.f32 1.442695, %v2771_v28  ;;  %8531 = vpow2.f32 %v3791_v45  ;;  %v14213_v28 = vld [vmem:[#allocation153_spill] sm:$0xff] }
 0x807   : > { %v8514_v20 = vpop.eup %8513  ;;  %14208 = vst [vmem:[#allocation148_spill] sm:$0xff] %v12117_v40  ;;  %v2553_v22 = vmul.f32 %v8512_v34, %v14209_v43  ;;  %v12129_v32 = vpop.xlane.xlu0 %3429  ;;  %v14212_v34 = vld [vmem:[#allocation61_spill] sm:$0xff]  ;;  %8533 = vpow2.f32 %v2349_v5 }
 0x808   : > { %v8516_v31 = vpop.eup %8515  ;;  %v3513_v23 = vmul.f32 %v8514_v20, %v14210_v27  ;;  %8535 = vrcp.f32 %v6975_v58 }
 0x809   : > { %v8518_v50 = vpop.eup %8517  ;;  %3463 = vmax.xlane.f32.xlu1 %v12111_v19  ;;  %v12132_v13 = vmul.f32 %v12015_v39, %v8516_v31  ;;  %v3065_v43 = vadd.f32 %v3033_v30, %v2553_v22  ;;  %8537 = vpow2.f32 %v2829_v44  ;;  %v3254_v31 = vmul.f32 %v11934_v29, %v14213_v28  ;;  %v14215_v44 = vld [vmem:[#allocation154_spill] sm:$0xff] }
 0x80a   : > { %v12121_v54 = vpop.xlane.xlu1 %3907  ;;  %3477 = vmax.xlane.f32.xlu0 %v12117_v40  ;;  %v8520_v24 = vpop.eup %8519  ;;  %v3993_v47 = vmul.f32 %v8518_v50, %v14212_v34  ;;  %v14221_v40 = vld [vmem:[#allocation141_spill] sm:$0xff] }
 0x80b   : > { %14211 = vst [vmem:[#allocation150_spill] sm:$0xff] %v12132_v13  ;;  %v3545_v21 = vadd.f32 %v3513_v23, %v3065_v43  ;;  %v12138_v36 = vmul.f32 %v12015_v39, %v8520_v24  ;;  %v8522_v4 = vpop.eup %8521  ;;  %v12146_v50 = vpop.xlane.xlu0 %3909  ;;  %v3315_v58 = vmul.f32 1.442695, %v3254_v31  ;;  %v3734_v43 = vmul.f32 %v11934_v29, %v14215_v44 }
 0x80c   : > { %v8524_v45 = vpop.eup %8523  ;;  %v12150_v27 = vmul.f32 %v12015_v39, %v8522_v4 }
 0x80d   : > { %3943 = vmax.xlane.f32.xlu1 %v12127_v7  ;;  %v12142_v30 = vadd.f32 %v3993_v47, %v3545_v21  ;;  %v8526_v22 = vpop.eup %8525  ;;  %v14217_v21 = vld [vmem:[#allocation155_spill] sm:$0xff] }
 0x80e   : > { %v2466_v20 = vpop.xlane.xlu1 %2465  ;;  %3957 = vmax.xlane.f32.xlu0 %v12132_v13  ;;  %v8528_v23 = vpop.eup %8527  ;;  %v2293_v4 = vmul.f32 %v11934_v29, %v14217_v21  ;;  %v14219_v13 = vld [vmem:[#allocation157_spill] sm:$0xff] }
 0x80f   : > { %14214 = vst [vmem:[#allocation147_spill] sm:$0xff] %v12142_v30  ;;  %8539 = vrcp.f32 %v2466_v20  ;;  %v8530_v24 = vpop.eup %8529  ;;  %v12162_v20 = vmul.f32 %v12015_v39, %v8524_v45  ;;  %v12171_v45 = vmul.f32 %v12015_v39, %v8528_v23  ;;  %v2773_v21 = vmul.f32 %v11934_v29, %v14219_v13 }
 0x810   : > { %8541 = vrcp.f32 %v11864_v63  ;;  %v7010_v63 = vadd.f32 -1.0, %v8526_v22  ;;  %v8532_v47 = vpop.eup %8531  ;;  %v2353_v44 = vmul.f32 1.442695, %v2293_v4  ;;  %v12179_v23 = vmul.f32 %v12015_v39, %v8530_v24 }
 0x811   : > { %2501 = vmax.xlane.f32.xlu1 %v12138_v36  ;;  %14216 = vst [vmem:[#allocation146_spill] sm:$0xff] %v12162_v20  ;;  %v7042_v31 = vadd.f32 -1.0, %v8532_v47  ;;  %14218 = vst [vmem:[#allocation124_spill] sm:$0xff] %v12171_v45 }
 0x812   : > { %v2946_v5 = vpop.xlane.xlu1 %2945  ;;  %4057 = vadd.xlane.f32.xlu0 %v12142_v30 }
 0x813   : > { %8543 = vrcp.f32 %v2946_v5 }
 0x814   : > { %8545 = vrcp.f32 %v11748_v6  ;;  %v8534_v6 = vpop.eup %8533 }
 0x815   : > { %8547 = vrcp.f32 %v11884_v53  ;;  %2981 = vmax.xlane.f32.xlu1 %v12150_v27  ;;  %v8536_v28 = vpop.eup %8535  ;;  %v3795_v53 = vmul.f32 1.442695, %v3734_v43  ;;  %v6945_v22 = vadd.f32 -1.0, %v8534_v6 }
 0x816   : > { %8549 = vrcp.f32 %v11727_v25  ;;  %v12158_v34 = vpop.xlane.xlu1 %3431  ;;  %v8538_v25 = vpop.eup %8537 }
 0x817   : > { %8551 = vrcp.f32 %v12074_v15 }
 0x818   : > { %8553 = vpow2.f32 %v3315_v58 }
 0x819   : > { %8555 = vrcp.f32 %v12088_v16  ;;  %3467 = vmax.xlane.f32.xlu1 %v12162_v20  ;;  %v8540_v15 = vpop.eup %8539  ;;  %v2833_v20 = vmul.f32 1.442695, %v2773_v21 }
 0x81a   : > { %8557 = vrcp.f32 %v7010_v63  ;;  %v12168_v5 = vpop.xlane.xlu1 %3911  ;;  %v8542_v58 = vpop.eup %8541  ;;  %v14220_v63 = vld [vmem:[#allocation139_spill] sm:$0xff] }
 0x81b   : > { %8559 = vpow2.f32 %v3795_v53  ;;  %v2557_v47 = vmul.f32 %v8540_v15, %v14220_v63  ;;  %v3517_v53 = vmul.f32 %v8542_v58, %v14222_v59  ;;  %v14224_v15 = vld [vmem:[#allocation151_spill] sm:$0xff]  ;;  %v12189_v59 = vmul.f32 %v12015_v39, %v8536_v28  ;;  %v12199_v28 = vpop.xlane.xlu0 %2475 }
 0x81c   : > { %8561 = vrcp.f32 %v7042_v31  ;;  %v3256_v31 = vmul.f32 %v11934_v29, %v14223_v48  ;;  %v14226_v48 = vld [vmem:[#allocation149_spill] sm:$0xff]  ;;  %v14227_v58 = vld [vmem:[#allocation167_spill] sm:$0xff] }
 0x81d   : > { %v8544_v43 = vpop.eup %8543  ;;  %3947 = vmax.xlane.f32.xlu1 %v12171_v45  ;;  %8563 = vrcp.f32 %v6945_v22  ;;  %v6977_v45 = vadd.f32 -1.0, %v8538_v25 }
 0x81e   : > { %v8546_v16 = vpop.eup %8545  ;;  %v3037_v9 = vmul.f32 %v8544_v43, %v14221_v40  ;;  %v2470_v41 = vpop.xlane.xlu1 %2469  ;;  %8565 = vpow2.f32 %v2353_v44  ;;  %v14225_v44 = vld [vmem:[#allocation159_spill] sm:$0xff] }
 0x81f   : > { %v8548_v6 = vpop.eup %8547  ;;  %8567 = vrcp.f32 %v2470_v41  ;;  %v3036_v22 = vmul.f32 %v8546_v16, %v14224_v15  ;;  %v3319_v16 = vmul.f32 1.442695, %v3256_v31  ;;  %v14229_v15 = vld [vmem:[#allocation162_spill] sm:$0xff] }
 0x820   : > { %v8550_v4 = vpop.eup %8549  ;;  %v3069_v13 = vadd.f32 %v3037_v9, %v2557_v47  ;;  %8569 = vrcp.f32 %v12129_v32  ;;  %v3997_v21 = vmul.f32 %v8548_v6, %v14225_v44  ;;  %v3736_v32 = vmul.f32 %v11934_v29, %v14229_v15  ;;  %v14232_v44 = vld [vmem:[#allocation82_spill] sm:$0xff] }
 0x821   : > { %v8552_v35 = vpop.eup %8551  ;;  %2505 = vmax.xlane.f32.xlu1 %v12179_v23  ;;  %v2556_v41 = vmul.f32 %v8550_v4, %v14226_v48 }
 0x822   : > { %v8554_v40 = vpop.eup %8553  ;;  %v2950_v24 = vpop.xlane.xlu1 %2949  ;;  %v3549_v43 = vadd.f32 %v3517_v53, %v3069_v13  ;;  %v3516_v63 = vmul.f32 %v8552_v35, %v14227_v58 }
 0x823   : > { %v8556_v9 = vpop.eup %8555  ;;  %8571 = vrcp.f32 %v2950_v24  ;;  %v7012_v6 = vadd.f32 -1.0, %v8554_v40  ;;  %v3068_v13 = vadd.f32 %v3036_v22, %v2556_v41  ;;  %v12215_v41 = vpop.xlane.xlu0 %2955 }
 0x824   : > { %v8558_v25 = vpop.eup %8557  ;;  %8573 = vpow2.f32 %v2833_v20  ;;  %v12193_v47 = vadd.f32 %v3997_v21, %v3549_v43  ;;  %v14230_v20 = vld [vmem:[#allocation169_spill] sm:$0xff] }
 0x825   : > { %8575 = vrcp.f32 %v12146_v50  ;;  %2985 = vmax.xlane.f32.xlu1 %v12189_v59  ;;  %v3996_v53 = vmul.f32 %v8556_v9, %v14230_v20  ;;  %v8560_v4 = vpop.eup %8559  ;;  %v12203_v35 = vmul.f32 %v12015_v39, %v8558_v25  ;;  %v3548_v31 = vadd.f32 %v3516_v63, %v3068_v13  ;;  %v14235_v13 = vld [vmem:[#allocation179_spill] sm:$0xff] }
 0x826   : > { %14228 = vst [vmem:[#allocation61_spill] sm:$0xff] %v12193_v47  ;;  %8577 = vrcp.f32 %v6977_v45  ;;  %v8562_v24 = vpop.eup %8561  ;;  %v3799_v50 = vmul.f32 1.442695, %v3736_v32  ;;  %v2295_v45 = vmul.f32 %v11934_v29, %v14232_v44  ;;  %v7044_v22 = vadd.f32 -1.0, %v8560_v4 }
 0x827   : > { %14231 = vst [vmem:[#allocation153_spill] sm:$0xff] %v12203_v35  ;;  %v8564_v43 = vpop.eup %8563  ;;  %8579 = vpow2.f32 %v3319_v16  ;;  %v12210_v21 = vadd.f32 %v3996_v53, %v3548_v31  ;;  %v12213_v25 = vmul.f32 %v12015_v39, %v8562_v24  ;;  %v14234_v16 = vld [vmem:[#allocation164_spill] sm:$0xff]  ;;  %v14236_v53 = vld [vmem:[#allocation181_spill] sm:$0xff] }
 0x828   : > { %4153 = vrot.lane.b32.xlu0 %v12142_v30, %s9133_s22  ;;  %v8566_v40 = vpop.eup %8565  ;;  %8581 = vrcp.f32 %v7012_v6  ;;  %v2357_v63 = vmul.f32 1.442695, %v2295_v45  ;;  %v2775_v15 = vmul.f32 %v11934_v29, %v14234_v16  ;;  %v12225_v31 = vmul.f32 %v12015_v39, %v8564_v43 }
 0x829   : > { %3471 = vmax.xlane.f32.xlu1 %v12203_v35  ;;  %14233 = vst [vmem:[#allocation154_spill] sm:$0xff] %v12210_v21  ;;  %v8568_v9 = vpop.eup %8567  ;;  %8583 = vpow2.f32 %v3799_v50  ;;  %v6947_v6 = vadd.f32 -1.0, %v8566_v40  ;;  %v14237_v50 = vld [vmem:[#allocation163_spill] sm:$0xff]  ;;  %v14238_v40 = vld [vmem:[#allocation80_spill] sm:$0xff] }
 0x82a   : > { %v8570_v48 = vpop.eup %8569  ;;  %8585 = vrcp.f32 %v7044_v22  ;;  %v2559_v20 = vmul.f32 %v8568_v9, %v14235_v13  ;;  %v2837_v35 = vmul.f32 1.442695, %v2775_v15 }
 0x82b   : > { %v3519_v45 = vmul.f32 %v8570_v48, %v14237_v50  ;;  %8587 = vpow2.f32 %v2357_v63 }
 0x82c   : > { %4159 = vrot.lane.b32.xlu0 %v12210_v21, %s9133_s22  ;;  %8589 = vrcp.f32 %v6947_v6 }
 0x82d   : > { %v8572_v58 = vpop.eup %8571  ;;  %3951 = vmax.xlane.f32.xlu1 %v12213_v25  ;;  %8591 = vpow2.f32 %v2837_v35 }
 0x82e   : > { %v8574_v32 = vpop.eup %8573  ;;  %v3039_v4 = vmul.f32 %v8572_v58, %v14236_v53 }
 0x82f   : > { %v8576_v24 = vpop.eup %8575  ;;  %v6979_v29 = vadd.f32 -1.0, %v8574_v32 }
 0x830   : > { %v8578_v44 = vpop.eup %8577  ;;  %v3071_v30 = vadd.f32 %v3039_v4, %v2559_v20  ;;  %v3999_v16 = vmul.f32 %v8576_v24, %v14238_v40 }
 0x831   : > { %2509 = vmax.xlane.f32.xlu1 %v12225_v31  ;;  %v8580_v9 = vpop.eup %8579  ;;  %v12231_v58 = vmul.f32 %v12015_v39, %v8578_v44  ;;  %8593 = vrcp.f32 %v6979_v29 }
 0x832   : > { %v3551_v22 = vadd.f32 %v3519_v45, %v3071_v30  ;;  %v8582_v13 = vpop.eup %8581  ;;  %v7014_v48 = vadd.f32 -1.0, %v8580_v9 }
 0x833   : > { %v8584_v63 = vpop.eup %8583  ;;  %v12237_v15 = vmul.f32 %v12015_v39, %v8582_v13 }
 0x834   : > { %v12233_v43 = vadd.f32 %v3999_v16, %v3551_v22  ;;  %v8586_v32 = vpop.eup %8585  ;;  %8595 = vrcp.f32 %v7014_v48  ;;  %v7046_v30 = vadd.f32 -1.0, %v8584_v63  ;;  %v12256_v16 = vpop.xlane.xlu0 %3433 }
 0x835   : > { %2989 = vmax.xlane.f32.xlu1 %v12231_v58  ;;  %v8588_v6 = vpop.eup %8587  ;;  %v12241_v20 = vmul.f32 %v12015_v39, %v8586_v32 }
 0x836   : > { %v8590_v53 = vpop.eup %8589  ;;  %8597 = vrcp.f32 %v7046_v30  ;;  %v6949_v35 = vadd.f32 -1.0, %v8588_v6 }
 0x837   : > { %v8592_v4 = vpop.eup %8591  ;;  %v12245_v24 = vmul.f32 %v12015_v39, %v8590_v53 }
 0x838   : > { %8599 = vrcp.f32 %v6949_v35  ;;  %v6981_v50 = vadd.f32 -1.0, %v8592_v4  ;;  %v14242_v35 = vld [vmem:[#allocation173_spill] sm:$0xff] }
 0x839   : > { %3475 = vmax.xlane.f32.xlu1 %v12237_v15 }
 0x83a   : > { %8601 = vrcp.f32 %v6981_v50  ;;  %v3914_v50 = vpop.xlane.xlu0 %3913 }
 0x83b   : > { %v8594_v44 = vpop.eup %8593  ;;  %8603 = vrcp.f32 %v12106_v38  ;;  %v14241_v38 = vld [vmem:[#allocation172_spill] sm:$0xff] }
 0x83c   : > { %v12249_v45 = vmul.f32 %v12015_v39, %v8594_v44  ;;  %8605 = vrcp.f32 %v12121_v54 }
 0x83d   : > { %3955 = vmax.xlane.f32.xlu1 %v12241_v20  ;;  %8607 = vrcp.f32 %v12158_v34 }
 0x83e   : > { %v8596_v29 = vpop.eup %8595  ;;  %8609 = vrcp.f32 %v12168_v5 }
 0x83f   : > { %v12253_v22 = vmul.f32 %v12015_v39, %v8596_v29  ;;  %v2480_v29 = vpop.xlane.xlu0 %2479  ;;  %8611 = vrcp.f32 %v12215_v41 }
 0x840   : > { %v8598_v40 = vpop.eup %8597  ;;  %8613 = vrcp.f32 %v12199_v28  ;;  %v14248_v28 = vld [vmem:[#allocation185_spill] sm:$0xff] }
 0x841   : > { %2513 = vmax.xlane.f32.xlu1 %v12245_v24  ;;  %v12259_v9 = vmul.f32 %v12015_v39, %v8598_v40 }
 0x842   : > { %v8600_v13 = vpop.eup %8599 }
 0x843   : > { %v12266_v48 = vmul.f32 %v12015_v39, %v8600_v13 }
 0x844   : > { %v8602_v63 = vpop.eup %8601 }
 0x845   : > { %2993 = vmax.xlane.f32.xlu1 %v12249_v45  ;;  %14239 = vst [vmem:[#allocation155_spill] sm:$0xff] %v12266_v48  ;;  %v12270_v32 = vmul.f32 %v12015_v39, %v8602_v63  ;;  %v8604_v30 = vpop.eup %8603  ;;  %v3436_v39 = vpop.xlane.xlu1 %3435  ;;  %v14243_v63 = vld [vmem:[#allocation176_spill] sm:$0xff] }
 0x846   : > { %v8606_v6 = vpop.eup %8605  ;;  %v3518_v53 = vmul.f32 %v8604_v30, %v14241_v38  ;;  %8615 = vrcp.f32 %v3436_v39 }
 0x847   : > { %14240 = vst [vmem:[#allocation157_spill] sm:$0xff] %v12270_v32  ;;  %v3998_v4 = vmul.f32 %v8606_v6, %v14242_v35  ;;  %v8608_v40 = vpop.eup %8607  ;;  %v14244_v6 = vld [vmem:[#allocation178_spill] sm:$0xff] }
 0x848   : > { %v3550_v54 = vadd.f32 %v3518_v53, %v11909_v26  ;;  %v8610_v13 = vpop.eup %8609  ;;  %v3520_v30 = vmul.f32 %v8608_v40, %v14243_v63 }
 0x849   : > { %3479 = vmax.xlane.f32.xlu1 %v12253_v22  ;;  %v3916_v26 = vpop.xlane.xlu1 %3915  ;;  %v4000_v38 = vmul.f32 %v8610_v13, %v14244_v6  ;;  %v14245_v13 = vld [vmem:[#allocation84_spill] sm:$0xff]  ;;  %v14246_v6 = vld [vmem:[#allocation83_spill] sm:$0xff] }
 0x84a   : > { %v12277_v44 = vadd.f32 %v3998_v4, %v3550_v54  ;;  %v3552_v53 = vadd.f32 %v3520_v30, %v11976_v12  ;;  %v2960_v4 = vpop.xlane.xlu0 %2959  ;;  %8617 = vrcp.f32 %v3916_v26  ;;  %v8612_v12 = vpop.eup %8611 }
 0x84b   : > { %4061 = vadd.xlane.f32.xlu0 %v11877_v60  ;;  %v8614_v54 = vpop.eup %8613  ;;  %v3042_v63 = vmul.f32 %v8612_v12, %v14245_v13 }
 0x84c   : > { %v12290_v35 = vadd.f32 %v4000_v38, %v3552_v53  ;;  %v2562_v38 = vmul.f32 %v8614_v54, %v14246_v6  ;;  %v14249_v54 = vld [vmem:[#allocation187_spill] sm:$0xff] }
 0x84d   : > { %3959 = vmax.xlane.f32.xlu1 %v12259_v9  ;;  %v2474_v34 = vpop.xlane.xlu1 %2473 }
 0x84e   : > { %v3438_v5 = vpop.xlane.xlu0 %3437 }
 0x850   : > { %v8616_v40 = vpop.eup %8615 }
 0x851   : > { %2517 = vmax.xlane.f32.xlu1 %v12266_v48  ;;  %v2954_v53 = vpop.xlane.xlu1 %2953 }
 0x852   : > { %v3918_v39 = vpop.xlane.xlu0 %3917  ;;  %8619 = vrcp.f32 %v2954_v53 }
 0x853   : > { %8621 = vrcp.f32 %v2474_v34  ;;  %v14252_v34 = vld [vmem:[#allocation165_spill] sm:$0xff] }
 0x854   : > { %v8618_v30 = vpop.eup %8617  ;;  %8623 = vrcp.f32 %v12256_v16 }
 0x855   : > { %2997 = vmax.xlane.f32.xlu1 %v12270_v32  ;;  %v3440_v26 = vpop.xlane.xlu1 %3439  ;;  %8625 = vrcp.f32 %v3914_v50 }
 0x856   : > { %8627 = vrcp.f32 %v2960_v4  ;;  %v2484_v16 = vpop.xlane.xlu0 %2483 }
 0x857   : > { %8629 = vrcp.f32 %v2480_v29  ;;  %v14256_v29 = vld [vmem:[#allocation190_spill] sm:$0xff] }
 0x858   : > { %8631 = vrcp.f32 %v3440_v26 }
 0x859   : > { %4059 = vadd.xlane.f32.xlu1 %v12099_v8 }
 0x85a   : > { %v2964_v26 = vpop.xlane.xlu0 %2963 }
 0x85c   : > { %v8620_v12 = vpop.eup %8619 }
 0x861   : > { %4163 = vrot.lane.b32.xlu0 %v12277_v44, %s9133_s22 }
 0x86a   : > { %4155 = vrot.lane.b32.xlu1 %v12099_v8, %s9133_s22  ;;  %v4002_v8 = vmul.f32 %v8618_v30, %v14248_v28  ;;  %v3920_v28 = vpop.xlane.xlu1 %3919 }
 0x86b   : > { %8633 = vrcp.f32 %v3920_v28 }
 0x880   : > { %4065 = vadd.xlane.f32.xlu0 %v12193_v47 }
 0x88e   : > { %4063 = vadd.xlane.f32.xlu1 %v12210_v21  ;;  %v3074_v21 = vadd.f32 %v3042_v63, %v2562_v38  ;;  %v14251_v63 = vld [vmem:[#allocation85_spill] sm:$0xff] }
 0x896   : > { %4167 = vrot.lane.b32.xlu0 %v12290_v35, %s9133_s22 }
 0x89f   : > { %4157 = vrot.lane.b32.xlu1 %v11877_v60, %s9133_s22  ;;  %v14247_v60 = vld [vmem:[#allocation183_spill] sm:$0xff] }
 0x8a0   : > { %v3522_v41 = vmul.f32 %v8616_v40, %v14247_v60  ;;  %v8622_v60 = vpop.eup %8621  ;;  %v3041_v40 = vmul.f32 %v8620_v12, %v14249_v54  ;;  %v14253_v54 = vld [vmem:[#allocation122_spill] sm:$0xff] }
 0x8a2   : > { %v3554_v48 = vadd.f32 %v3522_v41, %v3074_v21  ;;  %v14250_v21 = vld [vmem:[#allocation186_spill] sm:$0xff] }
 0x8a4   : > { %v12304_v32 = vadd.f32 %v4002_v8, %v3554_v48  ;;  %v2561_v8 = vmul.f32 %v8622_v60, %v14250_v21  ;;  %v8624_v48 = vpop.eup %8623 }
 0x8a5   : > { %v3521_v30 = vmul.f32 %v8624_v48, %v14251_v63  ;;  %v8626_v6 = vpop.eup %8625 }
 0x8a6   : > { %v3073_v13 = vadd.f32 %v3041_v40, %v2561_v8  ;;  %v4001_v53 = vmul.f32 %v8626_v6, %v14252_v34  ;;  %v8628_v50 = vpop.eup %8627  ;;  %v14254_v8 = vld [vmem:[#allocation120_spill] sm:$0xff]  ;;  %v2478_v6 = vpop.xlane.xlu1 %2477 }
 0x8a7   : > { %v8630_v12 = vpop.eup %8629  ;;  %v3044_v40 = vmul.f32 %v8628_v50, %v14253_v54  ;;  %v14258_v54 = vld [vmem:[#allocation193_spill] sm:$0xff] }
 0x8a8   : > { %v3553_v38 = vadd.f32 %v3521_v30, %v3073_v13  ;;  %v8632_v60 = vpop.eup %8631  ;;  %v2564_v48 = vmul.f32 %v8630_v12, %v14254_v8  ;;  %v14255_v13 = vld [vmem:[#allocation189_spill] sm:$0xff]  ;;  %v14257_v12 = vld [vmem:[#allocation195_spill] sm:$0xff] }
 0x8a9   : > { %v8634_v21 = vpop.eup %8633  ;;  %v3524_v63 = vmul.f32 %v8632_v60, %v14255_v13 }
 0x8aa   : > { %v12315_v41 = vadd.f32 %v4001_v53, %v3553_v38  ;;  %v3076_v4 = vadd.f32 %v3044_v40, %v2564_v48  ;;  %v4004_v30 = vmul.f32 %v8634_v21, %v14256_v29  ;;  %v2958_v53 = vpop.xlane.xlu1 %2957  ;;  %v14259_v48 = vld [vmem:[#allocation90_spill] sm:$0xff] }
 0x8ab   : > { %8635 = vrcp.f32 %v2958_v53 }
 0x8ac   : > { %v3556_v38 = vadd.f32 %v3524_v63, %v3076_v4  ;;  %8637 = vrcp.f32 %v2478_v6 }
 0x8ad   : > { %8639 = vrcp.f32 %v3438_v5  ;;  %v3442_v5 = vpop.xlane.xlu0 %3441 }
 0x8ae   : > { %v12323_v34 = vadd.f32 %v4004_v30, %v3556_v38  ;;  %8641 = vrcp.f32 %v3918_v39  ;;  %v3444_v4 = vpop.xlane.xlu1 %3443  ;;  %v14260_v30 = vld [vmem:[#allocation92_spill] sm:$0xff] }
 0x8af   : > { %8643 = vrcp.f32 %v2964_v26 }
 0x8b0   : > { %8645 = vrcp.f32 %v2484_v16  ;;  %v14264_v16 = vld [vmem:[#allocation199_spill] sm:$0xff] }
 0x8b1   : > { %8647 = vrcp.f32 %v3444_v4  ;;  %v3922_v4 = vpop.xlane.xlu0 %3921 }
 0x8b2   : > { %v3924_v39 = vpop.xlane.xlu1 %3923 }
 0x8b3   : > { %8649 = vrcp.f32 %v3924_v39 }
 0x8b5   : > { %4069 = vadd.xlane.f32.xlu0 %v12233_v43  ;;  %v8636_v28 = vpop.eup %8635 }
 0x8b6   : > { %v8638_v50 = vpop.eup %8637  ;;  %v3043_v60 = vmul.f32 %v8636_v28, %v14257_v12  ;;  %v14261_v12 = vld [vmem:[#allocation171_spill] sm:$0xff] }
 0x8b7   : > { %v2563_v40 = vmul.f32 %v8638_v50, %v14258_v54  ;;  %v8640_v21 = vpop.eup %8639 }
 0x8b8   : > { %v3523_v13 = vmul.f32 %v8640_v21, %v14259_v48  ;;  %v8642_v63 = vpop.eup %8641 }
 0x8b9   : > { %v3075_v8 = vadd.f32 %v3043_v60, %v2563_v40  ;;  %v4003_v6 = vmul.f32 %v8642_v63, %v14260_v30  ;;  %v8644_v53 = vpop.eup %8643  ;;  %v14262_v40 = vld [vmem:[#allocation95_spill] sm:$0xff]  ;;  %v2482_v63 = vpop.xlane.xlu1 %2481 }
 0x8ba   : > { %v8646_v28 = vpop.eup %8645  ;;  %v3046_v60 = vmul.f32 %v8644_v53, %v14261_v12 }
 0x8bb   : > { %v3555_v29 = vadd.f32 %v3523_v13, %v3075_v8  ;;  %v8648_v50 = vpop.eup %8647  ;;  %v2566_v21 = vmul.f32 %v8646_v28, %v14262_v40  ;;  %v14263_v8 = vld [vmem:[#allocation116_spill] sm:$0xff]  ;;  %v14265_v40 = vld [vmem:[#allocation97_spill] sm:$0xff] }
 0x8bc   : > { %v3526_v48 = vmul.f32 %v8648_v50, %v14263_v8 }
 0x8bd   : > { %v12333_v38 = vadd.f32 %v4003_v6, %v3555_v29  ;;  %v8650_v54 = vpop.eup %8649  ;;  %v3078_v26 = vadd.f32 %v3046_v60, %v2566_v21  ;;  %v2962_v6 = vpop.xlane.xlu1 %2961 }
 0x8be   : > { %v4006_v13 = vmul.f32 %v8650_v54, %v14264_v16  ;;  %8651 = vrcp.f32 %v2962_v6  ;;  %v2488_v60 = vpop.xlane.xlu0 %2487  ;;  %v14268_v6 = vld [vmem:[#allocation100_spill] sm:$0xff] }
 0x8bf   : > { %v3558_v29 = vadd.f32 %v3526_v48, %v3078_v26  ;;  %8653 = vrcp.f32 %v2482_v63 }
 0x8c0   : > { %8655 = vrcp.f32 %v3442_v5 }
 0x8c1   : > { %v12341_v30 = vadd.f32 %v4006_v13, %v3558_v29  ;;  %8657 = vrcp.f32 %v3922_v4  ;;  %v3448_v48 = vpop.xlane.xlu1 %3447  ;;  %v14266_v13 = vld [vmem:[#allocation99_spill] sm:$0xff] }
 0x8c2   : > { %v2968_v16 = vpop.xlane.xlu0 %2967 }
 0x8c3   : > { %4067 = vadd.xlane.f32.xlu1 %v12277_v44  ;;  %8659 = vrcp.f32 %v2968_v16 }
 0x8c4   : > { %8661 = vrcp.f32 %v2488_v60 }
 0x8c5   : > { %v3928_v5 = vpop.xlane.xlu1 %3927  ;;  %8663 = vrcp.f32 %v3448_v48 }
 0x8c6   : > { %8665 = vrcp.f32 %v3928_v5 }
 0x8c8   : > { %v8652_v39 = vpop.eup %8651 }
 0x8c9   : > { %v8654_v53 = vpop.eup %8653  ;;  %v3045_v28 = vmul.f32 %v8652_v39, %v11846_v37 }
 0x8ca   : > { %v2565_v50 = vmul.f32 %v8654_v53, %v11823_v42  ;;  %v8656_v12 = vpop.eup %8655 }
 0x8cb   : > { %4171 = vrot.lane.b32.xlu0 %v12304_v32, %s9133_s22  ;;  %v3525_v21 = vmul.f32 %v8656_v12, %v14265_v40  ;;  %v8658_v8 = vpop.eup %8657  ;;  %v2486_v40 = vpop.xlane.xlu1 %2485 }
 0x8cc   : > { %v3077_v54 = vadd.f32 %v3045_v28, %v2565_v50  ;;  %v4005_v63 = vmul.f32 %v8658_v8, %v14266_v13  ;;  %v14269_v28 = vld [vmem:[#allocation174_spill] sm:$0xff] }
 0x8cd   : > { %v8660_v42 = vpop.eup %8659 }
 0x8ce   : > { %v3557_v26 = vadd.f32 %v3525_v21, %v3077_v54  ;;  %v8662_v37 = vpop.eup %8661  ;;  %v3048_v39 = vmul.f32 %v8660_v42, %v14268_v6 }
 0x8cf   : > { %v8664_v4 = vpop.eup %8663  ;;  %v2568_v50 = vmul.f32 %v8662_v37, %v14269_v28  ;;  %v2966_v48 = vpop.xlane.xlu1 %2965 }
 0x8d0   : > { %v12351_v29 = vadd.f32 %v4005_v63, %v3557_v26  ;;  %v8666_v53 = vpop.eup %8665  ;;  %v3528_v12 = vmul.f32 %v8664_v4, %v11862_v3  ;;  %8667 = vrcp.f32 %v2966_v48  ;;  %v3446_v26 = vpop.xlane.xlu0 %3445  ;;  %v14270_v4 = vld [vmem:[#allocation104_spill] sm:$0xff]  ;;  %v14272_v48 = vld [vmem:[#allocation109_spill] sm:$0xff] }
 0x8d1   : > { %v3080_v54 = vadd.f32 %v3048_v39, %v2568_v50  ;;  %v4008_v60 = vmul.f32 %v8666_v53, %v11882_v11  ;;  %8669 = vrcp.f32 %v2486_v40 }
 0x8d2   : > { %14267 = vst [vmem:[#allocation139_spill] sm:$0xff] %v12351_v29  ;;  %8671 = vrcp.f32 %v3446_v26 }
 0x8d3   : > { %v3560_v21 = vadd.f32 %v3528_v12, %v3080_v54  ;;  %v3452_v53 = vpop.xlane.xlu1 %3451  ;;  %v14271_v12 = vld [vmem:[#allocation105_spill] sm:$0xff] }
 0x8d4   : > { %4161 = vrot.lane.b32.xlu1 %v12193_v47, %s9133_s22  ;;  %v3926_v16 = vpop.xlane.xlu0 %3925 }
 0x8d5   : > { %v12359_v8 = vadd.f32 %v4008_v60, %v3560_v21  ;;  %8673 = vrcp.f32 %v3926_v16 }
 0x8d7   : > { %v3932_v40 = vpop.xlane.xlu1 %3931 }
 0x8d8   : > { %v2492_v42 = vpop.xlane.xlu0 %2491 }
 0x8da   : > { %v8668_v3 = vpop.eup %8667 }
 0x8db   : > { %v8670_v13 = vpop.eup %8669  ;;  %v3047_v11 = vmul.f32 %v8668_v3, %v11918_v56  ;;  %v14273_v3 = vld [vmem:[#allocation106_spill] sm:$0xff] }
 0x8dc   : > { %v2567_v63 = vmul.f32 %v8670_v13, %v11897_v55  ;;  %v8672_v5 = vpop.eup %8671  ;;  %v2972_v50 = vpop.xlane.xlu0 %2971 }
 0x8dd   : > { %v3527_v6 = vmul.f32 %v8672_v5, %v14270_v4  ;;  %8675 = vrcp.f32 %v2972_v50 }
 0x8de   : > { %v3079_v37 = vadd.f32 %v3047_v11, %v2567_v63  ;;  %8677 = vrcp.f32 %v2492_v42  ;;  %v2490_v42 = vpop.xlane.xlu1 %2489 }
 0x8df   : > { %v8674_v39 = vpop.eup %8673  ;;  %8679 = vrcp.f32 %v3452_v53 }
 0x8e0   : > { %v3559_v28 = vadd.f32 %v3527_v6, %v3079_v37  ;;  %v4007_v54 = vmul.f32 %v8674_v39, %v14271_v12  ;;  %8681 = vrcp.f32 %v3932_v40  ;;  %v3450_v39 = vpop.xlane.xlu0 %3449 }
 0x8e2   : > { %v12369_v60 = vadd.f32 %v4007_v54, %v3559_v28  ;;  %v2970_v6 = vpop.xlane.xlu1 %2969 }
 0x8e3   : > { %8683 = vrcp.f32 %v2970_v6 }
 0x8e4   : > { %8685 = vrcp.f32 %v2490_v42  ;;  %v3930_v53 = vpop.xlane.xlu0 %3929  ;;  %v14277_v42 = vld [vmem:[#allocation188_spill] sm:$0xff] }
 0x8e5   : > { %8687 = vrcp.f32 %v3450_v39  ;;  %v14278_v39 = vld [vmem:[#allocation112_spill] sm:$0xff] }
 0x8e6   : > { %8689 = vrcp.f32 %v3930_v53 }
 0x8e7   : > { %v8676_v55 = vpop.eup %8675 }
 0x8e8   : > { %v8678_v56 = vpop.eup %8677  ;;  %v3050_v26 = vmul.f32 %v8676_v55, %v14272_v48  ;;  %v2496_v54 = vpop.xlane.xlu0 %2495  ;;  %v14275_v55 = vld [vmem:[#allocation184_spill] sm:$0xff] }
 0x8e9   : > { %v8680_v21 = vpop.eup %8679  ;;  %v2570_v13 = vmul.f32 %v8678_v56, %v14273_v3  ;;  %v3456_v48 = vpop.xlane.xlu1 %3455  ;;  %v14276_v3 = vld [vmem:[#allocation111_spill] sm:$0xff] }
 0x8ea   : > { %4073 = vadd.xlane.f32.xlu0 %v12315_v41  ;;  %v8682_v16 = vpop.eup %8681  ;;  %v3530_v11 = vmul.f32 %v8680_v21, %v11940_v10 }
 0x8eb   : > { %v3082_v63 = vadd.f32 %v3050_v26, %v2570_v13  ;;  %v4010_v5 = vmul.f32 %v8682_v16, %v11949_v52 }
 0x8ec   : > { %v2976_v16 = vpop.xlane.xlu0 %2975 }
 0x8ed   : > { %v3562_v37 = vadd.f32 %v3530_v11, %v3082_v63  ;;  %v8684_v10 = vpop.eup %8683  ;;  %8691 = vrcp.f32 %v2976_v16  ;;  %v3936_v63 = vpop.xlane.xlu1 %3935 }
 0x8ee   : > { %v8686_v28 = vpop.eup %8685  ;;  %v3049_v52 = vmul.f32 %v8684_v10, %v11981_v57  ;;  %8693 = vrcp.f32 %v2496_v54 }
 0x8ef   : > { %v12377_v4 = vadd.f32 %v4010_v5, %v3562_v37  ;;  %v2569_v50 = vmul.f32 %v8686_v28, %v11962_v33  ;;  %v8688_v12 = vpop.eup %8687  ;;  %8695 = vrcp.f32 %v3456_v48 }
 0x8f0   : > { %v3529_v56 = vmul.f32 %v8688_v12, %v14275_v55  ;;  %v8690_v21 = vpop.eup %8689  ;;  %8697 = vrcp.f32 %v3936_v63  ;;  %v3454_v55 = vpop.xlane.xlu0 %3453 }
 0x8f1   : > { %14274 = vst [vmem:[#allocation141_spill] sm:$0xff] %v12377_v4  ;;  %v3081_v40 = vadd.f32 %v3049_v52, %v2569_v50  ;;  %v4009_v13 = vmul.f32 %v8690_v21, %v14276_v3  ;;  %v2494_v50 = vpop.xlane.xlu1 %2493 }
 0x8f3   : > { %v3561_v26 = vadd.f32 %v3529_v56, %v3081_v40 }
 0x8f4   : > { %v3934_v56 = vpop.xlane.xlu0 %3933 }
 0x8f5   : > { %v12387_v11 = vadd.f32 %v4009_v13, %v3561_v26  ;;  %v2974_v40 = vpop.xlane.xlu1 %2973  ;;  %v14280_v13 = vld [vmem:[#allocation114_spill] sm:$0xff] }
 0x8f6   : > { %8699 = vrcp.f32 %v2974_v40 }
 0x8f7   : > { %v8692_v33 = vpop.eup %8691  ;;  %8701 = vrcp.f32 %v2494_v50 }
 0x8f8   : > { %4071 = vadd.xlane.f32.xlu1 %v12290_v35  ;;  %v8694_v57 = vpop.eup %8693  ;;  %v3052_v37 = vmul.f32 %v8692_v33, %v14277_v42  ;;  %8703 = vrcp.f32 %v3454_v55  ;;  %v2500_v16 = vpop.xlane.xlu0 %2499 }
 0x8f9   : > { %v8696_v5 = vpop.eup %8695  ;;  %v2572_v53 = vmul.f32 %v8694_v57, %v14278_v39  ;;  %8705 = vrcp.f32 %v3934_v56  ;;  %v3460_v57 = vpop.xlane.xlu1 %3459 }
 0x8fa   : > { %v8698_v6 = vpop.eup %8697  ;;  %v3532_v10 = vmul.f32 %v8696_v5, %v11996_v2 }
 0x8fb   : > { %v3084_v28 = vadd.f32 %v3052_v37, %v2572_v53  ;;  %v4012_v52 = vmul.f32 %v8698_v6, %v12006_v18  ;;  %v14281_v37 = vld [vmem:[#allocation191_spill] sm:$0xff] }
 0x8fc   : > { %v2980_v42 = vpop.xlane.xlu0 %2979 }
 0x8fd   : > { %v3564_v12 = vadd.f32 %v3532_v10, %v3084_v28  ;;  %8707 = vrcp.f32 %v2980_v42  ;;  %v3940_v53 = vpop.xlane.xlu1 %3939  ;;  %v14282_v28 = vld [vmem:[#allocation197_spill] sm:$0xff]  ;;  %v14285_v42 = vld [vmem:[#allocation198_spill] sm:$0xff] }
 0x8fe   : > { %8709 = vrcp.f32 %v2500_v16 }
 0x8ff   : > { %v12395_v54 = vadd.f32 %v4012_v52, %v3564_v12  ;;  %8711 = vrcp.f32 %v3460_v57  ;;  %v14283_v12 = vld [vmem:[#allocation194_spill] sm:$0xff] }
 0x900   : > { %4175 = vrot.lane.b32.xlu0 %v12323_v34, %s9133_s22  ;;  %v8700_v2 = vpop.eup %8699  ;;  %8713 = vrcp.f32 %v3940_v53  ;;  %v3458_v16 = vpop.xlane.xlu0 %3457 }
 0x901   : > { %14279 = vst [vmem:[#allocation156_spill] sm:$0xff] %v12395_v54  ;;  %v8702_v21 = vpop.eup %8701  ;;  %v3051_v18 = vmul.f32 %v8700_v2, %v12042_v62 }
 0x902   : > { %v2571_v48 = vmul.f32 %v8702_v21, %v12029_v61  ;;  %v8704_v26 = vpop.eup %8703  ;;  %v2498_v21 = vpop.xlane.xlu1 %2497 }
 0x903   : > { %v3531_v63 = vmul.f32 %v8704_v26, %v14280_v13  ;;  %v8706_v33 = vpop.eup %8705 }
 0x904   : > { %v3083_v3 = vadd.f32 %v3051_v18, %v2571_v48  ;;  %v4011_v6 = vmul.f32 %v8706_v33, %v14281_v37 }
 0x906   : > { %v3563_v5 = vadd.f32 %v3531_v63, %v3083_v3  ;;  %v2978_v26 = vpop.xlane.xlu1 %2977  ;;  %v3938_v3 = vpop.xlane.xlu0 %3937 }
 0x907   : > { %v8708_v61 = vpop.eup %8707  ;;  %8715 = vrcp.f32 %v2978_v26 }
 0x908   : > { %v12405_v39 = vadd.f32 %v4011_v6, %v3563_v5  ;;  %v8710_v62 = vpop.eup %8709  ;;  %v3054_v52 = vmul.f32 %v8708_v61, %v14282_v28  ;;  %8717 = vrcp.f32 %v2498_v21 }
 0x909   : > { %4165 = vrot.lane.b32.xlu1 %v12233_v43, %s9133_s22  ;;  %v8712_v10 = vpop.eup %8711  ;;  %v2574_v40 = vmul.f32 %v8710_v62, %v14283_v12  ;;  %8719 = vrcp.f32 %v3458_v16 }
 0x90a   : > { %v8714_v50 = vpop.eup %8713  ;;  %v3534_v55 = vmul.f32 %v8712_v10, %v12053_v0  ;;  %8721 = vrcp.f32 %v3938_v3  ;;  %v2504_v57 = vpop.xlane.xlu0 %2503  ;;  %v14286_v10 = vld [vmem:[#allocation200_spill] sm:$0xff] }
 0x90b   : > { %v3086_v56 = vadd.f32 %v3054_v52, %v2574_v40  ;;  %v4014_v2 = vmul.f32 %v8714_v50, %v12065_v49  ;;  %v3464_v53 = vpop.xlane.xlu1 %3463 }
 0x90d   : > { %v3566_v18 = vadd.f32 %v3534_v55, %v3086_v56 }
 0x90e   : > { %v2984_v62 = vpop.xlane.xlu0 %2983 }
 0x90f   : > { %v12413_v48 = vadd.f32 %v4014_v2, %v3566_v18  ;;  %8723 = vrcp.f32 %v2984_v62  ;;  %v3944_v50 = vpop.xlane.xlu1 %3943 }
 0x910   : > { %8725 = vrcp.f32 %v2504_v57 }
 0x911   : > { %14284 = vst [vmem:[#allocation161_spill] sm:$0xff] %v12413_v48  ;;  %v8716_v0 = vpop.eup %8715  ;;  %8727 = vrcp.f32 %v3464_v53 }
 0x912   : > { %v8718_v13 = vpop.eup %8717  ;;  %v3053_v49 = vmul.f32 %v8716_v0, %v12094_v14  ;;  %8729 = vrcp.f32 %v3944_v50 }
 0x913   : > { %v2573_v63 = vmul.f32 %v8718_v13, %v12079_v1  ;;  %v8720_v33 = vpop.eup %8719  ;;  %v2502_v26 = vpop.xlane.xlu1 %2501 }
 0x914   : > { %v3533_v37 = vmul.f32 %v8720_v33, %v14285_v42  ;;  %v8722_v6 = vpop.eup %8721 }
 0x915   : > { %v3085_v5 = vadd.f32 %v3053_v49, %v2573_v63  ;;  %v4013_v28 = vmul.f32 %v8722_v6, %v14286_v10 }
 0x917   : > { %v3565_v61 = vadd.f32 %v3533_v37, %v3085_v5  ;;  %v2982_v0 = vpop.xlane.xlu1 %2981 }
 0x918   : > { %8731 = vrcp.f32 %v2982_v0 }
 0x919   : > { %v12423_v52 = vadd.f32 %v4013_v28, %v3565_v61  ;;  %v8724_v1 = vpop.eup %8723  ;;  %8733 = vrcp.f32 %v2502_v26  ;;  %v14288_v61 = vld [vmem:[#allocation57_spill] sm:$0xff] }
 0x91a   : > { %v8726_v14 = vpop.eup %8725  ;;  %v3056_v40 = vmul.f32 %v8724_v1, %v11852_v46  ;;  %v3462_v46 = vpop.xlane.xlu0 %3461  ;;  %v14289_v1 = vld [vmem:[#allocation130_spill] sm:$0xff] }
 0x91b   : > { %v8728_v12 = vpop.eup %8727  ;;  %v2576_v56 = vmul.f32 %v8726_v14, %v11832_v17  ;;  %8735 = vrcp.f32 %v3462_v46  ;;  %v3468_v37 = vpop.xlane.xlu1 %3467 }
 0x91c   : > { %v8730_v55 = vpop.eup %8729  ;;  %v3536_v2 = vmul.f32 %v8728_v12, %v12111_v19  ;;  %v14290_v12 = vld [vmem:[#allocation202_spill] sm:$0xff] }
 0x91d   : > { %v3088_v21 = vadd.f32 %v3056_v40, %v2576_v56  ;;  %v4016_v18 = vmul.f32 %v8730_v55, %v12127_v7  ;;  %v14291_v55 = vld [vmem:[#allocation146_spill] sm:$0xff] }
 0x91e   : > { %v3942_v17 = vpop.xlane.xlu0 %3941 }
 0x91f   : > { %4077 = vadd.xlane.f32.xlu0 %v12333_v38  ;;  %v3568_v16 = vadd.f32 %v3536_v2, %v3088_v21  ;;  %8737 = vrcp.f32 %v3942_v17  ;;  %v3948_v28 = vpop.xlane.xlu1 %3947  ;;  %v14292_v21 = vld [vmem:[#allocation124_spill] sm:$0xff] }
 0x921   : > { %v12431_v3 = vadd.f32 %v4016_v18, %v3568_v16 }
 0x922   : > { %v8732_v19 = vpop.eup %8731  ;;  %v2508_v33 = vpop.xlane.xlu0 %2507 }
 0x923   : > { %14287 = vst [vmem:[#allocation151_spill] sm:$0xff] %v12431_v3  ;;  %v8734_v13 = vpop.eup %8733  ;;  %v3055_v7 = vmul.f32 %v8732_v19, %v12150_v27  ;;  %v2506_v26 = vpop.xlane.xlu1 %2505 }
 0x924   : > { %v2575_v49 = vmul.f32 %v8734_v13, %v12138_v36 }
 0x925   : > { %v8736_v63 = vpop.eup %8735 }
 0x926   : > { %v3087_v57 = vadd.f32 %v3055_v7, %v2575_v49  ;;  %v3535_v5 = vmul.f32 %v8736_v63, %v11872_v51  ;;  %v2988_v53 = vpop.xlane.xlu0 %2987 }
 0x927   : > { %8739 = vrcp.f32 %v2988_v53  ;;  %v2986_v46 = vpop.xlane.xlu1 %2985 }
 0x928   : > { %v3567_v6 = vadd.f32 %v3535_v5, %v3087_v57  ;;  %8741 = vrcp.f32 %v2508_v33 }
 0x929   : > { %v8738_v42 = vpop.eup %8737  ;;  %8743 = vrcp.f32 %v3468_v37 }
 0x92a   : > { %v4015_v62 = vmul.f32 %v8738_v42, %v14288_v61  ;;  %8745 = vrcp.f32 %v3948_v28  ;;  %v3466_v17 = vpop.xlane.xlu0 %3465  ;;  %v14294_v42 = vld [vmem:[#allocation204_spill] sm:$0xff]  ;;  %v14295_v28 = vld [vmem:[#allocation206_spill] sm:$0xff] }
 0x92b   : > { %8747 = vrcp.f32 %v2986_v46  ;;  %v3472_v53 = vpop.xlane.xlu1 %3471 }
 0x92c   : > { %v12441_v10 = vadd.f32 %v4015_v62, %v3567_v6  ;;  %8749 = vrcp.f32 %v2506_v26 }
 0x92d   : > { %4075 = vadd.xlane.f32.xlu1 %v12304_v32  ;;  %8751 = vrcp.f32 %v3466_v17 }
 0x92e   : > { %v3946_v19 = vpop.xlane.xlu0 %3945 }
 0x92f   : > { %8753 = vrcp.f32 %v3946_v19 }
 0x931   : > { %v8740_v36 = vpop.eup %8739 }
 0x932   : > { %v8742_v27 = vpop.eup %8741  ;;  %v3058_v51 = vmul.f32 %v8740_v36, %v14289_v1  ;;  %v2512_v57 = vpop.xlane.xlu0 %2511 }
 0x933   : > { %v8744_v50 = vpop.eup %8743  ;;  %v2578_v40 = vmul.f32 %v8742_v27, %v14290_v12 }
 0x934   : > { %v8746_v14 = vpop.eup %8745  ;;  %v3538_v56 = vmul.f32 %v8744_v50, %v14291_v55  ;;  %v3952_v50 = vpop.xlane.xlu1 %3951 }
 0x935   : > { %4179 = vrot.lane.b32.xlu0 %v12341_v30, %s9133_s22  ;;  %v3090_v2 = vadd.f32 %v3058_v51, %v2578_v40  ;;  %v4018_v18 = vmul.f32 %v8746_v14, %v14292_v21  ;;  %v8748_v13 = vpop.eup %8747  ;;  %v14296_v51 = vld [vmem:[#allocation134_spill] sm:$0xff]  ;;  %v14297_v40 = vld [vmem:[#allocation207_spill] sm:$0xff] }
 0x936   : > { %v8750_v7 = vpop.eup %8749  ;;  %v3057_v49 = vmul.f32 %v8748_v13, %v12189_v59  ;;  %v2992_v62 = vpop.xlane.xlu0 %2991 }
 0x937   : > { %v3570_v16 = vadd.f32 %v3538_v56, %v3090_v2  ;;  %v2577_v63 = vmul.f32 %v8750_v7, %v12179_v23  ;;  %v8752_v33 = vpop.eup %8751  ;;  %8755 = vrcp.f32 %v2992_v62  ;;  %v14298_v56 = vld [vmem:[#allocation153_spill] sm:$0xff] }
 0x938   : > { %v3537_v37 = vmul.f32 %v8752_v33, %v14294_v42  ;;  %8757 = vrcp.f32 %v2512_v57  ;;  %v2510_v21 = vpop.xlane.xlu1 %2509  ;;  %v14300_v62 = vld [vmem:[#allocation209_spill] sm:$0xff] }
 0x939   : > { %v12449_v0 = vadd.f32 %v4018_v18, %v3570_v16  ;;  %v3089_v5 = vadd.f32 %v3057_v49, %v2577_v63  ;;  %v8754_v6 = vpop.eup %8753  ;;  %8759 = vrcp.f32 %v3472_v53 }
 0x93a   : > { %v4017_v36 = vmul.f32 %v8754_v6, %v14295_v28  ;;  %8761 = vrcp.f32 %v3952_v50  ;;  %v3470_v19 = vpop.xlane.xlu0 %3469 }
 0x93b   : > { %14293 = vst [vmem:[#allocation159_spill] sm:$0xff] %v12449_v0  ;;  %v3569_v61 = vadd.f32 %v3537_v37, %v3089_v5 }
 0x93c   : > { %v2990_v17 = vpop.xlane.xlu1 %2989 }
 0x93d   : > { %v12459_v27 = vadd.f32 %v4017_v36, %v3569_v61  ;;  %8763 = vrcp.f32 %v2990_v17 }
 0x93e   : > { %4169 = vrot.lane.b32.xlu1 %v12315_v41, %s9133_s22  ;;  %8765 = vrcp.f32 %v2510_v21  ;;  %v3950_v7 = vpop.xlane.xlu0 %3949  ;;  %v14303_v21 = vld [vmem:[#allocation211_spill] sm:$0xff] }
 0x93f   : > { %8767 = vrcp.f32 %v3470_v19 }
 0x940   : > { %v3476_v13 = vpop.xlane.xlu1 %3475  ;;  %8769 = vrcp.f32 %v3950_v7 }
 0x941   : > { %v8756_v23 = vpop.eup %8755 }
 0x942   : > { %v8758_v59 = vpop.eup %8757  ;;  %v3060_v14 = vmul.f32 %v8756_v23, %v14296_v51 }
 0x943   : > { %v8760_v1 = vpop.eup %8759  ;;  %v2580_v55 = vmul.f32 %v8758_v59, %v14297_v40  ;;  %v14301_v59 = vld [vmem:[#allocation138_spill] sm:$0xff] }
 0x944   : > { %v8762_v12 = vpop.eup %8761  ;;  %v3540_v2 = vmul.f32 %v8760_v1, %v14298_v56  ;;  %v3956_v49 = vpop.xlane.xlu1 %3955 }
 0x945   : > { %v3092_v18 = vadd.f32 %v3060_v14, %v2580_v55  ;;  %v4020_v26 = vmul.f32 %v8762_v12, %v12213_v25  ;;  %v2516_v25 = vpop.xlane.xlu0 %2515 }
 0x947   : > { %v3572_v16 = vadd.f32 %v3540_v2, %v3092_v18  ;;  %v8764_v63 = vpop.eup %8763 }
 0x948   : > { %v8766_v33 = vpop.eup %8765  ;;  %v3059_v57 = vmul.f32 %v8764_v63, %v12231_v58  ;;  %v2514_v5 = vpop.xlane.xlu1 %2513 }
 0x949   : > { %v12467_v46 = vadd.f32 %v4020_v26, %v3572_v16  ;;  %v2579_v42 = vmul.f32 %v8766_v33, %v12225_v31  ;;  %v8768_v37 = vpop.eup %8767  ;;  %v2996_v6 = vpop.xlane.xlu0 %2995  ;;  %v14304_v16 = vld [vmem:[#allocation140_spill] sm:$0xff] }
 0x94a   : > { %v3539_v28 = vmul.f32 %v8768_v37, %v14300_v62  ;;  %v8770_v36 = vpop.eup %8769  ;;  %8771 = vrcp.f32 %v2996_v6 }
 0x94b   : > { %14299 = vst [vmem:[#allocation149_spill] sm:$0xff] %v12467_v46  ;;  %v3091_v53 = vadd.f32 %v3059_v57, %v2579_v42  ;;  %v4019_v1 = vmul.f32 %v8770_v36, %v14301_v59  ;;  %8773 = vrcp.f32 %v2516_v25 }
 0x94c   : > { %v2994_v61 = vpop.xlane.xlu1 %2993  ;;  %8775 = vrcp.f32 %v3476_v13 }
 0x94d   : > { %v3571_v50 = vadd.f32 %v3539_v28, %v3091_v53  ;;  %v3474_v23 = vpop.xlane.xlu0 %3473  ;;  %8777 = vrcp.f32 %v3956_v49 }
 0x94e   : > { %8779 = vrcp.f32 %v2994_v61 }
 0x94f   : > { %v12477_v14 = vadd.f32 %v4019_v1, %v3571_v50  ;;  %8781 = vrcp.f32 %v2514_v5 }
 0x950   : > { %v3480_v51 = vpop.xlane.xlu1 %3479  ;;  %8783 = vrcp.f32 %v3474_v23 }
 0x951   : > { %14302 = vst [vmem:[#allocation167_spill] sm:$0xff] %v12477_v14  ;;  %v3954_v31 = vpop.xlane.xlu0 %3953 }
 0x952   : > { %8785 = vrcp.f32 %v3954_v31 }
 0x954   : > { %4081 = vadd.xlane.f32.xlu0 %v12351_v29  ;;  %v3960_v58 = vpop.xlane.xlu1 %3959  ;;  %v8772_v40 = vpop.eup %8771 }
 0x955   : > { %v2520_v12 = vpop.xlane.xlu0 %2519  ;;  %v8774_v55 = vpop.eup %8773  ;;  %v3062_v18 = vmul.f32 %v8772_v40, %v14303_v21  ;;  %v14305_v40 = vld [vmem:[#allocation212_spill] sm:$0xff] }
 0x956   : > { %v8776_v2 = vpop.eup %8775  ;;  %v2582_v17 = vmul.f32 %v8774_v55, %v14304_v16 }
 0x957   : > { %v8778_v26 = vpop.eup %8777  ;;  %v3542_v7 = vmul.f32 %v8776_v2, %v12237_v15 }
 0x958   : > { %v12480_v56 = vpop.xlane.xlu1 %2517  ;;  %v3094_v49 = vadd.f32 %v3062_v18, %v2582_v17  ;;  %v4022_v63 = vmul.f32 %v8778_v26, %v12241_v20  ;;  %v8780_v53 = vpop.eup %8779  ;;  %v14306_v26 = vld [vmem:[#allocation213_spill] sm:$0xff] }
 0x959   : > { %v3000_v19 = vpop.xlane.xlu0 %2999  ;;  %v8782_v62 = vpop.eup %8781  ;;  %v3061_v61 = vmul.f32 %v8780_v53, %v12249_v45 }
 0x95a   : > { %v3574_v25 = vadd.f32 %v3542_v7, %v3094_v49  ;;  %v2581_v5 = vmul.f32 %v8782_v62, %v12245_v24  ;;  %v8784_v50 = vpop.eup %8783  ;;  %8787 = vrcp.f32 %v3000_v19  ;;  %v14307_v19 = vld [vmem:[#allocation215_spill] sm:$0xff] }
 0x95b   : > { %v3541_v55 = vmul.f32 %v8784_v50, %v14305_v40  ;;  %8789 = vrcp.f32 %v2520_v12  ;;  %v14308_v12 = vld [vmem:[#allocation214_spill] sm:$0xff] }
 0x95c   : > { %v12486_v13 = vpop.xlane.xlu1 %2997  ;;  %v12491_v57 = vadd.f32 %v4022_v63, %v3574_v25  ;;  %v3093_v1 = vadd.f32 %v3061_v61, %v2581_v5  ;;  %v8786_v2 = vpop.eup %8785  ;;  %8791 = vrcp.f32 %v3480_v51 }
 0x95d   : > { %v12489_v33 = vpop.xlane.xlu0 %3477  ;;  %v4021_v16 = vmul.f32 %v8786_v2, %v14306_v26  ;;  %8793 = vrcp.f32 %v3960_v58 }
 0x95e   : > { %v3573_v21 = vadd.f32 %v3541_v55, %v3093_v1  ;;  %8795 = vrcp.f32 %v12486_v13 }
 0x95f   : > { %8797 = vrcp.f32 %v12480_v56  ;;  %v14312_v56 = vld [vmem:[#allocation155_spill] sm:$0xff] }
 0x960   : > { %v12493_v42 = vpop.xlane.xlu1 %4059  ;;  %v12521_v17 = vadd.f32 %v4021_v16, %v3573_v21  ;;  %8799 = vrcp.f32 %v12489_v33 }
 0x961   : > { %v12497_v37 = vpop.xlane.xlu0 %3957 }
 0x962   : > { %4079 = vadd.xlane.f32.xlu1 %v12323_v34  ;;  %8801 = vrcp.f32 %v12497_v37 }
 0x964   : > { %v12499_v15 = vpop.permute.xlu1 %4155  ;;  %v8788_v63 = vpop.eup %8787 }
 0x965   : > { %v12503_v20 = vpop.xlane.xlu0 %4057  ;;  %v8790_v53 = vpop.eup %8789  ;;  %v3064_v5 = vmul.f32 %v8788_v63, %v14307_v19 }
 0x966   : > { %v8792_v62 = vpop.eup %8791  ;;  %v2584_v1 = vmul.f32 %v8790_v53, %v14308_v12  ;;  %v14310_v12 = vld [vmem:[#allocation157_spill] sm:$0xff] }
 0x967   : > { %v8794_v50 = vpop.eup %8793  ;;  %v3544_v51 = vmul.f32 %v8792_v62, %v12253_v22 }
 0x968   : > { %v12505_v6 = vpop.xlane.xlu1 %4063  ;;  %v3096_v55 = vadd.f32 %v3064_v5, %v2584_v1  ;;  %v4024_v2 = vmul.f32 %v8794_v50, %v12259_v9  ;;  %v8796_v5 = vpop.eup %8795 }
 0x969   : > { %v12507_v28 = vpop.permute.xlu0 %4153  ;;  %v8798_v50 = vpop.eup %8797  ;;  %v3063_v1 = vmul.f32 %v8796_v5, %v14310_v12  ;;  %v14316_v5 = vld [vmem:[#allocation150_spill] sm:$0xff] }
 0x96a   : > { %4183 = vrot.lane.b32.xlu0 %v12359_v8, %s9133_s22  ;;  %v3576_v21 = vadd.f32 %v3544_v51, %v3096_v55  ;;  %v2583_v51 = vmul.f32 %v8798_v50, %v14312_v56 }
 0x96c   : > { %v12509_v36 = vpop.permute.xlu1 %4157  ;;  %v12541_v16 = vadd.f32 %v4024_v2, %v3576_v21  ;;  %v8800_v2 = vpop.eup %8799  ;;  %v3095_v21 = vadd.f32 %v3063_v1, %v2583_v51 }
 0x96d   : > { %v12515_v23 = vpop.permute.xlu0 %4159 }
 0x970   : > { %v12513_v59 = vpop.xlane.xlu1 %4067 }
 0x971   : > { %v12518_v31 = vpop.xlane.xlu0 %4061 }
 0x973   : > { %4173 = vrot.lane.b32.xlu1 %v12333_v38, %s9133_s22 }
 0x974   : > { %v4162_v18 = vpop.permute.xlu1 %4161 }
 0x975   : > { %v12526_v24 = vpop.permute.xlu0 %4163 }
 0x979   : > { %v12528_v7 = vpop.xlane.xlu0 %4065 }
 0x97d   : > { %v12532_v61 = vpop.permute.xlu0 %4167 }
 0x981   : > { %v4070_v58 = vpop.xlane.xlu0 %4069 }
 0x985   : > { %v12523_v45 = vpop.xlane.xlu1 %4071 }
 0x989   : > { %4085 = vadd.xlane.f32.xlu0 %v12369_v60  ;;  %v4166_v49 = vpop.permute.xlu1 %4165 }
 0x997   : > { %4083 = vadd.xlane.f32.xlu1 %v12341_v30 }
 0x99f   : > { %4187 = vrot.lane.b32.xlu0 %v12377_v4, %s9133_s22 }
 0x9a8   : > { %4177 = vrot.lane.b32.xlu1 %v12351_v29, %s9133_s22 }
 0x9ba   : > { %v12530_v25 = vpop.xlane.xlu1 %4075 }
 0x9be   : > { %4089 = vadd.xlane.f32.xlu0 %v12387_v11  ;;  %v4170_v40 = vpop.permute.xlu1 %4169 }
 0x9cc   : > { %4087 = vadd.xlane.f32.xlu1 %v12359_v8 }
 0x9d4   : > { %4191 = vrot.lane.b32.xlu0 %v12395_v54, %s9133_s22 }
 0x9dd   : > { %4181 = vrot.lane.b32.xlu1 %v12369_v60, %s9133_s22 }
 0x9ef   : > { %v12539_v26 = vpop.xlane.xlu1 %4079 }
 0x9f3   : > { %4093 = vadd.xlane.f32.xlu0 %v12405_v39  ;;  %v4174_v53 = vpop.permute.xlu1 %4173 }
 0xa01   : > { %4091 = vadd.xlane.f32.xlu1 %v12377_v4  ;;  %v14314_v4 = vld [vmem:[#allocation216_spill] sm:$0xff] }
 0xa02   : > { %v4250_v37 = vadd.f32 %v12499_v15, %v14314_v4  ;;  %v4255_v15 = vadd.f32 %v4166_v49, %v12233_v43 }
 0xa04   : > { %v4282_v1 = vmul.f32 0.5, %v4250_v37 }
 0xa09   : > { %4195 = vrot.lane.b32.xlu0 %v12413_v48, %s9133_s22 }
 0xa12   : > { %4185 = vrot.lane.b32.xlu1 %v12387_v11, %s9133_s22 }
 0xa24   : > { %v12549_v22 = vpop.xlane.xlu1 %4083 }
 0xa25   : > { %14309 = vst [vmem:[#allocation162_spill] sm:$0xff] %v12549_v22 }
 0xa28   : > { %4097 = vadd.xlane.f32.xlu0 %v12423_v52  ;;  %v4178_v19 = vpop.permute.xlu1 %4177 }
 0xa36   : > { %4095 = vadd.xlane.f32.xlu1 %v12395_v54 }
 0xa3e   : > { %4199 = vrot.lane.b32.xlu0 %v12431_v3, %s9133_s22 }
 0xa47   : > { %4189 = vrot.lane.b32.xlu1 %v12405_v39, %s9133_s22 }
 0xa59   : > { %v12558_v13 = vpop.xlane.xlu1 %4087 }
 0xa5a   : > { %14311 = vst [vmem:[#allocation169_spill] sm:$0xff] %v12558_v13  ;;  %v4253_v13 = vadd.f32 %v4162_v18, %v12193_v47  ;;  %v4287_v18 = vmul.f32 0.5, %v4255_v15  ;;  %v4259_v47 = vadd.f32 %v4174_v53, %v12333_v38 }
 0xa5c   : > { %v4285_v51 = vmul.f32 0.5, %v4253_v13 }
 0xa5d   : > { %4101 = vadd.xlane.f32.xlu0 %v12441_v10 }
 0xa6b   : > { %4099 = vadd.xlane.f32.xlu1 %v12413_v48  ;;  %v8802_v48 = vpop.eup %8801 }
 0xa6c   : > { %v4023_v12 = vmul.f32 %v8802_v48, %v14316_v5  ;;  %v4257_v5 = vadd.f32 %v4170_v40, %v12315_v41 }
 0xa6e   : > { %v4289_v13 = vmul.f32 0.5, %v4257_v5 }
 0xa73   : > { %4203 = vrot.lane.b32.xlu0 %v12449_v0, %s9133_s22 }
 0xa7c   : > { %4193 = vrot.lane.b32.xlu1 %v12423_v52, %s9133_s22 }
 0xa92   : > { %4105 = vadd.xlane.f32.xlu0 %v12459_v27 }
 0xaa0   : > { %4103 = vadd.xlane.f32.xlu1 %v12431_v3  ;;  %v4182_v3 = vpop.permute.xlu1 %4181 }
 0xaa1   : > { %v4263_v15 = vadd.f32 %v4182_v3, %v12369_v60 }
 0xaa4   : > { %v12566_v22 = vpop.xlane.xlu1 %4091 }
 0xaa5   : > { %14315 = vst [vmem:[#allocation82_spill] sm:$0xff] %v12566_v22 }
 0xaa8   : > { %4207 = vrot.lane.b32.xlu0 %v12467_v46, %s9133_s22 }
 0xab1   : > { %4197 = vrot.lane.b32.xlu1 %v12441_v10, %s9133_s22 }
 0xac7   : > { %4109 = vadd.xlane.f32.xlu0 %v12477_v14 }
 0xad5   : > { %4107 = vadd.xlane.f32.xlu1 %v12449_v0  ;;  %v12543_v0 = vpop.permute.xlu0 %4171 }
 0xad9   : > { %v4074_v63 = vpop.xlane.xlu0 %4073 }
 0xada   : > { %v4321_v49 = vsub.f32 %v4074_v63, %v4289_v13 }
 0xadd   : > { %4211 = vrot.lane.b32.xlu0 %v12491_v57, %s9133_s22  ;;  %v12551_v62 = vpop.permute.xlu0 %4175 }
 0xae1   : > { %v4078_v9 = vpop.xlane.xlu0 %4077 }
 0xae5   : > { %v12561_v55 = vpop.permute.xlu0 %4179 }
 0xae6   : > { %4201 = vrot.lane.b32.xlu1 %v12459_v27, %s9133_s22 }
 0xafc   : > { %4113 = vadd.xlane.f32.xlu0 %v12521_v17 }
 0xb0a   : > { %4111 = vadd.xlane.f32.xlu1 %v12467_v46  ;;  %v4082_v46 = vpop.xlane.xlu0 %4081 }
 0xb0e   : > { %v12570_v50 = vpop.permute.xlu0 %4183 }
 0xb12   : > { %4215 = vrot.lane.b32.xlu0 %v12541_v16, %s9133_s22 }
 0xb1b   : > { %4205 = vrot.lane.b32.xlu1 %v12477_v14, %s9133_s22  ;;  %v14313_v14 = vld [vmem:[#allocation148_spill] sm:$0xff] }
 0xb1c   : > { %v3543_v33 = vmul.f32 %v8800_v2, %v14313_v14  ;;  %v4086_v14 = vpop.xlane.xlu0 %4085  ;;  %v4186_v2 = vpop.permute.xlu1 %4185 }
 0xb1e   : > { %v3575_v54 = vadd.f32 %v3543_v33, %v3095_v21  ;;  %v4314_v21 = vsub.f32 %v12493_v42, %v4282_v1  ;;  %v4317_v33 = vsub.f32 %v12528_v7, %v4285_v51  ;;  %v4291_v1 = vmul.f32 0.5, %v4259_v47 }
 0xb1f   : > { %v4261_v51 = vadd.f32 %v4178_v19, %v12351_v29  ;;  %v4265_v19 = vadd.f32 %v4186_v2, %v12387_v11 }
 0xb20   : > { %v12572_v56 = vadd.f32 %v4023_v12, %v3575_v54  ;;  %v12578_v4 = vpop.xlane.xlu1 %4095  ;;  %v4346_v48 = vmul.f32 0.014960632, %v4314_v21  ;;  %v12581_v54 = vpop.permute.xlu0 %4187  ;;  %v4349_v37 = vmul.f32 0.014960632, %v4317_v33  ;;  %v4319_v12 = vsub.f32 %v4070_v58, %v4287_v18 }
 0xb21   : > { %v4353_v58 = vmul.f32 0.014960632, %v4321_v49  ;;  %v4323_v33 = vsub.f32 %v4078_v9, %v4291_v1  ;;  %v4293_v53 = vmul.f32 0.5, %v4261_v51  ;;  %v4295_v18 = vmul.f32 0.5, %v4263_v15 }
 0xb22   : > { %14317 = vst [vmem:[#allocation164_spill] sm:$0xff] %v12572_v56  ;;  %8803 = vrcp.f32 %v4346_v48  ;;  %v4351_v7 = vmul.f32 0.014960632, %v4319_v12 }
 0xb23   : > { %8805 = vrcp.f32 %v4349_v37  ;;  %v4355_v63 = vmul.f32 0.014960632, %v4323_v33  ;;  %v4325_v47 = vsub.f32 %v4082_v46, %v4293_v53  ;;  %v4327_v13 = vsub.f32 %v4086_v14, %v4295_v18 }
 0xb24   : > { %v4090_v22 = vpop.xlane.xlu0 %4089  ;;  %v4190_v42 = vpop.permute.xlu1 %4189  ;;  %8807 = vrcp.f32 %v4351_v7  ;;  %v4297_v7 = vmul.f32 0.5, %v4265_v19 }
 0xb25   : > { %8809 = vrcp.f32 %v4353_v58  ;;  %v4357_v3 = vmul.f32 0.014960632, %v4325_v47  ;;  %v4267_v9 = vadd.f32 %v4190_v42, %v12405_v39  ;;  %v4359_v51 = vmul.f32 0.014960632, %v4327_v13 }
 0xb26   : > { %8811 = vrcp.f32 %v4355_v63  ;;  %v4329_v15 = vsub.f32 %v4090_v22, %v4297_v7 }
 0xb27   : > { %8813 = vrcp.f32 %v4357_v3  ;;  %v4299_v46 = vmul.f32 0.5, %v4267_v9 }
 0xb28   : > { %v12586_v21 = vpop.xlane.xlu1 %4099  ;;  %v12588_v40 = vpop.permute.xlu0 %4191  ;;  %8815 = vrcp.f32 %v4359_v51  ;;  %v4361_v53 = vmul.f32 0.014960632, %v4329_v15 }
 0xb2a   : > { %8817 = vrcp.f32 %v4361_v53 }
 0xb2c   : > { %v8804_v48 = vpop.eup %8803  ;;  %v4094_v5 = vpop.xlane.xlu0 %4093 }
 0xb2d   : > { %v4194_v37 = vpop.permute.xlu1 %4193  ;;  %v8806_v12 = vpop.eup %8805  ;;  %v4331_v42 = vsub.f32 %v4094_v5, %v4299_v46 }
 0xb2e   : > { %v8808_v1 = vpop.eup %8807  ;;  %v4269_v2 = vadd.f32 %v4194_v37, %v12423_v52 }
 0xb2f   : > { %v8810_v33 = vpop.eup %8809  ;;  %v4363_v22 = vmul.f32 0.014960632, %v4331_v42 }
 0xb30   : > { %v12595_v49 = vpop.permute.xlu0 %4195  ;;  %v8812_v63 = vpop.eup %8811 }
 0xb31   : > { %4117 = vadd.xlane.f32.xlu0 %v12572_v56  ;;  %v12592_v29 = vpop.xlane.xlu1 %4103  ;;  %8819 = vrcp.f32 %v4363_v22 }
 0xb34   : > { %v4098_v14 = vpop.xlane.xlu0 %4097 }
 0xb35   : > { %v4198_v58 = vpop.permute.xlu1 %4197 }
 0xb36   : > { %v4271_v18 = vadd.f32 %v4198_v58, %v12441_v10 }
 0xb38   : > { %v12601_v47 = vpop.permute.xlu0 %4199  ;;  %v4303_v19 = vmul.f32 0.5, %v4271_v18 }
 0xb3c   : > { %v4102_v13 = vpop.xlane.xlu0 %4101 }
 0xb3d   : > { %v4335_v7 = vsub.f32 %v4102_v13, %v4303_v19  ;;  %v14319_v19 = vld [vmem:[#allocation154_spill] sm:$0xff] }
 0xb3f   : > { %4115 = vadd.xlane.f32.xlu1 %v12491_v57  ;;  %v4367_v5 = vmul.f32 0.014960632, %v4335_v7 }
 0xb40   : > { %v12605_v46 = vpop.permute.xlu0 %4203 }
 0xb44   : > { %v4106_v53 = vpop.xlane.xlu0 %4105 }
 0xb47   : > { %4416 = vperm.xlu0 %7585, %v8804_v48   ;;  %v4301_v48 = vmul.f32 0.5, %v4269_v2 }
 0xb49   : > { %v4333_v37 = vsub.f32 %v4098_v14, %v4301_v48 }
 0xb4b   : > { %4431 = vperm.xlu0 %7585, %v8806_v12   ;;  %v8814_v12 = vpop.eup %8813  ;;  %v4365_v3 = vmul.f32 0.014960632, %v4333_v37 }
 0xb4c   : > { %v8816_v9 = vpop.eup %8815 }
 0xb4d   : > { %8821 = vrcp.f32 %v4365_v3  ;;  %v14320_v3 = vld [vmem:[#allocation123_spill] sm:$0xff] }
 0xb4e   : > { %8823 = vrcp.f32 %v4367_v5  ;;  %v4251_v7 = vadd.f32 %v12509_v36, %v14320_v3 }
 0xb4f   : > { %4441 = vperm.xlu0 %7585, %v8808_v1   ;;  %v8818_v1 = vpop.eup %8817 }
 0xb50   : > { %4209 = vrot.lane.b32.xlu1 %v12521_v17, %s9133_s22  ;;  %v8820_v15 = vpop.eup %8819 }
 0xb53   : > { %4451 = vperm.xlu0 %7585, %v8810_v33  }
 0xb57   : > { %4461 = vperm.xlu0 %7585, %v8812_v63   ;;  %v8822_v33 = vpop.eup %8821  ;;  %v14318_v63 = vld [vmem:[#allocation147_spill] sm:$0xff] }
 0xb58   : > { %v8824_v18 = vpop.eup %8823  ;;  %v4249_v22 = vadd.f32 %v12507_v28, %v14318_v63  ;;  %v4254_v28 = vadd.f32 %v12526_v24, %v12277_v44 }
 0xb5a   : > { %v4281_v37 = vmul.f32 0.5, %v4249_v22 }
 0xb5b   : > { %4471 = vperm.xlu0 %7585, %v8814_v12   ;;  %v4252_v12 = vadd.f32 %v12515_v23, %v14319_v19 }
 0xb5c   : > { %v4313_v13 = vsub.f32 %v12503_v20, %v4281_v37  ;;  %v4256_v20 = vadd.f32 %v12532_v61, %v12290_v35  ;;  %v4260_v61 = vadd.f32 %v12551_v62, %v12323_v34  ;;  %v4264_v62 = vadd.f32 %v12570_v50, %v12359_v8 }
 0xb5e   : > { %v4292_v37 = vmul.f32 0.5, %v4260_v61 }
 0xb5f   : > { %4481 = vperm.xlu0 %7585, %v8816_v9   ;;  %v4284_v9 = vmul.f32 0.5, %v4252_v12 }
 0xb62   : > { %v12603_v51 = vpop.xlane.xlu1 %4107 }
 0xb63   : > { %4491 = vperm.xlu0 %7585, %v8818_v1   ;;  %v4345_v1 = vmul.f32 0.014960632, %v4313_v13 }
 0xb66   : > { %v4202_v2 = vpop.permute.xlu1 %4201 }
 0xb67   : > { %v4273_v14 = vadd.f32 %v4202_v2, %v12459_v27  ;;  %4501 = vperm.xlu0 %7585, %v8820_v15   ;;  %v4316_v15 = vsub.f32 %v12505_v6, %v4284_v9  ;;  %v4283_v2 = vmul.f32 0.5, %v4251_v7  ;;  %v4258_v6 = vadd.f32 %v12543_v0, %v12304_v32 }
 0xb68   : > { %v4262_v0 = vadd.f32 %v12561_v55, %v12341_v30 }
 0xb69   : > { %v4305_v58 = vmul.f32 0.5, %v4273_v14  ;;  %v4348_v14 = vmul.f32 0.014960632, %v4316_v15  ;;  %v4315_v23 = vsub.f32 %v12518_v31, %v4283_v2  ;;  %v4296_v15 = vmul.f32 0.5, %v4264_v62  ;;  %v14322_v2 = vld [vmem:[#allocation141_spill] sm:$0xff] }
 0xb6a   : > { %v4294_v7 = vmul.f32 0.5, %v4262_v0  ;;  %v4266_v55 = vadd.f32 %v12581_v54, %v14322_v2 }
 0xb6b   : > { %v4337_v42 = vsub.f32 %v4106_v53, %v4305_v58  ;;  %4511 = vperm.xlu0 %7585, %v8822_v33   ;;  %v4286_v58 = vmul.f32 0.5, %v4254_v28  ;;  %v4347_v36 = vmul.f32 0.014960632, %v4315_v23  ;;  %v4288_v53 = vmul.f32 0.5, %v4256_v20 }
 0xb6c   : > { %v4298_v20 = vmul.f32 0.5, %v4266_v55 }
 0xb6d   : > { %v4369_v48 = vmul.f32 0.014960632, %v4337_v42  ;;  %v4318_v33 = vsub.f32 %v12513_v59, %v4286_v58  ;;  %v4320_v42 = vsub.f32 %v12523_v45, %v4288_v53  ;;  %v4324_v45 = vsub.f32 %v12539_v26, %v4292_v37  ;;  %v14325_v53 = vld [vmem:[#allocation82_spill] sm:$0xff] }
 0xb6f   : > { %8825 = vrcp.f32 %v4369_v48  ;;  %4521 = vperm.xlu0 %7585, %v8824_v18   ;;  %v4350_v24 = vmul.f32 0.014960632, %v4318_v33  ;;  %v4290_v48 = vmul.f32 0.5, %v4258_v6  ;;  %v4352_v18 = vmul.f32 0.014960632, %v4320_v42 }
 0xb70   : > { %8827 = vrcp.f32 %v4345_v1  ;;  %v4356_v9 = vmul.f32 0.014960632, %v4324_v45  ;;  %v4330_v6 = vsub.f32 %v14325_v53, %v4298_v20 }
 0xb71   : > { %8829 = vrcp.f32 %v4348_v14  ;;  %v4322_v59 = vsub.f32 %v12530_v25, %v4290_v48  ;;  %v14323_v14 = vld [vmem:[#allocation169_spill] sm:$0xff] }
 0xb72   : > { %8831 = vrcp.f32 %v4347_v36  ;;  %v4328_v26 = vsub.f32 %v14323_v14, %v4296_v15  ;;  %v14324_v36 = vld [vmem:[#allocation156_spill] sm:$0xff]  ;;  %v14326_v48 = vld [vmem:[#allocation161_spill] sm:$0xff]  ;;  %v14329_v15 = vld [vmem:[#allocation159_spill] sm:$0xff] }
 0xb73   : > { %8833 = vrcp.f32 %v4350_v24  ;;  %v4354_v12 = vmul.f32 0.014960632, %v4322_v59  ;;  %v4268_v50 = vadd.f32 %v12588_v40, %v14324_v36  ;;  %v4208_v24 = vpop.permute.xlu0 %4207  ;;  %v4270_v61 = vadd.f32 %v12595_v49, %v14326_v48 }
 0xb74   : > { %4119 = vadd.xlane.f32.xlu1 %v12541_v16  ;;  %8835 = vrcp.f32 %v4352_v18  ;;  %v4360_v33 = vmul.f32 0.014960632, %v4328_v26  ;;  %v14327_v18 = vld [vmem:[#allocation167_spill] sm:$0xff]  ;;  %v4274_v55 = vadd.f32 %v12605_v46, %v14329_v15  ;;  %v14330_v26 = vld [vmem:[#allocation149_spill] sm:$0xff] }
 0xb75   : > { %8837 = vrcp.f32 %v4354_v12  ;;  %v4300_v54 = vmul.f32 0.5, %v4268_v50  ;;  %v4302_v45 = vmul.f32 0.5, %v4270_v61 }
 0xb76   : > { %8839 = vrcp.f32 %v4356_v9 }
 0xb77   : > { %v4332_v37 = vsub.f32 %v12578_v4, %v4300_v54  ;;  %v4110_v0 = vpop.xlane.xlu0 %4109  ;;  %v4334_v49 = vsub.f32 %v12586_v21, %v4302_v45 }
 0xb79   : > { %v8826_v5 = vpop.eup %8825  ;;  %v4364_v9 = vmul.f32 0.014960632, %v4332_v37  ;;  %v4366_v4 = vmul.f32 0.014960632, %v4334_v49 }
 0xb7a   : > { %4531 = vperm.xlu0 %7585, %v8826_v5   ;;  %v8828_v31 = vpop.eup %8827  ;;  %v14321_v5 = vld [vmem:[#allocation162_spill] sm:$0xff] }
 0xb7b   : > { %v8830_v22 = vpop.eup %8829  ;;  %v4326_v25 = vsub.f32 %v14321_v5, %v4294_v7  ;;  %v4212_v61 = vpop.permute.xlu0 %4211 }
 0xb7c   : > { %v8832_v13 = vpop.eup %8831 }
 0xb7d   : > { %v8834_v1 = vpop.eup %8833  ;;  %v4358_v28 = vmul.f32 0.014960632, %v4326_v25 }
 0xb7e   : > { %v8836_v58 = vpop.eup %8835 }
 0xb7f   : > { %8841 = vrcp.f32 %v4358_v28 }
 0xb80   : > { %8843 = vrcp.f32 %v4360_v33 }
 0xb85   : > { %4213 = vrot.lane.b32.xlu1 %v12572_v56, %s9133_s22 }
 0xb89   : > { %4411 = vperm.xlu1 %7586, %v8828_v31   ;;  %v8838_v31 = vpop.eup %8837 }
 0xb8a   : > { %v8840_v12 = vpop.eup %8839 }
 0xb8b   : > { %v8842_v25 = vpop.eup %8841 }
 0xb8c   : > { %v8844_v14 = vpop.eup %8843 }
 0xb8d   : > { %4426 = vperm.xlu1 %7586, %v8830_v22   ;;  %v4362_v22 = vmul.f32 0.014960632, %v4330_v6 }
 0xb8f   : > { %8845 = vrcp.f32 %v4362_v22 }
 0xb91   : > { %4421 = vperm.xlu1 %7586, %v8832_v13   ;;  %v14328_v13 = vld [vmem:[#allocation151_spill] sm:$0xff] }
 0xb92   : > { %v4272_v7 = vadd.f32 %v12601_v47, %v14328_v13  ;;  %v4306_v47 = vmul.f32 0.5, %v4274_v55  ;;  %v9065_v55 = vld [vmem:[%s13577_s8] sm:$0x3] }
 0xb94   : > { %v4338_v21 = vsub.f32 %v12603_v51, %v4306_v47 }
 0xb95   : > { %4436 = vperm.xlu1 %7586, %v8834_v1   ;;  %v4304_v1 = vmul.f32 0.5, %v4272_v7  ;;  %v4114_v7 = vpop.xlane.xlu0 %4113 }
 0xb96   : > { %v4370_v46 = vmul.f32 0.014960632, %v4338_v21 }
 0xb97   : > { %v4112_v23 = vpop.xlane.xlu1 %4111  ;;  %v4336_v28 = vsub.f32 %v12592_v29, %v4304_v1 }
 0xb99   : > { %4446 = vperm.xlu1 %7586, %v8836_v58   ;;  %v4276_v58 = vadd.f32 %v4208_v24, %v14330_v26  ;;  %v4368_v20 = vmul.f32 0.014960632, %v4336_v28  ;;  %v8846_v50 = vpop.eup %8845  ;;  %v14332_v28 = vld [vmem:[#allocation7_spill] sm:$0xff] }
 0xb9b   : > { %v4206_v42 = vpop.permute.xlu1 %4205  ;;  %v4308_v33 = vmul.f32 0.5, %v4276_v58  ;;  %v4216_v58 = vpop.permute.xlu0 %4215 }
 0xb9c   : > { %v4275_v59 = vadd.f32 %v4206_v42, %v14327_v18 }
 0xb9d   : > { %4456 = vperm.xlu1 %7586, %v8838_v31   ;;  %v4340_v6 = vsub.f32 %v4112_v23, %v4308_v33 }
 0xb9e   : > { %v4307_v40 = vmul.f32 0.5, %v4275_v59  ;;  %v4278_v59 = vadd.f32 %v4212_v61, %v12491_v57 }
 0xb9f   : > { %v4372_v29 = vmul.f32 0.014960632, %v4340_v6 }
 0xba0   : > { %v4339_v62 = vsub.f32 %v4110_v0, %v4307_v40  ;;  %v4310_v22 = vmul.f32 0.5, %v4278_v59  ;;  %v14333_v59 = vld [vmem:[#allocation6_spill] sm:$0xff] }
 0xba1   : > { %4466 = vperm.xlu1 %7586, %v8840_v12  }
 0xba2   : > { %v4371_v5 = vmul.f32 0.014960632, %v4339_v62 }
 0xba4   : > { %8847 = vrcp.f32 %v4371_v5 }
 0xba5   : > { %4476 = vperm.xlu1 %7586, %v8842_v25   ;;  %8849 = vrcp.f32 %v4364_v9  ;;  %v14331_v25 = vld [vmem:[#allocation5_spill] sm:$0xff] }
 0xba6   : > { %8851 = vrcp.f32 %v4366_v4  ;;  %v4613_v1 = vsub.s32 0, %v14331_v25 }
 0xba7   : > { %8853 = vrcp.f32 %v4368_v20  ;;  %v4280_v20 = vadd.f32 %v4216_v58, %v12541_v16 }
 0xba8   : > { %8855 = vrcp.f32 %v4370_v46  ;;  %v12661_v4 = vrot.slane %v9065_v55, %v4613_v1 }
 0xba9   : > { %4486 = vperm.xlu1 %7586, %v8844_v14   ;;  %8857 = vrcp.f32 %v4372_v29  ;;  %v4312_v21 = vmul.f32 0.5, %v4280_v20 }
 0xbaa   : > { %v4694_v14 = vadd.f32 %v14332_v28, %v12661_v4  ;;  %v14339_v28 = vld [vmem:[#allocation11_spill] sm:$0xff] }
 0xbac   : > { %v7080_v47 = vmul.f32 -1.442695, %v4694_v14  ;;  %v4718_v14 = vadd.f32 %v14339_v28, %v12661_v4 }
 0xbad   : > { %4496 = vperm.xlu1 %7586, %v8846_v50  }
 0xbae   : > { %v8848_v53 = vpop.eup %8847 }
 0xbaf   : > { %4541 = vperm.xlu0 %7585, %v8848_v53   ;;  %v8850_v42 = vpop.eup %8849 }
 0xbb0   : > { %v8852_v31 = vpop.eup %8851 }
 0xbb1   : > { %4506 = vperm.xlu1 %7586, %v8850_v42   ;;  %v8854_v24 = vpop.eup %8853 }
 0xbb2   : > { %v8856_v54 = vpop.eup %8855 }
 0xbb3   : > { %v8858_v51 = vpop.eup %8857 }
 0xbb5   : > { %4516 = vperm.xlu1 %7586, %v8852_v31  }
 0xbb9   : > { %4526 = vperm.xlu1 %7586, %v8854_v24  }
 0xbbd   : > { %4536 = vperm.xlu1 %7586, %v8856_v54  }
 0xbbe   : > { %v4118_v24 = vpop.xlane.xlu0 %4117 }
 0xbc1   : > { %4546 = vperm.xlu1 %7586, %v8858_v51  }
 0xbcc   : > { %v4116_v37 = vpop.xlane.xlu1 %4115 }
 0xbcd   : > { %v4342_v23 = vsub.f32 %v4116_v37, %v4310_v22  ;;  %v4688_v22 = vadd.f32 %v14333_v59, %v12661_v4  ;;  %v4417_v37 = vpop.permute.xlu0 %4416 }
 0xbcf   : > { %v4374_v40 = vmul.f32 0.014960632, %v4342_v23 }
 0xbd0   : > { %v4210_v0 = vpop.permute.xlu1 %4209 }
 0xbd1   : > { %8859 = vrcp.f32 %v4374_v40  ;;  %v4277_v12 = vadd.f32 %v4210_v0, %v12521_v17  ;;  %v7079_v40 = vmul.f32 -1.442695, %v4688_v22  ;;  %v14334_v0 = vld [vmem:[#allocation9_spill] sm:$0xff] }
 0xbd3   : > { %v4309_v45 = vmul.f32 0.5, %v4277_v12  ;;  %v4706_v12 = vadd.f32 %v14334_v0, %v12661_v4 }
 0xbd5   : > { %v4341_v62 = vsub.f32 %v4114_v7, %v4309_v45  ;;  %v14335_v45 = vld [vmem:[#allocation216_spill] sm:$0xff]  ;;  %v7082_v25 = vmul.f32 -1.442695, %v4706_v12 }
 0xbd6   : > { %v12672_v7 = vmul.f32 %v4417_v37, %v14335_v45 }
 0xbd7   : > { %v4373_v9 = vmul.f32 0.014960632, %v4341_v62 }
 0xbd8   : > { %14336 = vst [vmem:[#allocation179_spill] sm:$0xff] %v12672_v7 }
 0xbd9   : > { %8861 = vrcp.f32 %v4373_v9 }
 0xbda   : > { %8863 = vpow2.f32 %v7080_v47  ;;  %v7084_v47 = vmul.f32 -1.442695, %v4718_v14 }
 0xbdb   : > { %v8860_v49 = vpop.eup %8859 }
 0xbdc   : > { %4556 = vperm.xlu1 %7586, %v8860_v49   ;;  %v14337_v49 = vld [vmem:[#allocation8_spill] sm:$0xff] }
 0xbe3   : > { %v8862_v5 = vpop.eup %8861 }
 0xbe4   : > { %4551 = vperm.xlu0 %7585, %v8862_v5   ;;  %v8864_v46 = vpop.eup %8863  ;;  %v4700_v5 = vadd.f32 %v14337_v49, %v12661_v4 }
 0xbe5   : > { %v4975_v29 = vadd.f32 1.0, %v8864_v46 }
 0xbe6   : > { %v7081_v55 = vmul.f32 -1.442695, %v4700_v5 }
 0xc01   : > { %v4120_v50 = vpop.xlane.xlu1 %4119 }
 0xc02   : > { %v4344_v33 = vsub.f32 %v4120_v50, %v4312_v21 }
 0xc04   : > { %v4376_v53 = vmul.f32 0.014960632, %v4344_v33 }
 0xc05   : > { %v4214_v6 = vpop.permute.xlu1 %4213 }
 0xc06   : > { %8865 = vrcp.f32 %v4376_v53  ;;  %v4279_v42 = vadd.f32 %v4214_v6, %v12572_v56 }
 0xc07   : > { %8867 = vrcp.f32 %v4975_v29 }
 0xc08   : > { %v4311_v31 = vmul.f32 0.5, %v4279_v42 }
 0xc09   : > { %v4412_v53 = vpop.permute.xlu1 %4411 }
 0xc0a   : > { %v4343_v54 = vsub.f32 %v4118_v24, %v4311_v31  ;;  %v14340_v31 = vld [vmem:[#allocation10_spill] sm:$0xff] }
 0xc0b   : > { %v4712_v24 = vadd.f32 %v14340_v31, %v12661_v4 }
 0xc0c   : > { %v4375_v51 = vmul.f32 0.014960632, %v4343_v54 }
 0xc0d   : > { %v4427_v29 = vpop.permute.xlu1 %4426 }
 0xc0e   : > { %8869 = vrcp.f32 %v4375_v51  ;;  %v12687_v51 = vmul.f32 %v4412_v53, %v14318_v63 }
 0xc0f   : > { %8871 = vpow2.f32 %v7079_v40  ;;  %v12693_v40 = vmul.f32 %v4427_v29, %v14319_v19 }
 0xc10   : > { %v8866_v61 = vpop.eup %8865  ;;  %8873 = vpow2.f32 %v7082_v25  ;;  %14341 = vst [vmem:[#allocation163_spill] sm:$0xff] %v12687_v51 }
 0xc11   : > { %4566 = vperm.xlu1 %7586, %v8866_v61   ;;  %v8868_v23 = vpop.eup %8867  ;;  %8875 = vpow2.f32 %v7081_v55  ;;  %v7083_v61 = vmul.f32 -1.442695, %v4712_v24  ;;  %v4422_v37 = vpop.permute.xlu1 %4421  ;;  %14343 = vst [vmem:[#allocation172_spill] sm:$0xff] %v12693_v40 }
 0xc12   : > { %v5071_v9 = vsub.f32 0.0, %v8868_v23  ;;  %8877 = vpow2.f32 %v7084_v47  ;;  %v12700_v63 = vmul.f32 %v4422_v37, %v14320_v3  ;;  %v4432_v47 = vpop.permute.xlu0 %4431 }
 0xc14   : > { %v12677_v1 = vmul.f32 %v5071_v9, %v12672_v7  ;;  %14345 = vst [vmem:[#allocation176_spill] sm:$0xff] %v12700_v63 }
 0xc16   : > { %14338 = vst [vmem:[#allocation181_spill] sm:$0xff] %v12677_v1  ;;  %v4442_v24 = vpop.permute.xlu0 %4441 }
 0xc18   : > { %v8870_v62 = vpop.eup %8869 }
 0xc19   : > { %4561 = vperm.xlu0 %7585, %v8870_v62   ;;  %v8872_v58 = vpop.eup %8871  ;;  %v4437_v62 = vpop.permute.xlu1 %4436 }
 0xc1a   : > { %v4974_v20 = vadd.f32 1.0, %v8872_v58  ;;  %v8874_v21 = vpop.eup %8873  ;;  %v12707_v19 = vmul.f32 %v4437_v62, %v12277_v44  ;;  %v14349_v44 = vld [vmem:[#allocation13_spill] sm:$0xff]  ;;  %v4452_v37 = vpop.permute.xlu0 %4451 }
 0xc1b   : > { %v4977_v50 = vadd.f32 1.0, %v8874_v21  ;;  %v8876_v33 = vpop.eup %8875  ;;  %v4730_v14 = vadd.f32 %v14349_v44, %v12661_v4  ;;  %v14350_v21 = vld [vmem:[#allocation61_spill] sm:$0xff] }
 0xc1c   : > { %8879 = vrcp.f32 %v4974_v20  ;;  %v4976_v46 = vadd.f32 1.0, %v8876_v33  ;;  %v8878_v6 = vpop.eup %8877  ;;  %14347 = vst [vmem:[#allocation84_spill] sm:$0xff] %v12707_v19 }
 0xc1d   : > { %5808 = vrot.lane.b32.xlu0 %v12677_v1, %s9133_s22  ;;  %8881 = vrcp.f32 %v4977_v50  ;;  %v4979_v42 = vadd.f32 1.0, %v8878_v6  ;;  %v7086_v20 = vmul.f32 -1.442695, %v4730_v14  ;;  %v12725_v50 = vmul.f32 %v4432_v47, %v14350_v21 }
 0xc1e   : > { %8883 = vrcp.f32 %v4976_v46 }
 0xc1f   : > { %8885 = vrcp.f32 %v4979_v42  ;;  %14351 = vst [vmem:[#allocation183_spill] sm:$0xff] %v12725_v50  ;;  %v14353_v42 = vld [vmem:[#allocation12_spill] sm:$0xff] }
 0xc20   : > { %8887 = vpow2.f32 %v7083_v61  ;;  %v4724_v29 = vadd.f32 %v14353_v42, %v12661_v4 }
 0xc22   : > { %v7085_v31 = vmul.f32 -1.442695, %v4724_v29 }
 0xc26   : > { %v8880_v54 = vpop.eup %8879 }
 0xc27   : > { %v5070_v59 = vsub.f32 0.0, %v8880_v54  ;;  %v8882_v22 = vpop.eup %8881  ;;  %v4447_v54 = vpop.permute.xlu1 %4446 }
 0xc28   : > { %v5073_v0 = vsub.f32 0.0, %v8882_v22  ;;  %v8884_v12 = vpop.eup %8883 }
 0xc29   : > { %v12690_v23 = vmul.f32 %v5070_v59, %v12687_v51  ;;  %v5072_v9 = vsub.f32 0.0, %v8884_v12  ;;  %v8886_v49 = vpop.eup %8885  ;;  %v12736_v59 = vmul.f32 %v4447_v54, %v12290_v35  ;;  %v14356_v35 = vld [vmem:[#allocation15_spill] sm:$0xff]  ;;  %v12816_v51 = vmul.f32 %v4452_v37, %v12315_v41 }
 0xc2a   : > { %v12697_v45 = vmul.f32 %v5073_v0, %v12693_v40  ;;  %v5075_v25 = vsub.f32 0.0, %v8886_v49  ;;  %v8888_v55 = vpop.eup %8887 }
 0xc2b   : > { %14342 = vst [vmem:[#allocation80_spill] sm:$0xff] %v12690_v23  ;;  %v12704_v5 = vmul.f32 %v5072_v9, %v12700_v63  ;;  %v4978_v3 = vadd.f32 1.0, %v8888_v55  ;;  %14354 = vst [vmem:[#allocation187_spill] sm:$0xff] %v12736_v59  ;;  %v12742_v9 = vpop.permute.xlu0 %4461  ;;  %v4457_v49 = vpop.permute.xlu1 %4456 }
 0xc2c   : > { %14344 = vst [vmem:[#allocation173_spill] sm:$0xff] %v12697_v45  ;;  %v12711_v28 = vmul.f32 %v5075_v25, %v12707_v19  ;;  %14365 = vst [vmem:[#allocation195_spill] sm:$0xff] %v12816_v51 }
 0xc2d   : > { %14346 = vst [vmem:[#allocation178_spill] sm:$0xff] %v12704_v5  ;;  %8889 = vrcp.f32 %v4978_v3  ;;  %v4742_v3 = vadd.f32 %v14356_v35, %v12661_v4 }
 0xc2e   : > { %14348 = vst [vmem:[#allocation83_spill] sm:$0xff] %v12711_v28  ;;  %8891 = vpow2.f32 %v7086_v20  ;;  %v12757_v20 = vmul.f32 %v4442_v24, %v12233_v43  ;;  %v14359_v43 = vld [vmem:[#allocation14_spill] sm:$0xff] }
 0xc2f   : > { %v12744_v25 = vpop.permute.xlu0 %4471  ;;  %v12746_v55 = vpop.permute.xlu1 %4466  ;;  %v7088_v14 = vmul.f32 -1.442695, %v4742_v3  ;;  %v4736_v24 = vadd.f32 %v14359_v43, %v12661_v4 }
 0xc30   : > { %14357 = vst [vmem:[#allocation85_spill] sm:$0xff] %v12757_v20 }
 0xc33   : > { %v12752_v47 = vpop.permute.xlu0 %4481 }
 0xc35   : > { %5712 = vadd.xlane.f32.xlu1 %v12677_v1 }
 0xc37   : > { %v8890_v58 = vpop.eup %8889 }
 0xc38   : > { %v5074_v33 = vsub.f32 0.0, %v8890_v58  ;;  %v8892_v46 = vpop.eup %8891  ;;  %v12754_v58 = vpop.permute.xlu1 %4476 }
 0xc39   : > { %v4981_v6 = vadd.f32 1.0, %v8892_v46  ;;  %v12762_v46 = vpop.permute.xlu0 %4491 }
 0xc3a   : > { %v12728_v53 = vmul.f32 %v5074_v33, %v12725_v50 }
 0xc3b   : > { %8893 = vrcp.f32 %v4981_v6 }
 0xc3c   : > { %5710 = vadd.xlane.f32.xlu0 %v12690_v23  ;;  %14352 = vst [vmem:[#allocation185_spill] sm:$0xff] %v12728_v53  ;;  %8895 = vpow2.f32 %v7085_v31  ;;  %v12764_v6 = vpop.permute.xlu1 %4486 }
 0xc3d   : > { %v12768_v42 = vpop.permute.xlu0 %4501 }
 0xc40   : > { %5716 = vadd.xlane.f32.xlu0 %v12697_v45  ;;  %v12770_v29 = vpop.permute.xlu1 %4496 }
 0xc44   : > { %5714 = vadd.xlane.f32.xlu0 %v12704_v5 }
 0xc45   : > { %v8894_v61 = vpop.eup %8893 }
 0xc46   : > { %5806 = vrot.lane.b32.xlu1 %v12690_v23, %s9133_s22  ;;  %v5077_v22 = vsub.f32 0.0, %v8894_v61  ;;  %v8896_v0 = vpop.eup %8895  ;;  %v12774_v61 = vpop.permute.xlu0 %4511 }
 0xc47   : > { %v4980_v62 = vadd.f32 1.0, %v8896_v0  ;;  %v7087_v0 = vmul.f32 -1.442695, %v4736_v24 }
 0xc48   : > { %5720 = vadd.xlane.f32.xlu0 %v12711_v28  ;;  %v12739_v12 = vmul.f32 %v5077_v22, %v12736_v59  ;;  %v12776_v22 = vpop.permute.xlu1 %4506 }
 0xc49   : > { %8897 = vrcp.f32 %v4980_v62 }
 0xc4a   : > { %5812 = vrot.lane.b32.xlu1 %v12697_v45, %s9133_s22  ;;  %14355 = vst [vmem:[#allocation186_spill] sm:$0xff] %v12739_v12  ;;  %8899 = vpow2.f32 %v7088_v14  ;;  %v12778_v62 = vpop.permute.xlu0 %4521 }
 0xc4c   : > { %v12780_v35 = vpop.permute.xlu1 %4516 }
 0xc4e   : > { %5810 = vrot.lane.b32.xlu1 %v12704_v5, %s9133_s22  ;;  %v12782_v3 = vpop.permute.xlu0 %4531 }
 0xc52   : > { %5816 = vrot.lane.b32.xlu1 %v12711_v28, %s9133_s22 }
 0xc53   : > { %v8898_v44 = vpop.eup %8897 }
 0xc54   : > { %v5076_v21 = vsub.f32 0.0, %v8898_v44  ;;  %v8900_v31 = vpop.eup %8899  ;;  %v12784_v44 = vpop.permute.xlu1 %4526 }
 0xc55   : > { %v4983_v54 = vadd.f32 1.0, %v8900_v31  ;;  %v12790_v31 = vpop.permute.xlu0 %4541 }
 0xc56   : > { %v12760_v33 = vmul.f32 %v5076_v21, %v12757_v20  ;;  %v12788_v21 = vmul.f32 %v4457_v49, %v12304_v32 }
 0xc57   : > { %8901 = vrcp.f32 %v4983_v54 }
 0xc58   : > { %14358 = vst [vmem:[#allocation165_spill] sm:$0xff] %v12760_v33  ;;  %8903 = vpow2.f32 %v7087_v0  ;;  %14360 = vst [vmem:[#allocation122_spill] sm:$0xff] %v12788_v21  ;;  %v12795_v59 = vpop.permute.xlu1 %4536 }
 0xc5c   : > { %v12802_v7 = vpop.permute.xlu1 %4546 }
 0xc5e   : > { %5814 = vrot.lane.b32.xlu0 %v12728_v53, %s9133_s22 }
 0xc60   : > { %v12804_v32 = vpop.permute.xlu1 %4556 }
 0xc61   : > { %v8902_v14 = vpop.eup %8901 }
 0xc62   : > { %v5079_v43 = vsub.f32 0.0, %v8902_v14  ;;  %v8904_v54 = vpop.eup %8903  ;;  %v14363_v14 = vld [vmem:[#allocation18_spill] sm:$0xff] }
 0xc63   : > { %v12797_v0 = vpop.permute.xlu0 %4551  ;;  %v4982_v19 = vadd.f32 1.0, %v8904_v54 }
 0xc64   : > { %v12793_v24 = vmul.f32 %v5079_v43, %v12788_v21  ;;  %v4754_v43 = vadd.f32 %v14363_v14, %v12661_v4 }
 0xc65   : > { %8905 = vrcp.f32 %v4982_v19 }
 0xc66   : > { %14361 = vst [vmem:[#allocation120_spill] sm:$0xff] %v12793_v24  ;;  %v7090_v54 = vmul.f32 -1.442695, %v4754_v43 }
 0xc68   : > { %8907 = vpow2.f32 %v7090_v54 }
 0xc6f   : > { %v8906_v50 = vpop.eup %8905 }
 0xc76   : > { %5718 = vadd.xlane.f32.xlu1 %v12728_v53  ;;  %v5078_v53 = vsub.f32 0.0, %v8906_v50  ;;  %v8908_v50 = vpop.eup %8907 }
 0xc78   : > { %v12823_v14 = vmul.f32 %v5078_v53, %v12816_v51  ;;  %v4985_v51 = vadd.f32 1.0, %v8908_v50  ;;  %v12854_v50 = vmul.f32 %v12746_v55, %v12323_v34  ;;  %v12866_v34 = vmul.f32 %v12742_v9, %v12333_v38 }
 0xc7a   : > { %14367 = vst [vmem:[#allocation90_spill] sm:$0xff] %v12823_v14  ;;  %8909 = vrcp.f32 %v4985_v51  ;;  %14372 = vst [vmem:[#allocation116_spill] sm:$0xff] %v12854_v50 }
 0xc7b   : > { %14375 = vst [vmem:[#allocation97_spill] sm:$0xff] %v12866_v34 }
 0xc7d   : > { %5724 = vadd.xlane.f32.xlu0 %v12739_v12 }
 0xc84   : > { %v8910_v53 = vpop.eup %8909 }
 0xc87   : > { %5820 = vrot.lane.b32.xlu1 %v12739_v12, %s9133_s22 }
 0xc90   : > { %v12811_v20 = vpop.permute.xlu1 %4566 }
 0xc93   : > { %5818 = vrot.lane.b32.xlu0 %v12760_v33, %s9133_s22 }
 0xc98   : > { %v12800_v40 = vpop.permute.xlu0 %4561 }
 0xc99   : > { %14362 = vst [vmem:[#allocation189_spill] sm:$0xff] %v12800_v40 }
 0xc9c   : > { %v5809_v49 = vpop.permute.xlu0 %5808 }
 0xc9d   : > { %v5903_v21 = vadd.f32 %v5809_v49, %v12677_v1 }
 0xc9f   : > { %v12813_v63 = vmul.f32 0.5, %v5903_v21 }
 0xca1   : > { %14364 = vst [vmem:[#allocation190_spill] sm:$0xff] %v12813_v63 }
 0xcab   : > { %5722 = vadd.xlane.f32.xlu1 %v12760_v33 }
 0xcb2   : > { %5728 = vadd.xlane.f32.xlu0 %v12793_v24 }
 0xcbc   : > { %5824 = vrot.lane.b32.xlu1 %v12793_v24, %s9133_s22 }
 0xcc2   : > { %v12818_v19 = vpop.xlane.xlu1 %5712 }
 0xcc3   : > { %14366 = vst [vmem:[#allocation193_spill] sm:$0xff] %v12818_v19  ;;  %v14370_v19 = vld [vmem:[#allocation16_spill] sm:$0xff] }
 0xcc6   : > { %v12825_v49 = vpop.permute.xlu1 %5806 }
 0xcc8   : > { %5822 = vrot.lane.b32.xlu0 %v12823_v14, %s9133_s22 }
 0xcc9   : > { %v12829_v21 = vpop.xlane.xlu0 %5710 }
 0xcca   : > { %14368 = vst [vmem:[#allocation92_spill] sm:$0xff] %v12829_v21  ;;  %v5813_v43 = vpop.permute.xlu1 %5812  ;;  %v4748_v21 = vadd.f32 %v14370_v19, %v12661_v4  ;;  %v5081_v19 = vsub.f32 0.0, %v8910_v53 }
 0xccb   : > { %v5905_v41 = vadd.f32 %v5813_v43, %v12697_v45 }
 0xccc   : > { %v7089_v45 = vmul.f32 -1.442695, %v4748_v21 }
 0xccd   : > { %v12832_v37 = vmul.f32 0.5, %v5905_v41  ;;  %v12834_v1 = vpop.xlane.xlu0 %5716 }
 0xcce   : > { %v12836_v33 = vpop.permute.xlu1 %5810  ;;  %8911 = vpow2.f32 %v7089_v45  ;;  %v14374_v45 = vld [vmem:[#allocation20_spill] sm:$0xff] }
 0xccf   : > { %14369 = vst [vmem:[#allocation171_spill] sm:$0xff] %v12832_v37 }
 0xcd1   : > { %v12840_v54 = vpop.xlane.xlu0 %5714 }
 0xcd2   : > { %v5817_v63 = vpop.permute.xlu1 %5816 }
 0xcd3   : > { %v5907_v40 = vadd.f32 %v5817_v63, %v12711_v28  ;;  %v4766_v63 = vadd.f32 %v14374_v45, %v12661_v4 }
 0xcd5   : > { %v12845_v43 = vmul.f32 0.5, %v5907_v40  ;;  %v12847_v41 = vpop.xlane.xlu0 %5720  ;;  %v12857_v40 = vmul.f32 %v5081_v19, %v12854_v50  ;;  %v7092_v56 = vmul.f32 -1.442695, %v4766_v63  ;;  %v14377_v63 = vld [vmem:[#allocation19_spill] sm:$0xff] }
 0xcd6   : > { %v4760_v28 = vadd.f32 %v14377_v63, %v12661_v4 }
 0xcd7   : > { %14371 = vst [vmem:[#allocation95_spill] sm:$0xff] %v12845_v43  ;;  %14373 = vst [vmem:[#allocation199_spill] sm:$0xff] %v12857_v40 }
 0xcd8   : > { %v8912_v37 = vpop.eup %8911 }
 0xcd9   : > { %v4984_v51 = vadd.f32 1.0, %v8912_v37 }
 0xcdb   : > { %8913 = vrcp.f32 %v4984_v51  ;;  %v12875_v51 = vpop.permute.xlu0 %5814 }
 0xcdc   : > { %8915 = vpow2.f32 %v7092_v56 }
 0xce0   : > { %5726 = vadd.xlane.f32.xlu1 %v12823_v14 }
 0xce5   : > { %v8914_v21 = vpop.eup %8913 }
 0xce6   : > { %v5080_v55 = vsub.f32 0.0, %v8914_v21  ;;  %v8916_v19 = vpop.eup %8915  ;;  %v7091_v21 = vmul.f32 -1.442695, %v4760_v28  ;;  %v14381_v28 = vld [vmem:[#allocation24_spill] sm:$0xff] }
 0xce7   : > { %5732 = vadd.xlane.f32.xlu0 %v12857_v40  ;;  %v4987_v45 = vadd.f32 1.0, %v8916_v19  ;;  %v12889_v19 = vmul.f32 %v12754_v58, %v12341_v30 }
 0xce8   : > { %v12869_v53 = vmul.f32 %v5080_v55, %v12866_v34 }
 0xce9   : > { %8917 = vrcp.f32 %v4987_v45  ;;  %14379 = vst [vmem:[#allocation174_spill] sm:$0xff] %v12889_v19 }
 0xcea   : > { %14376 = vst [vmem:[#allocation99_spill] sm:$0xff] %v12869_v53  ;;  %8919 = vpow2.f32 %v7091_v21 }
 0xcf1   : > { %5828 = vrot.lane.b32.xlu1 %v12857_v40, %s9133_s22 }
 0xcf3   : > { %v8918_v34 = vpop.eup %8917 }
 0xcf4   : > { %v5083_v63 = vsub.f32 0.0, %v8918_v34  ;;  %v8920_v43 = vpop.eup %8919 }
 0xcf5   : > { %v4986_v45 = vadd.f32 1.0, %v8920_v43 }
 0xcf7   : > { %8921 = vrcp.f32 %v4986_v45 }
 0xcfd   : > { %5826 = vrot.lane.b32.xlu0 %v12869_v53, %s9133_s22 }
 0xd01   : > { %v8922_v21 = vpop.eup %8921 }
 0xd02   : > { %v5082_v58 = vsub.f32 0.0, %v8922_v21 }
 0xd03   : > { %v12873_v37 = vpop.xlane.xlu1 %5718 }
 0xd07   : > { %v5821_v50 = vpop.permute.xlu1 %5820 }
 0xd08   : > { %v5909_v38 = vadd.f32 %v5821_v50, %v12739_v12  ;;  %v12892_v50 = vmul.f32 %v5083_v63, %v12889_v19  ;;  %v14382_v12 = vld [vmem:[#allocation139_spill] sm:$0xff] }
 0xd09   : > { %v12901_v30 = vmul.f32 %v12744_v25, %v14382_v12 }
 0xd0a   : > { %v12880_v9 = vmul.f32 0.5, %v5909_v38  ;;  %v12882_v56 = vpop.xlane.xlu0 %5724  ;;  %14380 = vst [vmem:[#allocation104_spill] sm:$0xff] %v12892_v50  ;;  %v4778_v38 = vadd.f32 %v14381_v28, %v12661_v4 }
 0xd0b   : > { %14383 = vst [vmem:[#allocation105_spill] sm:$0xff] %v12901_v30  ;;  %v12904_v34 = vmul.f32 %v5082_v58, %v12901_v30 }
 0xd0c   : > { %14378 = vst [vmem:[#allocation100_spill] sm:$0xff] %v12880_v9  ;;  %v7094_v55 = vmul.f32 -1.442695, %v4778_v38  ;;  %v14385_v38 = vld [vmem:[#allocation21_spill] sm:$0xff] }
 0xd0d   : > { %14384 = vst [vmem:[#allocation109_spill] sm:$0xff] %v12904_v34 }
 0xd0e   : > { %8923 = vpow2.f32 %v7094_v55  ;;  %v12910_v45 = vpop.permute.xlu0 %5818 }
 0xd15   : > { %5730 = vadd.xlane.f32.xlu1 %v12869_v53 }
 0xd18   : > { %v8924_v63 = vpop.eup %8923 }
 0xd19   : > { %v4989_v28 = vadd.f32 1.0, %v8924_v63  ;;  %v12924_v63 = vmul.f32 %v12764_v6, %v12359_v8  ;;  %v12936_v8 = vmul.f32 %v12752_v47, %v12369_v60 }
 0xd1b   : > { %8925 = vrcp.f32 %v4989_v28  ;;  %14386 = vst [vmem:[#allocation106_spill] sm:$0xff] %v12924_v63  ;;  %14389 = vst [vmem:[#allocation111_spill] sm:$0xff] %v12936_v8 }
 0xd1c   : > { %5736 = vadd.xlane.f32.xlu0 %v12892_v50 }
 0xd25   : > { %v8926_v30 = vpop.eup %8925 }
 0xd26   : > { %5832 = vrot.lane.b32.xlu1 %v12892_v50, %s9133_s22  ;;  %v4772_v50 = vadd.f32 %v14385_v38, %v12661_v4  ;;  %v5085_v38 = vsub.f32 0.0, %v8926_v30 }
 0xd28   : > { %v7093_v21 = vmul.f32 -1.442695, %v4772_v50  ;;  %v14388_v50 = vld [vmem:[#allocation29_spill] sm:$0xff] }
 0xd2a   : > { %8927 = vpow2.f32 %v7093_v21 }
 0xd32   : > { %5830 = vrot.lane.b32.xlu0 %v12904_v34, %s9133_s22 }
 0xd34   : > { %v8928_v9 = vpop.eup %8927 }
 0xd35   : > { %v4988_v28 = vadd.f32 1.0, %v8928_v9 }
 0xd37   : > { %8929 = vrcp.f32 %v4988_v28 }
 0xd38   : > { %v12908_v43 = vpop.xlane.xlu1 %5722 }
 0xd3c   : > { %v5825_v19 = vpop.permute.xlu1 %5824 }
 0xd3d   : > { %v5911_v12 = vadd.f32 %v5825_v19, %v12793_v24  ;;  %v12927_v19 = vmul.f32 %v5085_v38, %v12924_v63 }
 0xd3f   : > { %v12915_v25 = vmul.f32 0.5, %v5911_v12  ;;  %v12917_v55 = vpop.xlane.xlu0 %5728  ;;  %14387 = vst [vmem:[#allocation184_spill] sm:$0xff] %v12927_v19  ;;  %v4790_v12 = vadd.f32 %v14388_v50, %v12661_v4 }
 0xd41   : > { %v8930_v21 = vpop.eup %8929  ;;  %v7096_v58 = vmul.f32 -1.442695, %v4790_v12  ;;  %v14391_v12 = vld [vmem:[#allocation26_spill] sm:$0xff] }
 0xd42   : > { %v5084_v6 = vsub.f32 0.0, %v8930_v21  ;;  %v4784_v24 = vadd.f32 %v14391_v12, %v12661_v4 }
 0xd43   : > { %8931 = vpow2.f32 %v7096_v58  ;;  %v12945_v28 = vpop.permute.xlu0 %5822 }
 0xd44   : > { %v12939_v30 = vmul.f32 %v5084_v6, %v12936_v8  ;;  %v7095_v21 = vmul.f32 -1.442695, %v4784_v24  ;;  %v14393_v24 = vld [vmem:[#allocation35_spill] sm:$0xff] }
 0xd46   : > { %14390 = vst [vmem:[#allocation188_spill] sm:$0xff] %v12939_v30 }
 0xd4a   : > { %5734 = vadd.xlane.f32.xlu1 %v12904_v34 }
 0xd4d   : > { %v8932_v38 = vpop.eup %8931 }
 0xd4e   : > { %v4991_v50 = vadd.f32 1.0, %v8932_v38  ;;  %v12959_v38 = vmul.f32 %v12770_v29, %v14322_v2  ;;  %v12971_v2 = vmul.f32 %v12762_v46, %v12387_v11  ;;  %v12983_v11 = vmul.f32 %v12776_v22, %v14324_v36 }
 0xd4f   : > { %v12995_v36 = vmul.f32 %v12768_v42, %v12405_v39  ;;  %v13007_v39 = vmul.f32 %v12780_v35, %v14326_v48  ;;  %v13019_v48 = vmul.f32 %v12774_v61, %v12423_v52  ;;  %v13031_v52 = vmul.f32 %v12784_v44, %v14328_v13 }
 0xd50   : > { %8933 = vrcp.f32 %v4991_v50  ;;  %14392 = vst [vmem:[#allocation112_spill] sm:$0xff] %v12959_v38  ;;  %14394 = vst [vmem:[#allocation114_spill] sm:$0xff] %v12971_v2  ;;  %v13043_v13 = vmul.f32 %v12778_v62, %v12441_v10  ;;  %v13055_v10 = vmul.f32 %v12795_v59, %v14329_v15  ;;  %v13067_v15 = vmul.f32 %v12782_v3, %v12459_v27 }
 0xd51   : > { %5740 = vadd.xlane.f32.xlu0 %v12927_v19  ;;  %8935 = vpow2.f32 %v7095_v21  ;;  %14397 = vst [vmem:[#allocation197_spill] sm:$0xff] %v12983_v11  ;;  %14399 = vst [vmem:[#allocation194_spill] sm:$0xff] %v12995_v36  ;;  %v13079_v27 = vmul.f32 %v12802_v7, %v14330_v26  ;;  %v13091_v26 = vmul.f32 %v12790_v31, %v14327_v18 }
 0xd52   : > { %14401 = vst [vmem:[#allocation198_spill] sm:$0xff] %v13007_v39  ;;  %14403 = vst [vmem:[#allocation200_spill] sm:$0xff] %v13019_v48  ;;  %v13103_v18 = vmul.f32 %v12804_v32, %v12491_v57  ;;  %v13115_v57 = vmul.f32 %v12797_v0, %v12521_v17 }
 0xd53   : > { %14405 = vst [vmem:[#allocation57_spill] sm:$0xff] %v13031_v52  ;;  %14408 = vst [vmem:[#allocation202_spill] sm:$0xff] %v13043_v13 }
 0xd54   : > { %14410 = vst [vmem:[#allocation146_spill] sm:$0xff] %v13055_v10  ;;  %14413 = vst [vmem:[#allocation204_spill] sm:$0xff] %v13067_v15 }
 0xd55   : > { %14415 = vst [vmem:[#allocation206_spill] sm:$0xff] %v13079_v27  ;;  %14418 = vst [vmem:[#allocation207_spill] sm:$0xff] %v13091_v26 }
 0xd56   : > { %14420 = vst [vmem:[#allocation153_spill] sm:$0xff] %v13103_v18  ;;  %14423 = vst [vmem:[#allocation138_spill] sm:$0xff] %v13115_v57 }
 0xd5a   : > { %v8934_v8 = vpop.eup %8933 }
 0xd5b   : > { %5836 = vrot.lane.b32.xlu1 %v12927_v19, %s9133_s22  ;;  %v5087_v12 = vsub.f32 0.0, %v8934_v8  ;;  %v8936_v19 = vpop.eup %8935 }
 0xd5c   : > { %v4990_v50 = vadd.f32 1.0, %v8936_v19 }
 0xd5e   : > { %8937 = vrcp.f32 %v4990_v50  ;;  %v14396_v50 = vld [vmem:[#allocation32_spill] sm:$0xff] }
 0xd67   : > { %5834 = vrot.lane.b32.xlu0 %v12939_v30, %s9133_s22 }
 0xd68   : > { %v8938_v21 = vpop.eup %8937 }
 0xd69   : > { %v5086_v29 = vsub.f32 0.0, %v8938_v21 }
 0xd6b   : > { %v12974_v8 = vmul.f32 %v5086_v29, %v12971_v2 }
 0xd6d   : > { %v12943_v9 = vpop.xlane.xlu1 %5726  ;;  %14395 = vst [vmem:[#allocation191_spill] sm:$0xff] %v12974_v8 }
 0xd71   : > { %v5829_v63 = vpop.permute.xlu1 %5828 }
 0xd72   : > { %v5913_v60 = vadd.f32 %v5829_v63, %v12857_v40  ;;  %v12962_v63 = vmul.f32 %v5087_v12, %v12959_v38  ;;  %v4796_v38 = vadd.f32 %v14396_v50, %v12661_v4  ;;  %v14434_v40 = vld [vmem:[#allocation28_spill] sm:$0xff] }
 0xd74   : > { %v12950_v47 = vmul.f32 0.5, %v5913_v60  ;;  %v12952_v58 = vpop.xlane.xlu0 %5732  ;;  %v4802_v60 = vadd.f32 %v14393_v24, %v12661_v4  ;;  %v7097_v24 = vmul.f32 -1.442695, %v4796_v38  ;;  %v14398_v38 = vld [vmem:[#allocation38_spill] sm:$0xff] }
 0xd76   : > { %v7098_v6 = vmul.f32 -1.442695, %v4802_v60 }
 0xd78   : > { %8939 = vpow2.f32 %v7098_v6 }
 0xd7f   : > { %5738 = vadd.xlane.f32.xlu1 %v12939_v30 }
 0xd82   : > { %v8940_v19 = vpop.eup %8939 }
 0xd83   : > { %v4993_v12 = vadd.f32 1.0, %v8940_v19  ;;  %v4814_v19 = vadd.f32 %v14398_v38, %v12661_v4 }
 0xd85   : > { %8941 = vrcp.f32 %v4993_v12  ;;  %v7100_v50 = vmul.f32 -1.442695, %v4814_v19 }
 0xd86   : > { %5744 = vadd.xlane.f32.xlu0 %v12962_v63  ;;  %8943 = vpow2.f32 %v7097_v24 }
 0xd8f   : > { %v8942_v60 = vpop.eup %8941 }
 0xd90   : > { %5840 = vrot.lane.b32.xlu1 %v12962_v63, %s9133_s22  ;;  %v5089_v46 = vsub.f32 0.0, %v8942_v60  ;;  %v8944_v6 = vpop.eup %8943 }
 0xd91   : > { %v4992_v29 = vadd.f32 1.0, %v8944_v6  ;;  %v14400_v6 = vld [vmem:[#allocation37_spill] sm:$0xff] }
 0xd92   : > { %v12986_v21 = vmul.f32 %v5089_v46, %v12983_v11 }
 0xd93   : > { %8945 = vrcp.f32 %v4992_v29  ;;  %v4808_v29 = vadd.f32 %v14400_v6, %v12661_v4 }
 0xd94   : > { %8947 = vpow2.f32 %v7100_v50 }
 0xd95   : > { %v7099_v38 = vmul.f32 -1.442695, %v4808_v29 }
 0xd9c   : > { %5838 = vrot.lane.b32.xlu0 %v12974_v8, %s9133_s22 }
 0xd9d   : > { %v8946_v12 = vpop.eup %8945 }
 0xd9e   : > { %v5088_v22 = vsub.f32 0.0, %v8946_v12  ;;  %v8948_v60 = vpop.eup %8947 }
 0xd9f   : > { %v4995_v46 = vadd.f32 1.0, %v8948_v60  ;;  %v14402_v60 = vld [vmem:[#allocation42_spill] sm:$0xff] }
 0xda0   : > { %v12998_v24 = vmul.f32 %v5088_v22, %v12995_v36  ;;  %v14435_v36 = vld [vmem:[#allocation76_spill] sm:$0xff] }
 0xda1   : > { %8949 = vrcp.f32 %v4995_v46  ;;  %v4826_v46 = vadd.f32 %v14402_v60, %v12661_v4 }
 0xda2   : > { %8951 = vpow2.f32 %v7099_v38  ;;  %v13128_v0 = vpop.xlane.xlu1 %5730 }
 0xda3   : > { %v7102_v29 = vmul.f32 -1.442695, %v4826_v46 }
 0xdab   : > { %v8950_v19 = vpop.eup %8949 }
 0xdac   : > { %v5091_v42 = vsub.f32 0.0, %v8950_v19  ;;  %v8952_v12 = vpop.eup %8951 }
 0xdad   : > { %v4994_v22 = vadd.f32 1.0, %v8952_v12  ;;  %v14404_v12 = vld [vmem:[#allocation40_spill] sm:$0xff] }
 0xdae   : > { %v13010_v50 = vmul.f32 %v5091_v42, %v13007_v39 }
 0xdaf   : > { %8953 = vrcp.f32 %v4994_v22  ;;  %v4820_v22 = vadd.f32 %v14404_v12, %v12661_v4 }
 0xdb0   : > { %8955 = vpow2.f32 %v7102_v29 }
 0xdb1   : > { %v7101_v60 = vmul.f32 -1.442695, %v4820_v22 }
 0xdb4   : > { %5742 = vadd.xlane.f32.xlu1 %v12974_v8 }
 0xdb9   : > { %v8954_v6 = vpop.eup %8953 }
 0xdba   : > { %v5090_v35 = vsub.f32 0.0, %v8954_v6  ;;  %v8956_v19 = vpop.eup %8955 }
 0xdbb   : > { %5748 = vadd.xlane.f32.xlu0 %v12986_v21  ;;  %v4997_v42 = vadd.f32 1.0, %v8956_v19  ;;  %v14407_v19 = vld [vmem:[#allocation47_spill] sm:$0xff] }
 0xdbc   : > { %v13022_v38 = vmul.f32 %v5090_v35, %v13019_v48 }
 0xdbd   : > { %8957 = vrcp.f32 %v4997_v42  ;;  %v4838_v42 = vadd.f32 %v14407_v19, %v12661_v4 }
 0xdbe   : > { %8959 = vpow2.f32 %v7101_v60 }
 0xdbf   : > { %v7104_v22 = vmul.f32 -1.442695, %v4838_v42 }
 0xdc5   : > { %5844 = vrot.lane.b32.xlu1 %v12986_v21, %s9133_s22 }
 0xdc7   : > { %v8958_v46 = vpop.eup %8957 }
 0xdc8   : > { %v5093_v61 = vsub.f32 0.0, %v8958_v46  ;;  %v8960_v6 = vpop.eup %8959 }
 0xdc9   : > { %v4996_v35 = vadd.f32 1.0, %v8960_v6  ;;  %v14409_v6 = vld [vmem:[#allocation44_spill] sm:$0xff] }
 0xdca   : > { %v13034_v29 = vmul.f32 %v5093_v61, %v13031_v52  ;;  %v14431_v52 = vld [vmem:[#allocation71_spill] sm:$0xff] }
 0xdcb   : > { %8961 = vrcp.f32 %v4996_v35  ;;  %v4832_v35 = vadd.f32 %v14409_v6, %v12661_v4 }
 0xdcc   : > { %14406 = vst [vmem:[#allocation130_spill] sm:$0xff] %v13034_v29  ;;  %8963 = vpow2.f32 %v7104_v22 }
 0xdcd   : > { %v7103_v19 = vmul.f32 -1.442695, %v4832_v35 }
 0xdd1   : > { %5842 = vrot.lane.b32.xlu0 %v12998_v24, %s9133_s22 }
 0xdd5   : > { %v8962_v12 = vpop.eup %8961 }
 0xdd6   : > { %v5092_v44 = vsub.f32 0.0, %v8962_v12  ;;  %v8964_v46 = vpop.eup %8963 }
 0xdd7   : > { %v4999_v61 = vadd.f32 1.0, %v8964_v46  ;;  %v14412_v46 = vld [vmem:[#allocation51_spill] sm:$0xff] }
 0xdd8   : > { %v13046_v60 = vmul.f32 %v5092_v44, %v13043_v13 }
 0xdd9   : > { %8965 = vrcp.f32 %v4999_v61  ;;  %v4850_v61 = vadd.f32 %v14412_v46, %v12661_v4 }
 0xdda   : > { %8967 = vpow2.f32 %v7103_v19 }
 0xddb   : > { %v7106_v35 = vmul.f32 -1.442695, %v4850_v61 }
 0xde3   : > { %v8966_v42 = vpop.eup %8965 }
 0xde4   : > { %v5095_v62 = vsub.f32 0.0, %v8966_v42  ;;  %v8968_v12 = vpop.eup %8967 }
 0xde5   : > { %v4998_v44 = vadd.f32 1.0, %v8968_v12  ;;  %v14414_v12 = vld [vmem:[#allocation49_spill] sm:$0xff] }
 0xde6   : > { %v13058_v22 = vmul.f32 %v5095_v62, %v13055_v10  ;;  %v14430_v10 = vld [vmem:[#allocation45_spill] sm:$0xff] }
 0xde7   : > { %8969 = vrcp.f32 %v4998_v44  ;;  %v4844_v44 = vadd.f32 %v14414_v12, %v12661_v4  ;;  %v6256_v39 = vadd.f32 %v14431_v52, %v14430_v10  ;;  %v5904_v52 = vadd.f32 %v12836_v33, %v12704_v5  ;;  %v14437_v10 = vld [vmem:[#allocation30_spill] sm:$0xff]  ;;  %v14442_v33 = vld [vmem:[#allocation77_spill] sm:$0xff] }
 0xde8   : > { %14411 = vst [vmem:[#allocation124_spill] sm:$0xff] %v13058_v22  ;;  %8971 = vpow2.f32 %v7106_v35 }
 0xde9   : > { %5746 = vadd.xlane.f32.xlu1 %v12998_v24  ;;  %v7105_v46 = vmul.f32 -1.442695, %v4844_v44 }
 0xdf0   : > { %5752 = vadd.xlane.f32.xlu0 %v13010_v50 }
 0xdf1   : > { %v8970_v6 = vpop.eup %8969 }
 0xdf2   : > { %v5094_v59 = vsub.f32 0.0, %v8970_v6  ;;  %v8972_v42 = vpop.eup %8971 }
 0xdf3   : > { %v5001_v62 = vadd.f32 1.0, %v8972_v42  ;;  %v14417_v42 = vld [vmem:[#allocation56_spill] sm:$0xff] }
 0xdf4   : > { %v13070_v19 = vmul.f32 %v5094_v59, %v13067_v15 }
 0xdf5   : > { %8973 = vrcp.f32 %v5001_v62  ;;  %v4862_v62 = vadd.f32 %v14417_v42, %v12661_v4 }
 0xdf6   : > { %8975 = vpow2.f32 %v7105_v46 }
 0xdf7   : > { %v7108_v44 = vmul.f32 -1.442695, %v4862_v62 }
 0xdfa   : > { %5848 = vrot.lane.b32.xlu1 %v13010_v50, %s9133_s22 }
 0xdff   : > { %v8974_v61 = vpop.eup %8973 }
 0xe00   : > { %v5097_v3 = vsub.f32 0.0, %v8974_v61  ;;  %v8976_v6 = vpop.eup %8975 }
 0xe01   : > { %v5000_v59 = vadd.f32 1.0, %v8976_v6  ;;  %v14419_v6 = vld [vmem:[#allocation53_spill] sm:$0xff] }
 0xe02   : > { %v13082_v35 = vmul.f32 %v5097_v3, %v13079_v27  ;;  %v14429_v27 = vld [vmem:[#allocation69_spill] sm:$0xff] }
 0xe03   : > { %8977 = vrcp.f32 %v5000_v59  ;;  %v4856_v59 = vadd.f32 %v14419_v6, %v12661_v4 }
 0xe04   : > { %14416 = vst [vmem:[#allocation134_spill] sm:$0xff] %v13082_v35  ;;  %8979 = vpow2.f32 %v7108_v44 }
 0xe05   : > { %v7107_v42 = vmul.f32 -1.442695, %v4856_v59 }
 0xe06   : > { %5846 = vrot.lane.b32.xlu0 %v13022_v38, %s9133_s22 }
 0xe0d   : > { %v8978_v12 = vpop.eup %8977 }
 0xe0e   : > { %v5096_v7 = vsub.f32 0.0, %v8978_v12  ;;  %v8980_v61 = vpop.eup %8979 }
 0xe0f   : > { %v5003_v3 = vadd.f32 1.0, %v8980_v61  ;;  %v14422_v61 = vld [vmem:[#allocation60_spill] sm:$0xff] }
 0xe10   : > { %v13094_v46 = vmul.f32 %v5096_v7, %v13091_v26 }
 0xe11   : > { %8981 = vrcp.f32 %v5003_v3  ;;  %v4874_v3 = vadd.f32 %v14422_v61, %v12661_v4 }
 0xe12   : > { %8983 = vpow2.f32 %v7107_v42 }
 0xe13   : > { %v7110_v59 = vmul.f32 -1.442695, %v4874_v3  ;;  %v13124_v3 = vpop.permute.xlu0 %5826 }
 0xe17   : > { %v13126_v17 = vpop.xlane.xlu0 %5736 }
 0xe1b   : > { %v8982_v62 = vpop.eup %8981 }
 0xe1c   : > { %v5099_v31 = vsub.f32 0.0, %v8982_v62  ;;  %v8984_v12 = vpop.eup %8983 }
 0xe1d   : > { %v5002_v7 = vadd.f32 1.0, %v8984_v12  ;;  %v14425_v12 = vld [vmem:[#allocation58_spill] sm:$0xff] }
 0xe1e   : > { %5750 = vadd.xlane.f32.xlu1 %v13022_v38  ;;  %v13106_v44 = vmul.f32 %v5099_v31, %v13103_v18  ;;  %v14428_v18 = vld [vmem:[#allocation17_spill] sm:$0xff] }
 0xe1f   : > { %8985 = vrcp.f32 %v5002_v7  ;;  %v4868_v7 = vadd.f32 %v14425_v12, %v12661_v4  ;;  %v13137_v4 = vpop.permute.xlu1 %5832 }
 0xe20   : > { %14421 = vst [vmem:[#allocation209_spill] sm:$0xff] %v13106_v44  ;;  %8987 = vpow2.f32 %v7110_v59  ;;  %v13133_v59 = vmul.f32 %v12811_v20, %v12541_v16  ;;  %v6254_v16 = vadd.f32 %v14429_v27, %v14428_v18  ;;  %v6288_v27 = vmul.f32 0.5, %v6256_v39  ;;  %v14438_v39 = vld [vmem:[#allocation164_spill] sm:$0xff] }
 0xe21   : > { %v7109_v61 = vmul.f32 -1.442695, %v4868_v7 }
 0xe22   : > { %14426 = vst [vmem:[#allocation140_spill] sm:$0xff] %v13133_v59 }
 0xe25   : > { %5756 = vadd.xlane.f32.xlu0 %v13034_v29 }
 0xe29   : > { %v8986_v6 = vpop.eup %8985 }
 0xe2a   : > { %v5098_v32 = vsub.f32 0.0, %v8986_v6  ;;  %v8988_v62 = vpop.eup %8987 }
 0xe2b   : > { %v5005_v31 = vadd.f32 1.0, %v8988_v62 }
 0xe2c   : > { %v13118_v42 = vmul.f32 %v5098_v32, %v13115_v57  ;;  %v13135_v32 = vpop.permute.xlu0 %5830  ;;  %v13145_v57 = vpop.xlane.xlu1 %5734 }
 0xe2d   : > { %8989 = vrcp.f32 %v5005_v31 }
 0xe2e   : > { %14424 = vst [vmem:[#allocation211_spill] sm:$0xff] %v13118_v42  ;;  %8991 = vpow2.f32 %v7109_v61 }
 0xe2f   : > { %5852 = vrot.lane.b32.xlu1 %v13034_v29, %s9133_s22 }
 0xe30   : > { %v13142_v7 = vpop.xlane.xlu0 %5740  ;;  %v13153_v11 = vpop.permute.xlu1 %5836 }
 0xe34   : > { %v13149_v20 = vpop.permute.xlu0 %5834 }
 0xe37   : > { %v8990_v6 = vpop.eup %8989 }
 0xe38   : > { %v5101_v62 = vsub.f32 0.0, %v8990_v6  ;;  %v8992_v31 = vpop.eup %8991  ;;  %v6286_v6 = vmul.f32 0.5, %v6254_v16  ;;  %v13164_v16 = vpop.xlane.xlu1 %5738 }
 0xe39   : > { %v5004_v61 = vadd.f32 1.0, %v8992_v31  ;;  %v13158_v31 = vpop.xlane.xlu0 %5744 }
 0xe3a   : > { %v13140_v12 = vmul.f32 %v5101_v62, %v13133_v59  ;;  %v5902_v62 = vadd.f32 %v12825_v49, %v12690_v23  ;;  %v14432_v59 = vld [vmem:[#allocation23_spill] sm:$0xff]  ;;  %v6320_v49 = vsub.f32 %v14435_v36, %v6288_v27 }
 0xe3b   : > { %5850 = vrot.lane.b32.xlu0 %v13046_v60, %s9133_s22  ;;  %8993 = vrcp.f32 %v5004_v61  ;;  %v6318_v26 = vsub.f32 %v14432_v59, %v6286_v6  ;;  %v14433_v61 = vld [vmem:[#allocation62_spill] sm:$0xff]  ;;  %v14436_v6 = vld [vmem:[#allocation64_spill] sm:$0xff] }
 0xe3c   : > { %14427 = vst [vmem:[#allocation212_spill] sm:$0xff] %v13140_v12  ;;  %v6258_v15 = vadd.f32 %v14434_v40, %v14433_v61  ;;  %v5934_v13 = vmul.f32 0.5, %v5902_v62  ;;  %v6260_v18 = vadd.f32 %v14437_v10, %v14436_v6  ;;  %v14441_v40 = vld [vmem:[#allocation92_spill] sm:$0xff]  ;;  %v5936_v62 = vmul.f32 0.5, %v5904_v52  ;;  %v13179_v5 = vpop.permute.xlu1 %5840  ;;  %v14444_v6 = vld [vmem:[#allocation66_spill] sm:$0xff] }
 0xe3d   : > { %v6350_v48 = vmul.f32 0.014960632, %v6318_v26  ;;  %v13171_v23 = vpop.permute.xlu0 %5838 }
 0xe3e   : > { %v6290_v59 = vmul.f32 0.5, %v6258_v15  ;;  %v5966_v61 = vsub.f32 %v14441_v40, %v5934_v13  ;;  %v14443_v15 = vld [vmem:[#allocation185_spill] sm:$0xff]  ;;  %v6292_v10 = vmul.f32 0.5, %v6260_v18  ;;  %v14448_v40 = vld [vmem:[#allocation68_spill] sm:$0xff] }
 0xe3f   : > { %8995 = vrcp.f32 %v6350_v48  ;;  %v5906_v27 = vadd.f32 %v12875_v51, %v14443_v15  ;;  %v5968_v48 = vsub.f32 %v12840_v54, %v5936_v62  ;;  %v14447_v51 = vld [vmem:[#allocation165_spill] sm:$0xff]  ;;  %v14450_v62 = vld [vmem:[#allocation98_spill] sm:$0xff] }
 0xe40   : > { %v6322_v26 = vsub.f32 %v14442_v33, %v6290_v59  ;;  %v5998_v13 = vmul.f32 0.014960632, %v5966_v61  ;;  %v5908_v18 = vadd.f32 %v12910_v45, %v14447_v51  ;;  %v14449_v33 = vld [vmem:[#allocation107_spill] sm:$0xff]  ;;  %v5910_v45 = vadd.f32 %v12945_v28, %v12823_v14 }
 0xe42   : > { %v6354_v52 = vmul.f32 0.014960632, %v6322_v26  ;;  %v6030_v61 = vsub.f32 0.0, %v5998_v13  ;;  %v14453_v13 = vld [vmem:[#allocation119_spill] sm:$0xff]  ;;  %v5942_v14 = vmul.f32 0.5, %v5910_v45 }
 0xe45   : > { %v8994_v2 = vpop.eup %8993 }
 0xe46   : > { %v5100_v36 = vsub.f32 0.0, %v8994_v2  ;;  %v13192_v2 = vpop.xlane.xlu1 %5742 }
 0xe48   : > { %v13185_v29 = vpop.xlane.xlu0 %5748 }
 0xe53   : > { %5754 = vadd.xlane.f32.xlu1 %v13046_v60 }
 0xe5a   : > { %5760 = vadd.xlane.f32.xlu0 %v13058_v22 }
 0xe64   : > { %5856 = vrot.lane.b32.xlu1 %v13058_v22, %s9133_s22 }
 0xe70   : > { %5854 = vrot.lane.b32.xlu0 %v13070_v19, %s9133_s22 }
 0xe88   : > { %5758 = vadd.xlane.f32.xlu1 %v13070_v19 }
 0xe8f   : > { %5764 = vadd.xlane.f32.xlu0 %v13082_v35 }
 0xe99   : > { %5860 = vrot.lane.b32.xlu1 %v13082_v35, %s9133_s22  ;;  %v14445_v35 = vld [vmem:[#allocation93_spill] sm:$0xff] }
 0xe9a   : > { %v6262_v22 = vadd.f32 %v14445_v35, %v14444_v6 }
 0xe9c   : > { %v6294_v35 = vmul.f32 0.5, %v6262_v22  ;;  %v8996_v22 = vpop.eup %8995 }
 0xe9e   : > { %v6326_v26 = vsub.f32 %v14450_v62, %v6294_v35  ;;  %v14454_v35 = vld [vmem:[#allocation126_spill] sm:$0xff] }
 0xea5   : > { %5858 = vrot.lane.b32.xlu0 %v13094_v46, %s9133_s22 }
 0xebd   : > { %5762 = vadd.xlane.f32.xlu1 %v13094_v46 }
 0xec4   : > { %5768 = vadd.xlane.f32.xlu0 %v13106_v44 }
 0xece   : > { %5864 = vrot.lane.b32.xlu1 %v13106_v44, %s9133_s22  ;;  %v6352_v44 = vmul.f32 0.014960632, %v6320_v49  ;;  %v14446_v49 = vld [vmem:[#allocation88_spill] sm:$0xff] }
 0xecf   : > { %v6324_v59 = vsub.f32 %v14446_v49, %v6292_v10  ;;  %v13202_v10 = vpop.permute.xlu0 %5842  ;;  %v14451_v49 = vld [vmem:[#allocation115_spill] sm:$0xff] }
 0xed0   : > { %8997 = vrcp.f32 %v6352_v44 }
 0xed1   : > { %8999 = vrcp.f32 %v6354_v52  ;;  %v6356_v44 = vmul.f32 0.014960632, %v6324_v59 }
 0xed3   : > { %9001 = vrcp.f32 %v6356_v44  ;;  %v13214_v28 = vpop.xlane.xlu0 %5752 }
 0xeda   : > { %5862 = vrot.lane.b32.xlu0 %v13118_v42, %s9133_s22  ;;  %v8998_v51 = vpop.eup %8997 }
 0xef2   : > { %5766 = vadd.xlane.f32.xlu1 %v13118_v42 }
 0xef9   : > { %5772 = vadd.xlane.f32.xlu0 %v13140_v12 }
 0xf03   : > { %5868 = vrot.lane.b32.xlu1 %v13140_v12, %s9133_s22  ;;  %v14439_v12 = vld [vmem:[#allocation189_spill] sm:$0xff] }
 0xf04   : > { %v13175_v42 = vmul.f32 %v14439_v12, %v14438_v39  ;;  %v5938_v39 = vmul.f32 0.5, %v5906_v27  ;;  %v5940_v27 = vmul.f32 0.5, %v5908_v18  ;;  %v6358_v18 = vmul.f32 0.014960632, %v6326_v26 }
 0xf05   : > { %v5974_v26 = vsub.f32 %v12943_v9, %v5942_v14 }
 0xf06   : > { %14440 = vst [vmem:[#allocation213_spill] sm:$0xff] %v13175_v42  ;;  %v13188_v12 = vmul.f32 %v5100_v36, %v13175_v42  ;;  %v6264_v36 = vadd.f32 %v14449_v33, %v14448_v40  ;;  %v6000_v42 = vmul.f32 0.014960632, %v5968_v48  ;;  %v5970_v54 = vsub.f32 %v12873_v37, %v5938_v39  ;;  %v14452_v33 = vld [vmem:[#allocation74_spill] sm:$0xff]  ;;  %v13210_v40 = vpop.permute.xlu1 %5844 }
 0xf07   : > { %v6266_v48 = vadd.f32 %v14453_v13, %v14452_v33  ;;  %v6414_v37 = vmul.f32 %v8996_v22, %v6030_v61  ;;  %v5972_v39 = vsub.f32 %v12908_v43, %v5940_v27  ;;  %v14455_v33 = vld [vmem:[#allocation25_spill] sm:$0xff]  ;;  %9003 = vrcp.f32 %v6358_v18  ;;  %v14457_v27 = vld [vmem:[#allocation142_spill] sm:$0xff] }
 0xf08   : > { %v6296_v6 = vmul.f32 0.5, %v6264_v36  ;;  %v6032_v52 = vsub.f32 0.0, %v6000_v42  ;;  %v6002_v59 = vmul.f32 0.014960632, %v5970_v54  ;;  %v5912_v36 = vadd.f32 %v13124_v3, %v12869_v53  ;;  %v13228_v53 = vpop.permute.xlu0 %5846 }
 0xf09   : > { %v6298_v13 = vmul.f32 0.5, %v6266_v48  ;;  %v6004_v44 = vmul.f32 0.014960632, %v5972_v39  ;;  %v5914_v3 = vadd.f32 %v13135_v32, %v12904_v34  ;;  %v9000_v48 = vpop.eup %8999  ;;  %v14460_v39 = vld [vmem:[#allocation158_spill] sm:$0xff] }
 0xf0a   : > { %v6328_v62 = vsub.f32 %v14454_v35, %v6296_v6  ;;  %v13220_v42 = vpop.xlane.xlu1 %5746  ;;  %v6416_v54 = vmul.f32 %v8998_v51, %v6032_v52  ;;  %v6034_v43 = vsub.f32 0.0, %v6002_v59  ;;  %v5944_v22 = vmul.f32 0.5, %v5912_v36  ;;  %v14458_v35 = vld [vmem:[#allocation81_spill] sm:$0xff] }
 0xf0b   : > { %v6330_v45 = vsub.f32 %v14457_v27, %v6298_v13  ;;  %v6036_v52 = vsub.f32 0.0, %v6004_v44  ;;  %v6006_v59 = vmul.f32 0.014960632, %v5974_v26  ;;  %v5946_v32 = vmul.f32 0.5, %v5914_v3  ;;  %v9002_v13 = vpop.eup %9001  ;;  %v14464_v44 = vld [vmem:[#allocation73_spill] sm:$0xff] }
 0xf0c   : > { %v6360_v6 = vmul.f32 0.014960632, %v6328_v62  ;;  %v6418_v51 = vmul.f32 %v9000_v48, %v6034_v43  ;;  %v5976_v14 = vsub.f32 %v13128_v0, %v5944_v22  ;;  %v5916_v36 = vadd.f32 %v13149_v20, %v12939_v30  ;;  %v14463_v43 = vld [vmem:[#allocation55_spill] sm:$0xff]  ;;  %v14465_v0 = vld [vmem:[#allocation94_spill] sm:$0xff]  ;;  %v13242_v22 = vpop.xlane.xlu0 %5756 }
 0xf0d   : > { %v6362_v9 = vmul.f32 0.014960632, %v6330_v45  ;;  %v6257_v26 = vadd.f32 %v14464_v44, %v14463_v43 }
 0xf0e   : > { %9005 = vrcp.f32 %v6360_v6  ;;  %v13232_v62 = vpop.permute.xlu1 %5848  ;;  %v14466_v6 = vld [vmem:[#allocation86_spill] sm:$0xff]  ;;  %v6008_v3 = vmul.f32 0.014960632, %v5976_v14 }
 0xf0f   : > { %5866 = vrot.lane.b32.xlu0 %v13188_v12, %s9133_s22  ;;  %v6272_v45 = vadd.f32 %v14466_v6, %v14465_v0  ;;  %9007 = vrcp.f32 %v6362_v9  ;;  %v6289_v43 = vmul.f32 0.5, %v6257_v26  ;;  %v14474_v26 = vld [vmem:[#allocation78_spill] sm:$0xff] }
 0xf11   : > { %v9004_v44 = vpop.eup %9003 }
 0xf12   : > { %v13246_v30 = vpop.xlane.xlu1 %5750 }
 0xf13   : > { %6218 = vrot.lane.b32.xlu0 %v14451_v49, %s9133_s22  ;;  %v14456_v49 = vld [vmem:[#allocation136_spill] sm:$0xff] }
 0xf14   : > { %v6268_v61 = vadd.f32 %v14456_v49, %v14455_v33  ;;  %v14459_v49 = vld [vmem:[#allocation59_spill] sm:$0xff] }
 0xf15   : > { %v6270_v33 = vadd.f32 %v14459_v49, %v14458_v35  ;;  %v6038_v49 = vsub.f32 0.0, %v6006_v59  ;;  %v14469_v59 = vld [vmem:[#allocation89_spill] sm:$0xff] }
 0xf17   : > { %6480 = vperm.xlu0 %7585, %v6414_v37   ;;  %v6300_v37 = vmul.f32 0.5, %v6268_v61  ;;  %v14461_v61 = vld [vmem:[#allocation27_spill] sm:$0xff]  ;;  %v6302_v48 = vmul.f32 0.5, %v6270_v33  ;;  %v5918_v33 = vadd.f32 %v13171_v23, %v12974_v8  ;;  %v5851_v23 = vpop.permute.xlu0 %5850 }
 0xf19   : > { %v6332_v18 = vsub.f32 %v14460_v39, %v6300_v37  ;;  %v6420_v37 = vmul.f32 %v9002_v13, %v6036_v52  ;;  %v5978_v39 = vsub.f32 %v13145_v57, %v5946_v32  ;;  %v14468_v52 = vld [vmem:[#allocation41_spill] sm:$0xff]  ;;  %v6422_v13 = vmul.f32 %v9004_v44, %v6038_v49  ;;  %v14470_v32 = vld [vmem:[#allocation70_spill] sm:$0xff] }
 0xf1a   : > { %v6274_v14 = vadd.f32 %v14469_v59, %v14468_v52  ;;  %v6040_v57 = vsub.f32 0.0, %v6008_v3  ;;  %v5950_v34 = vmul.f32 0.5, %v5918_v33  ;;  %v5920_v49 = vadd.f32 %v13202_v10, %v12998_v24  ;;  %v14475_v3 = vld [vmem:[#allocation65_spill] sm:$0xff] }
 0xf1b   : > { %6490 = vperm.xlu0 %7585, %v6416_v54   ;;  %v14462_v54 = vld [vmem:[#allocation75_spill] sm:$0xff]  ;;  %v6364_v20 = vmul.f32 0.014960632, %v6332_v18  ;;  %v6010_v9 = vmul.f32 0.014960632, %v5978_v39  ;;  %v14476_v39 = vld [vmem:[#allocation96_spill] sm:$0xff] }
 0xf1c   : > { %v6255_v27 = vadd.f32 %v14462_v54, %v14461_v61  ;;  %v5948_v54 = vmul.f32 0.5, %v5916_v36  ;;  %v6304_v61 = vmul.f32 0.5, %v6272_v45  ;;  %v5982_v33 = vsub.f32 %v13192_v2, %v5950_v34  ;;  %v14482_v2 = vld [vmem:[#allocation50_spill] sm:$0xff] }
 0xf1d   : > { %9009 = vrcp.f32 %v6364_v20  ;;  %v6261_v20 = vadd.f32 %v14476_v39, %v14475_v3  ;;  %v6042_v59 = vsub.f32 0.0, %v6010_v9  ;;  %v14480_v9 = vld [vmem:[#allocation67_spill] sm:$0xff] }
 0xf1e   : > { %v6287_v6 = vmul.f32 0.5, %v6255_v27  ;;  %v5980_v18 = vsub.f32 %v13164_v16, %v5948_v54  ;;  %v14473_v27 = vld [vmem:[#allocation63_spill] sm:$0xff]  ;;  %v9006_v16 = vpop.eup %9005  ;;  %v14477_v54 = vld [vmem:[#allocation46_spill] sm:$0xff] }
 0xf1f   : > { %6500 = vperm.xlu0 %7585, %v6418_v51   ;;  %v14467_v51 = vld [vmem:[#allocation170_spill] sm:$0xff]  ;;  %v6259_v45 = vadd.f32 %v14474_v26, %v14473_v27  ;;  %v13269_v26 = vpop.xlane.xlu0 %5760  ;;  %v9008_v3 = vpop.eup %9007 }
 0xf20   : > { %v6334_v35 = vsub.f32 %v14467_v51, %v6302_v48  ;;  %v6319_v48 = vsub.f32 %v14470_v32, %v6287_v6  ;;  %v14471_v51 = vld [vmem:[#allocation192_spill] sm:$0xff]  ;;  %v13265_v6 = vpop.permute.xlu1 %5852  ;;  %v6012_v32 = vmul.f32 0.014960632, %v5980_v18  ;;  %v14481_v18 = vld [vmem:[#allocation110_spill] sm:$0xff] }
 0xf21   : > { %v6336_v0 = vsub.f32 %v14471_v51, %v6304_v61  ;;  %v14478_v61 = vld [vmem:[#allocation91_spill] sm:$0xff]  ;;  %v6291_v39 = vmul.f32 0.5, %v6259_v45 }
 0xf22   : > { %v6366_v36 = vmul.f32 0.014960632, %v6334_v35  ;;  %v6306_v35 = vmul.f32 0.5, %v6274_v14  ;;  %v6276_v44 = vadd.f32 %v14478_v61, %v14477_v54  ;;  %v6351_v51 = vmul.f32 0.014960632, %v6319_v48  ;;  %v14483_v48 = vld [vmem:[#allocation132_spill] sm:$0xff] }
 0xf23   : > { %6510 = vperm.xlu0 %7585, %v6420_v37   ;;  %v14472_v37 = vld [vmem:[#allocation34_spill] sm:$0xff]  ;;  %v6368_v10 = vmul.f32 0.014960632, %v6336_v0  ;;  %v5952_v14 = vmul.f32 0.5, %v5920_v49  ;;  %v5922_v61 = vadd.f32 %v13228_v53, %v13022_v38  ;;  %v6278_v0 = vadd.f32 %v14483_v48, %v14482_v2  ;;  %v14486_v48 = vld [vmem:[#allocation87_spill] sm:$0xff] }
 0xf24   : > { %v6321_v8 = vsub.f32 %v14472_v37, %v6289_v43  ;;  %v6424_v43 = vmul.f32 %v9006_v16, %v6040_v57  ;;  %9011 = vrcp.f32 %v6366_v36  ;;  %v14479_v37 = vld [vmem:[#allocation117_spill] sm:$0xff]  ;;  %v6293_v57 = vmul.f32 0.5, %v6261_v20  ;;  %v5755_v36 = vpop.xlane.xlu1 %5754  ;;  %v14484_v49 = vld [vmem:[#allocation54_spill] sm:$0xff] }
 0xf25   : > { %v6263_v16 = vadd.f32 %v14481_v18, %v14480_v9  ;;  %v6308_v34 = vmul.f32 0.5, %v6276_v44  ;;  %v6014_v54 = vmul.f32 0.014960632, %v5982_v33  ;;  %9013 = vrcp.f32 %v6368_v10 }
 0xf26   : > { %v6353_v27 = vmul.f32 0.014960632, %v6321_v8  ;;  %v5984_v8 = vsub.f32 %v13220_v42, %v5952_v14  ;;  %9015 = vrcp.f32 %v6351_v51  ;;  %v5954_v52 = vmul.f32 0.5, %v5922_v61  ;;  %v14487_v14 = vld [vmem:[#allocation125_spill] sm:$0xff] }
 0xf27   : > { %5770 = vadd.xlane.f32.xlu1 %v13188_v12  ;;  %6520 = vperm.xlu0 %7585, %v6422_v13   ;;  %v6338_v13 = vsub.f32 %v14479_v37, %v6306_v35  ;;  %v6426_v35 = vmul.f32 %v9008_v3, %v6042_v59  ;;  %v6044_v37 = vsub.f32 0.0, %v6012_v32  ;;  %v6340_v53 = vsub.f32 %v14484_v49, %v6308_v34  ;;  %v9010_v44 = vpop.eup %9009  ;;  %v5855_v32 = vpop.permute.xlu0 %5854  ;;  %v14488_v61 = vld [vmem:[#allocation193_spill] sm:$0xff]  ;;  %v14489_v34 = vld [vmem:[#allocation190_spill] sm:$0xff] }
 0xf28   : > { %v5924_v18 = vadd.f32 %v5851_v23, %v13046_v60  ;;  %9017 = vrcp.f32 %v6353_v27  ;;  %v6325_v9 = vsub.f32 %v14486_v48, %v6293_v57  ;;  %v6295_v3 = vmul.f32 0.5, %v6263_v16  ;;  %v13287_v49 = vpop.permute.xlu1 %5856  ;;  %v14491_v57 = vld [vmem:[#allocation72_spill] sm:$0xff]  ;;  %v14492_v16 = vld [vmem:[#allocation135_spill] sm:$0xff] }
 0xf29   : > { %v6370_v45 = vmul.f32 0.014960632, %v6338_v13  ;;  %v6310_v59 = vmul.f32 0.5, %v6278_v0  ;;  %v6428_v33 = vmul.f32 %v9010_v44, %v6044_v37  ;;  %v6046_v42 = vsub.f32 0.0, %v6014_v54 }
 0xf2a   : > { %v6016_v10 = vmul.f32 0.014960632, %v5984_v8  ;;  %v5986_v13 = vsub.f32 %v13246_v30, %v5954_v52  ;;  %v6372_v51 = vmul.f32 0.014960632, %v6340_v53  ;;  %v14490_v23 = vsub.f32 %v14488_v61, %v14489_v34  ;;  %v14493_v52 = vld [vmem:[#allocation101_spill] sm:$0xff]  ;;  %v14495_v53 = vld [vmem:[#allocation175_spill] sm:$0xff] }
 0xf2b   : > { %6530 = vperm.xlu0 %7585, %v6424_v43   ;;  %v14485_v43 = vld [vmem:[#allocation79_spill] sm:$0xff]  ;;  %9019 = vrcp.f32 %v6370_v45  ;;  %v6265_v0 = vadd.f32 %v14492_v16, %v14491_v57  ;;  %v5926_v54 = vadd.f32 %v5855_v32, %v13070_v19  ;;  %v6357_v30 = vmul.f32 0.014960632, %v6325_v9  ;;  %v14494_v45 = vld [vmem:[#allocation118_spill] sm:$0xff]  ;;  %v14499_v57 = vld [vmem:[#allocation152_spill] sm:$0xff] }
 0xf2c   : > { %v6323_v20 = vsub.f32 %v14485_v43, %v6291_v39  ;;  %v6342_v39 = vsub.f32 %v14487_v14, %v6310_v59  ;;  %v5956_v43 = vmul.f32 0.5, %v5924_v18  ;;  %v6327_v8 = vsub.f32 %v14493_v52, %v6295_v3  ;;  %v5759_v32 = vpop.xlane.xlu1 %5758  ;;  %v14498_v9 = vld [vmem:[#allocation22_spill] sm:$0xff] }
 0xf2d   : > { %v6280_v44 = vadd.f32 %v14495_v53, %v14494_v45  ;;  %v6048_v59 = vsub.f32 0.0, %v6016_v10  ;;  %v6018_v14 = vmul.f32 0.014960632, %v5986_v13  ;;  %9021 = vrcp.f32 %v6372_v51 }
 0xf2e   : > { %v6355_v27 = vmul.f32 0.014960632, %v6323_v20  ;;  %v9012_v37 = vpop.eup %9011  ;;  %v5988_v61 = vsub.f32 %v5755_v36, %v5956_v43  ;;  %v6374_v20 = vmul.f32 0.014960632, %v6342_v39  ;;  %v6267_v3 = vadd.f32 %v14499_v57, %v14498_v9  ;;  %v14500_v36 = vld [vmem:[#allocation145_spill] sm:$0xff]  ;;  %v14501_v57 = vld [vmem:[#allocation95_spill] sm:$0xff] }
 0xf2f   : > { %6540 = vperm.xlu0 %7585, %v6426_v35   ;;  %v5999_v35 = vmul.f32 0.014960632, %v14490_v23  ;;  %v6430_v48 = vmul.f32 %v9012_v37, %v6046_v42  ;;  %v14496_v23 = vld [vmem:[#allocation171_spill] sm:$0xff]  ;;  %v5958_v52 = vmul.f32 0.5, %v5926_v54  ;;  %v9014_v53 = vpop.eup %9013  ;;  %v6359_v42 = vmul.f32 0.014960632, %v6327_v8 }
 0xf30   : > { %v14497_v18 = vsub.f32 %v12834_v1, %v14496_v23  ;;  %9023 = vrcp.f32 %v6355_v27  ;;  %v6312_v10 = vmul.f32 0.5, %v6280_v44  ;;  %v9016_v13 = vpop.eup %9015  ;;  %v6432_v51 = vmul.f32 %v9014_v53, %v6048_v59  ;;  %v14504_v44 = vld [vmem:[#allocation31_spill] sm:$0xff]  ;;  %v14509_v53 = vld [vmem:[#allocation104_spill] sm:$0xff] }
 0xf31   : > { %v6031_v34 = vsub.f32 0.0, %v5999_v35  ;;  %9025 = vrcp.f32 %v6357_v30  ;;  %v6050_v39 = vsub.f32 0.0, %v6018_v14  ;;  %v6020_v1 = vmul.f32 0.014960632, %v5988_v61  ;;  %v14505_v23 = vld [vmem:[#allocation103_spill] sm:$0xff]  ;;  %v13309_v61 = vpop.xlane.xlu0 %5764 }
 0xf32   : > { %v6001_v16 = vmul.f32 0.014960632, %v14497_v18  ;;  %v5990_v35 = vsub.f32 %v5759_v32, %v5958_v52  ;;  %v9018_v43 = vpop.eup %9017  ;;  %9027 = vrcp.f32 %v6374_v20  ;;  %v14502_v54 = vsub.f32 %v12847_v41, %v14501_v57  ;;  %v14506_v59 = vld [vmem:[#allocation203_spill] sm:$0xff]  ;;  %v14507_v20 = vld [vmem:[#allocation100_spill] sm:$0xff] }
 0xf33   : > { %6550 = vperm.xlu0 %7585, %v6428_v33   ;;  %v6297_v33 = vmul.f32 0.5, %v6265_v0  ;;  %v6415_v27 = vmul.f32 %v9016_v13, %v6031_v34  ;;  %v6299_v8 = vmul.f32 0.5, %v6267_v3  ;;  %v6269_v18 = vadd.f32 %v14505_v23, %v14504_v44  ;;  %v14510_v57 = vld [vmem:[#allocation128_spill] sm:$0xff] }
 0xf34   : > { %v6033_v0 = vsub.f32 0.0, %v6001_v16  ;;  %v6003_v37 = vmul.f32 0.014960632, %v14502_v54  ;;  %v6344_v14 = vsub.f32 %v14506_v59, %v6312_v10  ;;  %v14508_v34 = vsub.f32 %v12882_v56, %v14507_v20  ;;  %v14512_v23 = vld [vmem:[#allocation108_spill] sm:$0xff]  ;;  %v14513_v56 = vld [vmem:[#allocation39_spill] sm:$0xff] }
 0xf35   : > { %v9020_v9 = vpop.eup %9019  ;;  %v6052_v41 = vsub.f32 0.0, %v6020_v1  ;;  %v6022_v52 = vmul.f32 0.014960632, %v5990_v35  ;;  %9029 = vrcp.f32 %v6359_v42  ;;  %v5915_v13 = vadd.f32 %v13137_v4, %v14509_v53  ;;  %v14514_v20 = vld [vmem:[#allocation196_spill] sm:$0xff] }
 0xf36   : > { %v6005_v16 = vmul.f32 0.014960632, %v14508_v34  ;;  %v6434_v32 = vmul.f32 %v9020_v9, %v6050_v39  ;;  %v6035_v3 = vsub.f32 0.0, %v6003_v37  ;;  %v6331_v54 = vsub.f32 %v14510_v57, %v6299_v8 }
 0xf37   : > { %6560 = vperm.xlu0 %7585, %v6430_v48   ;;  %v14503_v48 = vld [vmem:[#allocation52_spill] sm:$0xff]  ;;  %v6301_v10 = vmul.f32 0.5, %v6269_v18  ;;  %v9022_v59 = vpop.eup %9021  ;;  %v6273_v9 = vadd.f32 %v14514_v20, %v14513_v56  ;;  %v6376_v39 = vmul.f32 0.014960632, %v6344_v14  ;;  %v14515_v35 = vsub.f32 %v12917_v55, %v12915_v25  ;;  %v14518_v56 = vld [vmem:[#allocation43_spill] sm:$0xff]  ;;  %v14519_v25 = vld [vmem:[#allocation201_spill] sm:$0xff] }
 0xf38   : > { %6220 = vrot.lane.b32.xlu1 %v14500_v36, %s9133_s22  ;;  %v6329_v30 = vsub.f32 %v14503_v48, %v6297_v33  ;;  %v6417_v33 = vmul.f32 %v9018_v43, %v6033_v0  ;;  %v14511_v48 = vld [vmem:[#allocation33_spill] sm:$0xff]  ;;  %v6037_v1 = vsub.f32 0.0, %v6005_v16  ;;  %v6436_v43 = vmul.f32 %v9022_v59, %v6052_v41  ;;  %v14516_v18 = vld [vmem:[#allocation184_spill] sm:$0xff]  ;;  %v13336_v59 = vpop.permute.xlu1 %5860  ;;  %s378_s22 = sand.u32 1, %s9120_s18  }
 0xf39   : > { %v6007_v4 = vmul.f32 0.014960632, %v14515_v35  ;;  %v6054_v0 = vsub.f32 0.0, %v6022_v52  ;;  %v5947_v8 = vmul.f32 0.5, %v5915_v13  ;;  %v5917_v34 = vadd.f32 %v13153_v11, %v14516_v18  ;;  %v14522_v35 = vld [vmem:[#allocation166_spill] sm:$0xff]  ;;  %s6814_s24 = sshll.u32 %s378_s22, 8 }
 0xf3a   : > { %v9024_v42 = vpop.eup %9023  ;;  %v6363_v57 = vmul.f32 0.014960632, %v6331_v54  ;;  %v6305_v20 = vmul.f32 0.5, %v6273_v9  ;;  %v6275_v55 = vadd.f32 %v14519_v25, %v14518_v56  ;;  %v14520_v11 = vsub.f32 %v12952_v58, %v12950_v47  ;;  %s13385_s25 = scalar_lea.vmem [#allocation2], %s6814_s24  ;;  %s13528_s21 = scalar_lea.sflag [#allocation3], %s378_s22 }
 0xf3b   : > { %6570 = vperm.xlu0 %7585, %v6432_v51   ;;  %v6361_v51 = vmul.f32 0.014960632, %v6329_v30  ;;  %v9026_v37 = vpop.eup %9025  ;;  %v6419_v30 = vmul.f32 %v9024_v42, %v6035_v3  ;;  %v6039_v52 = vsub.f32 0.0, %v6007_v4  ;;  %v5979_v54 = vsub.f32 %v13126_v17, %v5947_v8  ;;  %s6748_s30 = sshll.u32 %s13385_s25, 4  ;;  %s9070_s24 = sshll.u32 %s9136_s16, 4  ;;  %s13523_s30 = int_to_ptr.vmem [resolvable:$true] %s6748_s30  ;;  %s9071_s24 = int_to_ptr.vmem [resolvable:$false] %s9070_s24 }
 0xf3c   : > { %6485 = vperm.xlu1 %7586, %v6415_v27   ;;  %v6271_v27 = vadd.f32 %v14512_v23, %v14511_v48  ;;  %v14517_v23 = vld [vmem:[#allocation144_spill] sm:$0xff]  ;;  %v9028_v16 = vpop.eup %9027  ;;  %v6421_v41 = vmul.f32 %v9026_v37, %v6037_v1  ;;  %v6337_v4 = vsub.f32 %v14522_v35, %v6305_v20  ;;  %v5921_v58 = vadd.f32 %v13210_v40, %v12986_v21  ;;  %s9066_s12 = scalar_lea.vmem %s13523_s30, 4096  ;;  %s9072_s29 = scalar_lea.vmem %s9071_s24, 8192 }
 0xf3d   : > { %9031 = vrcp.f32 %v6361_v51  ;;  %v6333_v14 = vsub.f32 %v14517_v23, %v6301_v10  ;;  %v6438_v3 = vmul.f32 %v9028_v16, %v6054_v0  ;;  %v6009_v51 = vmul.f32 0.014960632, %v14520_v11  ;;  %v14525_v20 = vld [vmem:[#allocation36_spill] sm:$0xff]  ;;  %p9067_p11 = scmp.ne.s32.totalorder %s13523_s30, %s9066_s12  ;;  %p9073_p0 = scmp.lt.s32.totalorder %s13523_s30, %s9071_s24 }
 0xf3e   : > { %9033 = vrcp.f32 %v6376_v39  ;;  %v5949_v10 = vmul.f32 0.5, %v5917_v34  ;;  %v14521_v39 = vld [vmem:[#allocation160_spill] sm:$0xff]  ;;  %v6011_v37 = vmul.f32 0.014960632, %v5979_v54  ;;  %v5923_v40 = vadd.f32 %v13232_v62, %v13010_v50  ;;  %v14526_v54 = vld [vmem:[#allocation113_spill] sm:$0xff]  ;;  %p9074_p1 = scmp.lt.s32.totalorder %s9072_s29, %s9066_s12 }
 0xf3f   : > { %6580 = vperm.xlu0 %7585, %v6434_v32   ;;  %v5859_v32 = vpop.permute.xlu0 %5858  ;;  %9035 = vrcp.f32 %v6363_v57  ;;  %v6365_v9 = vmul.f32 0.014960632, %v6333_v14  ;;  %v9030_v1 = vpop.eup %9029  ;;  %v6041_v0 = vsub.f32 0.0, %v6009_v51  ;;  %v14524_v57 = vld [vmem:[#allocation121_spill] sm:$0xff]  ;;  %p9068_p12 = pnand %p9067_p11, %p9237_p5 }
 0xf40   : > { %6495 = vperm.xlu1 %7586, %v6417_v33   ;;  %v6303_v33 = vmul.f32 0.5, %v6271_v27  ;;  %v5928_v13 = vadd.f32 %v5859_v32, %v13094_v46  ;;  %v5919_v27 = vadd.f32 %v13179_v5, %v12962_v63  ;;  %v6423_v47 = vmul.f32 %v9030_v1, %v6039_v52  ;;  %v14523_v32 = vld [vmem:[#allocation102_spill] sm:$0xff]  ;;  %p9075_p2 = por %p9074_p1, %p9073_p0 }
 0xf41   : > { %v5981_v5 = vsub.f32 %v13142_v7, %v5949_v10  ;;  %9037 = vrcp.f32 %v6365_v9  ;;  %v6277_v23 = vadd.f32 %v14524_v57, %v14523_v32  ;;  %v14527_v10 = vld [vmem:[#allocation129_spill] sm:$0xff]  ;;  %v5955_v62 = vmul.f32 0.5, %v5923_v40  ;;  %p9069_p13 = pneg %p9068_p12 }
 0xf42   : > { %v6335_v42 = vsub.f32 %v14521_v39, %v6303_v33  ;;  %v5960_v17 = vmul.f32 0.5, %v5928_v13  ;;  %v6369_v33 = vmul.f32 0.014960632, %v6337_v4 }
 0xf43   : > { %6590 = vperm.xlu0 %7585, %v6436_v43   ;;  %v6307_v43 = vmul.f32 0.5, %v6275_v55  ;;  %v5953_v55 = vmul.f32 0.5, %v5921_v58  ;;  %v6013_v13 = vmul.f32 0.014960632, %v5981_v5  ;;  %v6309_v51 = vmul.f32 0.5, %v6277_v23  ;;  %v14528_v58 = vld [vmem:[#allocation130_spill] sm:$0xff]  ;;  %p9076_p3 = pnand %p9075_p2, %p9069_p13 }
 0xf44   : > { %6505 = vperm.xlu1 %7586, %v6419_v30   ;;  %v5951_v30 = vmul.f32 0.5, %v5919_v27  ;;  %v6367_v34 = vmul.f32 0.014960632, %v6335_v42  ;;  %v6279_v27 = vadd.f32 %v14527_v10, %v14526_v54  ;;  %v14530_v5 = vld [vmem:[#allocation127_spill] sm:$0xff] }
 0xf45   : > { %v6339_v25 = vsub.f32 %v14525_v20, %v6307_v43  ;;  %v5985_v1 = vsub.f32 %v13185_v29, %v5953_v55  ;;  %v6045_v43 = vsub.f32 0.0, %v6013_v13  ;;  %v5987_v29 = vsub.f32 %v13214_v28, %v5955_v62 }
 0xf46   : > { %v5983_v11 = vsub.f32 %v13158_v31, %v5951_v30  ;;  %9039 = vrcp.f32 %v6367_v34  ;;  %v5925_v31 = vadd.f32 %v13265_v6, %v14528_v58  ;;  %v14531_v30 = vld [vmem:[#allocation205_spill] sm:$0xff] }
 0xf47   : > { %6600 = vperm.xlu0 %7585, %v6438_v3   ;;  %v9032_v16 = vpop.eup %9031  ;;  %v6043_v3 = vsub.f32 0.0, %v6011_v37  ;;  %9041 = vrcp.f32 %v6369_v33  ;;  %v6371_v42 = vmul.f32 0.014960632, %v6339_v25  ;;  %v6311_v37 = vmul.f32 0.5, %v6279_v27  ;;  %v14533_v25 = vld [vmem:[#allocation137_spill] sm:$0xff] }
 0xf48   : > { %6515 = vperm.xlu1 %7586, %v6421_v41   ;;  %v9034_v52 = vpop.eup %9033  ;;  %v6425_v7 = vmul.f32 %v9032_v16, %v6041_v0  ;;  %v6017_v57 = vmul.f32 0.014960632, %v5985_v1  ;;  %v5957_v33 = vmul.f32 0.5, %v5925_v31  ;;  %v14532_v16 = vld [vmem:[#allocation124_spill] sm:$0xff] }
 0xf49   : > { %v9036_v39 = vpop.eup %9035  ;;  %9043 = vrcp.f32 %v6371_v42  ;;  %v5927_v20 = vadd.f32 %v13287_v49, %v14532_v16  ;;  %v6343_v55 = vsub.f32 %v14533_v25, %v6311_v37  ;;  %v14537_v42 = vld [vmem:[#allocation48_spill] sm:$0xff] }
 0xf4a   : > { %v5763_v8 = vpop.xlane.xlu1 %5762  ;;  %v6427_v4 = vmul.f32 %v9036_v39, %v6043_v3  ;;  %v6049_v13 = vsub.f32 0.0, %v6017_v57  ;;  %v5989_v28 = vsub.f32 %v13242_v22, %v5957_v33 }
 0xf4b   : > { %v5992_v14 = vsub.f32 %v5763_v8, %v5960_v17  ;;  %v14529_v17 = vld [vmem:[#allocation168_spill] sm:$0xff]  ;;  %v6281_v8 = vadd.f32 %v14531_v30, %v14530_v5  ;;  %v9038_v34 = vpop.eup %9037  ;;  %v5959_v27 = vmul.f32 0.5, %v5927_v20  ;;  %v6375_v49 = vmul.f32 0.014960632, %v6343_v55 }
 0xf4c   : > { %6525 = vperm.xlu1 %7586, %v6423_v47   ;;  %v6015_v47 = vmul.f32 0.014960632, %v5983_v11  ;;  %v6341_v0 = vsub.f32 %v14529_v17, %v6309_v51  ;;  %v6429_v23 = vmul.f32 %v9038_v34, %v6045_v43  ;;  %v6019_v11 = vmul.f32 0.014960632, %v5987_v29 }
 0xf4d   : > { %v6024_v41 = vmul.f32 0.014960632, %v5992_v14  ;;  %v6313_v40 = vmul.f32 0.5, %v6281_v8  ;;  %v5991_v31 = vsub.f32 %v13269_v26, %v5959_v27  ;;  %v14539_v8 = vld [vmem:[#allocation180_spill] sm:$0xff] }
 0xf4e   : > { %v6047_v14 = vsub.f32 0.0, %v6015_v47  ;;  %v6373_v6 = vmul.f32 0.014960632, %v6341_v0  ;;  %v6051_v43 = vsub.f32 0.0, %v6019_v11  ;;  %v6021_v47 = vmul.f32 0.014960632, %v5989_v28 }
 0xf4f   : > { %v6056_v9 = vsub.f32 0.0, %v6024_v41  ;;  %v14534_v41 = vld [vmem:[#allocation143_spill] sm:$0xff]  ;;  %v6345_v1 = vsub.f32 %v14537_v42, %v6313_v40  ;;  %v14538_v0 = vld [vmem:[#allocation209_spill] sm:$0xff]  ;;  %v6023_v29 = vmul.f32 0.014960632, %v5991_v31 }
 0xf50   : > { %6535 = vperm.xlu1 %7586, %v6425_v7   ;;  %v9040_v3 = vpop.eup %9039  ;;  %9045 = vrcp.f32 %v6373_v6  ;;  %v6053_v57 = vsub.f32 0.0, %v6021_v47 }
 0xf51   : > { %v6440_v35 = vmul.f32 %v9034_v52, %v6056_v9  ;;  %v14535_v52 = vld [vmem:[#allocation208_spill] sm:$0xff]  ;;  %v9042_v51 = vpop.eup %9041  ;;  %v6431_v10 = vmul.f32 %v9040_v3, %v6047_v14  ;;  %v14536_v9 = vld [vmem:[#allocation134_spill] sm:$0xff]  ;;  %9047 = vrcp.f32 %v6375_v49  ;;  %v6377_v30 = vmul.f32 0.014960632, %v6345_v1  ;;  %v5769_v20 = vpop.xlane.xlu0 %5768  ;;  %v14542_v1 = vld [vmem:[#allocation131_spill] sm:$0xff] }
 0xf52   : > { %v6283_v7 = vadd.f32 %v14535_v52, %v14534_v41  ;;  %v5929_v39 = vadd.f32 %v13336_v59, %v14536_v9  ;;  %v6055_v25 = vsub.f32 0.0, %v6023_v29 }
 0xf53   : > { %6610 = vperm.xlu0 %7585, %v6440_v35   ;;  %v5865_v35 = vpop.permute.xlu1 %5864  ;;  %v9044_v22 = vpop.eup %9043  ;;  %9049 = vrcp.f32 %v6377_v30 }
 0xf54   : > { %6545 = vperm.xlu1 %7586, %v6427_v4   ;;  %v6315_v62 = vmul.f32 0.5, %v6283_v7  ;;  %v6433_v4 = vmul.f32 %v9042_v51, %v6049_v13  ;;  %v5961_v17 = vmul.f32 0.5, %v5929_v39  ;;  %v5931_v37 = vadd.f32 %v5865_v35, %v14538_v0  ;;  %v14540_v51 = vld [vmem:[#allocation133_spill] sm:$0xff] }
 0xf55   : > { %v6435_v34 = vmul.f32 %v9044_v22, %v6051_v43  ;;  %v14543_v43 = vld [vmem:[#allocation211_spill] sm:$0xff] }
 0xf56   : > { %v6347_v59 = vsub.f32 %v14539_v8, %v6315_v62  ;;  %v5963_v14 = vmul.f32 0.5, %v5931_v37 }
 0xf58   : > { %6555 = vperm.xlu1 %7586, %v6429_v23   ;;  %v5993_v23 = vsub.f32 %v13309_v61, %v5961_v17  ;;  %v6379_v33 = vmul.f32 0.014960632, %v6347_v59  ;;  %v5995_v40 = vsub.f32 %v5769_v20, %v5963_v14  ;;  %v14541_v61 = vld [vmem:[#allocation177_spill] sm:$0xff]  ;;  %v14544_v14 = vld [vmem:[#allocation163_spill] sm:$0xff] }
 0xf5a   : > { %v9046_v26 = vpop.eup %9045  ;;  %v6025_v55 = vmul.f32 0.014960632, %v5993_v23  ;;  %9051 = vrcp.f32 %v6379_v33  ;;  %v6027_v13 = vmul.f32 0.014960632, %v5995_v40  ;;  %v14545_v33 = vld [vmem:[#allocation80_spill] sm:$0xff] }
 0xf5b   : > { %v6437_v6 = vmul.f32 %v9046_v26, %v6053_v57  ;;  %v9048_v52 = vpop.eup %9047  ;;  %v6446_v20 = vadd.f32 %v14545_v33, %v14544_v14  ;;  %v14546_v26 = vld [vmem:[#allocation17_spill] sm:$0xff]  ;;  %v14547_v40 = vld [vmem:[#allocation176_spill] sm:$0xff] }
 0xf5c   : > { %6565 = vperm.xlu1 %7586, %v6431_v10   ;;  %v6439_v7 = vmul.f32 %v9048_v52, %v6055_v25  ;;  %v6057_v3 = vsub.f32 0.0, %v6025_v55  ;;  %v6282_v10 = vadd.f32 %v14541_v61, %v14540_v51  ;;  %v6059_v27 = vsub.f32 0.0, %v6027_v13  ;;  %v14548_v52 = vld [vmem:[#allocation178_spill] sm:$0xff] }
 0xf5d   : > { %v9050_v11 = vpop.eup %9049 }
 0xf5e   : > { %v6441_v28 = vmul.f32 %v9050_v11, %v6057_v3  ;;  %v6314_v49 = vmul.f32 0.5, %v6282_v10  ;;  %v14549_v3 = vld [vmem:[#allocation45_spill] sm:$0xff]  ;;  %v14550_v10 = vld [vmem:[#allocation183_spill] sm:$0xff] }
 0xf60   : > { %6575 = vperm.xlu1 %7586, %v6433_v4   ;;  %v6346_v62 = vsub.f32 %v14542_v1, %v6314_v49  ;;  %v5863_v4 = vpop.permute.xlu0 %5862  ;;  %v14552_v49 = vld [vmem:[#allocation115_spill] sm:$0xff] }
 0xf61   : > { %v5930_v47 = vadd.f32 %v5863_v4, %v14543_v43  ;;  %v14554_v4 = vld [vmem:[#allocation165_spill] sm:$0xff] }
 0xf62   : > { %v6378_v35 = vmul.f32 0.014960632, %v6346_v62 }
 0xf63   : > { %v5962_v31 = vmul.f32 0.5, %v5930_v47 }
 0xf64   : > { %6585 = vperm.xlu1 %7586, %v6435_v34   ;;  %v9052_v39 = vpop.eup %9051  ;;  %9053 = vrcp.f32 %v6378_v35  ;;  %v14553_v35 = vld [vmem:[#allocation85_spill] sm:$0xff] }
 0xf65   : > { %v6443_v42 = vmul.f32 %v9052_v39, %v6059_v27  ;;  %v14551_v27 = vld [vmem:[#allocation62_spill] sm:$0xff]  ;;  %v6452_v47 = vadd.f32 %v14554_v4, %v14553_v35  ;;  %v14566_v35 = vld [vmem:[#allocation111_spill] sm:$0xff]  ;;  %v14567_v4 = vld [vmem:[#allocation188_spill] sm:$0xff] }
 0xf68   : > { %6595 = vperm.xlu1 %7586, %v6437_v6  }
 0xf6c   : > { %6605 = vperm.xlu1 %7586, %v6439_v7   ;;  %v6448_v7 = vadd.f32 %v14548_v52, %v14547_v40  ;;  %v14562_v40 = vld [vmem:[#allocation68_spill] sm:$0xff] }
 0xf6e   : > { %v9054_v8 = vpop.eup %9053 }
 0xf70   : > { %6615 = vperm.xlu1 %7586, %v6441_v28   ;;  %v6450_v28 = vadd.f32 %v14443_v15, %v14550_v10  ;;  %v14557_v15 = vld [vmem:[#allocation90_spill] sm:$0xff] }
 0xf74   : > { %6625 = vperm.xlu1 %7586, %v6443_v42  }
 0xf7f   : > { %v5767_v17 = vpop.xlane.xlu1 %5766 }
 0xf80   : > { %v5994_v37 = vsub.f32 %v5767_v17, %v5962_v31  ;;  %v14555_v31 = vld [vmem:[#allocation64_spill] sm:$0xff] }
 0xf82   : > { %v6026_v22 = vmul.f32 0.014960632, %v5994_v37 }
 0xf84   : > { %v6058_v30 = vsub.f32 0.0, %v6026_v22 }
 0xf86   : > { %v6442_v59 = vmul.f32 %v9054_v8, %v6058_v30  ;;  %v13375_v34 = vpop.xlane.xlu0 %5772  ;;  %v14556_v8 = vld [vmem:[#allocation195_spill] sm:$0xff] }
 0xf88   : > { %6620 = vperm.xlu0 %7585, %v6442_v59   ;;  %v6454_v59 = vadd.f32 %v14557_v15, %v14556_v8  ;;  %v14569_v15 = vld [vmem:[#allocation114_spill] sm:$0xff] }
 0xf8a   : > { %v5867_v57 = vpop.permute.xlu0 %5866 }
 0xf8e   : > { %v6219_v29 = vpop.permute.xlu0 %6218 }
 0xf8f   : > { %v6284_v42 = vadd.f32 %v6219_v29, %v14552_v49  ;;  %v14559_v29 = vld [vmem:[#allocation210_spill] sm:$0xff] }
 0xf91   : > { %v6316_v37 = vmul.f32 0.5, %v6284_v42  ;;  %v5869_v42 = vpop.permute.xlu1 %5868 }
 0xf93   : > { %v6348_v33 = vsub.f32 %v14559_v29, %v6316_v37  ;;  %v14571_v29 = vld [vmem:[#allocation81_spill] sm:$0xff] }
 0xf96   : > { %v6481_v23 = vpop.permute.xlu0 %6480 }
 0xf97   : > { %v6638_v6 = vmul.f32 %v6481_v23, %v14546_v26  ;;  %v14558_v23 = vld [vmem:[#allocation66_spill] sm:$0xff] }
 0xf99   : > { %v6670_v25 = vadd.f32 %v6638_v6, %v6446_v20  ;;  %v14560_v6 = vld [vmem:[#allocation97_spill] sm:$0xff] }
 0xf9a   : > { %v6491_v55 = vpop.permute.xlu0 %6490 }
 0xf9b   : > { %6702 = vst [vmem:[%s13385_s25] sm:$0xff] %v6670_v25  ;;  %v6640_v13 = vmul.f32 %v6491_v55, %v14549_v3  ;;  %v14561_v25 = vld [vmem:[#allocation99_spill] sm:$0xff] }
 0xf9c   : > { %v6456_v55 = vadd.f32 %v14561_v25, %v14560_v6 }
 0xf9d   : > { %v6672_v11 = vadd.f32 %v6640_v13, %v6448_v7  ;;  %v6380_v7 = vmul.f32 0.014960632, %v6348_v33 }
 0xf9e   : > { %v6501_v61 = vpop.permute.xlu0 %6500 }
 0xf9f   : > { %6704 = vst [vmem:[%s13385_s25 + $0x10] sm:$0xff] %v6672_v11  ;;  %v6642_v39 = vmul.f32 %v6501_v61, %v14551_v27  ;;  %v14563_v11 = vld [vmem:[#allocation105_spill] sm:$0xff]  ;;  %v14565_v27 = vld [vmem:[#allocation74_spill] sm:$0xff]  ;;  %9055 = vrcp.f32 %v6380_v7 }
 0xfa0   : > { %v14564_v61 = vld [vmem:[#allocation109_spill] sm:$0xff] }
 0xfa1   : > { %v6674_v1 = vadd.f32 %v6642_v39, %v6450_v28  ;;  %v6458_v10 = vadd.f32 %v14564_v61, %v14563_v11  ;;  %v5932_v28 = vadd.f32 %v5867_v57, %v13188_v12 }
 0xfa2   : > { %v6511_v62 = vpop.permute.xlu0 %6510 }
 0xfa3   : > { %6706 = vst [vmem:[%s13385_s25 + $0x20] sm:$0xff] %v6674_v1  ;;  %v6644_v17 = vmul.f32 %v6511_v62, %v14555_v31  ;;  %v5964_v31 = vmul.f32 0.5, %v5932_v28 }
 0xfa5   : > { %v6676_v22 = vadd.f32 %v6644_v17, %v6452_v47  ;;  %v6460_v47 = vadd.f32 %v14567_v4, %v14566_v35  ;;  %v14568_v17 = vld [vmem:[#allocation25_spill] sm:$0xff]  ;;  %v14577_v35 = vld [vmem:[#allocation182_spill] sm:$0xff] }
 0xfa6   : > { %v6521_v30 = vpop.permute.xlu0 %6520 }
 0xfa7   : > { %6708 = vst [vmem:[%s13385_s25 + $0x30] sm:$0xff] %v6676_v22  ;;  %v6646_v14 = vmul.f32 %v6521_v30, %v14558_v23 }
 0xfa9   : > { %v6678_v20 = vadd.f32 %v6646_v14, %v6454_v59  ;;  %v14570_v59 = vld [vmem:[#allocation191_spill] sm:$0xff] }
 0xfaa   : > { %v6531_v26 = vpop.permute.xlu0 %6530  ;;  %v6462_v23 = vadd.f32 %v14570_v59, %v14569_v15 }
 0xfab   : > { %6710 = vst [vmem:[%s13385_s25 + $0x40] sm:$0xff] %v6678_v20  ;;  %v6648_v52 = vmul.f32 %v6531_v26, %v14562_v40  ;;  %v14572_v40 = vld [vmem:[#allocation212_spill] sm:$0xff] }
 0xfad   : > { %v6680_v3 = vadd.f32 %v6648_v52, %v6456_v55  ;;  %v9056_v55 = vpop.eup %9055  ;;  %v5933_v52 = vadd.f32 %v5869_v42, %v14572_v40 }
 0xfae   : > { %v6541_v13 = vpop.permute.xlu0 %6540 }
 0xfaf   : > { %6712 = vst [vmem:[%s13385_s25 + $0x50] sm:$0xff] %v6680_v3  ;;  %v6650_v39 = vmul.f32 %v6541_v13, %v14565_v27  ;;  %v14573_v3 = vld [vmem:[#allocation194_spill] sm:$0xff] }
 0xfb0   : > { %v6464_v13 = vadd.f32 %v12998_v24, %v14573_v3  ;;  %v14579_v24 = vld [vmem:[#allocation200_spill] sm:$0xff] }
 0xfb1   : > { %v6682_v1 = vadd.f32 %v6650_v39, %v6458_v10  ;;  %v14574_v10 = vld [vmem:[#allocation94_spill] sm:$0xff]  ;;  %v14575_v39 = vld [vmem:[#allocation179_spill] sm:$0xff] }
 0xfb2   : > { %v6551_v62 = vpop.permute.xlu0 %6550 }
 0xfb3   : > { %6714 = vst [vmem:[%s13385_s25 + $0x60] sm:$0xff] %v6682_v1  ;;  %v6652_v37 = vmul.f32 %v6551_v62, %v14568_v17  ;;  %v14576_v1 = vld [vmem:[#allocation181_spill] sm:$0xff]  ;;  %v5965_v17 = vmul.f32 0.5, %v5933_v52 }
 0xfb4   : > { %v5771_v22 = vpop.xlane.xlu1 %5770  ;;  %v6447_v62 = vadd.f32 %v14576_v1, %v14575_v39 }
 0xfb5   : > { %v6684_v30 = vadd.f32 %v6652_v37, %v6460_v47  ;;  %v5996_v8 = vsub.f32 %v5771_v22, %v5964_v31  ;;  %v14578_v31 = vld [vmem:[#allocation27_spill] sm:$0xff]  ;;  %v6466_v22 = vadd.f32 %v13022_v38, %v14579_v24  ;;  %v14584_v38 = vld [vmem:[#allocation202_spill] sm:$0xff]  ;;  %v14592_v24 = vld [vmem:[#allocation65_spill] sm:$0xff] }
 0xfb6   : > { %v6561_v57 = vpop.permute.xlu0 %6560 }
 0xfb7   : > { %6716 = vst [vmem:[%s13385_s25 + $0x70] sm:$0xff] %v6684_v30  ;;  %v6028_v14 = vmul.f32 0.014960632, %v5996_v8  ;;  %v6654_v33 = vmul.f32 %v6561_v57, %v14571_v29  ;;  %v14580_v57 = vld [vmem:[#allocation41_spill] sm:$0xff] }
 0xfb8   : > { %v6221_v20 = vpop.permute.xlu1 %6220 }
 0xfb9   : > { %v6060_v26 = vsub.f32 0.0, %v6028_v14  ;;  %v6686_v6 = vadd.f32 %v6654_v33, %v6462_v23  ;;  %v6285_v25 = vadd.f32 %v6221_v20, %v14500_v36  ;;  %v14581_v23 = vld [vmem:[#allocation172_spill] sm:$0xff]  ;;  %v14582_v14 = vld [vmem:[#allocation173_spill] sm:$0xff]  ;;  %v14583_v20 = vld [vmem:[#allocation55_spill] sm:$0xff] }
 0xfba   : > { %v6571_v7 = vpop.permute.xlu0 %6570  ;;  %v6449_v29 = vadd.f32 %v14582_v14, %v14581_v23  ;;  %v14594_v23 = vld [vmem:[#allocation120_spill] sm:$0xff] }
 0xfbb   : > { %v6444_v11 = vmul.f32 %v9056_v55, %v6060_v26  ;;  %6718 = vst [vmem:[%s13385_s25 + $0x80] sm:$0xff] %v6686_v6  ;;  %v6317_v61 = vmul.f32 0.5, %v6285_v25  ;;  %v6656_v28 = vmul.f32 %v6571_v7, %v14574_v10  ;;  %v5997_v6 = vsub.f32 %v13375_v34, %v5965_v17  ;;  %v14585_v7 = vld [vmem:[#allocation46_spill] sm:$0xff] }
 0xfbc   : > { %v6486_v27 = vpop.permute.xlu1 %6485  ;;  %v6468_v55 = vadd.f32 %v13046_v60, %v14584_v38  ;;  %v14598_v38 = vld [vmem:[#allocation72_spill] sm:$0xff] }
 0xfbd   : > { %v6349_v4 = vsub.f32 %v14577_v35, %v6317_v61  ;;  %v6688_v47 = vadd.f32 %v6656_v28, %v6464_v13  ;;  %v6639_v42 = vmul.f32 %v6486_v27, %v14578_v31  ;;  %6630 = vperm.xlu0 %7585, %v6444_v11   ;;  %v14586_v11 = vld [vmem:[#allocation84_spill] sm:$0xff]  ;;  %v14587_v61 = vld [vmem:[#allocation83_spill] sm:$0xff]  ;;  %v6029_v1 = vmul.f32 0.014960632, %v5997_v6 }
 0xfbe   : > { %v6581_v37 = vpop.permute.xlu0 %6580  ;;  %v6451_v10 = vadd.f32 %v14587_v61, %v14586_v11  ;;  %v14588_v27 = vld [vmem:[#allocation63_spill] sm:$0xff] }
 0xfbf   : > { %v6381_v30 = vmul.f32 0.014960632, %v6349_v4  ;;  %6720 = vst [vmem:[%s13385_s25 + $0x90] sm:$0xff] %v6688_v47  ;;  %v6671_v8 = vadd.f32 %v6639_v42, %v6447_v62  ;;  %v6658_v15 = vmul.f32 %v6581_v37, %v14580_v57  ;;  %v14589_v62 = vld [vmem:[#allocation204_spill] sm:$0xff]  ;;  %v14590_v31 = vld [vmem:[#allocation187_spill] sm:$0xff]  ;;  %v14591_v42 = vld [vmem:[#allocation186_spill] sm:$0xff] }
 0xfc0   : > { %v6496_v59 = vpop.permute.xlu1 %6495  ;;  %v6470_v35 = vadd.f32 %v13070_v19, %v14589_v62  ;;  %v6453_v17 = vadd.f32 %v14591_v42, %v14590_v31  ;;  %v14597_v6 = vld [vmem:[#allocation199_spill] sm:$0xff] }
 0xfc1   : > { %9057 = vrcp.f32 %v6381_v30  ;;  %6703 = vst [vmem:[%s13385_s25 + $0x8] sm:$0xff] %v6671_v8  ;;  %v6690_v33 = vadd.f32 %v6658_v15, %v6466_v22  ;;  %v6641_v26 = vmul.f32 %v6496_v59, %v14583_v20  ;;  %v6061_v30 = vsub.f32 0.0, %v6029_v1  ;;  %v14593_v59 = vld [vmem:[#allocation122_spill] sm:$0xff] }
 0xfc2   : > { %v6591_v25 = vpop.permute.xlu0 %6590  ;;  %v6455_v14 = vadd.f32 %v14594_v23, %v14593_v59 }
 0xfc3   : > { %6722 = vst [vmem:[%s13385_s25 + $0xa0] sm:$0xff] %v6690_v33  ;;  %v6673_v52 = vadd.f32 %v6641_v26, %v6449_v29  ;;  %v6660_v3 = vmul.f32 %v6591_v25, %v14585_v7  ;;  %v14596_v26 = vld [vmem:[#allocation116_spill] sm:$0xff]  ;;  %v14599_v7 = vld [vmem:[#allocation207_spill] sm:$0xff] }
 0xfc4   : > { %v6506_v13 = vpop.permute.xlu1 %6505  ;;  %v6457_v25 = vadd.f32 %v14597_v6, %v14596_v26 }
 0xfc5   : > { %6705 = vst [vmem:[%s13385_s25 + $0x18] sm:$0xff] %v6673_v52  ;;  %v6692_v28 = vadd.f32 %v6660_v3, %v6468_v55  ;;  %v6643_v39 = vmul.f32 %v6506_v13, %v14588_v27  ;;  %v6472_v3 = vadd.f32 %v13094_v46, %v14599_v7 }
 0xfc6   : > { %v6601_v34 = vpop.permute.xlu0 %6600 }
 0xfc7   : > { %6724 = vst [vmem:[%s13385_s25 + $0xb0] sm:$0xff] %v6692_v28  ;;  %v6675_v60 = vadd.f32 %v6643_v39, %v6451_v10  ;;  %v6662_v4 = vmul.f32 %v6601_v34, %v14482_v2  ;;  %v14595_v2 = vld [vmem:[#allocation67_spill] sm:$0xff]  ;;  %v14600_v10 = vld [vmem:[#allocation174_spill] sm:$0xff] }
 0xfc8   : > { %v6516_v47 = vpop.permute.xlu1 %6515  ;;  %v6459_v28 = vadd.f32 %v14509_v53, %v14600_v10  ;;  %v14601_v39 = vld [vmem:[#allocation22_spill] sm:$0xff]  ;;  %v14613_v10 = vld [vmem:[#allocation140_spill] sm:$0xff] }
 0xfc9   : > { %6707 = vst [vmem:[%s13385_s25 + $0x28] sm:$0xff] %v6675_v60  ;;  %v6694_v37 = vadd.f32 %v6662_v4, %v6470_v35  ;;  %v6645_v22 = vmul.f32 %v6516_v47, %v14592_v24  ;;  %v14602_v35 = vld [vmem:[#allocation106_spill] sm:$0xff]  ;;  %v14603_v47 = vld [vmem:[#allocation112_spill] sm:$0xff] }
 0xfca   : > { %v6461_v60 = vadd.f32 %v14516_v18, %v14602_v35  ;;  %v6463_v53 = vadd.f32 %v12962_v63, %v14603_v47  ;;  %v14605_v18 = vld [vmem:[#allocation39_spill] sm:$0xff] }
 0xfcb   : > { %v9058_v8 = vpop.eup %9057  ;;  %6726 = vst [vmem:[%s13385_s25 + $0xc0] sm:$0xff] %v6694_v37  ;;  %v6677_v57 = vadd.f32 %v6645_v22, %v6453_v17  ;;  %v14604_v37 = vld [vmem:[#allocation197_spill] sm:$0xff] }
 0xfcc   : > { %v6526_v15 = vpop.permute.xlu1 %6525  ;;  %v6445_v19 = vmul.f32 %v9058_v8, %v6061_v30  ;;  %v6465_v24 = vadd.f32 %v12986_v21, %v14604_v37  ;;  %v14606_v8 = vld [vmem:[#allocation198_spill] sm:$0xff] }
 0xfcd   : > { %6709 = vst [vmem:[%s13385_s25 + $0x38] sm:$0xff] %v6677_v57  ;;  %v6647_v29 = vmul.f32 %v6526_v15, %v14595_v2  ;;  %v6467_v57 = vadd.f32 %v13010_v50, %v14606_v8  ;;  %v14608_v2 = vld [vmem:[#allocation146_spill] sm:$0xff] }
 0xfce   : > { %6635 = vperm.xlu1 %7586, %v6445_v19   ;;  %v14607_v19 = vld [vmem:[#allocation57_spill] sm:$0xff] }
 0xfcf   : > { %v6679_v33 = vadd.f32 %v6647_v29, %v6455_v14  ;;  %v6469_v59 = vadd.f32 %v14528_v58, %v14607_v19  ;;  %v6471_v29 = vadd.f32 %v14532_v16, %v14608_v2 }
 0xfd0   : > { %v6536_v20 = vpop.permute.xlu1 %6535 }
 0xfd1   : > { %6711 = vst [vmem:[%s13385_s25 + $0x48] sm:$0xff] %v6679_v33  ;;  %v6649_v55 = vmul.f32 %v6536_v20, %v14598_v38  ;;  %v14609_v20 = vld [vmem:[#allocation206_spill] sm:$0xff] }
 0xfd2   : > { %v6611_v52 = vpop.permute.xlu0 %6610  ;;  %v6473_v26 = vadd.f32 %v14536_v9, %v14609_v20 }
 0xfd3   : > { %v6681_v13 = vadd.f32 %v6649_v55, %v6457_v25  ;;  %v6664_v11 = vmul.f32 %v6611_v52, %v14494_v45  ;;  %v14610_v25 = vld [vmem:[#allocation153_spill] sm:$0xff]  ;;  %v14611_v52 = vld [vmem:[#allocation138_spill] sm:$0xff] }
 0xfd4   : > { %v6546_v61 = vpop.permute.xlu1 %6545  ;;  %v6475_v38 = vadd.f32 %v14538_v0, %v14610_v25  ;;  %v6474_v9 = vadd.f32 %v14543_v43, %v14611_v52  ;;  %v6477_v43 = vadd.f32 %v14572_v40, %v14613_v10 }
 0xfd5   : > { %6713 = vst [vmem:[%s13385_s25 + $0x58] sm:$0xff] %v6681_v13  ;;  %v6696_v27 = vadd.f32 %v6664_v11, %v6472_v3  ;;  %v6651_v1 = vmul.f32 %v6546_v61, %v14601_v39  ;;  %v14612_v13 = vld [vmem:[#allocation213_spill] sm:$0xff] }
 0xfd6   : > { %v6476_v0 = vadd.f32 %v13188_v12, %v14612_v13 }
 0xfd7   : > { %6728 = vst [vmem:[%s13385_s25 + $0xd0] sm:$0xff] %v6696_v27  ;;  %v6683_v34 = vadd.f32 %v6651_v1, %v6459_v28 }
 0xfd8   : > { %v6556_v62 = vpop.permute.xlu1 %6555 }
 0xfd9   : > { %6715 = vst [vmem:[%s13385_s25 + $0x68] sm:$0xff] %v6683_v34  ;;  %v6653_v46 = vmul.f32 %v6556_v62, %v14504_v44 }
 0xfdb   : > { %v6685_v45 = vadd.f32 %v6653_v46, %v6461_v60 }
 0xfdc   : > { %v6566_v4 = vpop.permute.xlu1 %6565 }
 0xfdd   : > { %6717 = vst [vmem:[%s13385_s25 + $0x78] sm:$0xff] %v6685_v45  ;;  %v6655_v31 = vmul.f32 %v6566_v4, %v14511_v48 }
 0xfdf   : > { %v6687_v42 = vadd.f32 %v6655_v31, %v6463_v53 }
 0xfe0   : > { %v6576_v17 = vpop.permute.xlu1 %6575 }
 0xfe1   : > { %6719 = vst [vmem:[%s13385_s25 + $0x88] sm:$0xff] %v6687_v42  ;;  %v6657_v22 = vmul.f32 %v6576_v17, %v14605_v18 }
 0xfe3   : > { %v6689_v30 = vadd.f32 %v6657_v22, %v6465_v24 }
 0xfe4   : > { %v6586_v44 = vpop.permute.xlu1 %6585 }
 0xfe5   : > { %6721 = vst [vmem:[%s13385_s25 + $0x98] sm:$0xff] %v6689_v30  ;;  %v6659_v63 = vmul.f32 %v6586_v44, %v14518_v56 }
 0xfe7   : > { %v6691_v15 = vadd.f32 %v6659_v63, %v6467_v57 }
 0xfe8   : > { %v6596_v48 = vpop.permute.xlu1 %6595 }
 0xfe9   : > { %6723 = vst [vmem:[%s13385_s25 + $0xa8] sm:$0xff] %v6691_v15  ;;  %v6661_v21 = vmul.f32 %v6596_v48, %v14523_v32 }
 0xfeb   : > { %v6693_v23 = vadd.f32 %v6661_v21, %v6469_v59 }
 0xfec   : > { %v6606_v14 = vpop.permute.xlu1 %6605 }
 0xfed   : > { %6725 = vst [vmem:[%s13385_s25 + $0xb8] sm:$0xff] %v6693_v23  ;;  %v6663_v50 = vmul.f32 %v6606_v14, %v14526_v54 }
 0xfef   : > { %v6695_v33 = vadd.f32 %v6663_v50, %v6471_v29 }
 0xff0   : > { %v6616_v56 = vpop.permute.xlu1 %6615 }
 0xff1   : > { %6727 = vst [vmem:[%s13385_s25 + $0xc8] sm:$0xff] %v6695_v33  ;;  %v6665_v58 = vmul.f32 %v6616_v56, %v14530_v5 }
 0xff3   : > { %v6697_v6 = vadd.f32 %v6665_v58, %v6473_v26 }
 0xff4   : > { %v6626_v32 = vpop.permute.xlu1 %6625 }
 0xff5   : > { %6729 = vst [vmem:[%s13385_s25 + $0xd8] sm:$0xff] %v6697_v6  ;;  %v6667_v54 = vmul.f32 %v6626_v32, %v14534_v41 }
 0xff7   : > { %v6699_v16 = vadd.f32 %v6667_v54, %v6475_v38 }
 0xff9   : > { %6731 = vst [vmem:[%s13385_s25 + $0xe8] sm:$0xff] %v6699_v16 }
0x1007   : > { %v6621_v55 = vpop.permute.xlu0 %6620 }
0x1008   : > { %v6666_v7 = vmul.f32 %v6621_v55, %v14540_v51 }
0x100a   : > { %v6698_v5 = vadd.f32 %v6666_v7, %v6474_v9 }
0x100c   : > { %6730 = vst [vmem:[%s13385_s25 + $0xe0] sm:$0xff] %v6698_v5 }
0x103c   : > { %v6631_v3 = vpop.permute.xlu0 %6630 }
0x103d   : > { %v6668_v11 = vmul.f32 %v6631_v3, %v14552_v49 }
0x103f   : > { %v6700_v41 = vadd.f32 %v6668_v11, %v6476_v0 }
0x1041   : > { %6732 = vst [vmem:[%s13385_s25 + $0xf0] sm:$0xff] %v6700_v41 }
0x104d   : > { %v6636_v61 = vpop.permute.xlu1 %6635 }
0x104e   : > { %v6669_v51 = vmul.f32 %v6636_v61, %v14500_v36 }
0x1050   : > { %v6701_v12 = vadd.f32 %v6669_v51, %v6477_v43 }
0x1052   : > { %6733 = vst [vmem:[%s13385_s25 + $0xf8] sm:$0xff] %v6701_v12 }
0x1053   : > { %9079 = shalt.err (!%p9076_p3)
}
0x1054   : > { %s9080_s22 = scalar_lea.hbm %s13521_s15, 4096  ;;  %s9084_s14 = scalar_lea.hbm %s13580_s11, 8192 }
0x1055   : > { %p9081_p4 = scmp.ne.s32.totalorder %s13521_s15, %s9080_s22  ;;  %p9085_p9 = scmp.lt.u32.totalorder %s13521_s15, %s13580_s11 }
0x1056   : > { %p9086_p10 = scmp.lt.u32.totalorder %s9084_s14, %s9080_s22  ;;  %p9088_p12 = scmp.lt.u32.totalorder %s9080_s22, %s13521_s15 }
0x1057   : > { %p9082_p7 = pnand %p9081_p4, %p9237_p5 }
0x1058   : > { %p9087_p11 = por %p9086_p10, %p9085_p9 }
0x1059   : > { %p9083_p8 = pneg %p9082_p7 }
0x105a   : > { %p9089_p13 = por %p9088_p12, %p9087_p11 }
0x105c   : > { %p9090_p0 = pnand %p9089_p13, %p9083_p8 }
0x105e   : > { %9093 = shalt.err (!%p9090_p0)
}
0x105f   : > { %s9137_s12 = smov 128   ;;  %s9138_s29 = smov 8  }
0x1060   : > { %7412 = dma.vmem_to_hbm [thread:$0]  (%p9237_p5), %s13523_s30, 4096, %s13521_s15, %s13528_s21, %s9137_s12, %s9137_s12, %s9138_s29  }
0x1061 PF: > { %p7418_p1 = scmp.ge.s32.totalorder %s9128_s20, 2  ;;  %s6763_s25 = sand.u32 1, %s9116_s17  }
0x1062   : > { %s6764_s22 = scalar_lea.sflag [#allocation3], %s6763_s25 }
0x1063   : > { %p7415_p2 = pnand %p7418_p1, %p9241_p6 }
0x1065   : > { %9111 = dma.done.wait (!%p7415_p2), %s6764_s22, 4096  }
0x1066   : > { %9113 = vsyncadd (!%p7415_p2), %s6764_s22, 4294963200  ;;  %p21_p3 = scmp.ge.s32.totalorder %s9224_s23, 4   ;;  %s14614_s17 = smov %s9120_s18 }
0x1067   : > { %s14615_s18 = smov %s9124_s19  ;;  %s14616_s19 = smov %s9235_s26 }
0x1068   : > { %s14617_s20 = smov %s9224_s23  ;;  %23 = sbr.rel (!%p21_p3) target bundleno = 3 (0x3), region = 99 }
0x106f   :  { %6769 = vsyncpa [#allocation3], 1 }
0x1070   :  { %6771 = vsyncpa [#allocation3 + $0x1], 1 }

</bundles_post_ra>
